<compile_context>
chip_gen: v5e
topology: v5e:2x2
jax: 0.10.0
libtpu: 0.0.40
codegen_flags: <defaults>
</compile_context>

<pallas_src>
import jax
import jax.numpy as jnp
from jax.experimental import pallas as pl
from jax.experimental.pallas import tpu as pltpu

# ---- hyperparameters (small, consistent with TorNet.__init__) ----
D = 64            # input_size (d_model), divisible by num_heads
HID = 128         # dim_feedforward (hidden_size)
OUT = 16          # output_size
NUM_LAYERS = 4
NUM_HEADS = 4     # seq_len == 1 -> attention collapses regardless of head count
B = 256           # rows per call (many samples batched to amortize launch + weight DMA)
TM = 128          # rows per grid step
EPS = 1e-5        # nn.LayerNorm default

# ---- packed-slab layout (all offsets are compile-time Python ints) ----
SLAB_W = 128                              # lane width of both slabs
WROWS_PER_LAYER = 2 * D + HID             # attnw (D) + l1w (D) + l2w (HID) rows = 256
F1_OFF = NUM_LAYERS * WROWS_PER_LAYER     # 1024
F2_OFF = F1_OFF + D                       # 1088
F3_OFF = F2_OFF + D // 2                  # 1120
W_ROWS = F3_OFF + D // 4                  # 1136  (every block starts on a 16-row boundary)

BROWS_PER_LAYER = 8                       # 7 used rows + 1 pad per layer
ROW_ATTNB, ROW_LN1W, ROW_LN1B, ROW_LN2W, ROW_LN2B, ROW_L1B, ROW_L2B = range(7)
HEAD_B_OFF = NUM_LAYERS * BROWS_PER_LAYER  # 32
ROW_F1B, ROW_F2B, ROW_F3B = HEAD_B_OFF, HEAD_B_OFF + 1, HEAD_B_OFF + 2
B_ROWS = 40                               # padded to a multiple of 8 sublanes


def _layer_norm(x, g, b):
    # one-pass LN: both reductions are independent (issued together on the XLU),
    # var = E[x^2] - mean^2, all in fp32.
    inv_d = 1.0 / x.shape[-1]
    s1 = jnp.sum(x, axis=-1, keepdims=True)
    s2 = jnp.sum(x * x, axis=-1, keepdims=True)
    mu = s1 * inv_d
    var = jnp.maximum(s2 * inv_d - mu * mu, 0.0)
    return (x - mu) * jax.lax.rsqrt(var + EPS) * g + b


def _bf16_dot(x, w):
    # bf16 x bf16 -> fp32 accumulation on the MXU (w is already bf16 in the slab)
    return jnp.dot(x.astype(jnp.bfloat16), w, preferred_element_type=jnp.float32)


def tornet_kernel(x_ref, w_ref, b_ref, o_ref):
    x = x_ref[...]                                           # (TM, D) fp32

    for l in range(NUM_LAYERS):                              # static unrolled layer loop
        wo = l * WROWS_PER_LAYER
        bo = l * BROWS_PER_LAYER

        # folded seq_len==1 attention: x @ (Wv @ Wo) + (bv @ Wo + bo)
        attn = _bf16_dot(x, w_ref[wo:wo + D, 0:D]) \
            + b_ref[bo + ROW_ATTNB:bo + ROW_ATTNB + 1, 0:D]
        # post-norm encoder layer (PyTorch default norm_first=False), dropout = identity
        x = _layer_norm(x + attn,
                        b_ref[bo + ROW_LN1W:bo + ROW_LN1W + 1, 0:D],
                        b_ref[bo + ROW_LN1B:bo + ROW_LN1B + 1, 0:D])

        h = jnp.maximum(_bf16_dot(x, w_ref[wo + D:wo + 2 * D, :])
                        + b_ref[bo + ROW_L1B:bo + ROW_L1B + 1, :], 0.0)
        ff = _bf16_dot(h, w_ref[wo + 2 * D:wo + 2 * D + HID, 0:D]) \
            + b_ref[bo + ROW_L2B:bo + ROW_L2B + 1, 0:D]
        x = _layer_norm(x + ff,
                        b_ref[bo + ROW_LN2W:bo + ROW_LN2W + 1, 0:D],
                        b_ref[bo + ROW_LN2B:bo + ROW_LN2B + 1, 0:D])

    # fc1 -> relu -> fc2 -> relu -> fc3
    h1 = jnp.maximum(_bf16_dot(x, w_ref[F1_OFF:F1_OFF + D, 0:D // 2])
                     + b_ref[ROW_F1B:ROW_F1B + 1, 0:D // 2], 0.0)
    h2 = jnp.maximum(_bf16_dot(h1, w_ref[F2_OFF:F2_OFF + D // 2, 0:D // 4])
                     + b_ref[ROW_F2B:ROW_F2B + 1, 0:D // 4], 0.0)
    o_ref[...] = _bf16_dot(h2, w_ref[F3_OFF:F3_OFF + D // 4, 0:OUT]) \
        + b_ref[ROW_F3B:ROW_F3B + 1, 0:OUT]


def tornet_pallas(x, wslab, bslab, *, tm=TM):
    batch = x.shape[0]
    assert batch % tm == 0
    flops = 2 * batch * (NUM_LAYERS * (D * D + D * HID + HID * D)
                         + D * (D // 2) + (D // 2) * (D // 4) + (D // 4) * OUT)
    bytes_accessed = int(x.size * x.dtype.itemsize + batch * OUT * 4
                         + wslab.size * wslab.dtype.itemsize
                         + bslab.size * bslab.dtype.itemsize)
    cost = pl.CostEstimate(flops=flops,
                           transcendentals=2 * NUM_LAYERS * batch,   # rsqrt per LN row
                           bytes_accessed=bytes_accessed)
    return pl.pallas_call(
        tornet_kernel,
        out_shape=jax.ShapeDtypeStruct((batch, OUT), jnp.float32),
        grid_spec=pltpu.PrefetchScalarGridSpec(
            num_scalar_prefetch=0,
            grid=(batch // tm,),
            in_specs=[pl.BlockSpec((tm, D), lambda i: (i, 0)),
                      # both slabs are resident (constant index map -> fetched once)
                      pl.BlockSpec((W_ROWS, SLAB_W), lambda i: (0, 0)),
                      pl.BlockSpec((B_ROWS, SLAB_W), lambda i: (0, 0))],
            out_specs=pl.BlockSpec((tm, OUT), lambda i: (i, 0))),
        compiler_params=pltpu.CompilerParams(dimension_semantics=("parallel",)),
        cost_estimate=cost,
    )(x, wslab, bslab)


def init_params(key):
    ks = jax.random.split(key, 16)
    s = 0.05

    def rnd(k, shape):
        return jax.random.normal(k, shape, dtype=jnp.float32) * s

    return {
        # stacked per-layer encoder params, all Linear weights pre-transposed to (in, out)
        'inw':  rnd(ks[0], (NUM_LAYERS, D, 3 * D)),
        'inb':  rnd(ks[1], (NUM_LAYERS, 1, 3 * D)),
        'outw': rnd(ks[2], (NUM_LAYERS, D, D)),
        'outb': rnd(ks[3], (NUM_LAYERS, 1, D)),
        'ln1w': jnp.ones((NUM_LAYERS, 1, D), jnp.float32),
        'ln1b': jnp.zeros((NUM_LAYERS, 1, D), jnp.float32),
        'ln2w': jnp.ones((NUM_LAYERS, 1, D), jnp.float32),
        'ln2b': jnp.zeros((NUM_LAYERS, 1, D), jnp.float32),
        'l1w':  rnd(ks[4], (NUM_LAYERS, D, HID)),
        'l1b':  rnd(ks[5], (NUM_LAYERS, 1, HID)),
        'l2w':  rnd(ks[6], (NUM_LAYERS, HID, D)),
        'l2b':  rnd(ks[7], (NUM_LAYERS, 1, D)),
        # head MLP
        'f1w':  rnd(ks[8],  (D, D // 2)),
        'f1b':  rnd(ks[9],  (1, D // 2)),
        'f2w':  rnd(ks[10], (D // 2, D // 4)),
        'f2b':  rnd(ks[11], (1, D // 4)),
        'f3w':  rnd(ks[12], (D // 4, OUT)),
        'f3b':  rnd(ks[13], (1, OUT)),
    }


def fold_params(p):
    """Host-side prep: fold the seq_len==1 attention path, pre-cast matmul weights to
    bf16, and pack everything into two contiguous slabs (one bf16, one fp32)."""
    wv = p['inw'][:, :, 2 * D:3 * D]                    # (L, D, D)   V slice of in_proj
    bv = p['inb'][:, :, 2 * D:3 * D]                    # (L, 1, D)
    attn_w = jnp.einsum('lij,ljk->lik', wv, p['outw'])                  # (L, D, D)
    attn_b = jnp.einsum('lij,ljk->lik', bv, p['outw']) + p['outb']      # (L, 1, D)

    def padc(w):                                         # zero-pad columns to SLAB_W
        return jnp.pad(w, ((0, 0), (0, SLAB_W - w.shape[1])))

    # bf16 weight slab (W_ROWS, 128): every block starts on a 16-row boundary
    wrows = []
    for l in range(NUM_LAYERS):
        wrows += [padc(attn_w[l]), padc(p['l1w'][l]), padc(p['l2w'][l])]
    wrows += [padc(p['f1w']), padc(p['f2w']), padc(p['f3w'])]
    wslab = jnp.concatenate(wrows, axis=0).astype(jnp.bfloat16)

    # fp32 bias / LayerNorm slab (B_ROWS, 128): one row per vector, 8 rows per layer
    def brow(v):
        return padc(v.reshape(1, -1))

    brows = []
    for l in range(NUM_LAYERS):
        brows += [brow(attn_b[l]), brow(p['ln1w'][l]), brow(p['ln1b'][l]),
                  brow(p['ln2w'][l]), brow(p['ln2b'][l]),
                  brow(p['l1b'][l]), brow(p['l2b'][l]),
                  jnp.zeros((1, SLAB_W), jnp.float32)]
    brows += [brow(p['f1b']), brow(p['f2b']), brow(p['f3b']),
              jnp.zeros((5, SLAB_W), jnp.float32)]
    bslab = jnp.concatenate(brows, axis=0)

    assert wslab.shape == (W_ROWS, SLAB_W) and bslab.shape == (B_ROWS, SLAB_W)
    return wslab, bslab


def tornet_ref_bf16(x, wslab, bslab):
    # pure-JAX mirror of the exact kernel numerics, reading the same slab offsets
    for l in range(NUM_LAYERS):
        wo, bo = l * WROWS_PER_LAYER, l * BROWS_PER_LAYER
        attn = _bf16_dot(x, wslab[wo:wo + D, :D]) + bslab[bo + ROW_ATTNB, :D]
        x = _layer_norm(x + attn, bslab[bo + ROW_LN1W, :D], bslab[bo + ROW_LN1B, :D])
        h = jnp.maximum(_bf16_dot(x, wslab[wo + D:wo + 2 * D, :])
                        + bslab[bo + ROW_L1B, :], 0.0)
        ff = _bf16_dot(h, wslab[wo + 2 * D:wo + 2 * D + HID, :D]) + bslab[bo + ROW_L2B, :D]
        x = _layer_norm(x + ff, bslab[bo + ROW_LN2W, :D], bslab[bo + ROW_LN2B, :D])
    h1 = jnp.maximum(_bf16_dot(x, wslab[F1_OFF:F1_OFF + D, :D // 2])
                     + bslab[ROW_F1B, :D // 2], 0.0)
    h2 = jnp.maximum(_bf16_dot(h1, wslab[F2_OFF:F2_OFF + D // 2, :D // 4])
                     + bslab[ROW_F2B, :D // 4], 0.0)
    return _bf16_dot(h2, wslab[F3_OFF:F3_OFF + D // 4, :OUT]) + bslab[ROW_F3B, :OUT]


def tornet_ref_fp32(x, p):
    # unfolded fp32 reference of the original (eval-mode) module forward
    for l in range(NUM_LAYERS):
        qkv = x @ p['inw'][l] + p['inb'][l]
        v = qkv[:, 2 * D:3 * D]
        attn = v @ p['outw'][l] + p['outb'][l]
        x = _layer_norm(x + attn, p['ln1w'][l], p['ln1b'][l])
        h = jnp.maximum(x @ p['l1w'][l] + p['l1b'][l], 0.0)
        x = _layer_norm(x + (h @ p['l2w'][l] + p['l2b'][l]), p['ln2w'][l], p['ln2b'][l])
    h1 = jnp.maximum(x @ p['f1w'] + p['f1b'], 0.0)
    h2 = jnp.maximum(h1 @ p['f2w'] + p['f2b'], 0.0)
    return h2 @ p['f3w'] + p['f3b']


if __name__ == "__main__":
    key = jax.random.PRNGKey(0)
    kx, kp = jax.random.split(key)
    x = jax.random.normal(kx, (B, D), dtype=jnp.float32)
    raw = init_params(kp)
    wslab, bslab = fold_params(raw)   # one-time host-side fold + bf16 cast + slab pack

    # TODO(synk): dropout (train-mode stochastic masking) is implemented as identity (eval mode).
    out = jax.jit(tornet_pallas)(x, wslab, bslab)
    out = jax.block_until_ready(out)
    assert out.shape == (B, OUT)

    # tight check against a pure-JAX mirror of the exact kernel numerics
    ref = tornet_ref_bf16(x, wslab, bslab)
    assert jnp.allclose(out, ref, atol=1e-3, rtol=1e-3), \
        f"max abs err vs bf16 mirror {jnp.max(jnp.abs(out - ref))}"

    # loose check against the original-module fp32 semantics (bf16 matmul precision)
    ref32 = tornet_ref_fp32(x, raw)
    assert jnp.allclose(out, ref32, atol=5e-2, rtol=0.0), \
        f"max abs err vs fp32 ref {jnp.max(jnp.abs(out - ref32))}"

    print("KERNEL_OK")
</pallas_src>

<mosaic_0001>
module attributes {stable_mosaic.version = 11 : i64} {
  func.func @tornet_kernel(%arg0: i32, %arg1: memref<128x64xf32, #tpu.memory_space<vmem>>, %arg2: memref<1136x128xbf16, #tpu.memory_space<vmem>>, %arg3: memref<40x128xf32, #tpu.memory_space<vmem>>, %arg4: memref<128x16xf32, #tpu.memory_space<vmem>>) attributes {dimension_semantics = [#tpu.dimension_semantics<parallel>], iteration_bounds = array<i64: 2>, scalar_prefetch = 0 : i64, scratch_operands = 0 : i64, tpu.core_type = #tpu.core_type<tc>, window_params = [{transform_indices = @transform_0, window_bounds = array<i64: 128, 64>}, {pipeline_mode = #tpu.pipeline_mode<synchronous>, transform_indices = @transform_1, window_bounds = array<i64: 1136, 128>}, {pipeline_mode = #tpu.pipeline_mode<synchronous>, transform_indices = @transform_2, window_bounds = array<i64: 40, 128>}, {transform_indices = @transform_3, window_bounds = array<i64: 128, 16>}]} {
    %c0 = arith.constant 0 : index
    %c0_0 = arith.constant 0 : index
    %0 = vector.load %arg1[%c0, %c0_0] : memref<128x64xf32, #tpu.memory_space<vmem>>, vector<128x64xf32>
    %c0_1 = arith.constant 0 : index
    %c0_2 = arith.constant 0 : index
    %1 = vector.load %arg2[%c0_1, %c0_2] : memref<1136x128xbf16, #tpu.memory_space<vmem>>, vector<64x64xbf16>
    %2 = arith.truncf %0 : vector<128x64xf32> to vector<128x64xbf16>
    %cst = arith.constant dense<0.000000e+00> : vector<128x64xf32>
    %3 = tpu.matmul %2, %1, %cst {dimension_numbers = #tpu.dot_dimension_numbers<[1], [0], [0], [1], [0, 0, 1, 1], [], []>} : vector<128x64xbf16>, vector<64x64xbf16>, vector<128x64xf32> -> vector<128x64xf32>
    %c0_3 = arith.constant 0 : index
    %c0_4 = arith.constant 0 : index
    %4 = vector.load %arg3[%c0_3, %c0_4] : memref<40x128xf32, #tpu.memory_space<vmem>>, vector<1x64xf32>
    %5 = vector.broadcast %4 : vector<1x64xf32> to vector<128x64xf32>
    %6 = arith.addf %3, %5 : vector<128x64xf32>
    %7 = arith.addf %0, %6 : vector<128x64xf32>
    %c1 = arith.constant 1 : index
    %c0_5 = arith.constant 0 : index
    %8 = vector.load %arg3[%c1, %c0_5] : memref<40x128xf32, #tpu.memory_space<vmem>>, vector<1x64xf32>
    %c2 = arith.constant 2 : index
    %c0_6 = arith.constant 0 : index
    %9 = vector.load %arg3[%c2, %c0_6] : memref<40x128xf32, #tpu.memory_space<vmem>>, vector<1x64xf32>
    %cst_7 = arith.constant dense<0.000000e+00> : vector<128xf32>
    %10 = vector.multi_reduction <add>, %7, %cst_7 [1] : vector<128x64xf32> to vector<128xf32>
    %11 = vector.shape_cast %10 : vector<128xf32> to vector<128x1xf32>
    %12 = arith.mulf %7, %7 : vector<128x64xf32>
    %cst_8 = arith.constant dense<0.000000e+00> : vector<128xf32>
    %13 = vector.multi_reduction <add>, %12, %cst_8 [1] : vector<128x64xf32> to vector<128xf32>
    %14 = vector.shape_cast %13 : vector<128xf32> to vector<128x1xf32>
    %cst_9 = arith.constant 1.562500e-02 : f32
    %15 = vector.broadcast %cst_9 : f32 to vector<128x1xf32>
    %16 = arith.mulf %11, %15 : vector<128x1xf32>
    %cst_10 = arith.constant 1.562500e-02 : f32
    %17 = vector.broadcast %cst_10 : f32 to vector<128x1xf32>
    %18 = arith.mulf %14, %17 : vector<128x1xf32>
    %19 = arith.mulf %16, %16 : vector<128x1xf32>
    %20 = arith.subf %18, %19 : vector<128x1xf32>
    %cst_11 = arith.constant 0.000000e+00 : f32
    %21 = vector.broadcast %cst_11 : f32 to vector<128x1xf32>
    %22 = arith.maximumf %20, %21 : vector<128x1xf32>
    %23 = vector.broadcast %16 : vector<128x1xf32> to vector<128x64xf32>
    %24 = arith.subf %7, %23 : vector<128x64xf32>
    %cst_12 = arith.constant 9.99999974E-6 : f32
    %25 = vector.broadcast %cst_12 : f32 to vector<128x1xf32>
    %26 = arith.addf %22, %25 : vector<128x1xf32>
    %27 = math.rsqrt %26 : vector<128x1xf32>
    %28 = vector.broadcast %27 : vector<128x1xf32> to vector<128x64xf32>
    %29 = arith.mulf %24, %28 : vector<128x64xf32>
    %30 = vector.broadcast %8 : vector<1x64xf32> to vector<128x64xf32>
    %31 = arith.mulf %29, %30 : vector<128x64xf32>
    %32 = vector.broadcast %9 : vector<1x64xf32> to vector<128x64xf32>
    %33 = arith.addf %31, %32 : vector<128x64xf32>
    %c64 = arith.constant 64 : index
    %c0_13 = arith.constant 0 : index
    %34 = vector.load %arg2[%c64, %c0_13] : memref<1136x128xbf16, #tpu.memory_space<vmem>>, vector<64x128xbf16>
    %35 = arith.truncf %33 : vector<128x64xf32> to vector<128x64xbf16>
    %cst_14 = arith.constant dense<0.000000e+00> : vector<128x128xf32>
    %36 = tpu.matmul %35, %34, %cst_14 {dimension_numbers = #tpu.dot_dimension_numbers<[1], [0], [0], [1], [0, 0, 1, 1], [], []>} : vector<128x64xbf16>, vector<64x128xbf16>, vector<128x128xf32> -> vector<128x128xf32>
    %c5 = arith.constant 5 : index
    %c0_15 = arith.constant 0 : index
    %37 = vector.load %arg3[%c5, %c0_15] : memref<40x128xf32, #tpu.memory_space<vmem>>, vector<1x128xf32>
    %38 = vector.broadcast %37 : vector<1x128xf32> to vector<128x128xf32>
    %39 = arith.addf %36, %38 : vector<128x128xf32>
    %cst_16 = arith.constant 0.000000e+00 : f32
    %40 = vector.broadcast %cst_16 : f32 to vector<128x128xf32>
    %41 = arith.maximumf %39, %40 : vector<128x128xf32>
    %c128 = arith.constant 128 : index
    %c0_17 = arith.constant 0 : index
    %42 = vector.load %arg2[%c128, %c0_17] : memref<1136x128xbf16, #tpu.memory_space<vmem>>, vector<128x64xbf16>
    %43 = arith.truncf %41 : vector<128x128xf32> to vector<128x128xbf16>
    %cst_18 = arith.constant dense<0.000000e+00> : vector<128x64xf32>
    %44 = tpu.matmul %43, %42, %cst_18 {dimension_numbers = #tpu.dot_dimension_numbers<[1], [0], [0], [1], [0, 0, 1, 1], [], []>} : vector<128x128xbf16>, vector<128x64xbf16>, vector<128x64xf32> -> vector<128x64xf32>
    %c6 = arith.constant 6 : index
    %c0_19 = arith.constant 0 : index
    %45 = vector.load %arg3[%c6, %c0_19] : memref<40x128xf32, #tpu.memory_space<vmem>>, vector<1x64xf32>
    %46 = vector.broadcast %45 : vector<1x64xf32> to vector<128x64xf32>
    %47 = arith.addf %44, %46 : vector<128x64xf32>
    %48 = arith.addf %33, %47 : vector<128x64xf32>
    %c3 = arith.constant 3 : index
    %c0_20 = arith.constant 0 : index
    %49 = vector.load %arg3[%c3, %c0_20] : memref<40x128xf32, #tpu.memory_space<vmem>>, vector<1x64xf32>
    %c4 = arith.constant 4 : index
    %c0_21 = arith.constant 0 : index
    %50 = vector.load %arg3[%c4, %c0_21] : memref<40x128xf32, #tpu.memory_space<vmem>>, vector<1x64xf32>
    %cst_22 = arith.constant dense<0.000000e+00> : vector<128xf32>
    %51 = vector.multi_reduction <add>, %48, %cst_22 [1] : vector<128x64xf32> to vector<128xf32>
    %52 = vector.shape_cast %51 : vector<128xf32> to vector<128x1xf32>
    %53 = arith.mulf %48, %48 : vector<128x64xf32>
    %cst_23 = arith.constant dense<0.000000e+00> : vector<128xf32>
    %54 = vector.multi_reduction <add>, %53, %cst_23 [1] : vector<128x64xf32> to vector<128xf32>
    %55 = vector.shape_cast %54 : vector<128xf32> to vector<128x1xf32>
    %cst_24 = arith.constant 1.562500e-02 : f32
    %56 = vector.broadcast %cst_24 : f32 to vector<128x1xf32>
    %57 = arith.mulf %52, %56 : vector<128x1xf32>
    %cst_25 = arith.constant 1.562500e-02 : f32
    %58 = vector.broadcast %cst_25 : f32 to vector<128x1xf32>
    %59 = arith.mulf %55, %58 : vector<128x1xf32>
    %60 = arith.mulf %57, %57 : vector<128x1xf32>
    %61 = arith.subf %59, %60 : vector<128x1xf32>
    %cst_26 = arith.constant 0.000000e+00 : f32
    %62 = vector.broadcast %cst_26 : f32 to vector<128x1xf32>
    %63 = arith.maximumf %61, %62 : vector<128x1xf32>
    %64 = vector.broadcast %57 : vector<128x1xf32> to vector<128x64xf32>
    %65 = arith.subf %48, %64 : vector<128x64xf32>
    %cst_27 = arith.constant 9.99999974E-6 : f32
    %66 = vector.broadcast %cst_27 : f32 to vector<128x1xf32>
    %67 = arith.addf %63, %66 : vector<128x1xf32>
    %68 = math.rsqrt %67 : vector<128x1xf32>
    %69 = vector.broadcast %68 : vector<128x1xf32> to vector<128x64xf32>
    %70 = arith.mulf %65, %69 : vector<128x64xf32>
    %71 = vector.broadcast %49 : vector<1x64xf32> to vector<128x64xf32>
    %72 = arith.mulf %70, %71 : vector<128x64xf32>
    %73 = vector.broadcast %50 : vector<1x64xf32> to vector<128x64xf32>
    %74 = arith.addf %72, %73 : vector<128x64xf32>
    %c256 = arith.constant 256 : index
    %c0_28 = arith.constant 0 : index
    %75 = vector.load %arg2[%c256, %c0_28] : memref<1136x128xbf16, #tpu.memory_space<vmem>>, vector<64x64xbf16>
    %76 = arith.truncf %74 : vector<128x64xf32> to vector<128x64xbf16>
    %cst_29 = arith.constant dense<0.000000e+00> : vector<128x64xf32>
    %77 = tpu.matmul %76, %75, %cst_29 {dimension_numbers = #tpu.dot_dimension_numbers<[1], [0], [0], [1], [0, 0, 1, 1], [], []>} : vector<128x64xbf16>, vector<64x64xbf16>, vector<128x64xf32> -> vector<128x64xf32>
    %c8 = arith.constant 8 : index
    %c0_30 = arith.constant 0 : index
    %78 = vector.load %arg3[%c8, %c0_30] : memref<40x128xf32, #tpu.memory_space<vmem>>, vector<1x64xf32>
    %79 = vector.broadcast %78 : vector<1x64xf32> to vector<128x64xf32>
    %80 = arith.addf %77, %79 : vector<128x64xf32>
    %81 = arith.addf %74, %80 : vector<128x64xf32>
    %c9 = arith.constant 9 : index
    %c0_31 = arith.constant 0 : index
    %82 = vector.load %arg3[%c9, %c0_31] : memref<40x128xf32, #tpu.memory_space<vmem>>, vector<1x64xf32>
    %c10 = arith.constant 10 : index
    %c0_32 = arith.constant 0 : index
    %83 = vector.load %arg3[%c10, %c0_32] : memref<40x128xf32, #tpu.memory_space<vmem>>, vector<1x64xf32>
    %cst_33 = arith.constant dense<0.000000e+00> : vector<128xf32>
    %84 = vector.multi_reduction <add>, %81, %cst_33 [1] : vector<128x64xf32> to vector<128xf32>
    %85 = vector.shape_cast %84 : vector<128xf32> to vector<128x1xf32>
    %86 = arith.mulf %81, %81 : vector<128x64xf32>
    %cst_34 = arith.constant dense<0.000000e+00> : vector<128xf32>
    %87 = vector.multi_reduction <add>, %86, %cst_34 [1] : vector<128x64xf32> to vector<128xf32>
    %88 = vector.shape_cast %87 : vector<128xf32> to vector<128x1xf32>
    %cst_35 = arith.constant 1.562500e-02 : f32
    %89 = vector.broadcast %cst_35 : f32 to vector<128x1xf32>
    %90 = arith.mulf %85, %89 : vector<128x1xf32>
    %cst_36 = arith.constant 1.562500e-02 : f32
    %91 = vector.broadcast %cst_36 : f32 to vector<128x1xf32>
    %92 = arith.mulf %88, %91 : vector<128x1xf32>
    %93 = arith.mulf %90, %90 : vector<128x1xf32>
    %94 = arith.subf %92, %93 : vector<128x1xf32>
    %cst_37 = arith.constant 0.000000e+00 : f32
    %95 = vector.broadcast %cst_37 : f32 to vector<128x1xf32>
    %96 = arith.maximumf %94, %95 : vector<128x1xf32>
    %97 = vector.broadcast %90 : vector<128x1xf32> to vector<128x64xf32>
    %98 = arith.subf %81, %97 : vector<128x64xf32>
    %cst_38 = arith.constant 9.99999974E-6 : f32
    %99 = vector.broadcast %cst_38 : f32 to vector<128x1xf32>
    %100 = arith.addf %96, %99 : vector<128x1xf32>
    %101 = math.rsqrt %100 : vector<128x1xf32>
    %102 = vector.broadcast %101 : vector<128x1xf32> to vector<128x64xf32>
    %103 = arith.mulf %98, %102 : vector<128x64xf32>
    %104 = vector.broadcast %82 : vector<1x64xf32> to vector<128x64xf32>
    %105 = arith.mulf %103, %104 : vector<128x64xf32>
    %106 = vector.broadcast %83 : vector<1x64xf32> to vector<128x64xf32>
    %107 = arith.addf %105, %106 : vector<128x64xf32>
    %c320 = arith.constant 320 : index
    %c0_39 = arith.constant 0 : index
    %108 = vector.load %arg2[%c320, %c0_39] : memref<1136x128xbf16, #tpu.memory_space<vmem>>, vector<64x128xbf16>
    %109 = arith.truncf %107 : vector<128x64xf32> to vector<128x64xbf16>
    %cst_40 = arith.constant dense<0.000000e+00> : vector<128x128xf32>
    %110 = tpu.matmul %109, %108, %cst_40 {dimension_numbers = #tpu.dot_dimension_numbers<[1], [0], [0], [1], [0, 0, 1, 1], [], []>} : vector<128x64xbf16>, vector<64x128xbf16>, vector<128x128xf32> -> vector<128x128xf32>
    %c13 = arith.constant 13 : index
    %c0_41 = arith.constant 0 : index
    %111 = vector.load %arg3[%c13, %c0_41] : memref<40x128xf32, #tpu.memory_space<vmem>>, vector<1x128xf32>
    %112 = vector.broadcast %111 : vector<1x128xf32> to vector<128x128xf32>
    %113 = arith.addf %110, %112 : vector<128x128xf32>
    %cst_42 = arith.constant 0.000000e+00 : f32
    %114 = vector.broadcast %cst_42 : f32 to vector<128x128xf32>
    %115 = arith.maximumf %113, %114 : vector<128x128xf32>
    %c384 = arith.constant 384 : index
    %c0_43 = arith.constant 0 : index
    %116 = vector.load %arg2[%c384, %c0_43] : memref<1136x128xbf16, #tpu.memory_space<vmem>>, vector<128x64xbf16>
    %117 = arith.truncf %115 : vector<128x128xf32> to vector<128x128xbf16>
    %cst_44 = arith.constant dense<0.000000e+00> : vector<128x64xf32>
    %118 = tpu.matmul %117, %116, %cst_44 {dimension_numbers = #tpu.dot_dimension_numbers<[1], [0], [0], [1], [0, 0, 1, 1], [], []>} : vector<128x128xbf16>, vector<128x64xbf16>, vector<128x64xf32> -> vector<128x64xf32>
    %c14 = arith.constant 14 : index
    %c0_45 = arith.constant 0 : index
    %119 = vector.load %arg3[%c14, %c0_45] : memref<40x128xf32, #tpu.memory_space<vmem>>, vector<1x64xf32>
    %120 = vector.broadcast %119 : vector<1x64xf32> to vector<128x64xf32>
    %121 = arith.addf %118, %120 : vector<128x64xf32>
    %122 = arith.addf %107, %121 : vector<128x64xf32>
    %c11 = arith.constant 11 : index
    %c0_46 = arith.constant 0 : index
    %123 = vector.load %arg3[%c11, %c0_46] : memref<40x128xf32, #tpu.memory_space<vmem>>, vector<1x64xf32>
    %c12 = arith.constant 12 : index
    %c0_47 = arith.constant 0 : index
    %124 = vector.load %arg3[%c12, %c0_47] : memref<40x128xf32, #tpu.memory_space<vmem>>, vector<1x64xf32>
    %cst_48 = arith.constant dense<0.000000e+00> : vector<128xf32>
    %125 = vector.multi_reduction <add>, %122, %cst_48 [1] : vector<128x64xf32> to vector<128xf32>
    %126 = vector.shape_cast %125 : vector<128xf32> to vector<128x1xf32>
    %127 = arith.mulf %122, %122 : vector<128x64xf32>
    %cst_49 = arith.constant dense<0.000000e+00> : vector<128xf32>
    %128 = vector.multi_reduction <add>, %127, %cst_49 [1] : vector<128x64xf32> to vector<128xf32>
    %129 = vector.shape_cast %128 : vector<128xf32> to vector<128x1xf32>
    %cst_50 = arith.constant 1.562500e-02 : f32
    %130 = vector.broadcast %cst_50 : f32 to vector<128x1xf32>
    %131 = arith.mulf %126, %130 : vector<128x1xf32>
    %cst_51 = arith.constant 1.562500e-02 : f32
    %132 = vector.broadcast %cst_51 : f32 to vector<128x1xf32>
    %133 = arith.mulf %129, %132 : vector<128x1xf32>
    %134 = arith.mulf %131, %131 : vector<128x1xf32>
    %135 = arith.subf %133, %134 : vector<128x1xf32>
    %cst_52 = arith.constant 0.000000e+00 : f32
    %136 = vector.broadcast %cst_52 : f32 to vector<128x1xf32>
    %137 = arith.maximumf %135, %136 : vector<128x1xf32>
    %138 = vector.broadcast %131 : vector<128x1xf32> to vector<128x64xf32>
    %139 = arith.subf %122, %138 : vector<128x64xf32>
    %cst_53 = arith.constant 9.99999974E-6 : f32
    %140 = vector.broadcast %cst_53 : f32 to vector<128x1xf32>
    %141 = arith.addf %137, %140 : vector<128x1xf32>
    %142 = math.rsqrt %141 : vector<128x1xf32>
    %143 = vector.broadcast %142 : vector<128x1xf32> to vector<128x64xf32>
    %144 = arith.mulf %139, %143 : vector<128x64xf32>
    %145 = vector.broadcast %123 : vector<1x64xf32> to vector<128x64xf32>
    %146 = arith.mulf %144, %145 : vector<128x64xf32>
    %147 = vector.broadcast %124 : vector<1x64xf32> to vector<128x64xf32>
    %148 = arith.addf %146, %147 : vector<128x64xf32>
    %c512 = arith.constant 512 : index
    %c0_54 = arith.constant 0 : index
    %149 = vector.load %arg2[%c512, %c0_54] : memref<1136x128xbf16, #tpu.memory_space<vmem>>, vector<64x64xbf16>
    %150 = arith.truncf %148 : vector<128x64xf32> to vector<128x64xbf16>
    %cst_55 = arith.constant dense<0.000000e+00> : vector<128x64xf32>
    %151 = tpu.matmul %150, %149, %cst_55 {dimension_numbers = #tpu.dot_dimension_numbers<[1], [0], [0], [1], [0, 0, 1, 1], [], []>} : vector<128x64xbf16>, vector<64x64xbf16>, vector<128x64xf32> -> vector<128x64xf32>
    %c16 = arith.constant 16 : index
    %c0_56 = arith.constant 0 : index
    %152 = vector.load %arg3[%c16, %c0_56] : memref<40x128xf32, #tpu.memory_space<vmem>>, vector<1x64xf32>
    %153 = vector.broadcast %152 : vector<1x64xf32> to vector<128x64xf32>
    %154 = arith.addf %151, %153 : vector<128x64xf32>
    %155 = arith.addf %148, %154 : vector<128x64xf32>
    %c17 = arith.constant 17 : index
    %c0_57 = arith.constant 0 : index
    %156 = vector.load %arg3[%c17, %c0_57] : memref<40x128xf32, #tpu.memory_space<vmem>>, vector<1x64xf32>
    %c18 = arith.constant 18 : index
    %c0_58 = arith.constant 0 : index
    %157 = vector.load %arg3[%c18, %c0_58] : memref<40x128xf32, #tpu.memory_space<vmem>>, vector<1x64xf32>
    %cst_59 = arith.constant dense<0.000000e+00> : vector<128xf32>
    %158 = vector.multi_reduction <add>, %155, %cst_59 [1] : vector<128x64xf32> to vector<128xf32>
    %159 = vector.shape_cast %158 : vector<128xf32> to vector<128x1xf32>
    %160 = arith.mulf %155, %155 : vector<128x64xf32>
    %cst_60 = arith.constant dense<0.000000e+00> : vector<128xf32>
    %161 = vector.multi_reduction <add>, %160, %cst_60 [1] : vector<128x64xf32> to vector<128xf32>
    %162 = vector.shape_cast %161 : vector<128xf32> to vector<128x1xf32>
    %cst_61 = arith.constant 1.562500e-02 : f32
    %163 = vector.broadcast %cst_61 : f32 to vector<128x1xf32>
    %164 = arith.mulf %159, %163 : vector<128x1xf32>
    %cst_62 = arith.constant 1.562500e-02 : f32
    %165 = vector.broadcast %cst_62 : f32 to vector<128x1xf32>
    %166 = arith.mulf %162, %165 : vector<128x1xf32>
    %167 = arith.mulf %164, %164 : vector<128x1xf32>
    %168 = arith.subf %166, %167 : vector<128x1xf32>
    %cst_63 = arith.constant 0.000000e+00 : f32
    %169 = vector.broadcast %cst_63 : f32 to vector<128x1xf32>
    %170 = arith.maximumf %168, %169 : vector<128x1xf32>
    %171 = vector.broadcast %164 : vector<128x1xf32> to vector<128x64xf32>
    %172 = arith.subf %155, %171 : vector<128x64xf32>
    %cst_64 = arith.constant 9.99999974E-6 : f32
    %173 = vector.broadcast %cst_64 : f32 to vector<128x1xf32>
    %174 = arith.addf %170, %173 : vector<128x1xf32>
    %175 = math.rsqrt %174 : vector<128x1xf32>
    %176 = vector.broadcast %175 : vector<128x1xf32> to vector<128x64xf32>
    %177 = arith.mulf %172, %176 : vector<128x64xf32>
    %178 = vector.broadcast %156 : vector<1x64xf32> to vector<128x64xf32>
    %179 = arith.mulf %177, %178 : vector<128x64xf32>
    %180 = vector.broadcast %157 : vector<1x64xf32> to vector<128x64xf32>
    %181 = arith.addf %179, %180 : vector<128x64xf32>
    %c576 = arith.constant 576 : index
    %c0_65 = arith.constant 0 : index
    %182 = vector.load %arg2[%c576, %c0_65] : memref<1136x128xbf16, #tpu.memory_space<vmem>>, vector<64x128xbf16>
    %183 = arith.truncf %181 : vector<128x64xf32> to vector<128x64xbf16>
    %cst_66 = arith.constant dense<0.000000e+00> : vector<128x128xf32>
    %184 = tpu.matmul %183, %182, %cst_66 {dimension_numbers = #tpu.dot_dimension_numbers<[1], [0], [0], [1], [0, 0, 1, 1], [], []>} : vector<128x64xbf16>, vector<64x128xbf16>, vector<128x128xf32> -> vector<128x128xf32>
    %c21 = arith.constant 21 : index
    %c0_67 = arith.constant 0 : index
    %185 = vector.load %arg3[%c21, %c0_67] : memref<40x128xf32, #tpu.memory_space<vmem>>, vector<1x128xf32>
    %186 = vector.broadcast %185 : vector<1x128xf32> to vector<128x128xf32>
    %187 = arith.addf %184, %186 : vector<128x128xf32>
    %cst_68 = arith.constant 0.000000e+00 : f32
    %188 = vector.broadcast %cst_68 : f32 to vector<128x128xf32>
    %189 = arith.maximumf %187, %188 : vector<128x128xf32>
    %c640 = arith.constant 640 : index
    %c0_69 = arith.constant 0 : index
    %190 = vector.load %arg2[%c640, %c0_69] : memref<1136x128xbf16, #tpu.memory_space<vmem>>, vector<128x64xbf16>
    %191 = arith.truncf %189 : vector<128x128xf32> to vector<128x128xbf16>
    %cst_70 = arith.constant dense<0.000000e+00> : vector<128x64xf32>
    %192 = tpu.matmul %191, %190, %cst_70 {dimension_numbers = #tpu.dot_dimension_numbers<[1], [0], [0], [1], [0, 0, 1, 1], [], []>} : vector<128x128xbf16>, vector<128x64xbf16>, vector<128x64xf32> -> vector<128x64xf32>
    %c22 = arith.constant 22 : index
    %c0_71 = arith.constant 0 : index
    %193 = vector.load %arg3[%c22, %c0_71] : memref<40x128xf32, #tpu.memory_space<vmem>>, vector<1x64xf32>
    %194 = vector.broadcast %193 : vector<1x64xf32> to vector<128x64xf32>
    %195 = arith.addf %192, %194 : vector<128x64xf32>
    %196 = arith.addf %181, %195 : vector<128x64xf32>
    %c19 = arith.constant 19 : index
    %c0_72 = arith.constant 0 : index
    %197 = vector.load %arg3[%c19, %c0_72] : memref<40x128xf32, #tpu.memory_space<vmem>>, vector<1x64xf32>
    %c20 = arith.constant 20 : index
    %c0_73 = arith.constant 0 : index
    %198 = vector.load %arg3[%c20, %c0_73] : memref<40x128xf32, #tpu.memory_space<vmem>>, vector<1x64xf32>
    %cst_74 = arith.constant dense<0.000000e+00> : vector<128xf32>
    %199 = vector.multi_reduction <add>, %196, %cst_74 [1] : vector<128x64xf32> to vector<128xf32>
    %200 = vector.shape_cast %199 : vector<128xf32> to vector<128x1xf32>
    %201 = arith.mulf %196, %196 : vector<128x64xf32>
    %cst_75 = arith.constant dense<0.000000e+00> : vector<128xf32>
    %202 = vector.multi_reduction <add>, %201, %cst_75 [1] : vector<128x64xf32> to vector<128xf32>
    %203 = vector.shape_cast %202 : vector<128xf32> to vector<128x1xf32>
    %cst_76 = arith.constant 1.562500e-02 : f32
    %204 = vector.broadcast %cst_76 : f32 to vector<128x1xf32>
    %205 = arith.mulf %200, %204 : vector<128x1xf32>
    %cst_77 = arith.constant 1.562500e-02 : f32
    %206 = vector.broadcast %cst_77 : f32 to vector<128x1xf32>
    %207 = arith.mulf %203, %206 : vector<128x1xf32>
    %208 = arith.mulf %205, %205 : vector<128x1xf32>
    %209 = arith.subf %207, %208 : vector<128x1xf32>
    %cst_78 = arith.constant 0.000000e+00 : f32
    %210 = vector.broadcast %cst_78 : f32 to vector<128x1xf32>
    %211 = arith.maximumf %209, %210 : vector<128x1xf32>
    %212 = vector.broadcast %205 : vector<128x1xf32> to vector<128x64xf32>
    %213 = arith.subf %196, %212 : vector<128x64xf32>
    %cst_79 = arith.constant 9.99999974E-6 : f32
    %214 = vector.broadcast %cst_79 : f32 to vector<128x1xf32>
    %215 = arith.addf %211, %214 : vector<128x1xf32>
    %216 = math.rsqrt %215 : vector<128x1xf32>
    %217 = vector.broadcast %216 : vector<128x1xf32> to vector<128x64xf32>
    %218 = arith.mulf %213, %217 : vector<128x64xf32>
    %219 = vector.broadcast %197 : vector<1x64xf32> to vector<128x64xf32>
    %220 = arith.mulf %218, %219 : vector<128x64xf32>
    %221 = vector.broadcast %198 : vector<1x64xf32> to vector<128x64xf32>
    %222 = arith.addf %220, %221 : vector<128x64xf32>
    %c768 = arith.constant 768 : index
    %c0_80 = arith.constant 0 : index
    %223 = vector.load %arg2[%c768, %c0_80] : memref<1136x128xbf16, #tpu.memory_space<vmem>>, vector<64x64xbf16>
    %224 = arith.truncf %222 : vector<128x64xf32> to vector<128x64xbf16>
    %cst_81 = arith.constant dense<0.000000e+00> : vector<128x64xf32>
    %225 = tpu.matmul %224, %223, %cst_81 {dimension_numbers = #tpu.dot_dimension_numbers<[1], [0], [0], [1], [0, 0, 1, 1], [], []>} : vector<128x64xbf16>, vector<64x64xbf16>, vector<128x64xf32> -> vector<128x64xf32>
    %c24 = arith.constant 24 : index
    %c0_82 = arith.constant 0 : index
    %226 = vector.load %arg3[%c24, %c0_82] : memref<40x128xf32, #tpu.memory_space<vmem>>, vector<1x64xf32>
    %227 = vector.broadcast %226 : vector<1x64xf32> to vector<128x64xf32>
    %228 = arith.addf %225, %227 : vector<128x64xf32>
    %229 = arith.addf %222, %228 : vector<128x64xf32>
    %c25 = arith.constant 25 : index
    %c0_83 = arith.constant 0 : index
    %230 = vector.load %arg3[%c25, %c0_83] : memref<40x128xf32, #tpu.memory_space<vmem>>, vector<1x64xf32>
    %c26 = arith.constant 26 : index
    %c0_84 = arith.constant 0 : index
    %231 = vector.load %arg3[%c26, %c0_84] : memref<40x128xf32, #tpu.memory_space<vmem>>, vector<1x64xf32>
    %cst_85 = arith.constant dense<0.000000e+00> : vector<128xf32>
    %232 = vector.multi_reduction <add>, %229, %cst_85 [1] : vector<128x64xf32> to vector<128xf32>
    %233 = vector.shape_cast %232 : vector<128xf32> to vector<128x1xf32>
    %234 = arith.mulf %229, %229 : vector<128x64xf32>
    %cst_86 = arith.constant dense<0.000000e+00> : vector<128xf32>
    %235 = vector.multi_reduction <add>, %234, %cst_86 [1] : vector<128x64xf32> to vector<128xf32>
    %236 = vector.shape_cast %235 : vector<128xf32> to vector<128x1xf32>
    %cst_87 = arith.constant 1.562500e-02 : f32
    %237 = vector.broadcast %cst_87 : f32 to vector<128x1xf32>
    %238 = arith.mulf %233, %237 : vector<128x1xf32>
    %cst_88 = arith.constant 1.562500e-02 : f32
    %239 = vector.broadcast %cst_88 : f32 to vector<128x1xf32>
    %240 = arith.mulf %236, %239 : vector<128x1xf32>
    %241 = arith.mulf %238, %238 : vector<128x1xf32>
    %242 = arith.subf %240, %241 : vector<128x1xf32>
    %cst_89 = arith.constant 0.000000e+00 : f32
    %243 = vector.broadcast %cst_89 : f32 to vector<128x1xf32>
    %244 = arith.maximumf %242, %243 : vector<128x1xf32>
    %245 = vector.broadcast %238 : vector<128x1xf32> to vector<128x64xf32>
    %246 = arith.subf %229, %245 : vector<128x64xf32>
    %cst_90 = arith.constant 9.99999974E-6 : f32
    %247 = vector.broadcast %cst_90 : f32 to vector<128x1xf32>
    %248 = arith.addf %244, %247 : vector<128x1xf32>
    %249 = math.rsqrt %248 : vector<128x1xf32>
    %250 = vector.broadcast %249 : vector<128x1xf32> to vector<128x64xf32>
    %251 = arith.mulf %246, %250 : vector<128x64xf32>
    %252 = vector.broadcast %230 : vector<1x64xf32> to vector<128x64xf32>
    %253 = arith.mulf %251, %252 : vector<128x64xf32>
    %254 = vector.broadcast %231 : vector<1x64xf32> to vector<128x64xf32>
    %255 = arith.addf %253, %254 : vector<128x64xf32>
    %c832 = arith.constant 832 : index
    %c0_91 = arith.constant 0 : index
    %256 = vector.load %arg2[%c832, %c0_91] : memref<1136x128xbf16, #tpu.memory_space<vmem>>, vector<64x128xbf16>
    %257 = arith.truncf %255 : vector<128x64xf32> to vector<128x64xbf16>
    %cst_92 = arith.constant dense<0.000000e+00> : vector<128x128xf32>
    %258 = tpu.matmul %257, %256, %cst_92 {dimension_numbers = #tpu.dot_dimension_numbers<[1], [0], [0], [1], [0, 0, 1, 1], [], []>} : vector<128x64xbf16>, vector<64x128xbf16>, vector<128x128xf32> -> vector<128x128xf32>
    %c29 = arith.constant 29 : index
    %c0_93 = arith.constant 0 : index
    %259 = vector.load %arg3[%c29, %c0_93] : memref<40x128xf32, #tpu.memory_space<vmem>>, vector<1x128xf32>
    %260 = vector.broadcast %259 : vector<1x128xf32> to vector<128x128xf32>
    %261 = arith.addf %258, %260 : vector<128x128xf32>
    %cst_94 = arith.constant 0.000000e+00 : f32
    %262 = vector.broadcast %cst_94 : f32 to vector<128x128xf32>
    %263 = arith.maximumf %261, %262 : vector<128x128xf32>
    %c896 = arith.constant 896 : index
    %c0_95 = arith.constant 0 : index
    %264 = vector.load %arg2[%c896, %c0_95] : memref<1136x128xbf16, #tpu.memory_space<vmem>>, vector<128x64xbf16>
    %265 = arith.truncf %263 : vector<128x128xf32> to vector<128x128xbf16>
    %cst_96 = arith.constant dense<0.000000e+00> : vector<128x64xf32>
    %266 = tpu.matmul %265, %264, %cst_96 {dimension_numbers = #tpu.dot_dimension_numbers<[1], [0], [0], [1], [0, 0, 1, 1], [], []>} : vector<128x128xbf16>, vector<128x64xbf16>, vector<128x64xf32> -> vector<128x64xf32>
    %c30 = arith.constant 30 : index
    %c0_97 = arith.constant 0 : index
    %267 = vector.load %arg3[%c30, %c0_97] : memref<40x128xf32, #tpu.memory_space<vmem>>, vector<1x64xf32>
    %268 = vector.broadcast %267 : vector<1x64xf32> to vector<128x64xf32>
    %269 = arith.addf %266, %268 : vector<128x64xf32>
    %270 = arith.addf %255, %269 : vector<128x64xf32>
    %c27 = arith.constant 27 : index
    %c0_98 = arith.constant 0 : index
    %271 = vector.load %arg3[%c27, %c0_98] : memref<40x128xf32, #tpu.memory_space<vmem>>, vector<1x64xf32>
    %c28 = arith.constant 28 : index
    %c0_99 = arith.constant 0 : index
    %272 = vector.load %arg3[%c28, %c0_99] : memref<40x128xf32, #tpu.memory_space<vmem>>, vector<1x64xf32>
    %cst_100 = arith.constant dense<0.000000e+00> : vector<128xf32>
    %273 = vector.multi_reduction <add>, %270, %cst_100 [1] : vector<128x64xf32> to vector<128xf32>
    %274 = vector.shape_cast %273 : vector<128xf32> to vector<128x1xf32>
    %275 = arith.mulf %270, %270 : vector<128x64xf32>
    %cst_101 = arith.constant dense<0.000000e+00> : vector<128xf32>
    %276 = vector.multi_reduction <add>, %275, %cst_101 [1] : vector<128x64xf32> to vector<128xf32>
    %277 = vector.shape_cast %276 : vector<128xf32> to vector<128x1xf32>
    %cst_102 = arith.constant 1.562500e-02 : f32
    %278 = vector.broadcast %cst_102 : f32 to vector<128x1xf32>
    %279 = arith.mulf %274, %278 : vector<128x1xf32>
    %cst_103 = arith.constant 1.562500e-02 : f32
    %280 = vector.broadcast %cst_103 : f32 to vector<128x1xf32>
    %281 = arith.mulf %277, %280 : vector<128x1xf32>
    %282 = arith.mulf %279, %279 : vector<128x1xf32>
    %283 = arith.subf %281, %282 : vector<128x1xf32>
    %cst_104 = arith.constant 0.000000e+00 : f32
    %284 = vector.broadcast %cst_104 : f32 to vector<128x1xf32>
    %285 = arith.maximumf %283, %284 : vector<128x1xf32>
    %286 = vector.broadcast %279 : vector<128x1xf32> to vector<128x64xf32>
    %287 = arith.subf %270, %286 : vector<128x64xf32>
    %cst_105 = arith.constant 9.99999974E-6 : f32
    %288 = vector.broadcast %cst_105 : f32 to vector<128x1xf32>
    %289 = arith.addf %285, %288 : vector<128x1xf32>
    %290 = math.rsqrt %289 : vector<128x1xf32>
    %291 = vector.broadcast %290 : vector<128x1xf32> to vector<128x64xf32>
    %292 = arith.mulf %287, %291 : vector<128x64xf32>
    %293 = vector.broadcast %271 : vector<1x64xf32> to vector<128x64xf32>
    %294 = arith.mulf %292, %293 : vector<128x64xf32>
    %295 = vector.broadcast %272 : vector<1x64xf32> to vector<128x64xf32>
    %296 = arith.addf %294, %295 : vector<128x64xf32>
    %c1024 = arith.constant 1024 : index
    %c0_106 = arith.constant 0 : index
    %297 = vector.load %arg2[%c1024, %c0_106] : memref<1136x128xbf16, #tpu.memory_space<vmem>>, vector<64x32xbf16>
    %298 = arith.truncf %296 : vector<128x64xf32> to vector<128x64xbf16>
    %cst_107 = arith.constant dense<0.000000e+00> : vector<128x32xf32>
    %299 = tpu.matmul %298, %297, %cst_107 {dimension_numbers = #tpu.dot_dimension_numbers<[1], [0], [0], [1], [0, 0, 1, 1], [], []>} : vector<128x64xbf16>, vector<64x32xbf16>, vector<128x32xf32> -> vector<128x32xf32>
    %c32 = arith.constant 32 : index
    %c0_108 = arith.constant 0 : index
    %300 = vector.load %arg3[%c32, %c0_108] : memref<40x128xf32, #tpu.memory_space<vmem>>, vector<1x32xf32>
    %301 = vector.broadcast %300 : vector<1x32xf32> to vector<128x32xf32>
    %302 = arith.addf %299, %301 : vector<128x32xf32>
    %cst_109 = arith.constant 0.000000e+00 : f32
    %303 = vector.broadcast %cst_109 : f32 to vector<128x32xf32>
    %304 = arith.maximumf %302, %303 : vector<128x32xf32>
    %c1088 = arith.constant 1088 : index
    %c0_110 = arith.constant 0 : index
    %305 = vector.load %arg2[%c1088, %c0_110] : memref<1136x128xbf16, #tpu.memory_space<vmem>>, vector<32x16xbf16>
    %306 = arith.truncf %304 : vector<128x32xf32> to vector<128x32xbf16>
    %cst_111 = arith.constant dense<0.000000e+00> : vector<128x16xf32>
    %307 = tpu.matmul %306, %305, %cst_111 {dimension_numbers = #tpu.dot_dimension_numbers<[1], [0], [0], [1], [0, 0, 1, 1], [], []>} : vector<128x32xbf16>, vector<32x16xbf16>, vector<128x16xf32> -> vector<128x16xf32>
    %c33 = arith.constant 33 : index
    %c0_112 = arith.constant 0 : index
    %308 = vector.load %arg3[%c33, %c0_112] : memref<40x128xf32, #tpu.memory_space<vmem>>, vector<1x16xf32>
    %309 = vector.broadcast %308 : vector<1x16xf32> to vector<128x16xf32>
    %310 = arith.addf %307, %309 : vector<128x16xf32>
    %cst_113 = arith.constant 0.000000e+00 : f32
    %311 = vector.broadcast %cst_113 : f32 to vector<128x16xf32>
    %312 = arith.maximumf %310, %311 : vector<128x16xf32>
    %c1120 = arith.constant 1120 : index
    %c0_114 = arith.constant 0 : index
    %313 = vector.load %arg2[%c1120, %c0_114] : memref<1136x128xbf16, #tpu.memory_space<vmem>>, vector<16x16xbf16>
    %314 = arith.truncf %312 : vector<128x16xf32> to vector<128x16xbf16>
    %cst_115 = arith.constant dense<0.000000e+00> : vector<128x16xf32>
    %315 = tpu.matmul %314, %313, %cst_115 {dimension_numbers = #tpu.dot_dimension_numbers<[1], [0], [0], [1], [0, 0, 1, 1], [], []>} : vector<128x16xbf16>, vector<16x16xbf16>, vector<128x16xf32> -> vector<128x16xf32>
    %c34 = arith.constant 34 : index
    %c0_116 = arith.constant 0 : index
    %316 = vector.load %arg3[%c34, %c0_116] : memref<40x128xf32, #tpu.memory_space<vmem>>, vector<1x16xf32>
    %317 = vector.broadcast %316 : vector<1x16xf32> to vector<128x16xf32>
    %318 = arith.addf %315, %317 : vector<128x16xf32>
    %c0_117 = arith.constant 0 : index
    %c0_118 = arith.constant 0 : index
    %319 = vector.load %arg4[%c0_117, %c0_118] : memref<128x16xf32, #tpu.memory_space<vmem>>, vector<128x16xf32>
    tpu.vector_store %arg4[%c0_117, %c0_118], %318 {strides = array<i32>} : memref<128x16xf32, #tpu.memory_space<vmem>>, vector<128x16xf32>,
    return
  }
  func.func @transform_0(%arg0: i32) -> (i32, i32) {
    %c0_i32 = arith.constant 0 : i32
    %c0_i32_0 = arith.constant 0 : i32
    return %arg0, %c0_i32 : i32, i32
  }
  func.func @transform_1(%arg0: i32) -> (i32, i32) {
    %c0_i32 = arith.constant 0 : i32
    %c0_i32_0 = arith.constant 0 : i32
    %c0_i32_1 = arith.constant 0 : i32
    return %c0_i32, %c0_i32_0 : i32, i32
  }
  func.func @transform_2(%arg0: i32) -> (i32, i32) {
    %c0_i32 = arith.constant 0 : i32
    %c0_i32_0 = arith.constant 0 : i32
    %c0_i32_1 = arith.constant 0 : i32
    return %c0_i32, %c0_i32_0 : i32, i32
  }
  func.func @transform_3(%arg0: i32) -> (i32, i32) {
    %c0_i32 = arith.constant 0 : i32
    %c0_i32_0 = arith.constant 0 : i32
    return %arg0, %c0_i32 : i32, i32
  }
}

</mosaic_0001>

<bundles_post_ra>
// kernel: tornet_pallas.1
= control target key start
LH: loop header
LB: loop body
LE: loop exit
PB: predicated region body
PF: predicated region fallthrough
CT: control target
= control target key end

     0   :  { %8 = vsyncpa [#allocation3], 0  ;;  %s6565_s12 = smov 0   ;;  %s9549_s0 = inlined_call_operand.vmem [shape: f32[256,64], index: 0, kind: input, shape index: {}]   ;;  %s9550_s1 = inlined_call_operand.hbm [shape: bf16[1136,128], index: 1, kind: input, shape index: {}]   ;;  %s9551_s2 = inlined_call_operand.vmem [shape: f32[40,128], index: 2, kind: input, shape index: {}]   ;;  %s9552_s3 = inlined_call_operand.vmem [shape: f32[256,16], index: 3, kind: output, shape index: {}]  }
   0x1 LB: > { %s124_s15 = sshll.u32 %s9550_s1, 4  ;;  %s5724_s16 = sadd.s32 4294967295, %s6540_s12   ;;  %s6540_s12 = sphi %s6565_s12, %s14_s12   ;;  %s125_s15 = int_to_ptr.hbm [resolvable:$true] %s124_s15 }
   0x2   : > { %p5726_p0 = scmp.ge.s32.totalorder %s6540_s12, 1  ;;  %p113_p1 = scmp.lt.s32.totalorder %s6540_s12, 3 }
   0x3   : > { %p6200_p2 = scmp.eq.s32.totalorder %s5724_s16, 0  ;;  %s6542_s17 = smov [#allocation2]  }
   0x4   : > { %p114_p3 = pnand %p5726_p0, %p113_p1  ;;  %s126_s18 = sshll.u32 %s6542_s17, 4  ;;  %s127_s18 = int_to_ptr.vmem [resolvable:$true] %s126_s18 }
   0x5   : > { %s6543_s19 = smov 64   ;;  %s6544_s20 = smov 4  }
   0x6   : > { %p6196_p4 = pneg %p114_p3  ;;  %154 = sbr.rel (%p114_p3) target bundleno = 3491 (0xda3), region = 32 }
   0x8   : > { %p6197_p5 = pnand %p6200_p2, %p6196_p4 }
   0xa   : > { %6199 = dma.hbm_to_vmem [thread:$0]  (!%p6197_p5), %s125_s15, 9088, %s127_s18, [#allocation3], %s6543_s19, %s6543_s19, %s6544_s20  }
   0xb   : > { %6535 = dma.done.wait (%p6200_p2), [#allocation3], 9088  }
   0xc   : > { %6537 = vsyncadd (%p6200_p2), [#allocation3], 4294958208  ;;  %s5731_s21 = sshll.u32 %s5724_s16, 4  ;;  %v6112_v0 = vld [vmem:[#allocation2 + $0x18] sm:$0xff]  ;;  %v6111_v1 = vld [vmem:[#allocation2 + $0x10] sm:$0xff]  ;;  %vm250_vm0 = vcmask 523264  }
   0xd   : > { %p180_p6 = scmp.lt.s32.totalorder %s5731_s21, 31  ;;  %279 = vmatpush.bf16.msra.mxu0 %v6112_v0  ;;  %6180 = vmatpush.bf16.msra.mxu2 %v6112_v0  ;;  %v6110_v2 = vld [vmem:[#allocation2 + $0x8] sm:$0xff]  ;;  %v6109_v3 = vld [vmem:[#allocation2] sm:$0xff] }
   0xe   : > { %v6646_v28 = vld [vmem:[%s9551_s2] ss:$0 sm:$0xff] }
   0xf   : > { %s9562_s21 = smov (!%p180_p6, %s5731_s21), 31 }
  0x10   : > { %s5732_s22 = sshll.u32 %s9562_s21, 3 }
  0x11   : > { %s6584_s25 = scalar_lea.vmem %s9549_s0, %s5732_s22  ;;  %280 = vmatpush.bf16.msra.mxu0 %v6111_v1  ;;  %6181 = vmatpush.bf16.msra.mxu2 %v6111_v1  ;;  %s9512_s16 = scalar_lea.vmem %s9552_s3, %s5732_s22 }
  0x12   : > { %v192_v4 = vld [vmem:[%s6584_s25] sm:$0xff]  ;;  %v193_v5 = vld [vmem:[%s6584_s25 + $0x8] sm:$0xff]  ;;  %v194_v7 = vld [vmem:[%s6584_s25 + $0x10] sm:$0xff] }
  0x13   : > { %v216_v6 = vpack.c.bf16 %v193_v5, %v192_v4  ;;  %v195_v8 = vld [vmem:[%s6584_s25 + $0x18] sm:$0xff]  ;;  %v196_v10 = vld [vmem:[%s6584_s25 + $0x20] sm:$0xff]  ;;  %v6594_v11 = vld [vmem:[%s6584_s25 + $0x28] sm:$0xff] }
  0x14   : > { %v217_v9 = vpack.c.bf16 %v195_v8, %v194_v7  ;;  %v218_v12 = vpack.c.bf16 %v6594_v11, %v196_v10  ;;  %v6599_v13 = vld [vmem:[%s6584_s25 + $0x60] sm:$0xff]  ;;  %v6602_v14 = vld [vmem:[%s6584_s25 + $0x68] sm:$0xff]  ;;  %v6608_v16 = vld [vmem:[%s6584_s25 + $0x30] sm:$0xff] }
  0x15   : > { %281 = vmatpush.bf16.msra.mxu0 %v6110_v2  ;;  %6182 = vmatpush.bf16.msra.mxu2 %v6110_v2  ;;  %v222_v15 = vpack.c.bf16 %v6602_v14, %v6599_v13  ;;  %v6611_v17 = vld [vmem:[%s6584_s25 + $0x38] sm:$0xff]  ;;  %v6617_v19 = vld [vmem:[%s6584_s25 + $0x70] sm:$0xff]  ;;  %v6626_v22 = vld [vmem:[%s6584_s25 + $0x40] sm:$0xff] }
  0x16   : > { %v219_v18 = vpack.c.bf16 %v6611_v17, %v6608_v16  ;;  %v6620_v20 = vld [vmem:[%s6584_s25 + $0x78] sm:$0xff]  ;;  %v6629_v23 = vld [vmem:[%s6584_s25 + $0x48] sm:$0xff]  ;;  %v6635_v25 = vld [vmem:[%s6584_s25 + $0x50] sm:$0xff] }
  0x17   : > { %v223_v21 = vpack.c.bf16 %v6620_v20, %v6617_v19  ;;  %v220_v24 = vpack.c.bf16 %v6629_v23, %v6626_v22  ;;  %v6638_v26 = vld [vmem:[%s6584_s25 + $0x58] sm:$0xff] }
  0x18   : > { %v221_v27 = vpack.c.bf16 %v6638_v26, %v6635_v25 }
  0x19   : > { %282 = vmatpush.bf16.msra.mxu0 %v6109_v3  ;;  %6183 = vmatpush.bf16.msra.mxu2 %v6109_v3 }
  0x1c   : > { %5751 = vmatmul.msk.bf16.vlgmr.msra.gmra.mxu0 %vm250_vm0, %v216_v6  ;;  %5757 = vmatmul.msk.bf16.vlgmr.msra.gmra.mxu2 %vm250_vm0, %v222_v15 }
  0x2c   : > { %5752 = vmatmul.msk.bf16.gmra.mxu0 %vm250_vm0, %v217_v9  ;;  %5758 = vmatmul.msk.bf16.gmra.mxu2 %vm250_vm0, %v223_v21 }
  0x3c   : > { %5753 = vmatmul.msk.bf16.gmra.mxu0 %vm250_vm0, %v218_v12 }
  0x4c   : > { %5754 = vmatmul.msk.bf16.gmra.mxu0 %vm250_vm0, %v219_v18 }
  0x5c   : > { %5755 = vmatmul.msk.bf16.gmra.mxu0 %vm250_vm0, %v220_v24 }
  0x6c   : > { %5756 = vmatmul.msk.bf16.gmra.mxu0 %vm250_vm0, %v221_v27 }
  0x99   : > { %v284_v29 = vpop.f32.mrf.mxu0 }
  0x9a   : > { %v285_v30 = vadd.f32 %v6646_v28, %v284_v29 }
  0x9c   : > { %v6649_v31 = vadd.f32 %v285_v30, %v192_v4 }
  0x9e   : > { %v342_v32 = vsel %vm250_vm0, %v6649_v31, 0.0  ;;  %v390_v33 = vmul.f32 %v6649_v31, %v6649_v31 }
  0x9f   : > { %343 = vadd.xlane.f32.xlu0 %v342_v32 }
  0xa0   : > { %v406_v34 = vsel %vm250_vm0, %v390_v33, 0.0 }
  0xa1   : > { %v286_v35 = vpop.f32.mrf.mxu0  ;;  %407 = vadd.xlane.f32.xlu1 %v406_v34 }
  0xa2   : > { %v287_v36 = vadd.f32 %v6646_v28, %v286_v35 }
  0xa4   : > { %v6657_v37 = vadd.f32 %v287_v36, %v193_v5 }
  0xa6   : > { %v345_v38 = vsel %vm250_vm0, %v6657_v37, 0.0  ;;  %v391_v39 = vmul.f32 %v6657_v37, %v6657_v37 }
  0xa7   : > { %346 = vadd.xlane.f32.xlu0 %v345_v38 }
  0xa8   : > { %v409_v40 = vsel %vm250_vm0, %v391_v39, 0.0 }
  0xa9   : > { %v289_v41 = vpop.f32.mrf.mxu0  ;;  %410 = vadd.xlane.f32.xlu1 %v409_v40 }
  0xaa   : > { %v290_v42 = vadd.f32 %v6646_v28, %v289_v41 }
  0xac   : > { %v6665_v43 = vadd.f32 %v290_v42, %v194_v7 }
  0xae   : > { %v348_v44 = vsel %vm250_vm0, %v6665_v43, 0.0  ;;  %v392_v45 = vmul.f32 %v6665_v43, %v6665_v43 }
  0xaf   : > { %349 = vadd.xlane.f32.xlu2 %v348_v44 }
  0xb0   : > { %v412_v46 = vsel %vm250_vm0, %v392_v45, 0.0 }
  0xb1   : > { %v291_v47 = vpop.f32.mrf.mxu0  ;;  %413 = vadd.xlane.f32.xlu0 %v412_v46 }
  0xb2   : > { %v292_v48 = vadd.f32 %v6646_v28, %v291_v47 }
  0xb4   : > { %v6673_v49 = vadd.f32 %v292_v48, %v195_v8 }
  0xb6   : > { %v351_v50 = vsel %vm250_vm0, %v6673_v49, 0.0  ;;  %v393_v51 = vmul.f32 %v6673_v49, %v6673_v49 }
  0xb7   : > { %352 = vadd.xlane.f32.xlu2 %v351_v50 }
  0xb8   : > { %v415_v52 = vsel %vm250_vm0, %v393_v51, 0.0 }
  0xb9   : > { %v294_v53 = vpop.f32.mrf.mxu0  ;;  %416 = vadd.xlane.f32.xlu1 %v415_v52 }
  0xba   : > { %v295_v54 = vadd.f32 %v6646_v28, %v294_v53 }
  0xbc   : > { %v6681_v55 = vadd.f32 %v295_v54, %v196_v10 }
  0xbe   : > { %v354_v56 = vsel %vm250_vm0, %v6681_v55, 0.0  ;;  %v394_v57 = vmul.f32 %v6681_v55, %v6681_v55 }
  0xbf   : > { %355 = vadd.xlane.f32.xlu2 %v354_v56 }
  0xc0   : > { %v418_v58 = vsel %vm250_vm0, %v394_v57, 0.0 }
  0xc1   : > { %v296_v59 = vpop.f32.mrf.mxu0  ;;  %419 = vadd.xlane.f32.xlu1 %v418_v58 }
  0xc2   : > { %v297_v60 = vadd.f32 %v6646_v28, %v296_v59 }
  0xc4   : > { %v6690_v61 = vadd.f32 %v297_v60, %v6594_v11 }
  0xc6   : > { %v357_v62 = vsel %vm250_vm0, %v6690_v61, 0.0  ;;  %v395_v63 = vmul.f32 %v6690_v61, %v6690_v61 }
  0xc7   : > { %358 = vadd.xlane.f32.xlu0 %v357_v62 }
  0xc8   : > { %v421_v0 = vsel %vm250_vm0, %v395_v63, 0.0 }
  0xc9   : > { %v299_v1 = vpop.f32.mrf.mxu0  ;;  %422 = vadd.xlane.f32.xlu2 %v421_v0 }
  0xca   : > { %v300_v2 = vadd.f32 %v6646_v28, %v299_v1 }
  0xcc   : > { %v6699_v3 = vadd.f32 %v300_v2, %v6608_v16  ;;  %v314_v16 = vpop.f32.mrf.mxu2 }
  0xce   : > { %v360_v4 = vsel %vm250_vm0, %v6699_v3, 0.0  ;;  %v396_v5 = vmul.f32 %v6699_v3, %v6699_v3 }
  0xcf   : > { %361 = vadd.xlane.f32.xlu0 %v360_v4  ;;  %v6116_v4 = vld [vmem:[#allocation2 + $0x38] sm:$0xff] }
  0xd0   : > { %v424_v6 = vsel %vm250_vm0, %v396_v5, 0.0  ;;  %846 = vmatpush.bf16.msra.mxu1 %v6116_v4  ;;  %6184 = vmatpush.bf16.msrb.mxu2 %v6116_v4 }
  0xd1   : > { %v301_v7 = vpop.f32.mrf.mxu0  ;;  %425 = vadd.xlane.f32.xlu2 %v424_v6 }
  0xd2   : > { %v302_v8 = vadd.f32 %v6646_v28, %v301_v7  ;;  %v6115_v7 = vld [vmem:[#allocation2 + $0x30] sm:$0xff] }
  0xd4   : > { %v6708_v9 = vadd.f32 %v302_v8, %v6611_v17  ;;  %v316_v32 = vpop.f32.mrf.mxu2  ;;  %847 = vmatpush.bf16.msra.mxu1 %v6115_v7  ;;  %6185 = vmatpush.bf16.msrb.mxu2 %v6115_v7 }
  0xd5   : > { %v317_v42 = vadd.f32 %v6646_v28, %v316_v32 }
  0xd6   : > { %v363_v10 = vsel %vm250_vm0, %v6708_v9, 0.0  ;;  %v397_v11 = vmul.f32 %v6708_v9, %v6708_v9 }
  0xd7   : > { %364 = vadd.xlane.f32.xlu1 %v363_v10  ;;  %v6745_v47 = vadd.f32 %v317_v42, %v6602_v14 }
  0xd8   : > { %v427_v12 = vsel %vm250_vm0, %v397_v11, 0.0 }
  0xd9   : > { %v304_v15 = vpop.f32.mrf.mxu0  ;;  %428 = vadd.xlane.f32.xlu0 %v427_v12  ;;  %v381_v52 = vsel %vm250_vm0, %v6745_v47, 0.0 }
  0xda   : > { %v305_v18 = vadd.f32 %v6646_v28, %v304_v15  ;;  %v6114_v15 = vld [vmem:[#allocation2 + $0x28] sm:$0xff] }
  0xdb   : > { %848 = vmatpush.bf16.msra.mxu1 %v6114_v15  ;;  %6186 = vmatpush.bf16.msrb.mxu2 %v6114_v15  ;;  %v6810_v15 = vld [vmem:[%s9551_s2 + $0x1] ss:$0 sm:$0xff] }
  0xdc   : > { %v6717_v21 = vadd.f32 %v305_v18, %v6626_v22  ;;  %v319_v40 = vpop.f32.mrf.mxu2 }
  0xdd   : > { %v320_v53 = vadd.f32 %v6646_v28, %v319_v40 }
  0xde   : > { %v366_v17 = vsel %vm250_vm0, %v6717_v21, 0.0  ;;  %v398_v24 = vmul.f32 %v6717_v21, %v6717_v21 }
  0xdf   : > { %367 = vadd.xlane.f32.xlu1 %v366_v17 }
  0xe0   : > { %v430_v27 = vsel %vm250_vm0, %v398_v24, 0.0 }
  0xe1   : > { %v306_v29 = vpop.f32.mrf.mxu0  ;;  %431 = vadd.xlane.f32.xlu0 %v430_v27  ;;  %v6113_v27 = vld [vmem:[#allocation2 + $0x20] sm:$0xff] }
  0xe2   : > { %v307_v30 = vadd.f32 %v6646_v28, %v306_v29  ;;  %849 = vmatpush.bf16.msra.mxu1 %v6113_v27  ;;  %6187 = vmatpush.bf16.msrb.mxu2 %v6113_v27 }
  0xe4   : > { %v6726_v33 = vadd.f32 %v307_v30, %v6629_v23  ;;  %v321_v54 = vpop.f32.mrf.mxu2 }
  0xe5   : > { %v322_v57 = vadd.f32 %v6646_v28, %v321_v54 }
  0xe6   : > { %v369_v22 = vsel %vm250_vm0, %v6726_v33, 0.0  ;;  %v399_v34 = vmul.f32 %v6726_v33, %v6726_v33 }
  0xe7   : > { %370 = vadd.xlane.f32.xlu2 %v369_v22 }
  0xe8   : > { %v433_v35 = vsel %vm250_vm0, %v399_v34, 0.0 }
  0xe9   : > { %v309_v36 = vpop.f32.mrf.mxu0  ;;  %434 = vadd.xlane.f32.xlu1 %v433_v35 }
  0xea   : > { %v310_v38 = vadd.f32 %v6646_v28, %v309_v36 }
  0xec   : > { %v6735_v39 = vadd.f32 %v310_v38, %v6635_v25  ;;  %v315_v25 = vadd.f32 %v6646_v28, %v314_v16 }
  0xee   : > { %v372_v23 = vsel %vm250_vm0, %v6735_v39, 0.0  ;;  %v400_v41 = vmul.f32 %v6735_v39, %v6735_v39  ;;  %v6759_v14 = vadd.f32 %v315_v25, %v6599_v13  ;;  %v6773_v13 = vadd.f32 %v322_v57, %v6620_v20 }
  0xef   : > { %373 = vadd.xlane.f32.xlu2 %v372_v23 }
  0xf0   : > { %v436_v44 = vsel %vm250_vm0, %v400_v41, 0.0  ;;  %v402_v58 = vmul.f32 %v6759_v14, %v6759_v14  ;;  %v378_v59 = vsel %vm250_vm0, %v6759_v14, 0.0  ;;  %v387_v0 = vsel %vm250_vm0, %v6773_v13, 0.0 }
  0xf1   : > { %v311_v45 = vpop.f32.mrf.mxu0  ;;  %437 = vadd.xlane.f32.xlu1 %v436_v44 }
  0xf2   : > { %v312_v46 = vadd.f32 %v6646_v28, %v311_v45  ;;  %v442_v62 = vsel %vm250_vm0, %v402_v58, 0.0  ;;  %v405_v28 = vmul.f32 %v6773_v13, %v6773_v13 }
  0xf4   : > { %v6749_v48 = vadd.f32 %v312_v46, %v6638_v26  ;;  %v6763_v26 = vadd.f32 %v320_v53, %v6617_v19  ;;  %v403_v19 = vmul.f32 %v6745_v47, %v6745_v47  ;;  %v451_v1 = vsel %vm250_vm0, %v405_v28, 0.0 }
  0xf6   : > { %v375_v50 = vsel %vm250_vm0, %v6749_v48, 0.0  ;;  %v401_v51 = vmul.f32 %v6749_v48, %v6749_v48  ;;  %v384_v60 = vsel %vm250_vm0, %v6763_v26, 0.0  ;;  %v445_v63 = vsel %vm250_vm0, %v403_v19, 0.0 }
  0xf7   : > { %376 = vadd.xlane.f32.xlu0 %v375_v50  ;;  %v404_v20 = vmul.f32 %v6763_v26, %v6763_v26 }
  0xf8   : > { %v439_v56 = vsel %vm250_vm0, %v401_v51, 0.0 }
  0xf9   : > { %440 = vadd.xlane.f32.xlu2 %v439_v56  ;;  %382 = vadd.xlane.f32.xlu1 %v381_v52  ;;  %v448_v2 = vsel %vm250_vm0, %v404_v20, 0.0 }
  0xff   : > { %379 = vadd.xlane.f32.xlu0 %v378_v59 }
 0x101   : > { %443 = vadd.xlane.f32.xlu2 %v442_v62  ;;  %385 = vadd.xlane.f32.xlu1 %v384_v60 }
 0x107   : > { %446 = vadd.xlane.f32.xlu0 %v445_v63 }
 0x109   : > { %388 = vadd.xlane.f32.xlu2 %v387_v0  ;;  %452 = vadd.xlane.f32.xlu1 %v451_v1 }
 0x10f   : > { %449 = vadd.xlane.f32.xlu0 %v448_v2 }
 0x112   : > { %v344_v5 = vpop.xlane.xlu0 %343 }
 0x113   : > { %v6787_v6 = vmul.f32 0.015625, %v344_v5 }
 0x114   : > { %v408_v8 = vpop.xlane.xlu1 %407 }
 0x115   : > { %v486_v10 = vmul.f32 %v6787_v6, %v6787_v6  ;;  %v470_v11 = vmul.f32 0.015625, %v408_v8  ;;  %v534_v1 = vsub.f32 %v6649_v31, %v6787_v6 }
 0x117   : > { %v502_v12 = vsub.f32 %v470_v11, %v486_v10 }
 0x119   : > { %v518_v16 = vmax.f32 %v502_v12, 0.0 }
 0x11a   : > { %v347_v18 = vpop.xlane.xlu0 %346 }
 0x11b   : > { %v550_v17 = vadd.f32 1e-05, %v518_v16  ;;  %v6791_v24 = vmul.f32 0.015625, %v347_v18 }
 0x11c   : > { %v411_v29 = vpop.xlane.xlu1 %410 }
 0x11d   : > { %6244 = vrsqrt.f32 %v550_v17  ;;  %v487_v30 = vmul.f32 %v6791_v24, %v6791_v24  ;;  %v471_v32 = vmul.f32 0.015625, %v411_v29  ;;  %vm572_vm2 = vweird.f32 %v550_v17 }
 0x11e   : > { %v535_v18 = vsub.f32 %v6657_v37, %v6791_v24 }
 0x11f   : > { %v503_v22 = vsub.f32 %v471_v32, %v487_v30 }
 0x121   : > { %v519_v34 = vmax.f32 %v503_v22, 0.0 }
 0x122   : > { %v350_v35 = vpop.xlane.xlu2 %349 }
 0x123   : > { %v6245_v36 = vpop.eup %6244  ;;  %v6795_v38 = vmul.f32 0.015625, %v350_v35  ;;  %v551_v23 = vadd.f32 1e-05, %v519_v34  ;;  %v6820_v34 = vld [vmem:[%s9551_s2 + $0x2] ss:$0 sm:$0xff] }
 0x124   : > { %v567_v40 = vmul.f32 %v6245_v36, %v550_v17  ;;  %v414_v41 = vpop.xlane.xlu0 %413  ;;  %vm573_vm1 = vweird.f32 %v6245_v36 }
 0x125   : > { %v488_v42 = vmul.f32 %v6795_v38, %v6795_v38  ;;  %v472_v44 = vmul.f32 0.015625, %v414_v41  ;;  %6246 = vrsqrt.f32 %v551_v23  ;;  %vm574_vm3 = vmor %vm572_vm2, %vm573_vm1  ;;  %vm582_vm5 = vweird.f32 %v551_v23 }
 0x126   : > { %v568_v45 = vmul.f32 %v6245_v36, %v567_v40 }
 0x127   : > { %v504_v46 = vsub.f32 %v472_v44, %v488_v42 }
 0x128   : > { %v569_v25 = vmul.f32 0.5, %v568_v45 }
 0x129   : > { %v520_v50 = vmax.f32 %v504_v46, 0.0 }
 0x12a   : > { %v570_v51 = vsub.f32 1.5, %v569_v25  ;;  %v353_v52 = vpop.xlane.xlu2 %352 }
 0x12b   : > { %v552_v53 = vadd.f32 1e-05, %v520_v50  ;;  %v6799_v54 = vmul.f32 0.015625, %v353_v52  ;;  %v6247_v56 = vpop.eup %6246 }
 0x12c   : > { %v417_v57 = vpop.xlane.xlu1 %416  ;;  %v571_v58 = vmul.f32 %v6245_v36, %v570_v51  ;;  %v577_v59 = vmul.f32 %v6247_v56, %v551_v23  ;;  %vm583_vm4 = vweird.f32 %v6247_v56 }
 0x12d   : > { %6248 = vrsqrt.f32 %v552_v53  ;;  %v489_v60 = vmul.f32 %v6799_v54, %v6799_v54  ;;  %v473_v62 = vmul.f32 0.015625, %v417_v57  ;;  %vm584_vm6 = vmor %vm582_vm5, %vm583_vm4  ;;  %vm592_vm8 = vweird.f32 %v552_v53 }
 0x12e   : > { %v578_v19 = vmul.f32 %v6247_v56, %v577_v59  ;;  %v575_v0 = vsel %vm574_vm3, %v6245_v36, %v571_v58 }
 0x12f   : > { %v505_v28 = vsub.f32 %v473_v62, %v489_v60  ;;  %v726_v12 = vmul.f32 %v575_v0, %v534_v1  ;;  %v536_v60 = vsub.f32 %v6665_v43, %v6795_v38  ;;  %v537_v43 = vsub.f32 %v6673_v49, %v6799_v54 }
 0x130   : > { %v579_v63 = vmul.f32 0.5, %v578_v19 }
 0x131   : > { %v521_v20 = vmax.f32 %v505_v28, 0.0  ;;  %v743_v22 = vmul.f32 %v6810_v15, %v726_v12 }
 0x132   : > { %v356_v2 = vpop.xlane.xlu2 %355  ;;  %v580_v5 = vsub.f32 1.5, %v579_v63 }
 0x133   : > { %v6249_v4 = vpop.eup %6248  ;;  %v6805_v7 = vmul.f32 0.015625, %v356_v2  ;;  %v553_v10 = vadd.f32 1e-05, %v521_v20  ;;  %v6828_v44 = vadd.f32 %v6820_v34, %v743_v22 }
 0x134   : > { %v587_v8 = vmul.f32 %v6249_v4, %v552_v53  ;;  %v420_v11 = vpop.xlane.xlu1 %419  ;;  %v581_v16 = vmul.f32 %v6247_v56, %v580_v5  ;;  %vm593_vm7 = vweird.f32 %v6249_v4 }
 0x135   : > { %v490_v31 = vmul.f32 %v6805_v7, %v6805_v7  ;;  %v474_v6 = vmul.f32 0.015625, %v420_v11  ;;  %6250 = vrsqrt.f32 %v553_v10  ;;  %vm594_vm9 = vmor %vm592_vm8, %vm593_vm7  ;;  %vm602_vm11 = vweird.f32 %v553_v10 }
 0x136   : > { %v588_v17 = vmul.f32 %v6249_v4, %v587_v8  ;;  %v585_v29 = vsel %vm584_vm6, %v6247_v56, %v581_v16 }
 0x137   : > { %v506_v27 = vsub.f32 %v474_v6, %v490_v31  ;;  %v727_v32 = vmul.f32 %v585_v29, %v535_v18 }
 0x138   : > { %v589_v30 = vmul.f32 0.5, %v588_v17 }
 0x139   : > { %v522_v35 = vmax.f32 %v506_v27, 0.0  ;;  %v744_v23 = vmul.f32 %v6810_v15, %v727_v32 }
 0x13a   : > { %v590_v36 = vsub.f32 1.5, %v589_v30  ;;  %v359_v40 = vpop.xlane.xlu0 %358 }
 0x13b   : > { %v6823_v37 = vadd.f32 1e-05, %v522_v35  ;;  %v6825_v24 = vmul.f32 0.015625, %v359_v40  ;;  %v6251_v41 = vpop.eup %6250  ;;  %v6831_v45 = vadd.f32 %v6820_v34, %v744_v23 }
 0x13c   : > { %v423_v42 = vpop.xlane.xlu2 %422  ;;  %v591_v46 = vmul.f32 %v6249_v4, %v590_v36  ;;  %v597_v25 = vmul.f32 %v6251_v41, %v553_v10  ;;  %vm603_vm10 = vweird.f32 %v6251_v41 }
 0x13d   : > { %6252 = vrsqrt.f32 %v6823_v37  ;;  %v491_v50 = vmul.f32 %v6825_v24, %v6825_v24  ;;  %v475_v51 = vmul.f32 0.015625, %v423_v42  ;;  %v784_v52 = vpack.c.bf16 %v6831_v45, %v6828_v44  ;;  %vm604_vm12 = vmor %vm602_vm11, %vm603_vm10 }
 0x13e   : > { %v598_v56 = vmul.f32 %v6251_v41, %v597_v25  ;;  %v595_v59 = vsel %vm594_vm9, %v6249_v4, %v591_v46  ;;  %vm612_vm14 = vweird.f32 %v6823_v37 }
 0x13f   : > { %v507_v57 = vsub.f32 %v475_v51, %v491_v50  ;;  %5775 = vmatmul.msk.bf16.vlgmr.msra.gmra.mxu1 %vm250_vm0, %v784_v52  ;;  %v728_v2 = vmul.f32 %v595_v59, %v536_v60  ;;  %v538_v51 = vsub.f32 %v6681_v55, %v6805_v7  ;;  %v539_v55 = vsub.f32 %v6690_v61, %v6825_v24 }
 0x140   : > { %v599_v58 = vmul.f32 0.5, %v598_v56 }
 0x141   : > { %v523_v62 = vmax.f32 %v507_v57, 0.0  ;;  %v745_v6 = vmul.f32 %v6810_v15, %v728_v2 }
 0x142   : > { %v362_v19 = vpop.xlane.xlu0 %361  ;;  %v600_v63 = vsub.f32 1.5, %v599_v58 }
 0x143   : > { %v6253_v28 = vpop.eup %6252  ;;  %v6841_v0 = vmul.f32 0.015625, %v362_v19  ;;  %v555_v53 = vadd.f32 1e-05, %v523_v62  ;;  %v6855_v54 = vadd.f32 %v6820_v34, %v745_v6 }
 0x144   : > { %v607_v1 = vmul.f32 %v6253_v28, %v6823_v37  ;;  %v426_v20 = vpop.xlane.xlu2 %425  ;;  %v601_v5 = vmul.f32 %v6251_v41, %v600_v63  ;;  %vm613_vm13 = vweird.f32 %v6253_v28 }
 0x145   : > { %v492_v4 = vmul.f32 %v6841_v0, %v6841_v0  ;;  %v476_v8 = vmul.f32 0.015625, %v426_v20  ;;  %6254 = vrsqrt.f32 %v555_v53  ;;  %vm614_vm15 = vmor %vm612_vm14, %vm613_vm13  ;;  %vm622_vm2 = vweird.f32 %v555_v53 }
 0x146   : > { %v608_v38 = vmul.f32 %v6253_v28, %v607_v1  ;;  %v605_v12 = vsel %vm604_vm12, %v6251_v41, %v601_v5 }
 0x147   : > { %v508_v11 = vsub.f32 %v476_v8, %v492_v4  ;;  %v729_v31 = vmul.f32 %v605_v12, %v537_v43 }
 0x148   : > { %v609_v16 = vmul.f32 0.5, %v608_v38 }
 0x149   : > { %v524_v18 = vmax.f32 %v508_v11, 0.0  ;;  %v746_v10 = vmul.f32 %v6810_v15, %v729_v31 }
 0x14a   : > { %v610_v17 = vsub.f32 1.5, %v609_v16  ;;  %v365_v27 = vpop.xlane.xlu1 %364 }
 0x14b   : > { %v6850_v29 = vadd.f32 1e-05, %v524_v18  ;;  %v6852_v30 = vmul.f32 0.015625, %v365_v27  ;;  %v6255_v32 = vpop.eup %6254  ;;  %v6858_v22 = vadd.f32 %v6820_v34, %v746_v10 }
 0x14c   : > { %v429_v49 = vpop.xlane.xlu0 %428  ;;  %v611_v35 = vmul.f32 %v6253_v28, %v610_v17  ;;  %v617_v36 = vmul.f32 %v6255_v32, %v555_v53  ;;  %vm623_vm1 = vweird.f32 %v6255_v32 }
 0x14d   : > { %6256 = vrsqrt.f32 %v6850_v29  ;;  %v493_v40 = vmul.f32 %v6852_v30, %v6852_v30  ;;  %v477_v23 = vmul.f32 0.015625, %v429_v49  ;;  %v785_v41 = vpack.c.bf16 %v6858_v22, %v6855_v54  ;;  %vm624_vm3 = vmor %vm622_vm2, %vm623_vm1 }
 0x14e   : > { %v618_v42 = vmul.f32 %v6255_v32, %v617_v36  ;;  %v615_v50 = vsel %vm614_vm15, %v6253_v28, %v611_v35  ;;  %vm632_vm5 = vweird.f32 %v6850_v29 }
 0x14f   : > { %v509_v46 = vsub.f32 %v477_v23, %v493_v40  ;;  %5776 = vmatmul.msk.bf16.gmra.mxu1 %vm250_vm0, %v785_v41  ;;  %v730_v19 = vmul.f32 %v615_v50, %v538_v51 }
 0x150   : > { %v619_v25 = vmul.f32 0.5, %v618_v42 }
 0x151   : > { %v525_v52 = vmax.f32 %v509_v46, 0.0  ;;  %v747_v8 = vmul.f32 %v6810_v15, %v730_v19 }
 0x152   : > { %v368_v56 = vpop.xlane.xlu1 %367  ;;  %v620_v58 = vsub.f32 1.5, %v619_v25  ;;  %v540_v25 = vsub.f32 %v6699_v3, %v6841_v0 }
 0x153   : > { %v6257_v57 = vpop.eup %6256  ;;  %v6869_v59 = vmul.f32 0.015625, %v368_v56  ;;  %v557_v37 = vadd.f32 1e-05, %v525_v52  ;;  %v6883_v24 = vadd.f32 %v6820_v34, %v747_v8 }
 0x154   : > { %v627_v60 = vmul.f32 %v6257_v57, %v6850_v29  ;;  %v432_v62 = vpop.xlane.xlu0 %431  ;;  %v621_v63 = vmul.f32 %v6255_v32, %v620_v58  ;;  %vm633_vm4 = vweird.f32 %v6257_v57 }
 0x155   : > { %v494_v28 = vmul.f32 %v6869_v59, %v6869_v59  ;;  %v478_v1 = vmul.f32 0.015625, %v432_v62  ;;  %6258 = vrsqrt.f32 %v557_v37  ;;  %vm6895_vm6 = vmor %vm632_vm5, %vm633_vm4  ;;  %vm642_vm8 = vweird.f32 %v557_v37 }
 0x156   : > { %v628_v7 = vmul.f32 %v6257_v57, %v627_v60  ;;  %v625_v2 = vsel %vm624_vm3, %v6255_v32, %v621_v63 }
 0x157   : > { %v510_v20 = vsub.f32 %v478_v1, %v494_v28  ;;  %v731_v4 = vmul.f32 %v625_v2, %v539_v55 }
 0x158   : > { %v629_v5 = vmul.f32 0.5, %v628_v7 }
 0x159   : > { %v526_v43 = vmax.f32 %v510_v20, 0.0  ;;  %v748_v53 = vmul.f32 %v6810_v15, %v731_v4 }
 0x15a   : > { %v630_v38 = vsub.f32 1.5, %v629_v5  ;;  %v371_v11 = vpop.xlane.xlu2 %370 }
 0x15b   : > { %v6878_v12 = vadd.f32 1e-05, %v526_v43  ;;  %v6880_v16 = vmul.f32 0.015625, %v371_v11  ;;  %v6259_v31 = vpop.eup %6258  ;;  %v6886_v6 = vadd.f32 %v6820_v34, %v748_v53 }
 0x15c   : > { %v435_v61 = vpop.xlane.xlu1 %434  ;;  %v637_v18 = vmul.f32 %v6259_v31, %v557_v37  ;;  %v631_v17 = vmul.f32 %v6257_v57, %v630_v38  ;;  %vm643_vm7 = vweird.f32 %v6259_v31 }
 0x15d   : > { %6260 = vrsqrt.f32 %v6878_v12  ;;  %v495_v27 = vmul.f32 %v6880_v16, %v6880_v16  ;;  %v479_v10 = vmul.f32 0.015625, %v435_v61  ;;  %v786_v32 = vpack.c.bf16 %v6886_v6, %v6883_v24  ;;  %vm644_vm9 = vmor %vm642_vm8, %vm643_vm7 }
 0x15e   : > { %v638_v49 = vmul.f32 %v6259_v31, %v637_v18  ;;  %v635_v42 = vsel %vm6895_vm6, %v6257_v57, %v631_v17  ;;  %v541_v57 = vsub.f32 %v6708_v9, %v6852_v30  ;;  %vm652_vm11 = vweird.f32 %v6878_v12 }
 0x15f   : > { %v511_v35 = vsub.f32 %v479_v10, %v495_v27  ;;  %5777 = vmatmul.msk.bf16.gmra.mxu1 %vm250_vm0, %v786_v32  ;;  %v732_v19 = vmul.f32 %v635_v42, %v540_v25 }
 0x160   : > { %v639_v40 = vmul.f32 0.5, %v638_v49 }
 0x161   : > { %v527_v23 = vmax.f32 %v511_v35, 0.0  ;;  %v749_v55 = vmul.f32 %v6810_v15, %v732_v19  ;;  %v542_v35 = vsub.f32 %v6717_v21, %v6869_v59 }
 0x162   : > { %v374_v41 = vpop.xlane.xlu2 %373  ;;  %v640_v50 = vsub.f32 1.5, %v639_v40 }
 0x163   : > { %v6261_v46 = vpop.eup %6260  ;;  %v6903_v29 = vmul.f32 0.015625, %v374_v41  ;;  %v559_v52 = vadd.f32 1e-05, %v527_v23  ;;  %v6921_v53 = vadd.f32 %v6820_v34, %v749_v55 }
 0x164   : > { %v647_v51 = vmul.f32 %v6261_v46, %v6878_v12  ;;  %v438_v56 = vpop.xlane.xlu1 %437  ;;  %v641_v58 = vmul.f32 %v6259_v31, %v640_v50  ;;  %vm653_vm10 = vweird.f32 %v6261_v46 }
 0x165   : > { %v496_v60 = vmul.f32 %v6903_v29, %v6903_v29  ;;  %v480_v62 = vmul.f32 0.015625, %v438_v56  ;;  %6262 = vrsqrt.f32 %v559_v52  ;;  %vm6928_vm12 = vmor %vm652_vm11, %vm653_vm10  ;;  %vm662_vm14 = vweird.f32 %v559_v52 }
 0x166   : > { %v648_v3 = vmul.f32 %v6261_v46, %v647_v51  ;;  %v645_v63 = vsel %vm644_vm9, %v6259_v31, %v641_v58  ;;  %v543_v58 = vsub.f32 %v6726_v33, %v6880_v16 }
 0x167   : > { %v512_v0 = vsub.f32 %v480_v62, %v496_v60  ;;  %v733_v37 = vmul.f32 %v645_v63, %v541_v57 }
 0x168   : > { %v649_v28 = vmul.f32 0.5, %v648_v3 }
 0x169   : > { %v528_v1 = vmax.f32 %v512_v0, 0.0  ;;  %v750_v2 = vmul.f32 %v6810_v15, %v733_v37 }
 0x16a   : > { %v650_v7 = vsub.f32 1.5, %v649_v28  ;;  %v377_v20 = vpop.xlane.xlu0 %376 }
 0x16b   : > { %v6912_v5 = vadd.f32 1e-05, %v528_v1  ;;  %v6914_v4 = vmul.f32 0.015625, %v377_v20  ;;  %v6263_v8 = vpop.eup %6262  ;;  %v6917_v43 = vadd.f32 %v6820_v34, %v750_v2 }
 0x16c   : > { %v441_v9 = vpop.xlane.xlu2 %440  ;;  %v383_v30 = vpop.xlane.xlu1 %382  ;;  %v651_v38 = vmul.f32 %v6261_v46, %v650_v7  ;;  %v657_v11 = vmul.f32 %v6263_v8, %v559_v52  ;;  %vm663_vm13 = vweird.f32 %v6263_v8 }
 0x16d   : > { %6264 = vrsqrt.f32 %v6912_v5  ;;  %v497_v31 = vmul.f32 %v6914_v4, %v6914_v4  ;;  %v481_v61 = vmul.f32 0.015625, %v441_v9  ;;  %v787_v17 = vpack.c.bf16 %v6917_v43, %v6921_v53  ;;  %vm664_vm15 = vmor %vm662_vm14, %vm663_vm13 }
 0x16e   : > { %v658_v18 = vmul.f32 %v6263_v8, %v657_v11  ;;  %v655_v49 = vsel %vm6928_vm12, %v6261_v46, %v651_v38  ;;  %v6952_v28 = vmul.f32 0.015625, %v383_v30  ;;  %vm672_vm2 = vweird.f32 %v6912_v5 }
 0x16f   : > { %v513_v10 = vsub.f32 %v481_v61, %v497_v31  ;;  %5778 = vmatmul.msk.bf16.gmra.mxu1 %vm250_vm0, %v787_v17  ;;  %v734_v56 = vmul.f32 %v655_v49, %v542_v35  ;;  %v6124_v17 = vld [vmem:[#allocation2 + $0x78] sm:$0xff] }
 0x170   : > { %v659_v32 = vmul.f32 0.5, %v658_v18  ;;  %v499_v7 = vmul.f32 %v6952_v28, %v6952_v28  ;;  %981 = vmatpush.bf16.msra.mxu2 %v6124_v17 }
 0x171   : > { %v529_v36 = vmax.f32 %v513_v10, 0.0  ;;  %v751_v0 = vmul.f32 %v6810_v15, %v734_v56 }
 0x172   : > { %v380_v12 = vpop.xlane.xlu0 %379  ;;  %v660_v23 = vsub.f32 1.5, %v659_v32 }
 0x173   : > { %v6937_v40 = vpop.eup %6264  ;;  %v6939_v41 = vmul.f32 0.015625, %v380_v12  ;;  %v6943_v25 = vadd.f32 1e-05, %v529_v36 }
 0x174   : > { %v667_v42 = vmul.f32 %v6937_v40, %v6912_v5  ;;  %v444_v50 = vpop.xlane.xlu2 %443  ;;  %v386_v51 = vpop.xlane.xlu1 %385  ;;  %v661_v46 = vmul.f32 %v6263_v8, %v660_v23  ;;  %vm673_vm1 = vweird.f32 %v6937_v40  ;;  %v544_v23 = vsub.f32 %v6735_v39, %v6903_v29 }
 0x175   : > { %v498_v21 = vmul.f32 %v6939_v41, %v6939_v41  ;;  %v482_v59 = vmul.f32 0.015625, %v444_v50  ;;  %6266 = vrsqrt.f32 %v6943_v25  ;;  %v6974_v10 = vmul.f32 0.015625, %v386_v51  ;;  %vm6976_vm3 = vmor %vm672_vm2, %vm673_vm1 }
 0x176   : > { %v668_v60 = vmul.f32 %v6937_v40, %v667_v42  ;;  %v665_v19 = vsel %vm664_vm15, %v6263_v8, %v661_v46  ;;  %v6960_v8 = vadd.f32 %v6820_v34, %v751_v0  ;;  %vm682_vm5 = vweird.f32 %v6943_v25 }
 0x177   : > { %v514_v62 = vsub.f32 %v482_v59, %v498_v21  ;;  %v735_v3 = vmul.f32 %v665_v19, %v543_v58  ;;  %v500_v12 = vmul.f32 %v6974_v10, %v6974_v10  ;;  %v546_v17 = vsub.f32 %v6759_v14, %v6939_v41  ;;  %v6121_v41 = vld [vmem:[#allocation2 + $0x60] sm:$0xff] }
 0x178   : > { %v669_v57 = vmul.f32 0.5, %v668_v60 }
 0x179   : > { %v530_v63 = vmax.f32 %v514_v62, 0.0  ;;  %v752_v1 = vmul.f32 %v6810_v15, %v735_v3 }
 0x17a   : > { %v670_v52 = vsub.f32 1.5, %v669_v57  ;;  %v447_v37 = vpop.xlane.xlu0 %446 }
 0x17b   : > { %v6955_v55 = vadd.f32 1e-05, %v530_v63  ;;  %v483_v33 = vmul.f32 0.015625, %v447_v37  ;;  %v6267_v16 = vpop.eup %6266  ;;  %v6963_v9 = vadd.f32 %v6820_v34, %v752_v1 }
 0x17c   : > { %v389_v20 = vpop.xlane.xlu2 %388  ;;  %v453_v2 = vpop.xlane.xlu1 %452  ;;  %v671_v30 = vmul.f32 %v6937_v40, %v670_v52  ;;  %v677_v38 = vmul.f32 %v6267_v16, %v6943_v25  ;;  %vm683_vm4 = vweird.f32 %v6267_v16 }
 0x17d   : > { %6268 = vrsqrt.f32 %v6955_v55  ;;  %v515_v11 = vsub.f32 %v483_v33, %v499_v7  ;;  %v6969_v31 = vmul.f32 0.015625, %v389_v20  ;;  %v485_v61 = vmul.f32 0.015625, %v453_v2  ;;  %vm684_vm6 = vmor %vm682_vm5, %vm683_vm4 }
 0x17e   : > { %v788_v18 = vpack.c.bf16 %v6963_v9, %v6960_v8  ;;  %v678_v27 = vmul.f32 %v6267_v16, %v677_v38  ;;  %v675_v5 = vsel %vm6976_vm3, %v6937_v40, %v671_v30  ;;  %v545_v40 = vsub.f32 %v6749_v48, %v6914_v4  ;;  %v6123_v38 = vld [vmem:[#allocation2 + $0x70] sm:$0xff] }
 0x17f   : > { %v531_v49 = vmax.f32 %v515_v11, 0.0  ;;  %v501_v35 = vmul.f32 %v6969_v31, %v6969_v31  ;;  %v736_v58 = vmul.f32 %v675_v5, %v544_v23  ;;  %vm692_vm8 = vweird.f32 %v6955_v55  ;;  %982 = vmatpush.bf16.msra.mxu2 %v6123_v38 }
 0x180   : > { %v679_v36 = vmul.f32 0.5, %v678_v27  ;;  %5779 = vmatmul.msk.bf16.gmra.mxu1 %vm250_vm0, %v788_v18  ;;  %v547_v23 = vsub.f32 %v6745_v47, %v6952_v28 }
 0x181   : > { %v563_v42 = vadd.f32 1e-05, %v531_v49  ;;  %v517_v50 = vsub.f32 %v485_v61, %v501_v35  ;;  %v753_v52 = vmul.f32 %v6810_v15, %v736_v58 }
 0x182   : > { %v450_v51 = vpop.xlane.xlu0 %449  ;;  %v680_v46 = vsub.f32 1.5, %v679_v36 }
 0x183   : > { %v6269_v56 = vpop.eup %6268  ;;  %v484_v21 = vmul.f32 0.015625, %v450_v51  ;;  %6270 = vrsqrt.f32 %v563_v42  ;;  %v533_v62 = vmax.f32 %v517_v50, 0.0  ;;  %v7000_v4 = vadd.f32 %v6820_v34, %v753_v52  ;;  %v6119_v52 = vld [vmem:[#allocation2 + $0x50] sm:$0xff] }
 0x184   : > { %v687_v59 = vmul.f32 %v6269_v56, %v6955_v55  ;;  %v681_v60 = vmul.f32 %v6267_v16, %v680_v46  ;;  %vm693_vm7 = vweird.f32 %v6269_v56  ;;  %v6122_v55 = vld [vmem:[#allocation2 + $0x68] sm:$0xff]  ;;  %vm702_vm11 = vweird.f32 %v563_v42 }
 0x185   : > { %v516_v19 = vsub.f32 %v484_v21, %v500_v12  ;;  %v6994_v29 = vadd.f32 1e-05, %v533_v62  ;;  %vm7006_vm9 = vmor %vm692_vm8, %vm693_vm7  ;;  %983 = vmatpush.bf16.msra.mxu2 %v6122_v55 }
 0x186   : > { %v688_v39 = vmul.f32 %v6269_v56, %v687_v59  ;;  %v685_v3 = vsel %vm684_vm6, %v6267_v16, %v681_v60 }
 0x187   : > { %v532_v57 = vmax.f32 %v516_v19, 0.0  ;;  %v737_v63 = vmul.f32 %v685_v3, %v545_v40  ;;  %6272 = vrsqrt.f32 %v6994_v29  ;;  %v6120_v40 = vld [vmem:[#allocation2 + $0x58] sm:$0xff]  ;;  %vm722_vm2 = vweird.f32 %v6994_v29 }
 0x188   : > { %v689_v0 = vmul.f32 0.5, %v688_v39 }
 0x189   : > { %v564_v37 = vadd.f32 1e-05, %v532_v57  ;;  %v6271_v1 = vpop.eup %6270  ;;  %v754_v33 = vmul.f32 %v6810_v15, %v737_v63  ;;  %984 = vmatpush.bf16.msra.mxu2 %v6121_v41  ;;  %v548_v57 = vsub.f32 %v6763_v26, %v6974_v10  ;;  %v6117_v10 = vld [vmem:[#allocation2 + $0x40] sm:$0xff] }
 0x18a   : > { %v690_v25 = vsub.f32 1.5, %v689_v0  ;;  %v697_v7 = vmul.f32 %v6271_v1, %v563_v42  ;;  %vm703_vm10 = vweird.f32 %v6271_v1  ;;  %v549_v0 = vsub.f32 %v6773_v13, %v6969_v31 }
 0x18b   : > { %6274 = vrsqrt.f32 %v564_v37  ;;  %v7003_v16 = vadd.f32 %v6820_v34, %v754_v33  ;;  %vm704_vm12 = vmor %vm702_vm11, %vm703_vm10  ;;  %vm712_vm15 = vweird.f32 %v564_v37 }
 0x18c   : > { %v691_v48 = vmul.f32 %v6269_v56, %v690_v25  ;;  %v698_v20 = vmul.f32 %v6271_v1, %v697_v7  ;;  %v6118_v25 = vld [vmem:[#allocation2 + $0x48] sm:$0xff]  ;;  %v6216_v7 = vld [vmem:[%s9551_s2 + $0x5] ss:$0 sm:$0xff] }
 0x18d   : > { %v789_v30 = vpack.c.bf16 %v7003_v16, %v7000_v4  ;;  %v6273_v11 = vpop.eup %6272  ;;  %985 = vmatpush.bf16.msra.mxu2 %v6120_v40 }
 0x18e   : > { %v695_v61 = vsel %vm7006_vm9, %v6269_v56, %v691_v48  ;;  %v699_v18 = vmul.f32 0.5, %v698_v20  ;;  %v717_v27 = vmul.f32 %v6273_v11, %v6994_v29  ;;  %vm723_vm14 = vweird.f32 %v6273_v11 }
 0x18f   : > { %v738_v12 = vmul.f32 %v695_v61, %v546_v17  ;;  %vm724_vm3 = vmor %vm722_vm2, %vm723_vm14 }
 0x190   : > { %v700_v49 = vsub.f32 1.5, %v699_v18  ;;  %5780 = vmatmul.msk.bf16.gmra.mxu1 %vm250_vm0, %v789_v30  ;;  %v718_v35 = vmul.f32 %v6273_v11, %v717_v27 }
 0x191   : > { %v6275_v32 = vpop.eup %6274  ;;  %v755_v21 = vmul.f32 %v6810_v15, %v738_v12  ;;  %986 = vmatpush.bf16.msra.mxu2 %v6119_v52 }
 0x192   : > { %v707_v36 = vmul.f32 %v6275_v32, %v564_v37  ;;  %v701_v5 = vmul.f32 %v6271_v1, %v700_v49  ;;  %v719_v50 = vmul.f32 0.5, %v718_v35  ;;  %vm713_vm13 = vweird.f32 %v6275_v32 }
 0x193   : > { %v7023_v62 = vadd.f32 %v6820_v34, %v755_v21  ;;  %vm714_vm1 = vmor %vm712_vm15, %vm713_vm13 }
 0x194   : > { %v708_v14 = vmul.f32 %v6275_v32, %v707_v36  ;;  %v705_v51 = vsel %vm704_vm12, %v6271_v1, %v701_v5  ;;  %v720_v59 = vsub.f32 1.5, %v719_v50 }
 0x195   : > { %v739_v46 = vmul.f32 %v705_v51, %v547_v23  ;;  %987 = vmatpush.bf16.msra.mxu2 %v6118_v25 }
 0x196   : > { %v709_v56 = vmul.f32 0.5, %v708_v14  ;;  %v721_v28 = vmul.f32 %v6273_v11, %v720_v59 }
 0x197   : > { %v756_v60 = vmul.f32 %v6810_v15, %v739_v46 }
 0x198   : > { %v710_v58 = vsub.f32 1.5, %v709_v56  ;;  %v725_v3 = vsel %vm724_vm3, %v6273_v11, %v721_v28 }
 0x199   : > { %v7026_v47 = vadd.f32 %v6820_v34, %v756_v60  ;;  %v741_v37 = vmul.f32 %v725_v3, %v549_v0  ;;  %988 = vmatpush.bf16.msra.mxu2 %v6117_v10 }
 0x19a   : > { %v711_v42 = vmul.f32 %v6275_v32, %v710_v58 }
 0x19b   : > { %v790_v19 = vpack.c.bf16 %v7026_v47, %v7023_v62  ;;  %v758_v29 = vmul.f32 %v6810_v15, %v741_v37 }
 0x19c   : > { %v715_v39 = vsel %vm714_vm1, %v6275_v32, %v711_v42 }
 0x19d   : > { %5781 = vmatmul.msk.bf16.vlgmr.msrb.gmra.mxu2 %vm250_vm0, %v790_v19  ;;  %v740_v63 = vmul.f32 %v715_v39, %v548_v57  ;;  %v7042_v33 = vadd.f32 %v6820_v34, %v758_v29 }
 0x19f   : > { %v757_v1 = vmul.f32 %v6810_v15, %v740_v63 }
 0x1a1   : > { %v7039_v26 = vadd.f32 %v6820_v34, %v757_v1 }
 0x1a3   : > { %v791_v13 = vpack.c.bf16 %v7042_v33, %v7039_v26 }
 0x1ad   : > { %5782 = vmatmul.msk.bf16.gmra.mxu2 %vm250_vm0, %v791_v13 }
 0x1bc   : > { %v851_v31 = vpop.f32.mrf.mxu1 }
 0x1bd   : > { %v852_v15 = vadd.f32 %v6216_v7, %v851_v31 }
 0x1bf   : > { %v891_v2 = vmax.f32 %v852_v15, 0.0 }
 0x1c4   : > { %v853_v48 = vpop.f32.mrf.mxu1 }
 0x1c5   : > { %v854_v20 = vadd.f32 %v6216_v7, %v853_v48 }
 0x1c7   : > { %v892_v30 = vmax.f32 %v854_v20, 0.0 }
 0x1c9   : > { %v923_v38 = vpack.c.bf16 %v892_v30, %v891_v2 }
 0x1cb   : > { %989 = vmatmul.bf16.vlgmr.msra.gmra.mxu2 %v923_v38 }
 0x1cc   : > { %v856_v34 = vpop.f32.mrf.mxu1 }
 0x1cd   : > { %v857_v11 = vadd.f32 %v6216_v7, %v856_v34 }
 0x1cf   : > { %v893_v17 = vmax.f32 %v857_v11, 0.0 }
 0x1d4   : > { %v858_v61 = vpop.f32.mrf.mxu1 }
 0x1d5   : > { %v859_v18 = vadd.f32 %v6216_v7, %v858_v61  ;;  %v7053_v61 = vld [vmem:[%s9551_s2 + $0x6] ss:$0 sm:$0xff] }
 0x1d7   : > { %v894_v27 = vmax.f32 %v859_v18, 0.0 }
 0x1d9   : > { %v924_v55 = vpack.c.bf16 %v894_v27, %v893_v17 }
 0x1db   : > { %994 = vmatmul.bf16.gmra.mxu2 %v924_v55 }
 0x1dc   : > { %v861_v32 = vpop.f32.mrf.mxu1 }
 0x1dd   : > { %v862_v49 = vadd.f32 %v6216_v7, %v861_v32 }
 0x1df   : > { %v895_v12 = vmax.f32 %v862_v49, 0.0 }
 0x1e4   : > { %v863_v35 = vpop.f32.mrf.mxu1 }
 0x1e5   : > { %v864_v36 = vadd.f32 %v6216_v7, %v863_v35 }
 0x1e7   : > { %v896_v5 = vmax.f32 %v864_v36, 0.0 }
 0x1e9   : > { %v925_v23 = vpack.c.bf16 %v896_v5, %v895_v12  ;;  %v6128_v12 = vld [vmem:[#allocation2 + $0x98] sm:$0xff] }
 0x1ea   : > { %1552 = vmatpush.bf16.msrb.mxu2 %v6128_v12  ;;  %6188 = vmatpush.bf16.msra.mxu3 %v6128_v12 }
 0x1eb   : > { %999 = vmatmul.bf16.gmra.mxu2 %v925_v23 }
 0x1ec   : > { %v866_v50 = vpop.f32.mrf.mxu1 }
 0x1ed   : > { %v867_v14 = vadd.f32 %v6216_v7, %v866_v50 }
 0x1ef   : > { %v897_v56 = vmax.f32 %v867_v14, 0.0 }
 0x1f4   : > { %v868_v41 = vpop.f32.mrf.mxu1 }
 0x1f5   : > { %v869_v51 = vadd.f32 %v6216_v7, %v868_v41 }
 0x1f7   : > { %v898_v46 = vmax.f32 %v869_v51, 0.0 }
 0x1f9   : > { %v926_v21 = vpack.c.bf16 %v898_v46, %v897_v56 }
 0x1fb   : > { %1004 = vmatmul.bf16.gmra.mxu2 %v926_v21 }
 0x1fd   : > { %v871_v59 = vpop.f32.mrf.mxu1 }
 0x1fe   : > { %v872_v58 = vadd.f32 %v6216_v7, %v871_v59 }
 0x200   : > { %v899_v28 = vmax.f32 %v872_v58, 0.0 }
 0x205   : > { %v873_v60 = vpop.f32.mrf.mxu1 }
 0x206   : > { %v874_v42 = vadd.f32 %v6216_v7, %v873_v60 }
 0x208   : > { %v900_v19 = vmax.f32 %v874_v42, 0.0 }
 0x20a   : > { %v927_v40 = vpack.c.bf16 %v900_v19, %v899_v28 }
 0x20c   : > { %1009 = vmatmul.bf16.gmra.mxu2 %v927_v40 }
 0x20d   : > { %v876_v39 = vpop.f32.mrf.mxu1 }
 0x20e   : > { %v877_v57 = vadd.f32 %v6216_v7, %v876_v39 }
 0x210   : > { %v901_v63 = vmax.f32 %v877_v57, 0.0 }
 0x215   : > { %v878_v3 = vpop.f32.mrf.mxu1 }
 0x216   : > { %v879_v0 = vadd.f32 %v6216_v7, %v878_v3 }
 0x218   : > { %v902_v52 = vmax.f32 %v879_v0, 0.0 }
 0x21a   : > { %v928_v37 = vpack.c.bf16 %v902_v52, %v901_v63  ;;  %v6127_v63 = vld [vmem:[#allocation2 + $0x90] sm:$0xff] }
 0x21b   : > { %1553 = vmatpush.bf16.msrb.mxu2 %v6127_v63  ;;  %6189 = vmatpush.bf16.msra.mxu3 %v6127_v63 }
 0x21c   : > { %1014 = vmatmul.bf16.gmra.mxu2 %v928_v37 }
 0x220   : > { %v881_v1 = vpop.f32.mrf.mxu2 }
 0x221   : > { %v882_v25 = vadd.f32 %v6216_v7, %v881_v1 }
 0x223   : > { %v903_v13 = vmax.f32 %v882_v25, 0.0 }
 0x228   : > { %v883_v29 = vpop.f32.mrf.mxu2 }
 0x229   : > { %v884_v10 = vadd.f32 %v6216_v7, %v883_v29 }
 0x22b   : > { %v904_v31 = vmax.f32 %v884_v10, 0.0 }
 0x22d   : > { %v929_v15 = vpack.c.bf16 %v904_v31, %v903_v13 }
 0x22f   : > { %1019 = vmatmul.bf16.gmra.mxu2 %v929_v15 }
 0x230   : > { %v886_v48 = vpop.f32.mrf.mxu2 }
 0x231   : > { %v887_v20 = vadd.f32 %v6216_v7, %v886_v48 }
 0x233   : > { %v905_v38 = vmax.f32 %v887_v20, 0.0 }
 0x238   : > { %v888_v2 = vpop.f32.mrf.mxu2 }
 0x239   : > { %v889_v30 = vadd.f32 %v6216_v7, %v888_v2 }
 0x23b   : > { %v906_v34 = vmax.f32 %v889_v30, 0.0 }
 0x23d   : > { %v930_v11 = vpack.c.bf16 %v906_v34, %v905_v38 }
 0x23f   : > { %1024 = vmatmul.bf16.gmra.mxu2 %v930_v11 }
 0x24e   : > { %v990_v18 = vpop.f32.mrf.mxu2 }
 0x24f   : > { %v991_v17 = vadd.f32 %v7053_v61, %v990_v18  ;;  %v6126_v18 = vld [vmem:[#allocation2 + $0x88] sm:$0xff] }
 0x250   : > { %1554 = vmatpush.bf16.msrb.mxu2 %v6126_v18  ;;  %6190 = vmatpush.bf16.msra.mxu3 %v6126_v18  ;;  %v6125_v18 = vld [vmem:[#allocation2 + $0x80] sm:$0xff] }
 0x251   : > { %v7057_v27 = vadd.f32 %v991_v17, %v6828_v44 }
 0x253   : > { %v1048_v55 = vsel %vm250_vm0, %v7057_v27, 0.0  ;;  %v1096_v7 = vmul.f32 %v7057_v27, %v7057_v27 }
 0x254   : > { %1049 = vadd.xlane.f32.xlu2 %v1048_v55  ;;  %1555 = vmatpush.bf16.msrb.mxu2 %v6125_v18 }
 0x255   : > { %v1112_v32 = vsel %vm250_vm0, %v1096_v7, 0.0  ;;  %6191 = vmatpush.bf16.msra.mxu3 %v6125_v18 }
 0x256   : > { %v992_v49 = vpop.f32.mrf.mxu2  ;;  %1113 = vadd.xlane.f32.xlu1 %v1112_v32 }
 0x257   : > { %v993_v35 = vadd.f32 %v7053_v61, %v992_v49 }
 0x259   : > { %v7066_v36 = vadd.f32 %v993_v35, %v6831_v45 }
 0x25b   : > { %v1051_v44 = vsel %vm250_vm0, %v7066_v36, 0.0  ;;  %v1097_v5 = vmul.f32 %v7066_v36, %v7066_v36 }
 0x25c   : > { %1052 = vadd.xlane.f32.xlu0 %v1051_v44 }
 0x25d   : > { %v1115_v23 = vsel %vm250_vm0, %v1097_v5, 0.0 }
 0x25e   : > { %v995_v50 = vpop.f32.mrf.mxu2  ;;  %1116 = vadd.xlane.f32.xlu2 %v1115_v23 }
 0x25f   : > { %v996_v14 = vadd.f32 %v7053_v61, %v995_v50 }
 0x261   : > { %v7075_v41 = vadd.f32 %v996_v14, %v6855_v54 }
 0x263   : > { %v1054_v45 = vsel %vm250_vm0, %v7075_v41, 0.0  ;;  %v1098_v51 = vmul.f32 %v7075_v41, %v7075_v41 }
 0x264   : > { %1055 = vadd.xlane.f32.xlu0 %v1054_v45 }
 0x265   : > { %v1118_v56 = vsel %vm250_vm0, %v1098_v51, 0.0 }
 0x266   : > { %v997_v46 = vpop.f32.mrf.mxu2  ;;  %1119 = vadd.xlane.f32.xlu2 %v1118_v56 }
 0x267   : > { %v998_v21 = vadd.f32 %v7053_v61, %v997_v46 }
 0x269   : > { %v7084_v59 = vadd.f32 %v998_v21, %v6858_v22 }
 0x26b   : > { %v1057_v54 = vsel %vm250_vm0, %v7084_v59, 0.0  ;;  %v1099_v58 = vmul.f32 %v7084_v59, %v7084_v59 }
 0x26c   : > { %1058 = vadd.xlane.f32.xlu1 %v1057_v54 }
 0x26d   : > { %v1121_v60 = vsel %vm250_vm0, %v1099_v58, 0.0 }
 0x26e   : > { %v1000_v42 = vpop.f32.mrf.mxu2  ;;  %1122 = vadd.xlane.f32.xlu0 %v1121_v60 }
 0x26f   : > { %v1001_v28 = vadd.f32 %v7053_v61, %v1000_v42 }
 0x271   : > { %v7093_v19 = vadd.f32 %v1001_v28, %v6883_v24 }
 0x273   : > { %v1060_v22 = vsel %vm250_vm0, %v7093_v19, 0.0  ;;  %v1100_v40 = vmul.f32 %v7093_v19, %v7093_v19 }
 0x274   : > { %1061 = vadd.xlane.f32.xlu1 %v1060_v22 }
 0x275   : > { %v1124_v39 = vsel %vm250_vm0, %v1100_v40, 0.0 }
 0x276   : > { %v1002_v57 = vpop.f32.mrf.mxu2  ;;  %1125 = vadd.xlane.f32.xlu0 %v1124_v39 }
 0x277   : > { %v1003_v3 = vadd.f32 %v7053_v61, %v1002_v57 }
 0x279   : > { %v7102_v0 = vadd.f32 %v1003_v3, %v6886_v6 }
 0x27b   : > { %v1063_v24 = vsel %vm250_vm0, %v7102_v0, 0.0  ;;  %v1101_v52 = vmul.f32 %v7102_v0, %v7102_v0 }
 0x27c   : > { %1064 = vadd.xlane.f32.xlu2 %v1063_v24 }
 0x27d   : > { %v1127_v37 = vsel %vm250_vm0, %v1101_v52, 0.0 }
 0x27e   : > { %1128 = vadd.xlane.f32.xlu1 %v1127_v37  ;;  %v1005_v1 = vpop.f32.mrf.mxu2 }
 0x27f   : > { %v1006_v25 = vadd.f32 %v7053_v61, %v1005_v1 }
 0x281   : > { %v7111_v29 = vadd.f32 %v1006_v25, %v6921_v53 }
 0x283   : > { %v1066_v6 = vsel %vm250_vm0, %v7111_v29, 0.0  ;;  %v1102_v10 = vmul.f32 %v7111_v29, %v7111_v29 }
 0x284   : > { %1067 = vadd.xlane.f32.xlu2 %v1066_v6 }
 0x285   : > { %v1130_v13 = vsel %vm250_vm0, %v1102_v10, 0.0 }
 0x286   : > { %v1007_v31 = vpop.f32.mrf.mxu2  ;;  %1131 = vadd.xlane.f32.xlu1 %v1130_v13 }
 0x287   : > { %v1008_v15 = vadd.f32 %v7053_v61, %v1007_v31 }
 0x289   : > { %v7120_v48 = vadd.f32 %v1008_v15, %v6917_v43 }
 0x28b   : > { %v1069_v53 = vsel %vm250_vm0, %v7120_v48, 0.0  ;;  %v1103_v20 = vmul.f32 %v7120_v48, %v7120_v48 }
 0x28c   : > { %1070 = vadd.xlane.f32.xlu0 %v1069_v53 }
 0x28d   : > { %v1133_v2 = vsel %vm250_vm0, %v1103_v20, 0.0 }
 0x28e   : > { %1134 = vadd.xlane.f32.xlu2 %v1133_v2 }
 0x28f   : > { %v1010_v30 = vpop.f32.mrf.mxu2 }
 0x290   : > { %v1011_v38 = vadd.f32 %v7053_v61, %v1010_v30 }
 0x292   : > { %v7129_v34 = vadd.f32 %v1011_v38, %v6960_v8 }
 0x294   : > { %v1072_v43 = vsel %vm250_vm0, %v7129_v34, 0.0  ;;  %v1104_v11 = vmul.f32 %v7129_v34, %v7129_v34 }
 0x295   : > { %1073 = vadd.xlane.f32.xlu0 %v1072_v43 }
 0x296   : > { %v1136_v17 = vsel %vm250_vm0, %v1104_v11, 0.0 }
 0x297   : > { %v1012_v55 = vpop.f32.mrf.mxu2  ;;  %1137 = vadd.xlane.f32.xlu2 %v1136_v17 }
 0x298   : > { %v1013_v7 = vadd.f32 %v7053_v61, %v1012_v55 }
 0x29a   : > { %v7138_v32 = vadd.f32 %v1013_v7, %v6963_v9 }
 0x29c   : > { %v1075_v8 = vsel %vm250_vm0, %v7138_v32, 0.0  ;;  %v1105_v49 = vmul.f32 %v7138_v32, %v7138_v32 }
 0x29d   : > { %1076 = vadd.xlane.f32.xlu1 %v1075_v8 }
 0x29e   : > { %v1139_v35 = vsel %vm250_vm0, %v1105_v49, 0.0 }
 0x29f   : > { %v1015_v12 = vpop.f32.mrf.mxu2  ;;  %1140 = vadd.xlane.f32.xlu0 %v1139_v35 }
 0x2a0   : > { %v1016_v44 = vadd.f32 %v7053_v61, %v1015_v12 }
 0x2a2   : > { %v7147_v5 = vadd.f32 %v1016_v44, %v7000_v4 }
 0x2a4   : > { %v1078_v9 = vsel %vm250_vm0, %v7147_v5, 0.0  ;;  %v1106_v23 = vmul.f32 %v7147_v5, %v7147_v5 }
 0x2a5   : > { %1079 = vadd.xlane.f32.xlu1 %v1078_v9 }
 0x2a6   : > { %v1142_v50 = vsel %vm250_vm0, %v1106_v23, 0.0 }
 0x2a7   : > { %v1017_v14 = vpop.f32.mrf.mxu2  ;;  %1143 = vadd.xlane.f32.xlu0 %v1142_v50 }
 0x2a8   : > { %v1018_v45 = vadd.f32 %v7053_v61, %v1017_v14 }
 0x2aa   : > { %v7156_v51 = vadd.f32 %v1018_v45, %v7003_v16 }
 0x2ac   : > { %v1081_v4 = vsel %vm250_vm0, %v7156_v51, 0.0  ;;  %v1107_v56 = vmul.f32 %v7156_v51, %v7156_v51 }
 0x2ad   : > { %1082 = vadd.xlane.f32.xlu2 %v1081_v4 }
 0x2ae   : > { %v1145_v46 = vsel %vm250_vm0, %v1107_v56, 0.0 }
 0x2af   : > { %1146 = vadd.xlane.f32.xlu1 %v1145_v46 }
 0x2b2   : > { %v1020_v21 = vpop.f32.mrf.mxu2 }
 0x2b3   : > { %v1021_v54 = vadd.f32 %v7053_v61, %v1020_v21 }
 0x2b5   : > { %v7165_v58 = vadd.f32 %v1021_v54, %v7023_v62 }
 0x2b7   : > { %v1084_v16 = vsel %vm250_vm0, %v7165_v58, 0.0  ;;  %v1108_v60 = vmul.f32 %v7165_v58, %v7165_v58 }
 0x2b8   : > { %1085 = vadd.xlane.f32.xlu2 %v1084_v16 }
 0x2b9   : > { %v1148_v42 = vsel %vm250_vm0, %v1108_v60, 0.0 }
 0x2ba   : > { %v1022_v28 = vpop.f32.mrf.mxu2  ;;  %1149 = vadd.xlane.f32.xlu1 %v1148_v42 }
 0x2bb   : > { %v1023_v22 = vadd.f32 %v7053_v61, %v1022_v28 }
 0x2bd   : > { %v7174_v40 = vadd.f32 %v1023_v22, %v7026_v47 }
 0x2bf   : > { %v1087_v62 = vsel %vm250_vm0, %v7174_v40, 0.0  ;;  %v1109_v39 = vmul.f32 %v7174_v40, %v7174_v40 }
 0x2c0   : > { %1088 = vadd.xlane.f32.xlu0 %v1087_v62 }
 0x2c1   : > { %v1151_v57 = vsel %vm250_vm0, %v1109_v39, 0.0 }
 0x2c2   : > { %1152 = vadd.xlane.f32.xlu2 %v1151_v57  ;;  %v1025_v3 = vpop.f32.mrf.mxu2 }
 0x2c3   : > { %v1026_v63 = vadd.f32 %v7053_v61, %v1025_v3 }
 0x2c5   : > { %v7183_v24 = vadd.f32 %v1026_v63, %v7039_v26 }
 0x2c7   : > { %v1050_v52 = vpop.xlane.xlu2 %1049  ;;  %v1090_v47 = vsel %vm250_vm0, %v7183_v24, 0.0  ;;  %v1110_v37 = vmul.f32 %v7183_v24, %v7183_v24 }
 0x2c8   : > { %v7189_v1 = vmul.f32 0.015625, %v1050_v52  ;;  %1091 = vadd.xlane.f32.xlu0 %v1090_v47 }
 0x2c9   : > { %v1114_v25 = vpop.xlane.xlu1 %1113  ;;  %v1154_v6 = vsel %vm250_vm0, %v1110_v37, 0.0 }
 0x2ca   : > { %v1192_v10 = vmul.f32 %v7189_v1, %v7189_v1  ;;  %v1176_v13 = vmul.f32 0.015625, %v1114_v25  ;;  %v1027_v31 = vpop.f32.mrf.mxu2  ;;  %1155 = vadd.xlane.f32.xlu2 %v1154_v6  ;;  %v1240_v37 = vsub.f32 %v7057_v27, %v7189_v1 }
 0x2cb   : > { %v1028_v26 = vadd.f32 %v7053_v61, %v1027_v31 }
 0x2cc   : > { %v1208_v15 = vsub.f32 %v1176_v13, %v1192_v10 }
 0x2cd   : > { %v7196_v53 = vadd.f32 %v1028_v26, %v7042_v33  ;;  %v7222_v26 = vld [vmem:[%s9551_s2 + $0x3] ss:$0 sm:$0xff] }
 0x2ce   : > { %v1224_v20 = vmax.f32 %v1208_v15, 0.0 }
 0x2cf   : > { %v1053_v2 = vpop.xlane.xlu0 %1052  ;;  %v1093_v30 = vsel %vm250_vm0, %v7196_v53, 0.0  ;;  %v1111_v38 = vmul.f32 %v7196_v53, %v7196_v53 }
 0x2d0   : > { %v1256_v43 = vadd.f32 1e-05, %v1224_v20  ;;  %v7202_v11 = vmul.f32 0.015625, %v1053_v2  ;;  %1094 = vadd.xlane.f32.xlu1 %v1093_v30 }
 0x2d1   : > { %v1117_v17 = vpop.xlane.xlu2 %1116  ;;  %v1157_v61 = vsel %vm250_vm0, %v1111_v38, 0.0 }
 0x2d2   : > { %6276 = vrsqrt.f32 %v1256_v43  ;;  %v1193_v33 = vmul.f32 %v7202_v11, %v7202_v11  ;;  %1158 = vadd.xlane.f32.xlu0 %v1157_v61  ;;  %v1177_v55 = vmul.f32 0.015625, %v1117_v17  ;;  %vm1278_vm5 = vweird.f32 %v1256_v43 }
 0x2d4   : > { %v1209_v7 = vsub.f32 %v1177_v55, %v1193_v33  ;;  %v7231_v33 = vld [vmem:[%s9551_s2 + $0x4] ss:$0 sm:$0xff] }
 0x2d6   : > { %v1225_v8 = vmax.f32 %v1209_v7, 0.0 }
 0x2d7   : > { %v1056_v49 = vpop.xlane.xlu0 %1055 }
 0x2d8   : > { %v6277_v35 = vpop.eup %6276  ;;  %v7207_v12 = vmul.f32 0.015625, %v1056_v49  ;;  %v1257_v9 = vadd.f32 1e-05, %v1225_v8 }
 0x2d9   : > { %v1273_v44 = vmul.f32 %v6277_v35, %v1256_v43  ;;  %v1120_v23 = vpop.xlane.xlu2 %1119  ;;  %vm1279_vm4 = vweird.f32 %v6277_v35  ;;  %v1241_v43 = vsub.f32 %v7066_v36, %v7202_v11 }
 0x2da   : > { %v1194_v50 = vmul.f32 %v7207_v12, %v7207_v12  ;;  %v1178_v14 = vmul.f32 0.015625, %v1120_v23  ;;  %6278 = vrsqrt.f32 %v1257_v9  ;;  %vm1280_vm6 = vmor %vm1278_vm5, %vm1279_vm4  ;;  %vm1288_vm8 = vweird.f32 %v1257_v9 }
 0x2db   : > { %v1274_v45 = vmul.f32 %v6277_v35, %v1273_v44 }
 0x2dc   : > { %v1210_v4 = vsub.f32 %v1178_v14, %v1194_v50 }
 0x2dd   : > { %v1275_v56 = vmul.f32 0.5, %v1274_v45 }
 0x2de   : > { %v1226_v46 = vmax.f32 %v1210_v4, 0.0 }
 0x2df   : > { %v1276_v21 = vsub.f32 1.5, %v1275_v56  ;;  %v1059_v54 = vpop.xlane.xlu1 %1058 }
 0x2e0   : > { %v1258_v16 = vadd.f32 1e-05, %v1226_v46  ;;  %v7211_v60 = vmul.f32 0.015625, %v1059_v54  ;;  %v6279_v42 = vpop.eup %6278 }
 0x2e1   : > { %v1123_v28 = vpop.xlane.xlu0 %1122  ;;  %v1277_v22 = vmul.f32 %v6277_v35, %v1276_v21  ;;  %v1283_v62 = vmul.f32 %v6279_v42, %v1257_v9  ;;  %vm1289_vm7 = vweird.f32 %v6279_v42 }
 0x2e2   : > { %6280 = vrsqrt.f32 %v1258_v16  ;;  %v1195_v39 = vmul.f32 %v7211_v60, %v7211_v60  ;;  %v1179_v57 = vmul.f32 0.015625, %v1123_v28  ;;  %vm1290_vm9 = vmor %vm1288_vm8, %vm1289_vm7  ;;  %vm1298_vm11 = vweird.f32 %v1258_v16 }
 0x2e3   : > { %v1284_v3 = vmul.f32 %v6279_v42, %v1283_v62  ;;  %v1281_v52 = vsel %vm1280_vm6, %v6277_v35, %v1277_v22 }
 0x2e4   : > { %v1211_v63 = vsub.f32 %v1179_v57, %v1195_v39  ;;  %v1432_v15 = vmul.f32 %v1281_v52, %v1240_v37  ;;  %v1242_v39 = vsub.f32 %v7075_v41, %v7207_v12 }
 0x2e5   : > { %v1285_v47 = vmul.f32 0.5, %v1284_v3 }
 0x2e6   : > { %v1227_v25 = vmax.f32 %v1211_v63, 0.0  ;;  %v1449_v55 = vmul.f32 %v7222_v26, %v1432_v15 }
 0x2e7   : > { %v1062_v6 = vpop.xlane.xlu1 %1061  ;;  %v1286_v13 = vsub.f32 1.5, %v1285_v47 }
 0x2e8   : > { %v6281_v10 = vpop.eup %6280  ;;  %v7217_v31 = vmul.f32 0.015625, %v1062_v6  ;;  %v1259_v2 = vadd.f32 1e-05, %v1227_v25  ;;  %v7240_v50 = vadd.f32 %v7231_v33, %v1449_v55 }
 0x2e9   : > { %v1293_v20 = vmul.f32 %v6281_v10, %v1258_v16  ;;  %v1126_v30 = vpop.xlane.xlu0 %1125  ;;  %v1287_v38 = vmul.f32 %v6279_v42, %v1286_v13  ;;  %vm1299_vm10 = vweird.f32 %v6281_v10  ;;  %v1243_v13 = vsub.f32 %v7084_v59, %v7211_v60 }
 0x2ea   : > { %v1196_v27 = vmul.f32 %v7217_v31, %v7217_v31  ;;  %v1180_v1 = vmul.f32 0.015625, %v1126_v30  ;;  %6282 = vrsqrt.f32 %v1259_v2  ;;  %vm1300_vm12 = vmor %vm1298_vm11, %vm1299_vm10  ;;  %vm1308_vm14 = vweird.f32 %v1259_v2 }
 0x2eb   : > { %v1294_v18 = vmul.f32 %v6281_v10, %v1293_v20  ;;  %v1291_v17 = vsel %vm1290_vm9, %v6279_v42, %v1287_v38 }
 0x2ec   : > { %v1212_v61 = vsub.f32 %v1180_v1, %v1196_v27  ;;  %v1433_v7 = vmul.f32 %v1291_v17, %v1241_v43 }
 0x2ed   : > { %v1295_v8 = vmul.f32 0.5, %v1294_v18 }
 0x2ee   : > { %v1228_v49 = vmax.f32 %v1212_v61, 0.0  ;;  %v1450_v35 = vmul.f32 %v7222_v26, %v1433_v7 }
 0x2ef   : > { %v1296_v44 = vsub.f32 1.5, %v1295_v8  ;;  %v1065_v9 = vpop.xlane.xlu2 %1064 }
 0x2f0   : > { %v7235_v36 = vadd.f32 1e-05, %v1228_v49  ;;  %v7237_v11 = vmul.f32 0.015625, %v1065_v9  ;;  %v6283_v23 = vpop.eup %6282  ;;  %v7243_v14 = vadd.f32 %v7231_v33, %v1450_v35 }
 0x2f1   : > { %v1129_v45 = vpop.xlane.xlu1 %1128  ;;  %v1297_v4 = vmul.f32 %v6281_v10, %v1296_v44  ;;  %v1303_v56 = vmul.f32 %v6283_v23, %v1259_v2  ;;  %vm1309_vm13 = vweird.f32 %v6283_v23 }
 0x2f2   : > { %6284 = vrsqrt.f32 %v7235_v36  ;;  %v1197_v46 = vmul.f32 %v7237_v11, %v7237_v11  ;;  %v1181_v21 = vmul.f32 0.015625, %v1129_v45  ;;  %v1490_v42 = vpack.c.bf16 %v7243_v14, %v7240_v50  ;;  %vm1310_vm15 = vmor %vm1308_vm14, %vm1309_vm13 }
 0x2f3   : > { %v1304_v54 = vmul.f32 %v6283_v23, %v1303_v56  ;;  %v1301_v22 = vsel %vm1300_vm12, %v6281_v10, %v1297_v4  ;;  %vm1318_vm2 = vweird.f32 %v7235_v36 }
 0x2f4   : > { %v1213_v28 = vsub.f32 %v1181_v21, %v1197_v46  ;;  %5831 = vmatmul.msk.bf16.vlgmr.msrb.gmra.mxu2 %vm250_vm0, %v1490_v42  ;;  %v1434_v25 = vmul.f32 %v1301_v22, %v1242_v39 }
 0x2f5   : > { %v1305_v62 = vmul.f32 0.5, %v1304_v54  ;;  %v1244_v54 = vsub.f32 %v7093_v19, %v7217_v31 }
 0x2f6   : > { %v1229_v57 = vmax.f32 %v1213_v28, 0.0  ;;  %v1451_v27 = vmul.f32 %v7222_v26, %v1434_v25 }
 0x2f7   : > { %v1306_v63 = vsub.f32 1.5, %v1305_v62  ;;  %v1068_v52 = vpop.xlane.xlu2 %1067 }
 0x2f8   : > { %v6285_v3 = vpop.eup %6284  ;;  %v1261_v47 = vadd.f32 1e-05, %v1229_v57  ;;  %v7254_v37 = vmul.f32 0.015625, %v1068_v52  ;;  %v7265_v60 = vadd.f32 %v7231_v33, %v1451_v27  ;;  %v1245_v52 = vsub.f32 %v7102_v0, %v7237_v11 }
 0x2f9   : > { %v1313_v16 = vmul.f32 %v6285_v3, %v7235_v36  ;;  %v1307_v6 = vmul.f32 %v6283_v23, %v1306_v63  ;;  %v1132_v10 = vpop.xlane.xlu1 %1131  ;;  %vm1319_vm1 = vweird.f32 %v6285_v3 }
 0x2fa   : > { %6286 = vrsqrt.f32 %v1261_v47  ;;  %v1198_v41 = vmul.f32 %v7254_v37, %v7254_v37  ;;  %v1182_v20 = vmul.f32 0.015625, %v1132_v10  ;;  %vm1320_vm3 = vmor %vm1318_vm2, %vm1319_vm1  ;;  %vm1328_vm5 = vweird.f32 %v1261_v47 }
 0x2fb   : > { %v1314_v15 = vmul.f32 %v6285_v3, %v1313_v16  ;;  %v1311_v12 = vsel %vm1310_vm15, %v6283_v23, %v1307_v6 }
 0x2fc   : > { %v1435_v38 = vmul.f32 %v1311_v12, %v1243_v13  ;;  %v1214_v1 = vsub.f32 %v1182_v20, %v1198_v41 }
 0x2fd   : > { %v1315_v30 = vmul.f32 0.5, %v1314_v15 }
 0x2fe   : > { %v1452_v2 = vmul.f32 %v7222_v26, %v1435_v38  ;;  %v1230_v18 = vmax.f32 %v1214_v1, 0.0 }
 0x2ff   : > { %v1316_v43 = vsub.f32 1.5, %v1315_v30  ;;  %v1071_v17 = vpop.xlane.xlu0 %1070 }
 0x300   : > { %v6287_v61 = vpop.eup %6286  ;;  %v7262_v59 = vmul.f32 0.015625, %v1071_v17  ;;  %v7268_v55 = vadd.f32 %v7231_v33, %v1452_v2  ;;  %v1262_v8 = vadd.f32 1e-05, %v1230_v18 }
 0x301   : > { %v1323_v7 = vmul.f32 %v6287_v61, %v1261_v47  ;;  %v1135_v49 = vpop.xlane.xlu2 %1134  ;;  %v1317_v35 = vmul.f32 %v6285_v3, %v1316_v43  ;;  %vm1329_vm4 = vweird.f32 %v6287_v61 }
 0x302   : > { %v1199_v44 = vmul.f32 %v7262_v59, %v7262_v59  ;;  %v1183_v9 = vmul.f32 0.015625, %v1135_v49  ;;  %v1491_v23 = vpack.c.bf16 %v7268_v55, %v7265_v60  ;;  %6288 = vrsqrt.f32 %v1262_v8  ;;  %vm1330_vm6 = vmor %vm1328_vm5, %vm1329_vm4 }
 0x303   : > { %v1324_v45 = vmul.f32 %v6287_v61, %v1323_v7  ;;  %v1321_v21 = vsel %vm1320_vm3, %v6285_v3, %v1317_v35  ;;  %vm1338_vm8 = vweird.f32 %v1262_v8 }
 0x304   : > { %v1215_v4 = vsub.f32 %v1183_v9, %v1199_v44  ;;  %5832 = vmatmul.msk.bf16.gmra.mxu2 %vm250_vm0, %v1491_v23  ;;  %v1436_v63 = vmul.f32 %v1321_v21, %v1244_v54  ;;  %v1246_v23 = vsub.f32 %v7111_v29, %v7254_v37 }
 0x305   : > { %v1325_v56 = vmul.f32 0.5, %v1324_v45 }
 0x306   : > { %v1231_v46 = vmax.f32 %v1215_v4, 0.0  ;;  %v1453_v13 = vmul.f32 %v7222_v26, %v1436_v63 }
 0x307   : > { %v1326_v42 = vsub.f32 1.5, %v1325_v56 }
 0x308   : > { %v1074_v28 = vpop.xlane.xlu0 %1073  ;;  %v1263_v22 = vadd.f32 1e-05, %v1231_v46  ;;  %v6289_v39 = vpop.eup %6288  ;;  %v7292_v43 = vadd.f32 %v7231_v33, %v1453_v13 }
 0x309   : > { %v7278_v62 = vmul.f32 0.015625, %v1074_v28  ;;  %v1327_v57 = vmul.f32 %v6287_v61, %v1326_v42  ;;  %v1333_v16 = vmul.f32 %v6289_v39, %v1262_v8  ;;  %vm1339_vm7 = vweird.f32 %v6289_v39 }
 0x30a   : > { %v1138_v36 = vpop.xlane.xlu2 %1137  ;;  %6290 = vrsqrt.f32 %v1263_v22  ;;  %vm1340_vm9 = vmor %vm1338_vm8, %vm1339_vm7  ;;  %vm1348_vm11 = vweird.f32 %v1263_v22  ;;  %v1247_v28 = vsub.f32 %v7120_v48, %v7262_v59 }
 0x30b   : > { %v1200_v19 = vmul.f32 %v7278_v62, %v7278_v62  ;;  %v1184_v31 = vmul.f32 0.015625, %v1138_v36  ;;  %v1331_v3 = vsel %vm1330_vm6, %v6287_v61, %v1327_v57  ;;  %v1334_v25 = vmul.f32 %v6289_v39, %v1333_v16 }
 0x30c   : > { %v1437_v6 = vmul.f32 %v1331_v3, %v1245_v52 }
 0x30d   : > { %v1216_v10 = vsub.f32 %v1184_v31, %v1200_v19  ;;  %v1335_v15 = vmul.f32 0.5, %v1334_v25 }
 0x30e   : > { %v1454_v47 = vmul.f32 %v7222_v26, %v1437_v6 }
 0x30f   : > { %v1232_v41 = vmax.f32 %v1216_v10, 0.0  ;;  %v1336_v0 = vsub.f32 1.5, %v1335_v15 }
 0x310   : > { %v1077_v12 = vpop.xlane.xlu1 %1076  ;;  %v6291_v20 = vpop.eup %6290  ;;  %v7289_v30 = vadd.f32 %v7231_v33, %v1454_v47 }
 0x311   : > { %v7286_v11 = vmul.f32 0.015625, %v1077_v12  ;;  %v1343_v38 = vmul.f32 %v6291_v20, %v1263_v22  ;;  %v1264_v27 = vadd.f32 1e-05, %v1232_v41  ;;  %v1337_v2 = vmul.f32 %v6289_v39, %v1336_v0 }
 0x312   : > { %v1141_v1 = vpop.xlane.xlu0 %1140  ;;  %v1492_v7 = vpack.c.bf16 %v7289_v30, %v7292_v43  ;;  %vm1349_vm10 = vweird.f32 %v6291_v20 }
 0x313   : > { %v1201_v18 = vmul.f32 %v7286_v11, %v7286_v11  ;;  %v1185_v17 = vmul.f32 0.015625, %v1141_v1  ;;  %v1344_v61 = vmul.f32 %v6291_v20, %v1343_v38  ;;  %6292 = vrsqrt.f32 %v1264_v27  ;;  %vm1350_vm12 = vmor %vm1348_vm11, %vm1349_vm10 }
 0x314   : > { %5833 = vmatmul.msk.bf16.vlgmr.msra.gmra.mxu3 %vm250_vm0, %v1492_v7  ;;  %v1341_v9 = vsel %vm1340_vm9, %v6289_v39, %v1337_v2  ;;  %vm1358_vm14 = vweird.f32 %v1264_v27 }
 0x315   : > { %v1217_v49 = vsub.f32 %v1185_v17, %v1201_v18  ;;  %v1345_v35 = vmul.f32 0.5, %v1344_v61  ;;  %v1438_v42 = vmul.f32 %v1341_v9, %v1246_v23  ;;  %v1248_v17 = vsub.f32 %v7129_v34, %v7278_v62 }
 0x316   : > { %v1249_v9 = vsub.f32 %v7138_v32, %v7286_v11 }
 0x317   : > { %v1233_v44 = vmax.f32 %v1217_v49, 0.0  ;;  %v1346_v45 = vsub.f32 1.5, %v1345_v35  ;;  %v1455_v16 = vmul.f32 %v7222_v26, %v1438_v42 }
 0x318   : > { %v1080_v4 = vpop.xlane.xlu1 %1079 }
 0x319   : > { %v1265_v56 = vadd.f32 1e-05, %v1233_v44  ;;  %v7301_v46 = vmul.f32 0.015625, %v1080_v4  ;;  %v6293_v21 = vpop.eup %6292  ;;  %v1347_v54 = vmul.f32 %v6291_v20, %v1346_v45  ;;  %v7315_v47 = vadd.f32 %v7231_v33, %v1455_v16 }
 0x31a   : > { %v1144_v8 = vpop.xlane.xlu0 %1143  ;;  %v1353_v57 = vmul.f32 %v6293_v21, %v1264_v27  ;;  %vm1359_vm13 = vweird.f32 %v6293_v21 }
 0x31b   : > { %6294 = vrsqrt.f32 %v1265_v56  ;;  %v1202_v29 = vmul.f32 %v7301_v46, %v7301_v46  ;;  %v1186_v37 = vmul.f32 0.015625, %v1144_v8  ;;  %v1351_v39 = vsel %vm1350_vm12, %v6291_v20, %v1347_v54  ;;  %vm1360_vm15 = vmor %vm1358_vm14, %vm1359_vm13 }
 0x31c   : > { %v1354_v36 = vmul.f32 %v6293_v21, %v1353_v57  ;;  %v1439_v63 = vmul.f32 %v1351_v39, %v1247_v28  ;;  %vm1368_vm2 = vweird.f32 %v1265_v56 }
 0x31d   : > { %v1218_v52 = vsub.f32 %v1186_v37, %v1202_v29 }
 0x31e   : > { %v1355_v19 = vmul.f32 0.5, %v1354_v36  ;;  %v1456_v22 = vmul.f32 %v7222_v26, %v1439_v63 }
 0x31f   : > { %v1234_v31 = vmax.f32 %v1218_v52, 0.0 }
 0x320   : > { %v1083_v3 = vpop.xlane.xlu2 %1082  ;;  %v1356_v48 = vsub.f32 1.5, %v1355_v19  ;;  %v7312_v6 = vadd.f32 %v7231_v33, %v1456_v22 }
 0x321   : > { %v6295_v25 = vpop.eup %6294  ;;  %v7309_v59 = vmul.f32 0.015625, %v1083_v3  ;;  %v1266_v13 = vadd.f32 1e-05, %v1234_v31 }
 0x322   : > { %v1363_v10 = vmul.f32 %v6295_v25, %v1265_v56  ;;  %v1147_v15 = vpop.xlane.xlu1 %1146  ;;  %v1357_v41 = vmul.f32 %v6293_v21, %v1356_v48  ;;  %v1493_v38 = vpack.c.bf16 %v7312_v6, %v7315_v47  ;;  %vm1369_vm1 = vweird.f32 %v6295_v25 }
 0x323   : > { %v1203_v12 = vmul.f32 %v7309_v59, %v7309_v59  ;;  %v1187_v20 = vmul.f32 0.015625, %v1147_v15  ;;  %6296 = vrsqrt.f32 %v1266_v13  ;;  %vm1370_vm3 = vmor %vm1368_vm2, %vm1369_vm1  ;;  %vm1378_vm5 = vweird.f32 %v1266_v13 }
 0x324   : > { %v1364_v0 = vmul.f32 %v6295_v25, %v1363_v10  ;;  %5834 = vmatmul.msk.bf16.gmra.mxu3 %vm250_vm0, %v1493_v38  ;;  %v1361_v18 = vsel %vm1360_vm15, %v6293_v21, %v1357_v41  ;;  %v1250_v41 = vsub.f32 %v7147_v5, %v7301_v46 }
 0x325   : > { %v1219_v1 = vsub.f32 %v1187_v20, %v1203_v12  ;;  %v1440_v35 = vmul.f32 %v1361_v18, %v1248_v17 }
 0x326   : > { %v1365_v2 = vmul.f32 0.5, %v1364_v0 }
 0x327   : > { %v1235_v61 = vmax.f32 %v1219_v1, 0.0  ;;  %v1457_v8 = vmul.f32 %v7222_v26, %v1440_v35  ;;  %v1251_v1 = vsub.f32 %v7156_v51, %v7309_v59 }
 0x328   : > { %v1366_v7 = vsub.f32 1.5, %v1365_v2 }
 0x329   : > { %v1267_v49 = vadd.f32 1e-05, %v1235_v61  ;;  %v6297_v27 = vpop.eup %6296  ;;  %v7333_v37 = vadd.f32 %v7231_v33, %v1457_v8 }
 0x32a   : > { %v1367_v44 = vmul.f32 %v6295_v25, %v1366_v7  ;;  %v1373_v23 = vmul.f32 %v6297_v27, %v1266_v13  ;;  %vm1379_vm4 = vweird.f32 %v6297_v27 }
 0x32b   : > { %6298 = vrsqrt.f32 %v1267_v49  ;;  %v1086_v45 = vpop.xlane.xlu2 %1085  ;;  %vm1380_vm6 = vmor %vm1378_vm5, %vm1379_vm4  ;;  %vm1388_vm8 = vweird.f32 %v1267_v49 }
 0x32c   : > { %v7326_v4 = vmul.f32 0.015625, %v1086_v45  ;;  %v1371_v21 = vsel %vm1370_vm3, %v6295_v25, %v1367_v44  ;;  %v1374_v54 = vmul.f32 %v6297_v27, %v1373_v23 }
 0x32d   : > { %v1150_v34 = vpop.xlane.xlu1 %1149  ;;  %v1441_v62 = vmul.f32 %v1371_v21, %v1249_v9 }
 0x32e   : > { %v1204_v42 = vmul.f32 %v7326_v4, %v7326_v4  ;;  %v1188_v28 = vmul.f32 0.015625, %v1150_v34  ;;  %v1375_v56 = vmul.f32 0.5, %v1374_v54 }
 0x32f   : > { %v1458_v57 = vmul.f32 %v7222_v26, %v1441_v62 }
 0x330   : > { %v1220_v32 = vsub.f32 %v1188_v28, %v1204_v42  ;;  %v1376_v29 = vsub.f32 1.5, %v1375_v56 }
 0x331   : > { %v6299_v11 = vpop.eup %6298  ;;  %v7336_v39 = vadd.f32 %v7231_v33, %v1458_v57 }
 0x332   : > { %v1383_v36 = vmul.f32 %v6299_v11, %v1267_v49  ;;  %v1236_v63 = vmax.f32 %v1220_v32, 0.0  ;;  %v1377_v52 = vmul.f32 %v6297_v27, %v1376_v29  ;;  %vm1389_vm7 = vweird.f32 %v6299_v11 }
 0x333   : > { %v1089_v16 = vpop.xlane.xlu0 %1088  ;;  %v1494_v19 = vpack.c.bf16 %v7336_v39, %v7333_v37  ;;  %vm1390_vm9 = vmor %vm1388_vm8, %vm1389_vm7 }
 0x334   : > { %v1384_v22 = vmul.f32 %v6299_v11, %v1383_v36  ;;  %v1268_v31 = vadd.f32 1e-05, %v1236_v63  ;;  %v7340_v3 = vmul.f32 0.015625, %v1089_v16  ;;  %v1381_v15 = vsel %vm1380_vm6, %v6297_v27, %v1377_v52 }
 0x335   : > { %v1153_v25 = vpop.xlane.xlu2 %1152  ;;  %5835 = vmatmul.msk.bf16.gmra.mxu3 %vm250_vm0, %v1494_v19  ;;  %v1442_v0 = vmul.f32 %v1381_v15, %v1250_v41 }
 0x336   : > { %v1385_v48 = vmul.f32 0.5, %v1384_v22  ;;  %6300 = vrsqrt.f32 %v1268_v31  ;;  %v1205_v10 = vmul.f32 %v7340_v3, %v7340_v3  ;;  %v1189_v12 = vmul.f32 0.015625, %v1153_v25 }
 0x337   : > { %v1459_v44 = vmul.f32 %v7222_v26, %v1442_v0  ;;  %vm1398_vm11 = vweird.f32 %v1268_v31  ;;  %v1252_v25 = vsub.f32 %v7165_v58, %v7326_v4 }
 0x338   : > { %v1386_v20 = vsub.f32 1.5, %v1385_v48  ;;  %v1221_v13 = vsub.f32 %v1189_v12, %v1205_v10 }
 0x339   : > { %v7356_v21 = vadd.f32 %v7231_v33, %v1459_v44 }
 0x33a   : > { %v1387_v38 = vmul.f32 %v6299_v11, %v1386_v20  ;;  %v1237_v2 = vmax.f32 %v1221_v13, 0.0 }
 0x33b   : > { %v1092_v18 = vpop.xlane.xlu0 %1091 }
 0x33c   : > { %v6301_v17 = vpop.eup %6300  ;;  %v7349_v61 = vmul.f32 0.015625, %v1092_v18  ;;  %v1391_v7 = vsel %vm1390_vm9, %v6299_v11, %v1387_v38  ;;  %v1269_v27 = vadd.f32 1e-05, %v1237_v2 }
 0x33d   : > { %v1393_v35 = vmul.f32 %v6301_v17, %v1268_v31  ;;  %v1156_v5 = vpop.xlane.xlu2 %1155  ;;  %v1443_v46 = vmul.f32 %v1391_v7, %v1251_v1  ;;  %vm1399_vm10 = vweird.f32 %v6301_v17  ;;  %v1253_v31 = vsub.f32 %v7174_v40, %v7340_v3 }
 0x33e   : > { %v1206_v9 = vmul.f32 %v7349_v61, %v7349_v61  ;;  %v1190_v49 = vmul.f32 0.015625, %v1156_v5  ;;  %6302 = vrsqrt.f32 %v1269_v27  ;;  %vm1400_vm12 = vmor %vm1398_vm11, %vm1399_vm10  ;;  %vm1408_vm14 = vweird.f32 %v1269_v27 }
 0x33f   : > { %v1394_v23 = vmul.f32 %v6301_v17, %v1393_v35  ;;  %v1460_v51 = vmul.f32 %v7222_v26, %v1443_v46 }
 0x340   : > { %v1222_v59 = vsub.f32 %v1190_v49, %v1206_v9  ;;  %v1254_v9 = vsub.f32 %v7183_v24, %v7349_v61 }
 0x341   : > { %v1395_v45 = vmul.f32 0.5, %v1394_v23  ;;  %v7359_v54 = vadd.f32 %v7231_v33, %v1460_v51 }
 0x342   : > { %v1238_v34 = vmax.f32 %v1222_v59, 0.0 }
 0x343   : > { %v1396_v62 = vsub.f32 1.5, %v1395_v45  ;;  %v1095_v8 = vpop.xlane.xlu1 %1094  ;;  %v1495_v42 = vpack.c.bf16 %v7359_v54, %v7356_v21 }
 0x344   : > { %v1270_v28 = vadd.f32 1e-05, %v1238_v34  ;;  %v1175_v56 = vmul.f32 0.015625, %v1095_v8  ;;  %v6303_v57 = vpop.eup %6302 }
 0x345   : > { %v1159_v32 = vpop.xlane.xlu0 %1158  ;;  %v1397_v11 = vmul.f32 %v6301_v17, %v1396_v62  ;;  %v1403_v29 = vmul.f32 %v6303_v57, %v1269_v27  ;;  %5836 = vmatmul.msk.bf16.gmra.mxu3 %vm250_vm0, %v1495_v42  ;;  %vm1409_vm13 = vweird.f32 %v6303_v57 }
 0x346   : > { %6304 = vrsqrt.f32 %v1270_v28  ;;  %v1207_v36 = vmul.f32 %v1175_v56, %v1175_v56  ;;  %v1191_v63 = vmul.f32 0.015625, %v1159_v32  ;;  %vm1410_vm15 = vmor %vm1408_vm14, %vm1409_vm13  ;;  %vm1418_vm2 = vweird.f32 %v1270_v28 }
 0x347   : > { %v1404_v52 = vmul.f32 %v6303_v57, %v1403_v29  ;;  %v1401_v22 = vsel %vm1400_vm12, %v6301_v17, %v1397_v11  ;;  %v1255_v59 = vsub.f32 %v7196_v53, %v1175_v56  ;;  %v7396_v53 = vld [vmem:[%s9551_s2 + $0x8] ss:$0 sm:$0xff] }
 0x348   : > { %v1223_v16 = vsub.f32 %v1191_v63, %v1207_v36  ;;  %v1444_v20 = vmul.f32 %v1401_v22, %v1252_v25 }
 0x349   : > { %v1405_v19 = vmul.f32 0.5, %v1404_v52 }
 0x34a   : > { %v1239_v48 = vmax.f32 %v1223_v16, 0.0  ;;  %v1461_v58 = vmul.f32 %v7222_v26, %v1444_v20 }
 0x34b   : > { %v1406_v15 = vsub.f32 1.5, %v1405_v19 }
 0x34c   : > { %v6305_v10 = vpop.eup %6304  ;;  %v1271_v12 = vadd.f32 1e-05, %v1239_v48  ;;  %v7371_v7 = vadd.f32 %v7231_v33, %v1461_v58 }
 0x34d   : > { %v1413_v41 = vmul.f32 %v6305_v10, %v1270_v28  ;;  %v1407_v13 = vmul.f32 %v6303_v57, %v1406_v15  ;;  %vm1419_vm1 = vweird.f32 %v6305_v10 }
 0x34e   : > { %6306 = vrsqrt.f32 %v1271_v12  ;;  %vm1420_vm3 = vmor %vm1418_vm2, %vm1419_vm1  ;;  %vm1428_vm5 = vweird.f32 %v1271_v12 }
 0x34f   : > { %v1414_v0 = vmul.f32 %v6305_v10, %v1413_v41  ;;  %v1411_v38 = vsel %vm1410_vm15, %v6303_v57, %v1407_v13 }
 0x350   : > { %v1445_v2 = vmul.f32 %v1411_v38, %v1253_v31 }
 0x351   : > { %v1415_v1 = vmul.f32 0.5, %v1414_v0 }
 0x352   : > { %v1462_v18 = vmul.f32 %v7222_v26, %v1445_v2 }
 0x353   : > { %v1416_v4 = vsub.f32 1.5, %v1415_v1 }
 0x354   : > { %v6307_v17 = vpop.eup %6306  ;;  %v7374_v35 = vadd.f32 %v7231_v33, %v1462_v18  ;;  %v6132_v18 = vld [vmem:[#allocation2 + $0xb8] sm:$0xff] }
 0x355   : > { %v1417_v27 = vmul.f32 %v6305_v10, %v1416_v4  ;;  %v1423_v40 = vmul.f32 %v6307_v17, %v1271_v12  ;;  %vm1429_vm4 = vweird.f32 %v6307_v17  ;;  %2119 = vmatpush.bf16.msrb.mxu0 %v6132_v18 }
 0x356   : > { %v1496_v3 = vpack.c.bf16 %v7374_v35, %v7371_v7  ;;  %vm1430_vm6 = vmor %vm1428_vm5, %vm1429_vm4 }
 0x357   : > { %v1424_v5 = vmul.f32 %v6307_v17, %v1423_v40  ;;  %v1421_v44 = vsel %vm1420_vm3, %v6305_v10, %v1417_v27 }
 0x358   : > { %5837 = vmatmul.msk.bf16.gmra.mxu3 %vm250_vm0, %v1496_v3  ;;  %v1446_v23 = vmul.f32 %v1421_v44, %v1254_v9 }
 0x359   : > { %v1425_v46 = vmul.f32 0.5, %v1424_v5 }
 0x35a   : > { %v1463_v62 = vmul.f32 %v7222_v26, %v1446_v23 }
 0x35b   : > { %v1426_v49 = vsub.f32 1.5, %v1425_v46 }
 0x35c   : > { %v7385_v42 = vadd.f32 %v7231_v33, %v1463_v62 }
 0x35d   : > { %v1427_v51 = vmul.f32 %v6307_v17, %v1426_v49 }
 0x35f   : > { %v1431_v45 = vsel %vm1430_vm6, %v6307_v17, %v1427_v51 }
 0x360   : > { %v1447_v34 = vmul.f32 %v1431_v45, %v1255_v59 }
 0x362   : > { %v1464_v8 = vmul.f32 %v7222_v26, %v1447_v34  ;;  %v6131_v34 = vld [vmem:[#allocation2 + $0xb0] sm:$0xff] }
 0x363   : > { %2120 = vmatpush.bf16.msrb.mxu0 %v6131_v34 }
 0x364   : > { %v7388_v28 = vadd.f32 %v7231_v33, %v1464_v8 }
 0x366   : > { %v1497_v24 = vpack.c.bf16 %v7388_v28, %v7385_v42 }
 0x368   : > { %5838 = vmatmul.msk.bf16.gmra.mxu3 %vm250_vm0, %v1497_v24 }
 0x377   : > { %v1557_v61 = vpop.f32.mrf.mxu2 }
 0x378   : > { %v1558_v56 = vadd.f32 %v7396_v53, %v1557_v61 }
 0x37a   : > { %v7400_v26 = vadd.f32 %v1558_v56, %v7240_v50 }
 0x37c   : > { %v1615_v33 = vsel %vm250_vm0, %v7400_v26, 0.0  ;;  %v1663_v57 = vmul.f32 %v7400_v26, %v7400_v26 }
 0x37d   : > { %1616 = vadd.xlane.f32.xlu1 %v1615_v33 }
 0x37e   : > { %v1679_v32 = vsel %vm250_vm0, %v1663_v57, 0.0 }
 0x37f   : > { %v1559_v11 = vpop.f32.mrf.mxu2  ;;  %1680 = vadd.xlane.f32.xlu0 %v1679_v32 }
 0x380   : > { %v1560_v29 = vadd.f32 %v7396_v53, %v1559_v11 }
 0x382   : > { %v7409_v36 = vadd.f32 %v1560_v29, %v7243_v14 }
 0x384   : > { %v1618_v50 = vsel %vm250_vm0, %v7409_v36, 0.0  ;;  %v1664_v63 = vmul.f32 %v7409_v36, %v7409_v36 }
 0x385   : > { %1619 = vadd.xlane.f32.xlu2 %v1618_v50 }
 0x386   : > { %v1682_v52 = vsel %vm250_vm0, %v1664_v63, 0.0 }
 0x387   : > { %v1562_v16 = vpop.f32.mrf.mxu2  ;;  %1683 = vadd.xlane.f32.xlu1 %v1682_v52 }
 0x388   : > { %v1563_v19 = vadd.f32 %v7396_v53, %v1562_v16 }
 0x38a   : > { %v7418_v22 = vadd.f32 %v1563_v19, %v7265_v60 }
 0x38c   : > { %v1621_v14 = vsel %vm250_vm0, %v7418_v22, 0.0  ;;  %v1665_v25 = vmul.f32 %v7418_v22, %v7418_v22 }
 0x38d   : > { %1622 = vadd.xlane.f32.xlu2 %v1621_v14 }
 0x38e   : > { %v1685_v48 = vsel %vm250_vm0, %v1665_v25, 0.0 }
 0x38f   : > { %v1564_v10 = vpop.f32.mrf.mxu2  ;;  %1686 = vadd.xlane.f32.xlu1 %v1685_v48  ;;  %v6130_v48 = vld [vmem:[#allocation2 + $0xa8] sm:$0xff] }
 0x390   : > { %v1565_v15 = vadd.f32 %v7396_v53, %v1564_v10  ;;  %2121 = vmatpush.bf16.msrb.mxu0 %v6130_v48 }
 0x392   : > { %v7427_v41 = vadd.f32 %v1565_v15, %v7268_v55 }
 0x394   : > { %v1624_v60 = vsel %vm250_vm0, %v7427_v41, 0.0  ;;  %v1666_v12 = vmul.f32 %v7427_v41, %v7427_v41 }
 0x395   : > { %1625 = vadd.xlane.f32.xlu0 %v1624_v60 }
 0x396   : > { %v1688_v20 = vsel %vm250_vm0, %v1666_v12, 0.0 }
 0x397   : > { %v1567_v13 = vpop.f32.mrf.mxu3  ;;  %1689 = vadd.xlane.f32.xlu2 %v1688_v20 }
 0x398   : > { %v1568_v31 = vadd.f32 %v7396_v53, %v1567_v13 }
 0x39a   : > { %v7436_v0 = vadd.f32 %v1568_v31, %v7292_v43 }
 0x39c   : > { %v1627_v55 = vsel %vm250_vm0, %v7436_v0, 0.0  ;;  %v1667_v38 = vmul.f32 %v7436_v0, %v7436_v0 }
 0x39d   : > { %1628 = vadd.xlane.f32.xlu0 %v1627_v55 }
 0x39e   : > { %v1691_v1 = vsel %vm250_vm0, %v1667_v38, 0.0 }
 0x39f   : > { %v1569_v2 = vpop.f32.mrf.mxu3  ;;  %1692 = vadd.xlane.f32.xlu2 %v1691_v1 }
 0x3a0   : > { %v1570_v58 = vadd.f32 %v7396_v53, %v1569_v2 }
 0x3a2   : > { %v7445_v4 = vadd.f32 %v1570_v58, %v7289_v30 }
 0x3a4   : > { %v1630_v43 = vsel %vm250_vm0, %v7445_v4, 0.0  ;;  %v1668_v17 = vmul.f32 %v7445_v4, %v7445_v4 }
 0x3a5   : > { %1631 = vadd.xlane.f32.xlu1 %v1630_v43 }
 0x3a6   : > { %v1694_v27 = vsel %vm250_vm0, %v1668_v17, 0.0 }
 0x3a7   : > { %v1572_v40 = vpop.f32.mrf.mxu3  ;;  %1695 = vadd.xlane.f32.xlu0 %v1694_v27 }
 0x3a8   : > { %v1573_v3 = vadd.f32 %v7396_v53, %v1572_v40 }
 0x3aa   : > { %v7454_v5 = vadd.f32 %v1573_v3, %v7315_v47 }
 0x3ac   : > { %v1633_v30 = vsel %vm250_vm0, %v7454_v5, 0.0  ;;  %v1669_v46 = vmul.f32 %v7454_v5, %v7454_v5 }
 0x3ad   : > { %1634 = vadd.xlane.f32.xlu1 %v1633_v30 }
 0x3ae   : > { %v1697_v44 = vsel %vm250_vm0, %v1669_v46, 0.0 }
 0x3af   : > { %v1574_v9 = vpop.f32.mrf.mxu3  ;;  %1698 = vadd.xlane.f32.xlu0 %v1697_v44 }
 0x3b0   : > { %v1575_v49 = vadd.f32 %v7396_v53, %v1574_v9 }
 0x3b2   : > { %v7463_v23 = vadd.f32 %v1575_v49, %v7312_v6 }
 0x3b4   : > { %v1636_v47 = vsel %vm250_vm0, %v7463_v23, 0.0  ;;  %v1670_v51 = vmul.f32 %v7463_v23, %v7463_v23 }
 0x3b5   : > { %1637 = vadd.xlane.f32.xlu2 %v1636_v47 }
 0x3b6   : > { %v1700_v59 = vsel %vm250_vm0, %v1670_v51, 0.0 }
 0x3b7   : > { %1701 = vadd.xlane.f32.xlu1 %v1700_v59 }
 0x3b8   : > { %v1577_v45 = vpop.f32.mrf.mxu3 }
 0x3b9   : > { %v1578_v62 = vadd.f32 %v7396_v53, %v1577_v45 }
 0x3bb   : > { %v7472_v8 = vadd.f32 %v1578_v62, %v7333_v37 }
 0x3bd   : > { %v1639_v6 = vsel %vm250_vm0, %v7472_v8, 0.0  ;;  %v1671_v24 = vmul.f32 %v7472_v8, %v7472_v8 }
 0x3be   : > { %1640 = vadd.xlane.f32.xlu2 %v1639_v6 }
 0x3bf   : > { %v1703_v61 = vsel %vm250_vm0, %v1671_v24, 0.0 }
 0x3c0   : > { %v1579_v56 = vpop.f32.mrf.mxu3  ;;  %1704 = vadd.xlane.f32.xlu1 %v1703_v61 }
 0x3c1   : > { %v1580_v33 = vadd.f32 %v7396_v53, %v1579_v56  ;;  %v6129_v56 = vld [vmem:[#allocation2 + $0xa0] sm:$0xff] }
 0x3c2   : > { %2122 = vmatpush.bf16.msrb.mxu0 %v6129_v56 }
 0x3c3   : > { %v7481_v57 = vadd.f32 %v1580_v33, %v7336_v39 }
 0x3c5   : > { %v1642_v37 = vsel %vm250_vm0, %v7481_v57, 0.0  ;;  %v1672_v32 = vmul.f32 %v7481_v57, %v7481_v57 }
 0x3c6   : > { %1643 = vadd.xlane.f32.xlu0 %v1642_v37 }
 0x3c7   : > { %v1706_v11 = vsel %vm250_vm0, %v1672_v32, 0.0 }
 0x3c8   : > { %v1582_v29 = vpop.f32.mrf.mxu3  ;;  %1707 = vadd.xlane.f32.xlu2 %v1706_v11 }
 0x3c9   : > { %v1583_v50 = vadd.f32 %v7396_v53, %v1582_v29 }
 0x3cb   : > { %v7490_v63 = vadd.f32 %v1583_v50, %v7356_v21 }
 0x3cd   : > { %v1645_v39 = vsel %vm250_vm0, %v7490_v63, 0.0  ;;  %v1673_v52 = vmul.f32 %v7490_v63, %v7490_v63 }
 0x3ce   : > { %1646 = vadd.xlane.f32.xlu0 %v1645_v39 }
 0x3cf   : > { %v1709_v16 = vsel %vm250_vm0, %v1673_v52, 0.0 }
 0x3d0   : > { %v1584_v19 = vpop.f32.mrf.mxu3  ;;  %1710 = vadd.xlane.f32.xlu2 %v1709_v16 }
 0x3d1   : > { %v1585_v14 = vadd.f32 %v7396_v53, %v1584_v19 }
 0x3d3   : > { %v7499_v25 = vadd.f32 %v1585_v14, %v7359_v54 }
 0x3d5   : > { %v1648_v21 = vsel %vm250_vm0, %v7499_v25, 0.0  ;;  %v1674_v10 = vmul.f32 %v7499_v25, %v7499_v25 }
 0x3d6   : > { %1649 = vadd.xlane.f32.xlu1 %v1648_v21 }
 0x3d7   : > { %v1712_v15 = vsel %vm250_vm0, %v1674_v10, 0.0 }
 0x3d8   : > { %1713 = vadd.xlane.f32.xlu0 %v1712_v15 }
 0x3db   : > { %v1587_v60 = vpop.f32.mrf.mxu3 }
 0x3dc   : > { %v1588_v12 = vadd.f32 %v7396_v53, %v1587_v60 }
 0x3de   : > { %v7508_v20 = vadd.f32 %v1588_v12, %v7371_v7 }
 0x3e0   : > { %v1651_v54 = vsel %vm250_vm0, %v7508_v20, 0.0  ;;  %v1675_v13 = vmul.f32 %v7508_v20, %v7508_v20 }
 0x3e1   : > { %1652 = vadd.xlane.f32.xlu1 %v1651_v54 }
 0x3e2   : > { %v1715_v31 = vsel %vm250_vm0, %v1675_v13, 0.0 }
 0x3e3   : > { %v1589_v55 = vpop.f32.mrf.mxu3  ;;  %1716 = vadd.xlane.f32.xlu0 %v1715_v31 }
 0x3e4   : > { %v1590_v38 = vadd.f32 %v7396_v53, %v1589_v55 }
 0x3e6   : > { %v7517_v1 = vadd.f32 %v1590_v38, %v7374_v35 }
 0x3e8   : > { %v1654_v7 = vsel %vm250_vm0, %v7517_v1, 0.0  ;;  %v1676_v2 = vmul.f32 %v7517_v1, %v7517_v1 }
 0x3e9   : > { %1655 = vadd.xlane.f32.xlu2 %v1654_v7 }
 0x3ea   : > { %v1718_v58 = vsel %vm250_vm0, %v1676_v2, 0.0 }
 0x3eb   : > { %1719 = vadd.xlane.f32.xlu1 %v1718_v58  ;;  %v1592_v18 = vpop.f32.mrf.mxu3 }
 0x3ec   : > { %v1593_v43 = vadd.f32 %v7396_v53, %v1592_v18 }
 0x3ee   : > { %v7526_v17 = vadd.f32 %v1593_v43, %v7385_v42 }
 0x3f0   : > { %v1657_v35 = vsel %vm250_vm0, %v7526_v17, 0.0  ;;  %v1677_v27 = vmul.f32 %v7526_v17, %v7526_v17  ;;  %v1617_v40 = vpop.xlane.xlu1 %1616 }
 0x3f1   : > { %1658 = vadd.xlane.f32.xlu2 %v1657_v35  ;;  %v7532_v3 = vmul.f32 0.015625, %v1617_v40 }
 0x3f2   : > { %v1721_v30 = vsel %vm250_vm0, %v1677_v27, 0.0  ;;  %v1681_v46 = vpop.xlane.xlu0 %1680 }
 0x3f3   : > { %v1594_v44 = vpop.f32.mrf.mxu3  ;;  %1722 = vadd.xlane.f32.xlu1 %v1721_v30  ;;  %v1759_v9 = vmul.f32 %v7532_v3, %v7532_v3  ;;  %v1743_v42 = vmul.f32 0.015625, %v1681_v46  ;;  %v1807_v40 = vsub.f32 %v7400_v26, %v7532_v3 }
 0x3f4   : > { %v1595_v49 = vadd.f32 %v7396_v53, %v1594_v44 }
 0x3f5   : > { %v1775_v47 = vsub.f32 %v1743_v42, %v1759_v9 }
 0x3f6   : > { %v7539_v51 = vadd.f32 %v1595_v49, %v7388_v28 }
 0x3f7   : > { %v1791_v59 = vmax.f32 %v1775_v47, 0.0 }
 0x3f8   : > { %v1660_v45 = vsel %vm250_vm0, %v7539_v51, 0.0  ;;  %v1678_v34 = vmul.f32 %v7539_v51, %v7539_v51  ;;  %v1620_v62 = vpop.xlane.xlu2 %1619 }
 0x3f9   : > { %1661 = vadd.xlane.f32.xlu0 %v1660_v45  ;;  %v1823_v6 = vadd.f32 1e-05, %v1791_v59  ;;  %v7545_v24 = vmul.f32 0.015625, %v1620_v62 }
 0x3fa   : > { %v1724_v61 = vsel %vm250_vm0, %v1678_v34, 0.0  ;;  %v1684_v53 = vpop.xlane.xlu1 %1683  ;;  %v7565_v34 = vld [vmem:[%s9551_s2 + $0x9] ss:$0 sm:$0xff] }
 0x3fb   : > { %1725 = vadd.xlane.f32.xlu2 %v1724_v61  ;;  %6308 = vrsqrt.f32 %v1823_v6  ;;  %v1760_v28 = vmul.f32 %v7545_v24, %v7545_v24  ;;  %v1744_v33 = vmul.f32 0.015625, %v1684_v53  ;;  %vm1845_vm8 = vweird.f32 %v1823_v6 }
 0x3fd   : > { %v1776_v37 = vsub.f32 %v1744_v33, %v1760_v28 }
 0x3ff   : > { %v1792_v32 = vmax.f32 %v1776_v37, 0.0 }
 0x400   : > { %v1623_v11 = vpop.xlane.xlu2 %1622 }
 0x401   : > { %v6309_v29 = vpop.eup %6308  ;;  %v7550_v50 = vmul.f32 0.015625, %v1623_v11  ;;  %v1824_v52 = vadd.f32 1e-05, %v1792_v32  ;;  %v7575_v32 = vld [vmem:[%s9551_s2 + $0xa] ss:$0 sm:$0xff] }
 0x402   : > { %v1840_v39 = vmul.f32 %v6309_v29, %v1823_v6  ;;  %v1687_v16 = vpop.xlane.xlu1 %1686  ;;  %vm1846_vm7 = vweird.f32 %v6309_v29  ;;  %v1808_v6 = vsub.f32 %v7409_v36, %v7545_v24 }
 0x403   : > { %v1761_v19 = vmul.f32 %v7550_v50, %v7550_v50  ;;  %v1745_v14 = vmul.f32 0.015625, %v1687_v16  ;;  %6310 = vrsqrt.f32 %v1824_v52  ;;  %vm1847_vm9 = vmor %vm1845_vm8, %vm1846_vm7  ;;  %vm1855_vm11 = vweird.f32 %v1824_v52 }
 0x404   : > { %v1841_v48 = vmul.f32 %v6309_v29, %v1840_v39 }
 0x405   : > { %v1777_v21 = vsub.f32 %v1745_v14, %v1761_v19 }
 0x406   : > { %v1842_v10 = vmul.f32 0.5, %v1841_v48 }
 0x407   : > { %v1793_v15 = vmax.f32 %v1777_v21, 0.0 }
 0x408   : > { %v1843_v60 = vsub.f32 1.5, %v1842_v10  ;;  %v1626_v12 = vpop.xlane.xlu0 %1625 }
 0x409   : > { %v1825_v54 = vadd.f32 1e-05, %v1793_v15  ;;  %v7554_v13 = vmul.f32 0.015625, %v1626_v12  ;;  %v6311_v31 = vpop.eup %6310 }
 0x40a   : > { %v1690_v55 = vpop.xlane.xlu2 %1689  ;;  %v1844_v38 = vmul.f32 %v6309_v29, %v1843_v60  ;;  %v1850_v7 = vmul.f32 %v6311_v31, %v1824_v52  ;;  %vm1856_vm10 = vweird.f32 %v6311_v31 }
 0x40b   : > { %6312 = vrsqrt.f32 %v1825_v54  ;;  %v1762_v2 = vmul.f32 %v7554_v13, %v7554_v13  ;;  %v1746_v58 = vmul.f32 0.015625, %v1690_v55  ;;  %vm1857_vm12 = vmor %vm1855_vm11, %vm1856_vm10  ;;  %vm1865_vm14 = vweird.f32 %v1825_v54 }
 0x40c   : > { %v1851_v18 = vmul.f32 %v6311_v31, %v1850_v7  ;;  %v1848_v35 = vsel %vm1847_vm9, %v6309_v29, %v1844_v38 }
 0x40d   : > { %v1778_v43 = vsub.f32 %v1746_v58, %v1762_v2  ;;  %v1999_v45 = vmul.f32 %v1848_v35, %v1807_v40  ;;  %v1809_v2 = vsub.f32 %v7418_v22, %v7550_v50  ;;  %v1810_v22 = vsub.f32 %v7427_v41, %v7554_v13 }
 0x40e   : > { %v1852_v27 = vmul.f32 0.5, %v1851_v18 }
 0x40f   : > { %v1794_v30 = vmax.f32 %v1778_v43, 0.0  ;;  %v2016_v37 = vmul.f32 %v7565_v34, %v1999_v45 }
 0x410   : > { %v1629_v46 = vpop.xlane.xlu0 %1628  ;;  %v1853_v9 = vsub.f32 1.5, %v1852_v27 }
 0x411   : > { %v6313_v44 = vpop.eup %6312  ;;  %v7560_v42 = vmul.f32 0.015625, %v1629_v46  ;;  %v1826_v47 = vadd.f32 1e-05, %v1794_v30  ;;  %v7583_v14 = vadd.f32 %v7575_v32, %v2016_v37 }
 0x412   : > { %v1860_v49 = vmul.f32 %v6313_v44, %v1825_v54  ;;  %v1693_v59 = vpop.xlane.xlu2 %1692  ;;  %v1854_v62 = vmul.f32 %v6311_v31, %v1853_v9  ;;  %vm1866_vm13 = vweird.f32 %v6313_v44 }
 0x413   : > { %v1763_v26 = vmul.f32 %v7560_v42, %v7560_v42  ;;  %v1747_v3 = vmul.f32 0.015625, %v1693_v59  ;;  %6314 = vrsqrt.f32 %v1826_v47  ;;  %vm1867_vm15 = vmor %vm1865_vm14, %vm1866_vm13  ;;  %vm1875_vm2 = vweird.f32 %v1826_v47 }
 0x414   : > { %v1861_v61 = vmul.f32 %v6313_v44, %v1860_v49  ;;  %v1858_v56 = vsel %vm1857_vm12, %v6311_v31, %v1854_v62 }
 0x415   : > { %v1779_v53 = vsub.f32 %v1747_v3, %v1763_v26  ;;  %v2000_v33 = vmul.f32 %v1858_v56, %v1808_v6 }
 0x416   : > { %v1862_v28 = vmul.f32 0.5, %v1861_v61 }
 0x417   : > { %v1795_v11 = vmax.f32 %v1779_v53, 0.0  ;;  %v2017_v52 = vmul.f32 %v7565_v34, %v2000_v33 }
 0x418   : > { %v1863_v29 = vsub.f32 1.5, %v1862_v28  ;;  %v1632_v39 = vpop.xlane.xlu1 %1631 }
 0x419   : > { %v7578_v36 = vadd.f32 1e-05, %v1795_v11  ;;  %v7580_v24 = vmul.f32 0.015625, %v1632_v39  ;;  %v6315_v16 = vpop.eup %6314  ;;  %v7586_v48 = vadd.f32 %v7575_v32, %v2017_v52 }
 0x41a   : > { %v1696_v19 = vpop.xlane.xlu0 %1695  ;;  %v1864_v21 = vmul.f32 %v6313_v44, %v1863_v29  ;;  %v1870_v10 = vmul.f32 %v6315_v16, %v1826_v47  ;;  %vm1876_vm1 = vweird.f32 %v6315_v16 }
 0x41b   : > { %6316 = vrsqrt.f32 %v7578_v36  ;;  %v1764_v15 = vmul.f32 %v7580_v24, %v7580_v24  ;;  %v1748_v60 = vmul.f32 0.015625, %v1696_v19  ;;  %v2057_v12 = vpack.c.bf16 %v7586_v48, %v7583_v14  ;;  %vm1877_vm3 = vmor %vm1875_vm2, %vm1876_vm1 }
 0x41c   : > { %v1871_v31 = vmul.f32 %v6315_v16, %v1870_v10  ;;  %v1868_v7 = vsel %vm1867_vm15, %v6313_v44, %v1864_v21  ;;  %vm1885_vm5 = vweird.f32 %v7578_v36 }
 0x41d   : > { %v1780_v55 = vsub.f32 %v1748_v60, %v1764_v15  ;;  %5855 = vmatmul.msk.bf16.vlgmr.msrb.gmra.mxu0 %vm250_vm0, %v2057_v12  ;;  %v2001_v46 = vmul.f32 %v1868_v7, %v1809_v2  ;;  %v1811_v60 = vsub.f32 %v7436_v0, %v7560_v42  ;;  %v1812_v0 = vsub.f32 %v7445_v4, %v7580_v24 }
 0x41e   : > { %v1872_v38 = vmul.f32 0.5, %v1871_v31 }
 0x41f   : > { %v1796_v58 = vmax.f32 %v1780_v55, 0.0  ;;  %v2018_v3 = vmul.f32 %v7565_v34, %v2001_v46 }
 0x420   : > { %v1635_v18 = vpop.xlane.xlu1 %1634  ;;  %v1873_v35 = vsub.f32 1.5, %v1872_v38 }
 0x421   : > { %v6317_v43 = vpop.eup %6316  ;;  %v7596_v27 = vmul.f32 0.015625, %v1635_v18  ;;  %v1828_v54 = vadd.f32 1e-05, %v1796_v58  ;;  %v7610_v13 = vadd.f32 %v7575_v32, %v2018_v3 }
 0x422   : > { %v1880_v40 = vmul.f32 %v6317_v43, %v7578_v36  ;;  %v1699_v30 = vpop.xlane.xlu0 %1698  ;;  %v1874_v9 = vmul.f32 %v6315_v16, %v1873_v35  ;;  %vm1886_vm4 = vweird.f32 %v6317_v43 }
 0x423   : > { %v1765_v44 = vmul.f32 %v7596_v27, %v7596_v27  ;;  %v1749_v49 = vmul.f32 0.015625, %v1699_v30  ;;  %6318 = vrsqrt.f32 %v1828_v54  ;;  %vm1887_vm6 = vmor %vm1885_vm5, %vm1886_vm4  ;;  %vm1895_vm8 = vweird.f32 %v1828_v54 }
 0x424   : > { %v1881_v50 = vmul.f32 %v6317_v43, %v1880_v40  ;;  %v1878_v45 = vsel %vm1877_vm3, %v6315_v16, %v1874_v9 }
 0x425   : > { %v1781_v59 = vsub.f32 %v1749_v49, %v1765_v44  ;;  %v2002_v26 = vmul.f32 %v1878_v45, %v1810_v22 }
 0x426   : > { %v1882_v62 = vmul.f32 0.5, %v1881_v50 }
 0x427   : > { %v1797_v6 = vmax.f32 %v1781_v59, 0.0  ;;  %v2019_v47 = vmul.f32 %v7565_v34, %v2002_v26 }
 0x428   : > { %v1883_v61 = vsub.f32 1.5, %v1882_v62  ;;  %v1638_v56 = vpop.xlane.xlu2 %1637 }
 0x429   : > { %v7605_v53 = vadd.f32 1e-05, %v1797_v6  ;;  %v7607_v28 = vmul.f32 0.015625, %v1638_v56  ;;  %v6319_v33 = vpop.eup %6318  ;;  %v7613_v37 = vadd.f32 %v7575_v32, %v2019_v47 }
 0x42a   : > { %v1702_v41 = vpop.xlane.xlu1 %1701  ;;  %v1884_v11 = vmul.f32 %v6317_v43, %v1883_v61  ;;  %v1890_v29 = vmul.f32 %v6319_v33, %v1828_v54  ;;  %vm1896_vm7 = vweird.f32 %v6319_v33 }
 0x42b   : > { %6320 = vrsqrt.f32 %v7605_v53  ;;  %v1766_v39 = vmul.f32 %v7607_v28, %v7607_v28  ;;  %v1750_v52 = vmul.f32 0.015625, %v1702_v41  ;;  %v2058_v16 = vpack.c.bf16 %v7613_v37, %v7610_v13  ;;  %vm1897_vm9 = vmor %vm1895_vm8, %vm1896_vm7 }
 0x42c   : > { %v1891_v19 = vmul.f32 %v6319_v33, %v1890_v29  ;;  %v1888_v15 = vsel %vm1887_vm6, %v6317_v43, %v1884_v11  ;;  %vm1905_vm11 = vweird.f32 %v7605_v53 }
 0x42d   : > { %v1782_v21 = vsub.f32 %v1750_v52, %v1766_v39  ;;  %5856 = vmatmul.msk.bf16.gmra.mxu0 %vm250_vm0, %v2058_v16  ;;  %v2003_v18 = vmul.f32 %v1888_v15, %v1811_v60  ;;  %v1813_v52 = vsub.f32 %v7454_v5, %v7596_v27  ;;  %v1814_v5 = vsub.f32 %v7463_v23, %v7607_v28 }
 0x42e   : > { %v1892_v10 = vmul.f32 0.5, %v1891_v19 }
 0x42f   : > { %v1798_v12 = vmax.f32 %v1782_v21, 0.0  ;;  %v2020_v49 = vmul.f32 %v7565_v34, %v2003_v18 }
 0x430   : > { %v1893_v38 = vsub.f32 1.5, %v1892_v10 }
 0x431   : > { %v1641_v31 = vpop.xlane.xlu2 %1640  ;;  %v6321_v55 = vpop.eup %6320  ;;  %v1830_v36 = vadd.f32 1e-05, %v1798_v12  ;;  %v7638_v24 = vadd.f32 %v7575_v32, %v2020_v49 }
 0x432   : > { %v7624_v7 = vmul.f32 0.015625, %v1641_v31  ;;  %v1900_v2 = vmul.f32 %v6321_v55, %v7605_v53  ;;  %v1894_v35 = vmul.f32 %v6319_v33, %v1893_v38  ;;  %vm1906_vm10 = vweird.f32 %v6321_v55 }
 0x433   : > { %v1705_v58 = vpop.xlane.xlu1 %1704  ;;  %6322 = vrsqrt.f32 %v1830_v36  ;;  %vm1907_vm12 = vmor %vm1905_vm11, %vm1906_vm10  ;;  %vm1915_vm14 = vweird.f32 %v1830_v36 }
 0x434   : > { %v1767_v43 = vmul.f32 %v7624_v7, %v7624_v7  ;;  %v1751_v40 = vmul.f32 0.015625, %v1705_v58  ;;  %v1901_v42 = vmul.f32 %v6321_v55, %v1900_v2  ;;  %v1898_v46 = vsel %vm1897_vm9, %v6319_v33, %v1894_v35  ;;  %v6140_v58 = vld [vmem:[#allocation2 + $0xf8] sm:$0xff] }
 0x435   : > { %v2004_v44 = vmul.f32 %v1898_v46, %v1812_v0  ;;  %2254 = vmatpush.bf16.msrb.mxu1 %v6140_v58 }
 0x436   : > { %v1783_v30 = vsub.f32 %v1751_v40, %v1767_v43  ;;  %v1902_v9 = vmul.f32 0.5, %v1901_v42 }
 0x437   : > { %v2021_v54 = vmul.f32 %v7565_v34, %v2004_v44 }
 0x438   : > { %v1799_v22 = vmax.f32 %v1783_v30, 0.0  ;;  %v1903_v50 = vsub.f32 1.5, %v1902_v9 }
 0x439   : > { %v1644_v59 = vpop.xlane.xlu0 %1643  ;;  %v6323_v26 = vpop.eup %6322  ;;  %v7641_v3 = vadd.f32 %v7575_v32, %v2021_v54 }
 0x43a   : > { %v7633_v45 = vadd.f32 1e-05, %v1799_v22  ;;  %v7635_v62 = vmul.f32 0.015625, %v1644_v59  ;;  %v1904_v6 = vmul.f32 %v6321_v55, %v1903_v50  ;;  %v1910_v61 = vmul.f32 %v6323_v26, %v1830_v36 }
 0x43b   : > { %v1708_v4 = vpop.xlane.xlu2 %1707  ;;  %v2059_v33 = vpack.c.bf16 %v7641_v3, %v7638_v24  ;;  %vm1916_vm13 = vweird.f32 %v6323_v26 }
 0x43c   : > { %6324 = vrsqrt.f32 %v7633_v45  ;;  %v1768_v56 = vmul.f32 %v7635_v62, %v7635_v62  ;;  %v1752_v47 = vmul.f32 0.015625, %v1708_v4  ;;  %v1911_v41 = vmul.f32 %v6323_v26, %v1910_v61  ;;  %vm1917_vm15 = vmor %vm1915_vm14, %vm1916_vm13 }
 0x43d   : > { %5857 = vmatmul.msk.bf16.gmra.mxu0 %vm250_vm0, %v2059_v33  ;;  %v1908_v39 = vsel %vm1907_vm12, %v6321_v55, %v1904_v6  ;;  %vm1925_vm2 = vweird.f32 %v7633_v45 }
 0x43e   : > { %v1784_v11 = vsub.f32 %v1752_v47, %v1768_v56  ;;  %v1912_v29 = vmul.f32 0.5, %v1911_v41  ;;  %v2005_v31 = vmul.f32 %v1908_v39, %v1813_v52  ;;  %v6139_v47 = vld [vmem:[#allocation2 + $0xf0] sm:$0xff] }
 0x43f   : > { %2255 = vmatpush.bf16.msrb.mxu1 %v6139_v47 }
 0x440   : > { %v1800_v16 = vmax.f32 %v1784_v11, 0.0  ;;  %v1913_v10 = vsub.f32 1.5, %v1912_v29  ;;  %v2022_v0 = vmul.f32 %v7565_v34, %v2005_v31  ;;  %v1815_v29 = vsub.f32 %v7472_v8, %v7624_v7 }
 0x441   : > { %v1647_v19 = vpop.xlane.xlu0 %1646 }
 0x442   : > { %v6325_v21 = vpop.eup %6324  ;;  %v7652_v15 = vmul.f32 0.015625, %v1647_v19  ;;  %v1832_v53 = vadd.f32 1e-05, %v1800_v16  ;;  %v1914_v38 = vmul.f32 %v6323_v26, %v1913_v10  ;;  %v7666_v49 = vadd.f32 %v7575_v32, %v2022_v0 }
 0x443   : > { %v1920_v60 = vmul.f32 %v6325_v21, %v7633_v45  ;;  %v1711_v12 = vpop.xlane.xlu2 %1710  ;;  %vm1926_vm1 = vweird.f32 %v6325_v21 }
 0x444   : > { %v1769_v55 = vmul.f32 %v7652_v15, %v7652_v15  ;;  %v1753_v2 = vmul.f32 0.015625, %v1711_v12  ;;  %6326 = vrsqrt.f32 %v1832_v53  ;;  %v1918_v35 = vsel %vm1917_vm15, %v6323_v26, %v1914_v38  ;;  %vm1927_vm3 = vmor %vm1925_vm2, %vm1926_vm1 }
 0x445   : > { %v1921_v27 = vmul.f32 %v6325_v21, %v1920_v60  ;;  %v2006_v40 = vmul.f32 %v1918_v35, %v1814_v5  ;;  %vm1935_vm5 = vweird.f32 %v1832_v53 }
 0x446   : > { %v1785_v18 = vsub.f32 %v1753_v2, %v1769_v55 }
 0x447   : > { %v1922_v43 = vmul.f32 0.5, %v1921_v27  ;;  %v2023_v46 = vmul.f32 %v7565_v34, %v2006_v40  ;;  %v6138_v27 = vld [vmem:[#allocation2 + $0xe8] sm:$0xff] }
 0x448   : > { %v1801_v42 = vmax.f32 %v1785_v18, 0.0  ;;  %2256 = vmatpush.bf16.msrb.mxu1 %v6138_v27 }
 0x449   : > { %v1923_v36 = vsub.f32 1.5, %v1922_v43  ;;  %v1650_v30 = vpop.xlane.xlu1 %1649  ;;  %v7669_v22 = vadd.f32 %v7575_v32, %v2023_v46 }
 0x44a   : > { %v7661_v9 = vadd.f32 1e-05, %v1801_v42  ;;  %v7663_v44 = vmul.f32 0.015625, %v1650_v30  ;;  %v6327_v23 = vpop.eup %6326 }
 0x44b   : > { %v1714_v28 = vpop.xlane.xlu0 %1713  ;;  %v1930_v50 = vmul.f32 %v6327_v23, %v1832_v53  ;;  %v1924_v59 = vmul.f32 %v6325_v21, %v1923_v36  ;;  %v2060_v4 = vpack.c.bf16 %v7669_v22, %v7666_v49  ;;  %vm1936_vm4 = vweird.f32 %v6327_v23 }
 0x44c   : > { %6328 = vrsqrt.f32 %v7661_v9  ;;  %v1770_v54 = vmul.f32 %v7663_v44, %v7663_v44  ;;  %v1754_v26 = vmul.f32 0.015625, %v1714_v28  ;;  %vm1937_vm6 = vmor %vm1935_vm5, %vm1936_vm4  ;;  %vm1945_vm8 = vweird.f32 %v7661_v9 }
 0x44d   : > { %v1931_v6 = vmul.f32 %v6327_v23, %v1930_v50  ;;  %5858 = vmatmul.msk.bf16.gmra.mxu0 %vm250_vm0, %v2060_v4  ;;  %v1928_v41 = vsel %vm1927_vm3, %v6325_v21, %v1924_v59  ;;  %v1816_v21 = vsub.f32 %v7481_v57, %v7635_v62  ;;  %v1817_v4 = vsub.f32 %v7490_v63, %v7652_v15 }
 0x44e   : > { %v1786_v61 = vsub.f32 %v1754_v26, %v1770_v54  ;;  %v2007_v10 = vmul.f32 %v1928_v41, %v1815_v29  ;;  %v1818_v29 = vsub.f32 %v7499_v25, %v7663_v44  ;;  %v6137_v44 = vld [vmem:[#allocation2 + $0xe0] sm:$0xff] }
 0x44f   : > { %v1932_v56 = vmul.f32 0.5, %v1931_v6  ;;  %2257 = vmatpush.bf16.msrb.mxu1 %v6137_v44 }
 0x450   : > { %v1802_v33 = vmax.f32 %v1786_v61, 0.0  ;;  %v2024_v53 = vmul.f32 %v7565_v34, %v2007_v10 }
 0x451   : > { %v1933_v39 = vsub.f32 1.5, %v1932_v56 }
 0x452   : > { %v6329_v11 = vpop.eup %6328  ;;  %v1834_v16 = vadd.f32 1e-05, %v1802_v33  ;;  %v7690_v0 = vadd.f32 %v7575_v32, %v2024_v53 }
 0x453   : > { %v1940_v52 = vmul.f32 %v6329_v11, %v7661_v9  ;;  %v1934_v19 = vmul.f32 %v6327_v23, %v1933_v39  ;;  %vm1946_vm7 = vweird.f32 %v6329_v11 }
 0x454   : > { %v1653_v45 = vpop.xlane.xlu1 %1652  ;;  %6330 = vrsqrt.f32 %v1834_v16  ;;  %vm1947_vm9 = vmor %vm1945_vm8, %vm1946_vm7  ;;  %vm1955_vm11 = vweird.f32 %v1834_v16 }
 0x455   : > { %v1941_v60 = vmul.f32 %v6329_v11, %v1940_v52  ;;  %v7681_v12 = vmul.f32 0.015625, %v1653_v45  ;;  %v1938_v8 = vsel %vm1937_vm6, %v6327_v23, %v1934_v19 }
 0x456   : > { %v1717_v31 = vpop.xlane.xlu0 %1716  ;;  %v2008_v2 = vmul.f32 %v1938_v8, %v1816_v21 }
 0x457   : > { %v1942_v7 = vmul.f32 0.5, %v1941_v60  ;;  %v1771_v38 = vmul.f32 %v7681_v12, %v7681_v12  ;;  %v1755_v55 = vmul.f32 0.015625, %v1717_v31 }
 0x458   : > { %v2025_v18 = vmul.f32 %v7565_v34, %v2008_v2 }
 0x459   : > { %v1943_v58 = vsub.f32 1.5, %v1942_v7  ;;  %v1787_v5 = vsub.f32 %v1755_v55, %v1771_v38  ;;  %v6136_v55 = vld [vmem:[#allocation2 + $0xd8] sm:$0xff] }
 0x45a   : > { %v6331_v35 = vpop.eup %6330  ;;  %v7693_v42 = vadd.f32 %v7575_v32, %v2025_v18  ;;  %2258 = vmatpush.bf16.msrb.mxu1 %v6136_v55 }
 0x45b   : > { %v1803_v43 = vmax.f32 %v1787_v5, 0.0  ;;  %v1944_v57 = vmul.f32 %v6329_v11, %v1943_v58  ;;  %v1950_v62 = vmul.f32 %v6331_v35, %v1834_v16  ;;  %vm1956_vm10 = vweird.f32 %v6331_v35 }
 0x45c   : > { %v1656_v40 = vpop.xlane.xlu2 %1655  ;;  %v2061_v23 = vpack.c.bf16 %v7693_v42, %v7690_v0  ;;  %vm1957_vm12 = vmor %vm1955_vm11, %vm1956_vm10 }
 0x45d   : > { %v7695_v36 = vadd.f32 1e-05, %v1803_v43  ;;  %v7697_v30 = vmul.f32 0.015625, %v1656_v40  ;;  %v1951_v46 = vmul.f32 %v6331_v35, %v1950_v62  ;;  %v1948_v26 = vsel %vm1947_vm9, %v6329_v11, %v1944_v57  ;;  %v6135_v62 = vld [vmem:[#allocation2 + $0xd0] sm:$0xff] }
 0x45e   : > { %v1720_v28 = vpop.xlane.xlu1 %1719  ;;  %5859 = vmatmul.msk.bf16.gmra.mxu0 %vm250_vm0, %v2061_v23  ;;  %v2009_v61 = vmul.f32 %v1948_v26, %v1817_v4  ;;  %2259 = vmatpush.bf16.msrb.mxu1 %v6135_v62  ;;  %v1819_v26 = vsub.f32 %v7508_v20, %v7681_v12 }
 0x45f   : > { %6332 = vrsqrt.f32 %v7695_v36  ;;  %v1772_v50 = vmul.f32 %v7697_v30, %v7697_v30  ;;  %v1952_v59 = vmul.f32 0.5, %v1951_v46  ;;  %v1756_v54 = vmul.f32 0.015625, %v1720_v28 }
 0x460   : > { %v2026_v16 = vmul.f32 %v7565_v34, %v2009_v61  ;;  %vm1965_vm14 = vweird.f32 %v7695_v36 }
 0x461   : > { %v1953_v9 = vsub.f32 1.5, %v1952_v59  ;;  %v1788_v6 = vsub.f32 %v1756_v54, %v1772_v50  ;;  %v6134_v54 = vld [vmem:[#allocation2 + $0xc8] sm:$0xff] }
 0x462   : > { %v7718_v7 = vadd.f32 %v7575_v32, %v2026_v16  ;;  %2260 = vmatpush.bf16.msrb.mxu1 %v6134_v54 }
 0x463   : > { %v1954_v56 = vmul.f32 %v6331_v35, %v1953_v9  ;;  %v1804_v47 = vmax.f32 %v1788_v6, 0.0 }
 0x464   : > { %v1659_v33 = vpop.xlane.xlu2 %1658 }
 0x465   : > { %v6333_v41 = vpop.eup %6332  ;;  %v7710_v39 = vmul.f32 0.015625, %v1659_v33  ;;  %v1836_v52 = vadd.f32 1e-05, %v1804_v47  ;;  %v1958_v63 = vsel %vm1957_vm12, %v6331_v35, %v1954_v56 }
 0x466   : > { %v1960_v11 = vmul.f32 %v6333_v41, %v7695_v36  ;;  %v1723_v19 = vpop.xlane.xlu1 %1722  ;;  %v2010_v10 = vmul.f32 %v1958_v63, %v1818_v29  ;;  %vm1966_vm13 = vweird.f32 %v6333_v41  ;;  %v1820_v36 = vsub.f32 %v7517_v1, %v7697_v30  ;;  %v6133_v30 = vld [vmem:[#allocation2 + $0xc0] sm:$0xff] }
 0x467   : > { %v1773_v15 = vmul.f32 %v7710_v39, %v7710_v39  ;;  %v1757_v45 = vmul.f32 0.015625, %v1723_v19  ;;  %6334 = vrsqrt.f32 %v1836_v52  ;;  %vm1967_vm15 = vmor %vm1965_vm14, %vm1966_vm13  ;;  %vm1975_vm2 = vweird.f32 %v1836_v52  ;;  %2261 = vmatpush.bf16.msrb.mxu1 %v6133_v30 }
 0x468   : > { %v1961_v60 = vmul.f32 %v6333_v41, %v1960_v11  ;;  %v2027_v25 = vmul.f32 %v7565_v34, %v2010_v10  ;;  %v1821_v44 = vsub.f32 %v7526_v17, %v7710_v39 }
 0x469   : > { %v1789_v21 = vsub.f32 %v1757_v45, %v1773_v15 }
 0x46a   : > { %v1962_v31 = vmul.f32 0.5, %v1961_v60  ;;  %v7721_v38 = vadd.f32 %v7575_v32, %v2027_v25 }
 0x46b   : > { %v1805_v8 = vmax.f32 %v1789_v21, 0.0 }
 0x46c   : > { %v1963_v2 = vsub.f32 1.5, %v1962_v31  ;;  %v1662_v53 = vpop.xlane.xlu0 %1661  ;;  %v2062_v27 = vpack.c.bf16 %v7721_v38, %v7718_v7 }
 0x46d   : > { %v1837_v58 = vadd.f32 1e-05, %v1805_v8  ;;  %v7723_v5 = vmul.f32 0.015625, %v1662_v53  ;;  %v6335_v18 = vpop.eup %6334 }
 0x46e   : > { %v1726_v35 = vpop.xlane.xlu2 %1725  ;;  %v1964_v43 = vmul.f32 %v6333_v41, %v1963_v2  ;;  %v1970_v57 = vmul.f32 %v6335_v18, %v1836_v52  ;;  %5860 = vmatmul.msk.bf16.gmra.mxu0 %vm250_vm0, %v2062_v27  ;;  %vm1976_vm1 = vweird.f32 %v6335_v18 }
 0x46f   : > { %6336 = vrsqrt.f32 %v1837_v58  ;;  %v1774_v40 = vmul.f32 %v7723_v5, %v7723_v5  ;;  %v1758_v46 = vmul.f32 0.015625, %v1726_v35  ;;  %vm1977_vm3 = vmor %vm1975_vm2, %vm1976_vm1  ;;  %vm1985_vm5 = vweird.f32 %v1837_v58 }
 0x470   : > { %v1971_v23 = vmul.f32 %v6335_v18, %v1970_v57  ;;  %v1968_v50 = vsel %vm1967_vm15, %v6333_v41, %v1964_v43  ;;  %v1822_v2 = vsub.f32 %v7539_v51, %v7723_v5  ;;  %v6223_v51 = vld [vmem:[%s9551_s2 + $0xd] ss:$0 sm:$0xff] }
 0x471   : > { %v1790_v28 = vsub.f32 %v1758_v46, %v1774_v40  ;;  %v2011_v47 = vmul.f32 %v1968_v50, %v1819_v26 }
 0x472   : > { %v1972_v59 = vmul.f32 0.5, %v1971_v23 }
 0x473   : > { %v1806_v4 = vmax.f32 %v1790_v28, 0.0  ;;  %v2028_v20 = vmul.f32 %v7565_v34, %v2011_v47 }
 0x474   : > { %v1973_v6 = vsub.f32 1.5, %v1972_v59 }
 0x475   : > { %v6337_v9 = vpop.eup %6336  ;;  %v1838_v56 = vadd.f32 1e-05, %v1806_v4  ;;  %v7738_v45 = vadd.f32 %v7575_v32, %v2028_v20 }
 0x476   : > { %v1980_v61 = vmul.f32 %v6337_v9, %v1837_v58  ;;  %v1974_v33 = vmul.f32 %v6335_v18, %v1973_v6  ;;  %vm1986_vm4 = vweird.f32 %v6337_v9 }
 0x477   : > { %6338 = vrsqrt.f32 %v1838_v56  ;;  %vm1987_vm6 = vmor %vm1985_vm5, %vm1986_vm4  ;;  %vm1995_vm8 = vweird.f32 %v1838_v56 }
 0x478   : > { %v1981_v41 = vmul.f32 %v6337_v9, %v1980_v61  ;;  %v1978_v29 = vsel %vm1977_vm3, %v6335_v18, %v1974_v33 }
 0x479   : > { %v2012_v19 = vmul.f32 %v1978_v29, %v1820_v36 }
 0x47a   : > { %v1982_v11 = vmul.f32 0.5, %v1981_v41 }
 0x47b   : > { %v2029_v63 = vmul.f32 %v7565_v34, %v2012_v19 }
 0x47c   : > { %v1983_v12 = vsub.f32 1.5, %v1982_v11 }
 0x47d   : > { %v6339_v15 = vpop.eup %6338  ;;  %v7741_v52 = vadd.f32 %v7575_v32, %v2029_v63 }
 0x47e   : > { %v1984_v10 = vmul.f32 %v6337_v9, %v1983_v12  ;;  %v1990_v1 = vmul.f32 %v6339_v15, %v1838_v56  ;;  %vm1996_vm7 = vweird.f32 %v6339_v15 }
 0x47f   : > { %v2063_v16 = vpack.c.bf16 %v7741_v52, %v7738_v45  ;;  %vm1997_vm9 = vmor %vm1995_vm8, %vm1996_vm7 }
 0x480   : > { %v1991_v60 = vmul.f32 %v6339_v15, %v1990_v1  ;;  %v1988_v21 = vsel %vm1987_vm6, %v6337_v9, %v1984_v10 }
 0x481   : > { %5861 = vmatmul.msk.bf16.gmra.mxu0 %vm250_vm0, %v2063_v16  ;;  %v2013_v8 = vmul.f32 %v1988_v21, %v1821_v44 }
 0x482   : > { %v1992_v25 = vmul.f32 0.5, %v1991_v60 }
 0x483   : > { %v2030_v27 = vmul.f32 %v7565_v34, %v2013_v8 }
 0x484   : > { %v1993_v31 = vsub.f32 1.5, %v1992_v25 }
 0x485   : > { %v7753_v35 = vadd.f32 %v7575_v32, %v2030_v27 }
 0x486   : > { %v1994_v55 = vmul.f32 %v6339_v15, %v1993_v31 }
 0x488   : > { %v1998_v53 = vsel %vm1997_vm9, %v6339_v15, %v1994_v55 }
 0x489   : > { %v2014_v58 = vmul.f32 %v1998_v53, %v1822_v2 }
 0x48b   : > { %v2031_v18 = vmul.f32 %v7565_v34, %v2014_v58 }
 0x48d   : > { %v7756_v17 = vadd.f32 %v7575_v32, %v2031_v18 }
 0x48f   : > { %v2064_v39 = vpack.c.bf16 %v7756_v17, %v7753_v35 }
 0x491   : > { %5862 = vmatmul.msk.bf16.gmra.mxu0 %vm250_vm0, %v2064_v39 }
 0x49a   : > { %v2124_v43 = vpop.f32.mrf.mxu0 }
 0x49b   : > { %v2125_v5 = vadd.f32 %v6223_v51, %v2124_v43 }
 0x49d   : > { %v2164_v34 = vmax.f32 %v2125_v5, 0.0 }
 0x4a2   : > { %v2126_v57 = vpop.f32.mrf.mxu0 }
 0x4a3   : > { %v2127_v62 = vadd.f32 %v6223_v51, %v2126_v57 }
 0x4a5   : > { %v2165_v40 = vmax.f32 %v2127_v62, 0.0 }
 0x4a7   : > { %v2196_v46 = vpack.c.bf16 %v2165_v40, %v2164_v34 }
 0x4a9   : > { %2262 = vmatmul.bf16.vlgmr.msrb.gmra.mxu1 %v2196_v46 }
 0x4aa   : > { %v2129_v23 = vpop.f32.mrf.mxu0 }
 0x4ab   : > { %v2130_v32 = vadd.f32 %v6223_v51, %v2129_v23 }
 0x4ad   : > { %v2166_v59 = vmax.f32 %v2130_v32, 0.0 }
 0x4b2   : > { %v2131_v28 = vpop.f32.mrf.mxu0 }
 0x4b3   : > { %v2132_v50 = vadd.f32 %v6223_v51, %v2131_v28  ;;  %v7767_v28 = vld [vmem:[%s9551_s2 + $0xe] ss:$0 sm:$0xff] }
 0x4b5   : > { %v2167_v54 = vmax.f32 %v2132_v50, 0.0 }
 0x4b7   : > { %v2197_v26 = vpack.c.bf16 %v2167_v54, %v2166_v59 }
 0x4b9   : > { %2267 = vmatmul.bf16.gmra.mxu1 %v2197_v26 }
 0x4ba   : > { %v2134_v4 = vpop.f32.mrf.mxu0 }
 0x4bb   : > { %v2135_v9 = vadd.f32 %v6223_v51, %v2134_v4 }
 0x4bd   : > { %v2168_v56 = vmax.f32 %v2135_v9, 0.0 }
 0x4c2   : > { %v2136_v6 = vpop.f32.mrf.mxu0 }
 0x4c3   : > { %v2137_v61 = vadd.f32 %v6223_v51, %v2136_v6 }
 0x4c5   : > { %v2169_v47 = vmax.f32 %v2137_v61, 0.0 }
 0x4c7   : > { %v2198_v33 = vpack.c.bf16 %v2169_v47, %v2168_v56 }
 0x4c9   : > { %2272 = vmatmul.bf16.gmra.mxu1 %v2198_v33 }
 0x4ca   : > { %v2139_v36 = vpop.f32.mrf.mxu0 }
 0x4cb   : > { %v2140_v41 = vadd.f32 %v6223_v51, %v2139_v36 }
 0x4cd   : > { %v2170_v19 = vmax.f32 %v2140_v41, 0.0 }
 0x4d2   : > { %v2141_v29 = vpop.f32.mrf.mxu0 }
 0x4d3   : > { %v2142_v11 = vadd.f32 %v6223_v51, %v2141_v29 }
 0x4d5   : > { %v2171_v20 = vmax.f32 %v2142_v11, 0.0 }
 0x4d7   : > { %v2199_v12 = vpack.c.bf16 %v2171_v20, %v2170_v19 }
 0x4d9   : > { %2277 = vmatmul.bf16.gmra.mxu1 %v2199_v12 }
 0x4db   : > { %v2144_v63 = vpop.f32.mrf.mxu0 }
 0x4dc   : > { %v2145_v15 = vadd.f32 %v6223_v51, %v2144_v63 }
 0x4de   : > { %v2172_v30 = vmax.f32 %v2145_v15, 0.0 }
 0x4e3   : > { %v2146_v10 = vpop.f32.mrf.mxu0 }
 0x4e4   : > { %v2147_v1 = vadd.f32 %v6223_v51, %v2146_v10 }
 0x4e6   : > { %v2173_v16 = vmax.f32 %v2147_v1, 0.0 }
 0x4e8   : > { %v2200_v60 = vpack.c.bf16 %v2173_v16, %v2172_v30 }
 0x4ea   : > { %2282 = vmatmul.bf16.gmra.mxu1 %v2200_v60 }
 0x4eb   : > { %v2149_v21 = vpop.f32.mrf.mxu0 }
 0x4ec   : > { %v2150_v25 = vadd.f32 %v6223_v51, %v2149_v21 }
 0x4ee   : > { %v2174_v8 = vmax.f32 %v2150_v25, 0.0 }
 0x4f3   : > { %v2151_v44 = vpop.f32.mrf.mxu0 }
 0x4f4   : > { %v2152_v31 = vadd.f32 %v6223_v51, %v2151_v44 }
 0x4f6   : > { %v2175_v55 = vmax.f32 %v2152_v31, 0.0  ;;  %v6144_v31 = vld [vmem:[#allocation2 + $0x118] sm:$0xff] }
 0x4f7   : > { %2825 = vmatpush.bf16.msrb.mxu3 %v6144_v31 }
 0x4f8   : > { %v2201_v2 = vpack.c.bf16 %v2175_v55, %v2174_v8 }
 0x4fa   : > { %2287 = vmatmul.bf16.gmra.mxu1 %v2201_v2 }
 0x4fe   : > { %v2154_v53 = vpop.f32.mrf.mxu0 }
 0x4ff   : > { %v2155_v58 = vadd.f32 %v6223_v51, %v2154_v53 }
 0x501   : > { %v2176_v39 = vmax.f32 %v2155_v58, 0.0 }
 0x506   : > { %v2156_v27 = vpop.f32.mrf.mxu0 }
 0x507   : > { %v2157_v18 = vadd.f32 %v6223_v51, %v2156_v27 }
 0x509   : > { %v2177_v43 = vmax.f32 %v2157_v18, 0.0 }
 0x50b   : > { %v2202_v5 = vpack.c.bf16 %v2177_v43, %v2176_v39 }
 0x50d   : > { %2292 = vmatmul.bf16.gmra.mxu1 %v2202_v5 }
 0x50e   : > { %v2159_v57 = vpop.f32.mrf.mxu0 }
 0x50f   : > { %v2160_v62 = vadd.f32 %v6223_v51, %v2159_v57 }
 0x511   : > { %v2178_v46 = vmax.f32 %v2160_v62, 0.0 }
 0x516   : > { %v2161_v34 = vpop.f32.mrf.mxu0 }
 0x517   : > { %v2162_v40 = vadd.f32 %v6223_v51, %v2161_v34 }
 0x519   : > { %v2179_v23 = vmax.f32 %v2162_v40, 0.0  ;;  %v6143_v40 = vld [vmem:[#allocation2 + $0x110] sm:$0xff] }
 0x51a   : > { %2826 = vmatpush.bf16.msrb.mxu3 %v6143_v40 }
 0x51b   : > { %v2203_v32 = vpack.c.bf16 %v2179_v23, %v2178_v46 }
 0x51d   : > { %2297 = vmatmul.bf16.gmra.mxu1 %v2203_v32 }
 0x526   : > { %v2263_v50 = vpop.f32.mrf.mxu1 }
 0x527   : > { %v2264_v59 = vadd.f32 %v7767_v28, %v2263_v50 }
 0x529   : > { %v7771_v54 = vadd.f32 %v2264_v59, %v7583_v14 }
 0x52b   : > { %v2321_v26 = vsel %vm250_vm0, %v7771_v54, 0.0  ;;  %v2369_v51 = vmul.f32 %v7771_v54, %v7771_v54 }
 0x52c   : > { %2322 = vadd.xlane.f32.xlu0 %v2321_v26 }
 0x52d   : > { %v2385_v4 = vsel %vm250_vm0, %v2369_v51, 0.0 }
 0x52e   : > { %v2265_v9 = vpop.f32.mrf.mxu1  ;;  %2386 = vadd.xlane.f32.xlu2 %v2385_v4 }
 0x52f   : > { %v2266_v6 = vadd.f32 %v7767_v28, %v2265_v9 }
 0x531   : > { %v7780_v61 = vadd.f32 %v2266_v6, %v7586_v48 }
 0x533   : > { %v2324_v14 = vsel %vm250_vm0, %v7780_v61, 0.0  ;;  %v2370_v56 = vmul.f32 %v7780_v61, %v7780_v61 }
 0x534   : > { %2325 = vadd.xlane.f32.xlu1 %v2324_v14 }
 0x535   : > { %v2388_v47 = vsel %vm250_vm0, %v2370_v56, 0.0 }
 0x536   : > { %2389 = vadd.xlane.f32.xlu0 %v2388_v47  ;;  %v2268_v33 = vpop.f32.mrf.mxu1 }
 0x537   : > { %v2269_v36 = vadd.f32 %v7767_v28, %v2268_v33 }
 0x539   : > { %v7789_v41 = vadd.f32 %v2269_v36, %v7610_v13 }
 0x53b   : > { %v2327_v48 = vsel %vm250_vm0, %v7789_v41, 0.0  ;;  %v2371_v29 = vmul.f32 %v7789_v41, %v7789_v41 }
 0x53c   : > { %2328 = vadd.xlane.f32.xlu1 %v2327_v48 }
 0x53d   : > { %v2391_v11 = vsel %vm250_vm0, %v2371_v29, 0.0 }
 0x53e   : > { %v2270_v19 = vpop.f32.mrf.mxu1  ;;  %2392 = vadd.xlane.f32.xlu0 %v2391_v11  ;;  %v6142_v11 = vld [vmem:[#allocation2 + $0x108] sm:$0xff] }
 0x53f   : > { %v2271_v20 = vadd.f32 %v7767_v28, %v2270_v19  ;;  %2827 = vmatpush.bf16.msrb.mxu3 %v6142_v11 }
 0x541   : > { %v7798_v12 = vadd.f32 %v2271_v20, %v7613_v37 }
 0x543   : > { %v2330_v13 = vsel %vm250_vm0, %v7798_v12, 0.0  ;;  %v2372_v63 = vmul.f32 %v7798_v12, %v7798_v12 }
 0x544   : > { %2331 = vadd.xlane.f32.xlu2 %v2330_v13 }
 0x545   : > { %v2394_v15 = vsel %vm250_vm0, %v2372_v63, 0.0 }
 0x546   : > { %2395 = vadd.xlane.f32.xlu1 %v2394_v15  ;;  %v2273_v10 = vpop.f32.mrf.mxu1 }
 0x547   : > { %v2274_v1 = vadd.f32 %v7767_v28, %v2273_v10 }
 0x549   : > { %v7807_v30 = vadd.f32 %v2274_v1, %v7638_v24 }
 0x54b   : > { %v2333_v37 = vsel %vm250_vm0, %v7807_v30, 0.0  ;;  %v2373_v16 = vmul.f32 %v7807_v30, %v7807_v30 }
 0x54c   : > { %2334 = vadd.xlane.f32.xlu2 %v2333_v37 }
 0x54d   : > { %v2397_v60 = vsel %vm250_vm0, %v2373_v16, 0.0 }
 0x54e   : > { %v2275_v21 = vpop.f32.mrf.mxu1  ;;  %2398 = vadd.xlane.f32.xlu1 %v2397_v60 }
 0x54f   : > { %v2276_v25 = vadd.f32 %v7767_v28, %v2275_v21 }
 0x551   : > { %v7816_v44 = vadd.f32 %v2276_v25, %v7641_v3 }
 0x553   : > { %v2336_v24 = vsel %vm250_vm0, %v7816_v44, 0.0  ;;  %v2374_v8 = vmul.f32 %v7816_v44, %v7816_v44 }
 0x554   : > { %2337 = vadd.xlane.f32.xlu0 %v2336_v24 }
 0x555   : > { %v2400_v55 = vsel %vm250_vm0, %v2374_v8, 0.0 }
 0x556   : > { %2401 = vadd.xlane.f32.xlu2 %v2400_v55  ;;  %v2278_v2 = vpop.f32.mrf.mxu1 }
 0x557   : > { %v2279_v53 = vadd.f32 %v7767_v28, %v2278_v2 }
 0x559   : > { %v7825_v58 = vadd.f32 %v2279_v53, %v7666_v49 }
 0x55b   : > { %v2339_v3 = vsel %vm250_vm0, %v7825_v58, 0.0  ;;  %v2375_v27 = vmul.f32 %v7825_v58, %v7825_v58 }
 0x55c   : > { %2340 = vadd.xlane.f32.xlu0 %v2339_v3 }
 0x55d   : > { %v2403_v18 = vsel %vm250_vm0, %v2375_v27, 0.0 }
 0x55e   : > { %v2280_v39 = vpop.f32.mrf.mxu1  ;;  %2404 = vadd.xlane.f32.xlu2 %v2403_v18 }
 0x55f   : > { %v2281_v43 = vadd.f32 %v7767_v28, %v2280_v39 }
 0x561   : > { %v7834_v5 = vadd.f32 %v2281_v43, %v7669_v22 }
 0x563   : > { %v2342_v49 = vsel %vm250_vm0, %v7834_v5, 0.0  ;;  %v2376_v57 = vmul.f32 %v7834_v5, %v7834_v5 }
 0x564   : > { %2343 = vadd.xlane.f32.xlu1 %v2342_v49 }
 0x565   : > { %v2406_v62 = vsel %vm250_vm0, %v2376_v57, 0.0 }
 0x566   : > { %2407 = vadd.xlane.f32.xlu0 %v2406_v62 }
 0x567   : > { %v2283_v34 = vpop.f32.mrf.mxu1 }
 0x568   : > { %v2284_v46 = vadd.f32 %v7767_v28, %v2283_v34 }
 0x56a   : > { %v7843_v23 = vadd.f32 %v2284_v46, %v7690_v0 }
 0x56c   : > { %v2345_v22 = vsel %vm250_vm0, %v7843_v23, 0.0  ;;  %v2377_v32 = vmul.f32 %v7843_v23, %v7843_v23 }
 0x56d   : > { %2346 = vadd.xlane.f32.xlu1 %v2345_v22 }
 0x56e   : > { %v2409_v50 = vsel %vm250_vm0, %v2377_v32, 0.0 }
 0x56f   : > { %v2285_v59 = vpop.f32.mrf.mxu1  ;;  %2410 = vadd.xlane.f32.xlu0 %v2409_v50 }
 0x570   : > { %v2286_v26 = vadd.f32 %v7767_v28, %v2285_v59  ;;  %v6141_v59 = vld [vmem:[#allocation2 + $0x100] sm:$0xff] }
 0x571   : > { %2828 = vmatpush.bf16.msrb.mxu3 %v6141_v59 }
 0x572   : > { %v7852_v51 = vadd.f32 %v2286_v26, %v7693_v42 }
 0x574   : > { %v2348_v0 = vsel %vm250_vm0, %v7852_v51, 0.0  ;;  %v2378_v4 = vmul.f32 %v7852_v51, %v7852_v51 }
 0x575   : > { %2349 = vadd.xlane.f32.xlu2 %v2348_v0 }
 0x576   : > { %v2412_v9 = vsel %vm250_vm0, %v2378_v4, 0.0 }
 0x577   : > { %2413 = vadd.xlane.f32.xlu1 %v2412_v9  ;;  %v2288_v6 = vpop.f32.mrf.mxu1 }
 0x578   : > { %v2289_v14 = vadd.f32 %v7767_v28, %v2288_v6 }
 0x57a   : > { %v7861_v56 = vadd.f32 %v2289_v14, %v7718_v7 }
 0x57c   : > { %v2351_v42 = vsel %vm250_vm0, %v7861_v56, 0.0  ;;  %v2379_v47 = vmul.f32 %v7861_v56, %v7861_v56 }
 0x57d   : > { %2352 = vadd.xlane.f32.xlu2 %v2351_v42 }
 0x57e   : > { %v2415_v33 = vsel %vm250_vm0, %v2379_v47, 0.0 }
 0x57f   : > { %v2290_v36 = vpop.f32.mrf.mxu1  ;;  %2416 = vadd.xlane.f32.xlu1 %v2415_v33 }
 0x580   : > { %v2291_v48 = vadd.f32 %v7767_v28, %v2290_v36 }
 0x582   : > { %v7870_v29 = vadd.f32 %v2291_v48, %v7721_v38 }
 0x584   : > { %v2354_v7 = vsel %vm250_vm0, %v7870_v29, 0.0  ;;  %v2380_v19 = vmul.f32 %v7870_v29, %v7870_v29 }
 0x585   : > { %2355 = vadd.xlane.f32.xlu0 %v2354_v7 }
 0x586   : > { %v2418_v20 = vsel %vm250_vm0, %v2380_v19, 0.0 }
 0x587   : > { %2419 = vadd.xlane.f32.xlu2 %v2418_v20 }
 0x58a   : > { %v2293_v13 = vpop.f32.mrf.mxu1 }
 0x58b   : > { %v2294_v63 = vadd.f32 %v7767_v28, %v2293_v13 }
 0x58d   : > { %v7879_v15 = vadd.f32 %v2294_v63, %v7738_v45 }
 0x58f   : > { %v2357_v38 = vsel %vm250_vm0, %v7879_v15, 0.0  ;;  %v2381_v10 = vmul.f32 %v7879_v15, %v7879_v15 }
 0x590   : > { %2358 = vadd.xlane.f32.xlu0 %v2357_v38 }
 0x591   : > { %v2421_v1 = vsel %vm250_vm0, %v2381_v10, 0.0 }
 0x592   : > { %v2295_v37 = vpop.f32.mrf.mxu1  ;;  %2422 = vadd.xlane.f32.xlu2 %v2421_v1 }
 0x593   : > { %v2296_v16 = vadd.f32 %v7767_v28, %v2295_v37 }
 0x595   : > { %v7888_v60 = vadd.f32 %v2296_v16, %v7741_v52 }
 0x597   : > { %v2360_v45 = vsel %vm250_vm0, %v7888_v60, 0.0  ;;  %v2382_v21 = vmul.f32 %v7888_v60, %v7888_v60 }
 0x598   : > { %2361 = vadd.xlane.f32.xlu1 %v2360_v45 }
 0x599   : > { %v2424_v25 = vsel %vm250_vm0, %v2382_v21, 0.0 }
 0x59a   : > { %2425 = vadd.xlane.f32.xlu0 %v2424_v25  ;;  %v2298_v31 = vpop.f32.mrf.mxu1 }
 0x59b   : > { %v2299_v24 = vadd.f32 %v7767_v28, %v2298_v31 }
 0x59d   : > { %v7897_v8 = vadd.f32 %v2299_v24, %v7753_v35 }
 0x59f   : > { %v2363_v52 = vsel %vm250_vm0, %v7897_v8, 0.0  ;;  %v2383_v55 = vmul.f32 %v7897_v8, %v7897_v8  ;;  %v2323_v2 = vpop.xlane.xlu0 %2322 }
 0x5a0   : > { %2364 = vadd.xlane.f32.xlu1 %v2363_v52  ;;  %v7903_v53 = vmul.f32 0.015625, %v2323_v2 }
 0x5a1   : > { %v2427_v3 = vsel %vm250_vm0, %v2383_v55, 0.0  ;;  %v2387_v27 = vpop.xlane.xlu2 %2386 }
 0x5a2   : > { %v2300_v18 = vpop.f32.mrf.mxu1  ;;  %2428 = vadd.xlane.f32.xlu0 %v2427_v3  ;;  %v2465_v39 = vmul.f32 %v7903_v53, %v7903_v53  ;;  %v2449_v35 = vmul.f32 0.015625, %v2387_v27  ;;  %v2513_v2 = vsub.f32 %v7771_v54, %v7903_v53 }
 0x5a3   : > { %v2301_v43 = vadd.f32 %v7767_v28, %v2300_v18 }
 0x5a4   : > { %v2481_v49 = vsub.f32 %v2449_v35, %v2465_v39 }
 0x5a5   : > { %v7910_v57 = vadd.f32 %v2301_v43, %v7756_v17 }
 0x5a6   : > { %v2497_v62 = vmax.f32 %v2481_v49, 0.0 }
 0x5a7   : > { %v2366_v34 = vsel %vm250_vm0, %v7910_v57, 0.0  ;;  %v2384_v40 = vmul.f32 %v7910_v57, %v7910_v57  ;;  %v2326_v46 = vpop.xlane.xlu1 %2325 }
 0x5a8   : > { %2367 = vadd.xlane.f32.xlu2 %v2366_v34  ;;  %v2529_v22 = vadd.f32 1e-05, %v2497_v62  ;;  %v7916_v32 = vmul.f32 0.015625, %v2326_v46 }
 0x5a9   : > { %v2430_v50 = vsel %vm250_vm0, %v2384_v40, 0.0  ;;  %v2390_v28 = vpop.xlane.xlu0 %2389  ;;  %v7936_v40 = vld [vmem:[%s9551_s2 + $0xb] ss:$0 sm:$0xff] }
 0x5aa   : > { %2431 = vadd.xlane.f32.xlu1 %v2430_v50  ;;  %6340 = vrsqrt.f32 %v2529_v22  ;;  %v2466_v17 = vmul.f32 %v7916_v32, %v7916_v32  ;;  %v2450_v26 = vmul.f32 0.015625, %v2390_v28  ;;  %vm2551_vm11 = vweird.f32 %v2529_v22 }
 0x5ac   : > { %v2482_v0 = vsub.f32 %v2450_v26, %v2466_v17 }
 0x5ae   : > { %v2498_v4 = vmax.f32 %v2482_v0, 0.0 }
 0x5af   : > { %v2329_v9 = vpop.xlane.xlu1 %2328 }
 0x5b0   : > { %v6341_v6 = vpop.eup %6340  ;;  %v7921_v14 = vmul.f32 0.015625, %v2329_v9  ;;  %v2530_v47 = vadd.f32 1e-05, %v2498_v4  ;;  %v7946_v4 = vld [vmem:[%s9551_s2 + $0xc] ss:$0 sm:$0xff] }
 0x5b1   : > { %v2546_v42 = vmul.f32 %v6341_v6, %v2529_v22  ;;  %v2393_v33 = vpop.xlane.xlu0 %2392  ;;  %vm2552_vm10 = vweird.f32 %v6341_v6  ;;  %v2514_v22 = vsub.f32 %v7780_v61, %v7916_v32 }
 0x5b2   : > { %v2467_v36 = vmul.f32 %v7921_v14, %v7921_v14  ;;  %v2451_v48 = vmul.f32 0.015625, %v2393_v33  ;;  %6342 = vrsqrt.f32 %v2530_v47  ;;  %vm2553_vm12 = vmor %vm2551_vm11, %vm2552_vm10  ;;  %vm2561_vm14 = vweird.f32 %v2530_v47 }
 0x5b3   : > { %v2547_v11 = vmul.f32 %v6341_v6, %v2546_v42 }
 0x5b4   : > { %v2483_v7 = vsub.f32 %v2451_v48, %v2467_v36 }
 0x5b5   : > { %v2548_v19 = vmul.f32 0.5, %v2547_v11 }
 0x5b6   : > { %v2499_v20 = vmax.f32 %v2483_v7, 0.0 }
 0x5b7   : > { %v2549_v13 = vsub.f32 1.5, %v2548_v19  ;;  %v2332_v63 = vpop.xlane.xlu2 %2331 }
 0x5b8   : > { %v2531_v38 = vadd.f32 1e-05, %v2499_v20  ;;  %v7925_v10 = vmul.f32 0.015625, %v2332_v63  ;;  %v6343_v1 = vpop.eup %6342 }
 0x5b9   : > { %v2396_v37 = vpop.xlane.xlu1 %2395  ;;  %v2550_v16 = vmul.f32 %v6341_v6, %v2549_v13  ;;  %v2556_v45 = vmul.f32 %v6343_v1, %v2530_v47  ;;  %vm2562_vm13 = vweird.f32 %v6343_v1 }
 0x5ba   : > { %6344 = vrsqrt.f32 %v2531_v38  ;;  %v2468_v21 = vmul.f32 %v7925_v10, %v7925_v10  ;;  %v2452_v25 = vmul.f32 0.015625, %v2396_v37  ;;  %vm2563_vm15 = vmor %vm2561_vm14, %vm2562_vm13  ;;  %vm2571_vm2 = vweird.f32 %v2531_v38 }
 0x5bb   : > { %v2557_v31 = vmul.f32 %v6343_v1, %v2556_v45  ;;  %v2554_v52 = vsel %vm2553_vm12, %v6341_v6, %v2550_v16 }
 0x5bc   : > { %v2484_v24 = vsub.f32 %v2452_v25, %v2468_v21  ;;  %v2705_v34 = vmul.f32 %v2554_v52, %v2513_v2  ;;  %v2515_v21 = vsub.f32 %v7789_v41, %v7921_v14  ;;  %v2516_v41 = vsub.f32 %v7798_v12, %v7925_v10 }
 0x5bd   : > { %v2558_v55 = vmul.f32 0.5, %v2557_v31 }
 0x5be   : > { %v2500_v3 = vmax.f32 %v2484_v24, 0.0  ;;  %v2722_v0 = vmul.f32 %v7936_v40, %v2705_v34 }
 0x5bf   : > { %v2335_v27 = vpop.xlane.xlu2 %2334  ;;  %v2559_v39 = vsub.f32 1.5, %v2558_v55 }
 0x5c0   : > { %v6345_v18 = vpop.eup %6344  ;;  %v7931_v35 = vmul.f32 0.015625, %v2335_v27  ;;  %v2532_v49 = vadd.f32 1e-05, %v2500_v3  ;;  %v7954_v48 = vadd.f32 %v7946_v4, %v2722_v0 }
 0x5c1   : > { %v2566_v43 = vmul.f32 %v6345_v18, %v2531_v38  ;;  %v2399_v62 = vpop.xlane.xlu1 %2398  ;;  %v2560_v46 = vmul.f32 %v6343_v1, %v2559_v39  ;;  %vm2572_vm1 = vweird.f32 %v6345_v18 }
 0x5c2   : > { %v2469_v54 = vmul.f32 %v7931_v35, %v7931_v35  ;;  %v2453_v53 = vmul.f32 0.015625, %v2399_v62  ;;  %6346 = vrsqrt.f32 %v2532_v49  ;;  %vm2573_vm3 = vmor %vm2571_vm2, %vm2572_vm1  ;;  %vm2581_vm5 = vweird.f32 %v2532_v49 }
 0x5c3   : > { %v2567_v50 = vmul.f32 %v6345_v18, %v2566_v43  ;;  %v2564_v59 = vsel %vm2563_vm15, %v6343_v1, %v2560_v46 }
 0x5c4   : > { %v2485_v28 = vsub.f32 %v2453_v53, %v2469_v54  ;;  %v2706_v26 = vmul.f32 %v2564_v59, %v2514_v22 }
 0x5c5   : > { %v2568_v17 = vmul.f32 0.5, %v2567_v50 }
 0x5c6   : > { %v2501_v9 = vmax.f32 %v2485_v28, 0.0  ;;  %v2723_v47 = vmul.f32 %v7936_v40, %v2706_v26 }
 0x5c7   : > { %v2569_v6 = vsub.f32 1.5, %v2568_v17  ;;  %v2338_v42 = vpop.xlane.xlu0 %2337 }
 0x5c8   : > { %v7949_v61 = vadd.f32 1e-05, %v2501_v9  ;;  %v7951_v32 = vmul.f32 0.015625, %v2338_v42  ;;  %v6347_v33 = vpop.eup %6346  ;;  %v7957_v11 = vadd.f32 %v7946_v4, %v2723_v47 }
 0x5c9   : > { %v2402_v36 = vpop.xlane.xlu2 %2401  ;;  %v2570_v7 = vmul.f32 %v6345_v18, %v2569_v6  ;;  %v2576_v19 = vmul.f32 %v6347_v33, %v2532_v49  ;;  %vm2582_vm4 = vweird.f32 %v6347_v33 }
 0x5ca   : > { %6348 = vrsqrt.f32 %v7949_v61  ;;  %v2470_v20 = vmul.f32 %v7951_v32, %v7951_v32  ;;  %v2454_v13 = vmul.f32 0.015625, %v2402_v36  ;;  %v2763_v63 = vpack.c.bf16 %v7957_v11, %v7954_v48  ;;  %vm2583_vm6 = vmor %vm2581_vm5, %vm2582_vm4 }
 0x5cb   : > { %v2577_v1 = vmul.f32 %v6347_v33, %v2576_v19  ;;  %v2574_v45 = vsel %vm2573_vm3, %v6345_v18, %v2570_v7  ;;  %vm2591_vm8 = vweird.f32 %v7949_v61 }
 0x5cc   : > { %v2486_v37 = vsub.f32 %v2454_v13, %v2470_v20  ;;  %5911 = vmatmul.msk.bf16.vlgmr.msrb.gmra.mxu3 %vm250_vm0, %v2763_v63  ;;  %v2707_v27 = vmul.f32 %v2574_v45, %v2515_v21  ;;  %v2517_v13 = vsub.f32 %v7807_v30, %v7931_v35 }
 0x5cd   : > { %v2578_v16 = vmul.f32 0.5, %v2577_v1 }
 0x5ce   : > { %v2502_v25 = vmax.f32 %v2486_v37, 0.0  ;;  %v2724_v53 = vmul.f32 %v7936_v40, %v2707_v27 }
 0x5cf   : > { %v2341_v31 = vpop.xlane.xlu0 %2340  ;;  %v2579_v52 = vsub.f32 1.5, %v2578_v16 }
 0x5d0   : > { %v6349_v24 = vpop.eup %6348  ;;  %v7967_v55 = vmul.f32 0.015625, %v2341_v31  ;;  %v2534_v38 = vadd.f32 1e-05, %v2502_v25  ;;  %v7981_v10 = vadd.f32 %v7946_v4, %v2724_v53 }
 0x5d1   : > { %v2586_v2 = vmul.f32 %v6349_v24, %v7949_v61  ;;  %v2405_v3 = vpop.xlane.xlu2 %2404  ;;  %v2580_v39 = vmul.f32 %v6347_v33, %v2579_v52  ;;  %vm2592_vm7 = vweird.f32 %v6349_v24 }
 0x5d2   : > { %v2471_v18 = vmul.f32 %v7967_v55, %v7967_v55  ;;  %v2455_v43 = vmul.f32 0.015625, %v2405_v3  ;;  %6350 = vrsqrt.f32 %v2534_v38  ;;  %vm2593_vm9 = vmor %vm2591_vm8, %vm2592_vm7  ;;  %vm2601_vm11 = vweird.f32 %v2534_v38 }
 0x5d3   : > { %v2587_v14 = vmul.f32 %v6349_v24, %v2586_v2  ;;  %v2584_v34 = vsel %vm2583_vm6, %v6347_v33, %v2580_v39 }
 0x5d4   : > { %v2487_v62 = vsub.f32 %v2455_v43, %v2471_v18  ;;  %v2708_v54 = vmul.f32 %v2584_v34, %v2516_v41 }
 0x5d5   : > { %v2588_v46 = vmul.f32 0.5, %v2587_v14 }
 0x5d6   : > { %v2503_v22 = vmax.f32 %v2487_v62, 0.0  ;;  %v2725_v49 = vmul.f32 %v7936_v40, %v2708_v54 }
 0x5d7   : > { %v2589_v50 = vsub.f32 1.5, %v2588_v46  ;;  %v2344_v59 = vpop.xlane.xlu1 %2343 }
 0x5d8   : > { %v7976_v28 = vadd.f32 1e-05, %v2503_v22  ;;  %v7978_v17 = vmul.f32 0.015625, %v2344_v59  ;;  %v6351_v26 = vpop.eup %6350  ;;  %v7984_v0 = vadd.f32 %v7946_v4, %v2725_v49 }
 0x5d9   : > { %v2408_v12 = vpop.xlane.xlu0 %2407  ;;  %v2590_v9 = vmul.f32 %v6349_v24, %v2589_v50  ;;  %v2596_v6 = vmul.f32 %v6351_v26, %v2534_v38  ;;  %vm2602_vm10 = vweird.f32 %v6351_v26 }
 0x5da   : > { %6352 = vrsqrt.f32 %v7976_v28  ;;  %v2472_v42 = vmul.f32 %v7978_v17, %v7978_v17  ;;  %v2456_v47 = vmul.f32 0.015625, %v2408_v12  ;;  %v2764_v33 = vpack.c.bf16 %v7984_v0, %v7981_v10  ;;  %vm2603_vm12 = vmor %vm2601_vm11, %vm2602_vm10 }
 0x5db   : > { %v2597_v36 = vmul.f32 %v6351_v26, %v2596_v6  ;;  %v2594_v20 = vsel %vm2593_vm9, %v6349_v24, %v2590_v9  ;;  %v2518_v24 = vsub.f32 %v7816_v44, %v7951_v32  ;;  %vm2611_vm14 = vweird.f32 %v7976_v28 }
 0x5dc   : > { %v2488_v7 = vsub.f32 %v2456_v47, %v2472_v42  ;;  %5912 = vmatmul.msk.bf16.gmra.mxu3 %vm250_vm0, %v2764_v33  ;;  %v2709_v61 = vmul.f32 %v2594_v20, %v2517_v13  ;;  %v2519_v33 = vsub.f32 %v7825_v58, %v7967_v55 }
 0x5dd   : > { %v2598_v19 = vmul.f32 0.5, %v2597_v36 }
 0x5de   : > { %v2504_v63 = vmax.f32 %v2488_v7, 0.0  ;;  %v2726_v18 = vmul.f32 %v7936_v40, %v2709_v61 }
 0x5df   : > { %v2599_v37 = vsub.f32 1.5, %v2598_v19 }
 0x5e0   : > { %v6353_v1 = vpop.eup %6352  ;;  %v2347_v16 = vpop.xlane.xlu1 %2346  ;;  %v2536_v21 = vadd.f32 1e-05, %v2504_v63  ;;  %v8007_v32 = vadd.f32 %v7946_v4, %v2726_v18 }
 0x5e1   : > { %v2606_v45 = vmul.f32 %v6353_v1, %v7976_v28  ;;  %v7996_v25 = vmul.f32 0.015625, %v2347_v16  ;;  %v2600_v31 = vmul.f32 %v6351_v26, %v2599_v37  ;;  %vm2612_vm13 = vweird.f32 %v6353_v1 }
 0x5e2   : > { %v2411_v52 = vpop.xlane.xlu0 %2410  ;;  %6354 = vrsqrt.f32 %v2536_v21  ;;  %vm2613_vm15 = vmor %vm2611_vm14, %vm2612_vm13  ;;  %vm2621_vm2 = vweird.f32 %v2536_v21  ;;  %v2520_v16 = vsub.f32 %v7834_v5, %v7978_v17 }
 0x5e3   : > { %v2607_v2 = vmul.f32 %v6353_v1, %v2606_v45  ;;  %v2473_v30 = vmul.f32 %v7996_v25, %v7996_v25  ;;  %v2457_v35 = vmul.f32 0.015625, %v2411_v52  ;;  %v2604_v3 = vsel %vm2603_vm12, %v6351_v26, %v2600_v31 }
 0x5e4   : > { %v2710_v39 = vmul.f32 %v2604_v3, %v2518_v24 }
 0x5e5   : > { %v2608_v27 = vmul.f32 0.5, %v2607_v2  ;;  %v2489_v43 = vsub.f32 %v2457_v35, %v2473_v30 }
 0x5e6   : > { %v2727_v38 = vmul.f32 %v7936_v40, %v2710_v39 }
 0x5e7   : > { %v2609_v41 = vsub.f32 1.5, %v2608_v27  ;;  %v2505_v14 = vmax.f32 %v2489_v43, 0.0 }
 0x5e8   : > { %v2350_v62 = vpop.xlane.xlu2 %2349  ;;  %v6355_v34 = vpop.eup %6354  ;;  %v8010_v46 = vadd.f32 %v7946_v4, %v2727_v38 }
 0x5e9   : > { %v8004_v44 = vmul.f32 0.015625, %v2350_v62  ;;  %v2616_v54 = vmul.f32 %v6355_v34, %v2536_v21  ;;  %v2537_v53 = vadd.f32 1e-05, %v2505_v14  ;;  %v2610_v50 = vmul.f32 %v6353_v1, %v2609_v41 }
 0x5ea   : > { %v2414_v22 = vpop.xlane.xlu1 %2413  ;;  %v2765_v26 = vpack.c.bf16 %v8010_v46, %v8007_v32  ;;  %vm2622_vm1 = vweird.f32 %v6355_v34 }
 0x5eb   : > { %v2474_v59 = vmul.f32 %v8004_v44, %v8004_v44  ;;  %v2458_v49 = vmul.f32 0.015625, %v2414_v22  ;;  %v2617_v12 = vmul.f32 %v6355_v34, %v2616_v54  ;;  %6356 = vrsqrt.f32 %v2537_v53  ;;  %vm2623_vm3 = vmor %vm2621_vm2, %vm2622_vm1 }
 0x5ec   : > { %5913 = vmatmul.msk.bf16.gmra.mxu3 %vm250_vm0, %v2765_v26  ;;  %v2614_v47 = vsel %vm2613_vm15, %v6353_v1, %v2610_v50  ;;  %vm2631_vm5 = vweird.f32 %v2537_v53 }
 0x5ed   : > { %v2490_v9 = vsub.f32 %v2458_v49, %v2474_v59  ;;  %v2618_v6 = vmul.f32 0.5, %v2617_v12  ;;  %v2711_v37 = vmul.f32 %v2614_v47, %v2519_v33  ;;  %v2521_v49 = vsub.f32 %v7843_v23, %v7996_v25 }
 0x5ee   : > { %v2522_v33 = vsub.f32 %v7852_v51, %v8004_v44 }
 0x5ef   : > { %v2506_v42 = vmax.f32 %v2490_v9, 0.0  ;;  %v2619_v36 = vsub.f32 1.5, %v2618_v6  ;;  %v2728_v24 = vmul.f32 %v7936_v40, %v2711_v37 }
 0x5f0   : > { %v2353_v7 = vpop.xlane.xlu2 %2352 }
 0x5f1   : > { %v2538_v19 = vadd.f32 1e-05, %v2506_v42  ;;  %v8020_v20 = vmul.f32 0.015625, %v2353_v7  ;;  %v6357_v13 = vpop.eup %6356  ;;  %v2620_v63 = vmul.f32 %v6355_v34, %v2619_v36  ;;  %v8034_v41 = vadd.f32 %v7946_v4, %v2728_v24 }
 0x5f2   : > { %v2417_v28 = vpop.xlane.xlu1 %2416  ;;  %v2626_v45 = vmul.f32 %v6357_v13, %v2537_v53  ;;  %vm2632_vm4 = vweird.f32 %v6357_v13 }
 0x5f3   : > { %6358 = vrsqrt.f32 %v2538_v19  ;;  %v2475_v58 = vmul.f32 %v8020_v20, %v8020_v20  ;;  %v2459_v55 = vmul.f32 0.015625, %v2417_v28  ;;  %v2624_v1 = vsel %vm2623_vm3, %v6355_v34, %v2620_v63  ;;  %vm2633_vm6 = vmor %vm2631_vm5, %vm2632_vm4 }
 0x5f4   : > { %v2627_v61 = vmul.f32 %v6357_v13, %v2626_v45  ;;  %v2712_v31 = vmul.f32 %v2624_v1, %v2520_v16  ;;  %vm2641_vm8 = vweird.f32 %v2538_v19 }
 0x5f5   : > { %v2491_v52 = vsub.f32 %v2459_v55, %v2475_v58 }
 0x5f6   : > { %v2628_v2 = vmul.f32 0.5, %v2627_v61  ;;  %v2729_v21 = vmul.f32 %v7936_v40, %v2712_v31 }
 0x5f7   : > { %v2507_v30 = vmax.f32 %v2491_v52, 0.0 }
 0x5f8   : > { %v2356_v35 = vpop.xlane.xlu0 %2355  ;;  %v2629_v5 = vsub.f32 1.5, %v2628_v2  ;;  %v8031_v27 = vadd.f32 %v7946_v4, %v2729_v21 }
 0x5f9   : > { %v6359_v3 = vpop.eup %6358  ;;  %v8028_v17 = vmul.f32 0.015625, %v2356_v35  ;;  %v2539_v18 = vadd.f32 1e-05, %v2507_v30 }
 0x5fa   : > { %v2636_v39 = vmul.f32 %v6359_v3, %v2538_v19  ;;  %v2420_v43 = vpop.xlane.xlu2 %2419  ;;  %v2630_v38 = vmul.f32 %v6357_v13, %v2629_v5  ;;  %v2766_v54 = vpack.c.bf16 %v8031_v27, %v8034_v41  ;;  %vm2642_vm7 = vweird.f32 %v6359_v3 }
 0x5fb   : > { %v2476_v14 = vmul.f32 %v8028_v17, %v8028_v17  ;;  %v2460_v62 = vmul.f32 0.015625, %v2420_v43  ;;  %6360 = vrsqrt.f32 %v2539_v18  ;;  %vm2643_vm9 = vmor %vm2641_vm8, %vm2642_vm7  ;;  %vm2651_vm11 = vweird.f32 %v2539_v18 }
 0x5fc   : > { %v2637_v34 = vmul.f32 %v6359_v3, %v2636_v39  ;;  %5914 = vmatmul.msk.bf16.gmra.mxu3 %vm250_vm0, %v2766_v54  ;;  %v2634_v59 = vsel %vm2633_vm6, %v6357_v13, %v2630_v38 }
 0x5fd   : > { %v2492_v22 = vsub.f32 %v2460_v62, %v2476_v14  ;;  %v2713_v6 = vmul.f32 %v2634_v59, %v2521_v49  ;;  %v2523_v62 = vsub.f32 %v7861_v56, %v8020_v20 }
 0x5fe   : > { %v2638_v50 = vmul.f32 0.5, %v2637_v34 }
 0x5ff   : > { %v2508_v26 = vmax.f32 %v2492_v22, 0.0  ;;  %v2730_v37 = vmul.f32 %v7936_v40, %v2713_v6 }
 0x600   : > { %v2639_v12 = vsub.f32 1.5, %v2638_v50 }
 0x601   : > { %v2540_v9 = vadd.f32 1e-05, %v2508_v26  ;;  %v6361_v53 = vpop.eup %6360  ;;  %v8052_v55 = vadd.f32 %v7946_v4, %v2730_v37 }
 0x602   : > { %v2640_v42 = vmul.f32 %v6359_v3, %v2639_v12  ;;  %v2646_v36 = vmul.f32 %v6361_v53, %v2539_v18  ;;  %vm2652_vm10 = vweird.f32 %v6361_v53  ;;  %v2524_v12 = vsub.f32 %v7870_v29, %v8028_v17 }
 0x603   : > { %v2359_v47 = vpop.xlane.xlu0 %2358  ;;  %6362 = vrsqrt.f32 %v2540_v9  ;;  %vm2653_vm12 = vmor %vm2651_vm11, %vm2652_vm10  ;;  %vm2661_vm14 = vweird.f32 %v2540_v9 }
 0x604   : > { %v8045_v7 = vmul.f32 0.015625, %v2359_v47  ;;  %v2644_v63 = vsel %vm2643_vm9, %v6359_v3, %v2640_v42  ;;  %v2647_v23 = vmul.f32 %v6361_v53, %v2646_v36 }
 0x605   : > { %v2423_v13 = vpop.xlane.xlu2 %2422  ;;  %v2714_v28 = vmul.f32 %v2644_v63, %v2522_v33 }
 0x606   : > { %v2461_v25 = vmul.f32 0.015625, %v2423_v13  ;;  %v2477_v16 = vmul.f32 %v8045_v7, %v8045_v7  ;;  %v2648_v19 = vmul.f32 0.5, %v2647_v23 }
 0x607   : > { %v2731_v45 = vmul.f32 %v7936_v40, %v2714_v28 }
 0x608   : > { %v2493_v58 = vsub.f32 %v2461_v25, %v2477_v16  ;;  %v2649_v44 = vsub.f32 1.5, %v2648_v19 }
 0x609   : > { %v6363_v51 = vpop.eup %6362  ;;  %v8055_v1 = vadd.f32 %v7946_v4, %v2731_v45 }
 0x60a   : > { %v2656_v61 = vmul.f32 %v6363_v51, %v2540_v9  ;;  %v2509_v31 = vmax.f32 %v2493_v58, 0.0  ;;  %v2650_v24 = vmul.f32 %v6361_v53, %v2649_v44  ;;  %vm2662_vm13 = vweird.f32 %v6363_v51 }
 0x60b   : > { %v2362_v52 = vpop.xlane.xlu1 %2361  ;;  %v2767_v21 = vpack.c.bf16 %v8055_v1, %v8052_v55  ;;  %vm2663_vm15 = vmor %vm2661_vm14, %vm2662_vm13 }
 0x60c   : > { %v8057_v2 = vmul.f32 0.015625, %v2362_v52  ;;  %v2657_v30 = vmul.f32 %v6363_v51, %v2656_v61  ;;  %v2541_v35 = vadd.f32 1e-05, %v2509_v31  ;;  %v2654_v14 = vsel %vm2653_vm12, %v6361_v53, %v2650_v24 }
 0x60d   : > { %v2426_v3 = vpop.xlane.xlu0 %2425  ;;  %5915 = vmatmul.msk.bf16.gmra.mxu3 %vm250_vm0, %v2767_v21  ;;  %v2715_v50 = vmul.f32 %v2654_v14, %v2523_v62 }
 0x60e   : > { %v2478_v5 = vmul.f32 %v8057_v2, %v8057_v2  ;;  %v2462_v39 = vmul.f32 0.015625, %v2426_v3  ;;  %v2658_v43 = vmul.f32 0.5, %v2657_v30  ;;  %6364 = vrsqrt.f32 %v2541_v35 }
 0x60f   : > { %v2732_v9 = vmul.f32 %v7936_v40, %v2715_v50  ;;  %vm2671_vm2 = vweird.f32 %v2541_v35  ;;  %v2525_v3 = vsub.f32 %v7879_v15, %v8045_v7 }
 0x610   : > { %v2494_v38 = vsub.f32 %v2462_v39, %v2478_v5  ;;  %v2659_v34 = vsub.f32 1.5, %v2658_v43 }
 0x611   : > { %v8075_v29 = vadd.f32 %v7946_v4, %v2732_v9 }
 0x612   : > { %v2510_v54 = vmax.f32 %v2494_v38, 0.0  ;;  %v2660_v22 = vmul.f32 %v6363_v51, %v2659_v34 }
 0x613   : > { %v2365_v18 = vpop.xlane.xlu1 %2364 }
 0x614   : > { %v2542_v59 = vadd.f32 1e-05, %v2510_v54  ;;  %v8066_v49 = vmul.f32 0.015625, %v2365_v18  ;;  %v6365_v26 = vpop.eup %6364  ;;  %v2664_v53 = vsel %vm2663_vm15, %v6363_v51, %v2660_v22 }
 0x615   : > { %v2429_v6 = vpop.xlane.xlu0 %2428  ;;  %v2666_v42 = vmul.f32 %v6365_v26, %v2541_v35  ;;  %v2716_v47 = vmul.f32 %v2664_v53, %v2524_v12  ;;  %vm2672_vm1 = vweird.f32 %v6365_v26  ;;  %v2526_v35 = vsub.f32 %v7888_v60, %v8057_v2 }
 0x616   : > { %6366 = vrsqrt.f32 %v2542_v59  ;;  %v2479_v56 = vmul.f32 %v8066_v49, %v8066_v49  ;;  %v2463_v20 = vmul.f32 0.015625, %v2429_v6  ;;  %vm2673_vm3 = vmor %vm2671_vm2, %vm2672_vm1  ;;  %vm2681_vm5 = vweird.f32 %v2542_v59 }
 0x617   : > { %v2667_v33 = vmul.f32 %v6365_v26, %v2666_v42  ;;  %v2733_v13 = vmul.f32 %v7936_v40, %v2716_v47  ;;  %v2527_v47 = vsub.f32 %v7897_v8, %v8066_v49 }
 0x618   : > { %v2495_v36 = vsub.f32 %v2463_v20, %v2479_v56 }
 0x619   : > { %v2668_v63 = vmul.f32 0.5, %v2667_v33  ;;  %v8078_v17 = vadd.f32 %v7946_v4, %v2733_v13 }
 0x61a   : > { %v2511_v23 = vmax.f32 %v2495_v36, 0.0 }
 0x61b   : > { %v2368_v25 = vpop.xlane.xlu2 %2367  ;;  %v2669_v37 = vsub.f32 1.5, %v2668_v63  ;;  %v2768_v58 = vpack.c.bf16 %v8078_v17, %v8075_v29 }
 0x61c   : > { %v6367_v28 = vpop.eup %6366  ;;  %v2448_v16 = vmul.f32 0.015625, %v2368_v25  ;;  %v2543_v45 = vadd.f32 1e-05, %v2511_v23 }
 0x61d   : > { %v2676_v19 = vmul.f32 %v6367_v28, %v2542_v59  ;;  %v2432_v51 = vpop.xlane.xlu1 %2431  ;;  %v2670_v44 = vmul.f32 %v6365_v26, %v2669_v37  ;;  %5916 = vmatmul.msk.bf16.gmra.mxu3 %vm250_vm0, %v2768_v58  ;;  %vm2682_vm4 = vweird.f32 %v6367_v28 }
 0x61e   : > { %v2480_v61 = vmul.f32 %v2448_v16, %v2448_v16  ;;  %v2464_v31 = vmul.f32 0.015625, %v2432_v51  ;;  %6368 = vrsqrt.f32 %v2543_v45  ;;  %vm2683_vm6 = vmor %vm2681_vm5, %vm2682_vm4  ;;  %vm2691_vm8 = vweird.f32 %v2543_v45 }
 0x61f   : > { %v2677_v52 = vmul.f32 %v6367_v28, %v2676_v19  ;;  %v2674_v21 = vsel %vm2673_vm3, %v6365_v26, %v2670_v44  ;;  %v2528_v13 = vsub.f32 %v7910_v57, %v2448_v16  ;;  %v8115_v57 = vld [vmem:[%s9551_s2 + $0x10] ss:$0 sm:$0xff] }
 0x620   : > { %v2496_v24 = vsub.f32 %v2464_v31, %v2480_v61  ;;  %v2717_v43 = vmul.f32 %v2674_v21, %v2525_v3 }
 0x621   : > { %v2678_v30 = vmul.f32 0.5, %v2677_v52 }
 0x622   : > { %v2512_v5 = vmax.f32 %v2496_v24, 0.0  ;;  %v2734_v50 = vmul.f32 %v7936_v40, %v2717_v43 }
 0x623   : > { %v2679_v39 = vsub.f32 1.5, %v2678_v30 }
 0x624   : > { %v2544_v38 = vadd.f32 1e-05, %v2512_v5  ;;  %v6369_v14 = vpop.eup %6368  ;;  %v8090_v6 = vadd.f32 %v7946_v4, %v2734_v50 }
 0x625   : > { %v2680_v62 = vmul.f32 %v6367_v28, %v2679_v39  ;;  %v2686_v34 = vmul.f32 %v6369_v14, %v2543_v45  ;;  %vm2692_vm7 = vweird.f32 %v6369_v14 }
 0x626   : > { %6370 = vrsqrt.f32 %v2544_v38  ;;  %vm2693_vm9 = vmor %vm2691_vm8, %vm2692_vm7  ;;  %vm2701_vm11 = vweird.f32 %v2544_v38 }
 0x627   : > { %v2684_v54 = vsel %vm2683_vm6, %v6367_v28, %v2680_v62  ;;  %v2687_v18 = vmul.f32 %v6369_v14, %v2686_v34 }
 0x628   : > { %v2718_v22 = vmul.f32 %v2684_v54, %v2526_v35 }
 0x629   : > { %v2688_v15 = vmul.f32 0.5, %v2687_v18 }
 0x62a   : > { %v2735_v7 = vmul.f32 %v7936_v40, %v2718_v22 }
 0x62b   : > { %v2689_v12 = vsub.f32 1.5, %v2688_v15 }
 0x62c   : > { %v6371_v26 = vpop.eup %6370  ;;  %v8093_v59 = vadd.f32 %v7946_v4, %v2735_v7 }
 0x62d   : > { %v2696_v60 = vmul.f32 %v6371_v26, %v2544_v38  ;;  %v2690_v2 = vmul.f32 %v6369_v14, %v2689_v12  ;;  %vm2702_vm10 = vweird.f32 %v6371_v26 }
 0x62e   : > { %v2769_v53 = vpack.c.bf16 %v8093_v59, %v8090_v6  ;;  %vm2703_vm12 = vmor %vm2701_vm11, %vm2702_vm10 }
 0x62f   : > { %v2697_v42 = vmul.f32 %v6371_v26, %v2696_v60  ;;  %v2694_v56 = vsel %vm2693_vm9, %v6369_v14, %v2690_v2 }
 0x630   : > { %5917 = vmatmul.msk.bf16.gmra.mxu3 %vm250_vm0, %v2769_v53  ;;  %v2719_v33 = vmul.f32 %v2694_v56, %v2527_v47 }
 0x631   : > { %v2698_v20 = vmul.f32 0.5, %v2697_v42 }
 0x632   : > { %v2736_v25 = vmul.f32 %v7936_v40, %v2719_v33 }
 0x633   : > { %v2699_v9 = vsub.f32 1.5, %v2698_v20 }
 0x634   : > { %v8104_v37 = vadd.f32 %v7946_v4, %v2736_v25 }
 0x635   : > { %v2700_v36 = vmul.f32 %v6371_v26, %v2699_v9 }
 0x637   : > { %v2704_v63 = vsel %vm2703_vm12, %v6371_v26, %v2700_v36 }
 0x638   : > { %v2720_v23 = vmul.f32 %v2704_v63, %v2528_v13 }
 0x63a   : > { %v2737_v28 = vmul.f32 %v7936_v40, %v2720_v23 }
 0x63c   : > { %v8107_v19 = vadd.f32 %v7946_v4, %v2737_v28 }
 0x63e   : > { %v2770_v8 = vpack.c.bf16 %v8107_v19, %v8104_v37 }
 0x640   : > { %5918 = vmatmul.msk.bf16.gmra.mxu3 %vm250_vm0, %v2770_v8 }
 0x64f   : > { %v2830_v49 = vpop.f32.mrf.mxu3 }
 0x650   : > { %v2831_v16 = vadd.f32 %v8115_v57, %v2830_v49 }
 0x652   : > { %v8119_v40 = vadd.f32 %v2831_v16, %v7954_v48 }
 0x654   : > { %v2888_v4 = vsel %vm250_vm0, %v8119_v40, 0.0  ;;  %v2936_v45 = vmul.f32 %v8119_v40, %v8119_v40 }
 0x655   : > { %2889 = vadd.xlane.f32.xlu2 %v2888_v4 }
 0x656   : > { %v2952_v58 = vsel %vm250_vm0, %v2936_v45, 0.0 }
 0x657   : > { %v2832_v51 = vpop.f32.mrf.mxu3  ;;  %2953 = vadd.xlane.f32.xlu1 %v2952_v58 }
 0x658   : > { %v2833_v44 = vadd.f32 %v8115_v57, %v2832_v51 }
 0x65a   : > { %v8128_v61 = vadd.f32 %v2833_v44, %v7957_v11 }
 0x65c   : > { %v2891_v48 = vsel %vm250_vm0, %v8128_v61, 0.0  ;;  %v2937_v31 = vmul.f32 %v8128_v61, %v8128_v61 }
 0x65d   : > { %2892 = vadd.xlane.f32.xlu0 %v2891_v48 }
 0x65e   : > { %v2955_v52 = vsel %vm250_vm0, %v2937_v31, 0.0 }
 0x65f   : > { %2956 = vadd.xlane.f32.xlu2 %v2955_v52  ;;  %v2835_v24 = vpop.f32.mrf.mxu3 }
 0x660   : > { %v2836_v21 = vadd.f32 %v8115_v57, %v2835_v24 }
 0x662   : > { %v8137_v30 = vadd.f32 %v2836_v21, %v7981_v10 }
 0x664   : > { %v2894_v11 = vsel %vm250_vm0, %v8137_v30, 0.0  ;;  %v2938_v3 = vmul.f32 %v8137_v30, %v8137_v30 }
 0x665   : > { %2895 = vadd.xlane.f32.xlu0 %v2894_v11 }
 0x666   : > { %v2958_v5 = vsel %vm250_vm0, %v2938_v3, 0.0 }
 0x667   : > { %v2837_v39 = vpop.f32.mrf.mxu3  ;;  %2959 = vadd.xlane.f32.xlu2 %v2958_v5 }
 0x668   : > { %v2838_v43 = vadd.f32 %v8115_v57, %v2837_v39 }
 0x66a   : > { %v8146_v38 = vadd.f32 %v2838_v43, %v7984_v0 }
 0x66c   : > { %v2897_v10 = vsel %vm250_vm0, %v8146_v38, 0.0  ;;  %v2939_v14 = vmul.f32 %v8146_v38, %v8146_v38 }
 0x66d   : > { %2898 = vadd.xlane.f32.xlu1 %v2897_v10 }
 0x66e   : > { %v2961_v62 = vsel %vm250_vm0, %v2939_v14, 0.0 }
 0x66f   : > { %2962 = vadd.xlane.f32.xlu0 %v2961_v62  ;;  %v2840_v35 = vpop.f32.mrf.mxu3 }
 0x670   : > { %v2841_v34 = vadd.f32 %v8115_v57, %v2840_v35 }
 0x672   : > { %v8155_v54 = vadd.f32 %v2841_v34, %v8007_v32 }
 0x674   : > { %v2900_v0 = vsel %vm250_vm0, %v8155_v54, 0.0  ;;  %v2940_v22 = vmul.f32 %v8155_v54, %v8155_v54 }
 0x675   : > { %2901 = vadd.xlane.f32.xlu1 %v2900_v0 }
 0x676   : > { %v2964_v18 = vsel %vm250_vm0, %v2940_v22, 0.0 }
 0x677   : > { %v2842_v50 = vpop.f32.mrf.mxu3  ;;  %2965 = vadd.xlane.f32.xlu0 %v2964_v18 }
 0x678   : > { %v2843_v15 = vadd.f32 %v8115_v57, %v2842_v50 }
 0x67a   : > { %v8164_v7 = vadd.f32 %v2843_v15, %v8010_v46 }
 0x67c   : > { %v2903_v32 = vsel %vm250_vm0, %v8164_v7, 0.0  ;;  %v2941_v26 = vmul.f32 %v8164_v7, %v8164_v7 }
 0x67d   : > { %2904 = vadd.xlane.f32.xlu2 %v2903_v32  ;;  %v6148_v32 = vld [vmem:[#allocation2 + $0x138] sm:$0xff] }
 0x67e   : > { %v2967_v12 = vsel %vm250_vm0, %v2941_v26, 0.0  ;;  %3392 = vmatpush.bf16.msra.mxu2 %v6148_v32 }
 0x67f   : > { %2968 = vadd.xlane.f32.xlu1 %v2967_v12  ;;  %v2845_v60 = vpop.f32.mrf.mxu3 }
 0x680   : > { %v2846_v2 = vadd.f32 %v8115_v57, %v2845_v60 }
 0x682   : > { %v8173_v53 = vadd.f32 %v2846_v2, %v8034_v41 }
 0x684   : > { %v2906_v46 = vsel %vm250_vm0, %v8173_v53, 0.0  ;;  %v2942_v42 = vmul.f32 %v8173_v53, %v8173_v53 }
 0x685   : > { %2907 = vadd.xlane.f32.xlu2 %v2906_v46 }
 0x686   : > { %v2970_v56 = vsel %vm250_vm0, %v2942_v42, 0.0  ;;  %v6147_v42 = vld [vmem:[#allocation2 + $0x130] sm:$0xff] }
 0x687   : > { %v2847_v20 = vpop.f32.mrf.mxu3  ;;  %2971 = vadd.xlane.f32.xlu1 %v2970_v56  ;;  %3393 = vmatpush.bf16.msra.mxu2 %v6147_v42 }
 0x688   : > { %v2848_v47 = vadd.f32 %v8115_v57, %v2847_v20 }
 0x68a   : > { %v8182_v9 = vadd.f32 %v2848_v47, %v8031_v27 }
 0x68c   : > { %v2909_v41 = vsel %vm250_vm0, %v8182_v9, 0.0  ;;  %v2943_v33 = vmul.f32 %v8182_v9, %v8182_v9 }
 0x68d   : > { %2910 = vadd.xlane.f32.xlu0 %v2909_v41 }
 0x68e   : > { %v2973_v36 = vsel %vm250_vm0, %v2943_v33, 0.0 }
 0x68f   : > { %2974 = vadd.xlane.f32.xlu2 %v2973_v36  ;;  %v6146_v36 = vld [vmem:[#allocation2 + $0x128] sm:$0xff] }
 0x690   : > { %v2850_v13 = vpop.f32.mrf.mxu3  ;;  %3394 = vmatpush.bf16.msra.mxu2 %v6146_v36 }
 0x691   : > { %v2851_v63 = vadd.f32 %v8115_v57, %v2850_v13 }
 0x693   : > { %v8191_v23 = vadd.f32 %v2851_v63, %v8052_v55 }
 0x695   : > { %v2912_v27 = vsel %vm250_vm0, %v8191_v23, 0.0  ;;  %v2944_v25 = vmul.f32 %v8191_v23, %v8191_v23 }
 0x696   : > { %2913 = vadd.xlane.f32.xlu0 %v2912_v27 }
 0x697   : > { %v2976_v28 = vsel %vm250_vm0, %v2944_v25, 0.0 }
 0x698   : > { %v2852_v8 = vpop.f32.mrf.mxu3  ;;  %2977 = vadd.xlane.f32.xlu2 %v2976_v28 }
 0x699   : > { %v2853_v49 = vadd.f32 %v8115_v57, %v2852_v8 }
 0x69b   : > { %v8200_v16 = vadd.f32 %v2853_v49, %v8055_v1 }
 0x69d   : > { %v2915_v55 = vsel %vm250_vm0, %v8200_v16, 0.0  ;;  %v2945_v4 = vmul.f32 %v8200_v16, %v8200_v16 }
 0x69e   : > { %2916 = vadd.xlane.f32.xlu1 %v2915_v55 }
 0x69f   : > { %v2979_v45 = vsel %vm250_vm0, %v2945_v4, 0.0 }
 0x6a0   : > { %2980 = vadd.xlane.f32.xlu0 %v2979_v45  ;;  %v2855_v58 = vpop.f32.mrf.mxu3 }
 0x6a1   : > { %v2856_v51 = vadd.f32 %v8115_v57, %v2855_v58 }
 0x6a3   : > { %v8209_v44 = vadd.f32 %v2856_v51, %v8075_v29 }
 0x6a5   : > { %v2918_v1 = vsel %vm250_vm0, %v8209_v44, 0.0  ;;  %v2946_v48 = vmul.f32 %v8209_v44, %v8209_v44 }
 0x6a6   : > { %2919 = vadd.xlane.f32.xlu1 %v2918_v1 }
 0x6a7   : > { %v2982_v31 = vsel %vm250_vm0, %v2946_v48, 0.0 }
 0x6a8   : > { %v2857_v52 = vpop.f32.mrf.mxu3  ;;  %2983 = vadd.xlane.f32.xlu0 %v2982_v31 }
 0x6a9   : > { %v2858_v24 = vadd.f32 %v8115_v57, %v2857_v52 }
 0x6ab   : > { %v8218_v21 = vadd.f32 %v2858_v24, %v8078_v17 }
 0x6ad   : > { %v2921_v29 = vsel %vm250_vm0, %v8218_v21, 0.0  ;;  %v2947_v11 = vmul.f32 %v8218_v21, %v8218_v21 }
 0x6ae   : > { %2922 = vadd.xlane.f32.xlu2 %v2921_v29 }
 0x6af   : > { %v2985_v3 = vsel %vm250_vm0, %v2947_v11, 0.0 }
 0x6b0   : > { %2986 = vadd.xlane.f32.xlu1 %v2985_v3 }
 0x6b3   : > { %v2860_v5 = vpop.f32.mrf.mxu3 }
 0x6b4   : > { %v2861_v39 = vadd.f32 %v8115_v57, %v2860_v5 }
 0x6b6   : > { %v8227_v43 = vadd.f32 %v2861_v39, %v8090_v6 }
 0x6b8   : > { %v2924_v17 = vsel %vm250_vm0, %v8227_v43, 0.0  ;;  %v2948_v10 = vmul.f32 %v8227_v43, %v8227_v43 }
 0x6b9   : > { %2925 = vadd.xlane.f32.xlu2 %v2924_v17 }
 0x6ba   : > { %v2988_v14 = vsel %vm250_vm0, %v2948_v10, 0.0 }
 0x6bb   : > { %v2862_v62 = vpop.f32.mrf.mxu3  ;;  %2989 = vadd.xlane.f32.xlu1 %v2988_v14 }
 0x6bc   : > { %v2863_v35 = vadd.f32 %v8115_v57, %v2862_v62 }
 0x6be   : > { %v8236_v34 = vadd.f32 %v2863_v35, %v8093_v59 }
 0x6c0   : > { %v2927_v6 = vsel %vm250_vm0, %v8236_v34, 0.0  ;;  %v2949_v0 = vmul.f32 %v8236_v34, %v8236_v34 }
 0x6c1   : > { %2928 = vadd.xlane.f32.xlu0 %v2927_v6 }
 0x6c2   : > { %v2991_v22 = vsel %vm250_vm0, %v2949_v0, 0.0 }
 0x6c3   : > { %2992 = vadd.xlane.f32.xlu2 %v2991_v22  ;;  %v2865_v18 = vpop.f32.mrf.mxu3 }
 0x6c4   : > { %v2866_v50 = vadd.f32 %v8115_v57, %v2865_v18 }
 0x6c6   : > { %v8245_v15 = vadd.f32 %v2866_v50, %v8104_v37 }
 0x6c8   : > { %v2930_v59 = vsel %vm250_vm0, %v8245_v15, 0.0  ;;  %v2950_v26 = vmul.f32 %v8245_v15, %v8245_v15  ;;  %v2890_v12 = vpop.xlane.xlu2 %2889 }
 0x6c9   : > { %2931 = vadd.xlane.f32.xlu0 %v2930_v59  ;;  %v8252_v2 = vmul.f32 0.015625, %v2890_v12 }
 0x6ca   : > { %v2994_v60 = vsel %vm250_vm0, %v2950_v26, 0.0  ;;  %v2954_v56 = vpop.xlane.xlu1 %2953 }
 0x6cb   : > { %v2867_v46 = vpop.f32.mrf.mxu3  ;;  %2995 = vadd.xlane.f32.xlu2 %v2994_v60  ;;  %v3032_v20 = vmul.f32 %v8252_v2, %v8252_v2  ;;  %v3016_v47 = vmul.f32 0.015625, %v2954_v56 }
 0x6cc   : > { %v2868_v37 = vadd.f32 %v8115_v57, %v2867_v46 }
 0x6cd   : > { %v3048_v33 = vsub.f32 %v3016_v47, %v3032_v20 }
 0x6ce   : > { %v8258_v41 = vadd.f32 %v2868_v37, %v8107_v19  ;;  %v6145_v19 = vld [vmem:[#allocation2 + $0x120] sm:$0xff]  ;;  %v3080_v37 = vsub.f32 %v8119_v40, %v8252_v2 }
 0x6cf   : > { %v3064_v27 = vmax.f32 %v3048_v33, 0.0  ;;  %3395 = vmatpush.bf16.msra.mxu2 %v6145_v19 }
 0x6d0   : > { %v2933_v13 = vsel %vm250_vm0, %v8258_v41, 0.0  ;;  %v2951_v63 = vmul.f32 %v8258_v41, %v8258_v41  ;;  %v2893_v57 = vpop.xlane.xlu0 %2892 }
 0x6d1   : > { %2934 = vadd.xlane.f32.xlu1 %v2933_v13  ;;  %v3096_v28 = vadd.f32 1e-05, %v3064_v27  ;;  %v8265_v8 = vmul.f32 0.015625, %v2893_v57 }
 0x6d2   : > { %v2997_v25 = vsel %vm250_vm0, %v2951_v63, 0.0  ;;  %v2957_v49 = vpop.xlane.xlu2 %2956  ;;  %v8284_v63 = vld [vmem:[%s9551_s2 + $0x11] ss:$0 sm:$0xff] }
 0x6d3   : > { %2998 = vadd.xlane.f32.xlu0 %v2997_v25  ;;  %6372 = vrsqrt.f32 %v3096_v28  ;;  %v3033_v55 = vmul.f32 %v8265_v8, %v8265_v8  ;;  %v3017_v4 = vmul.f32 0.015625, %v2957_v49  ;;  %vm3118_vm14 = vweird.f32 %v3096_v28 }
 0x6d4   : > { %v3081_v40 = vsub.f32 %v8128_v61, %v8265_v8 }
 0x6d5   : > { %v3049_v45 = vsub.f32 %v3017_v4, %v3033_v55 }
 0x6d7   : > { %v3065_v58 = vmax.f32 %v3049_v45, 0.0  ;;  %v8293_v45 = vld [vmem:[%s9551_s2 + $0x12] ss:$0 sm:$0xff] }
 0x6d8   : > { %v2896_v51 = vpop.xlane.xlu0 %2895 }
 0x6d9   : > { %v6373_v1 = vpop.eup %6372  ;;  %v8269_v48 = vmul.f32 0.015625, %v2896_v51  ;;  %v3097_v52 = vadd.f32 1e-05, %v3065_v58 }
 0x6da   : > { %v3113_v31 = vmul.f32 %v6373_v1, %v3096_v28  ;;  %v2960_v24 = vpop.xlane.xlu2 %2959  ;;  %vm3119_vm13 = vweird.f32 %v6373_v1 }
 0x6db   : > { %v3034_v29 = vmul.f32 %v8269_v48, %v8269_v48  ;;  %v3018_v11 = vmul.f32 0.015625, %v2960_v24  ;;  %6374 = vrsqrt.f32 %v3097_v52  ;;  %vm3120_vm15 = vmor %vm3118_vm14, %vm3119_vm13  ;;  %vm3128_vm2 = vweird.f32 %v3097_v52 }
 0x6dc   : > { %v3114_v3 = vmul.f32 %v6373_v1, %v3113_v31 }
 0x6dd   : > { %v3050_v5 = vsub.f32 %v3018_v11, %v3034_v29 }
 0x6de   : > { %v3115_v39 = vmul.f32 0.5, %v3114_v3 }
 0x6df   : > { %v3066_v17 = vmax.f32 %v3050_v5, 0.0 }
 0x6e0   : > { %v3116_v10 = vsub.f32 1.5, %v3115_v39  ;;  %v2899_v14 = vpop.xlane.xlu1 %2898 }
 0x6e1   : > { %v3098_v62 = vadd.f32 1e-05, %v3066_v17  ;;  %v8273_v35 = vmul.f32 0.015625, %v2899_v14  ;;  %v6375_v6 = vpop.eup %6374 }
 0x6e2   : > { %v2963_v0 = vpop.xlane.xlu0 %2962  ;;  %v3123_v22 = vmul.f32 %v6375_v6, %v3097_v52  ;;  %v3117_v18 = vmul.f32 %v6373_v1, %v3116_v10  ;;  %vm3129_vm1 = vweird.f32 %v6375_v6 }
 0x6e3   : > { %6376 = vrsqrt.f32 %v3098_v62  ;;  %v3035_v50 = vmul.f32 %v8273_v35, %v8273_v35  ;;  %v3019_v32 = vmul.f32 0.015625, %v2963_v0  ;;  %vm3130_vm3 = vmor %vm3128_vm2, %vm3129_vm1  ;;  %vm3138_vm5 = vweird.f32 %v3098_v62 }
 0x6e4   : > { %v3124_v59 = vmul.f32 %v6375_v6, %v3123_v22  ;;  %v3121_v60 = vsel %vm3120_vm15, %v6373_v1, %v3117_v18 }
 0x6e5   : > { %v3051_v26 = vsub.f32 %v3019_v32, %v3035_v50  ;;  %v3272_v27 = vmul.f32 %v3121_v60, %v3080_v37 }
 0x6e6   : > { %v3125_v12 = vmul.f32 0.5, %v3124_v59  ;;  %v3082_v59 = vsub.f32 %v8137_v30, %v8269_v48 }
 0x6e7   : > { %v3067_v46 = vmax.f32 %v3051_v26, 0.0  ;;  %v3289_v58 = vmul.f32 %v8284_v63, %v3272_v27 }
 0x6e8   : > { %v2902_v42 = vpop.xlane.xlu1 %2901  ;;  %v3126_v20 = vsub.f32 1.5, %v3125_v12 }
 0x6e9   : > { %v6377_v56 = vpop.eup %6376  ;;  %v8279_v47 = vmul.f32 0.015625, %v2902_v42  ;;  %v3099_v36 = vadd.f32 1e-05, %v3067_v46  ;;  %v8305_v3 = vadd.f32 %v8293_v45, %v3289_v58 }
 0x6ea   : > { %v3133_v33 = vmul.f32 %v6377_v56, %v3098_v62  ;;  %v2966_v13 = vpop.xlane.xlu0 %2965  ;;  %v3127_v57 = vmul.f32 %v6375_v6, %v3126_v20  ;;  %vm3139_vm4 = vweird.f32 %v6377_v56 }
 0x6eb   : > { %v3036_v25 = vmul.f32 %v8279_v47, %v8279_v47  ;;  %v3020_v28 = vmul.f32 0.015625, %v2966_v13  ;;  %6378 = vrsqrt.f32 %v3099_v36  ;;  %vm3140_vm6 = vmor %vm3138_vm5, %vm3139_vm4  ;;  %vm3148_vm8 = vweird.f32 %v3099_v36 }
 0x6ec   : > { %v3134_v2 = vmul.f32 %v6377_v56, %v3133_v33  ;;  %v3131_v19 = vsel %vm3130_vm3, %v6375_v6, %v3127_v57 }
 0x6ed   : > { %v3052_v49 = vsub.f32 %v3020_v28, %v3036_v25  ;;  %v3273_v55 = vmul.f32 %v3131_v19, %v3081_v40 }
 0x6ee   : > { %v3135_v4 = vmul.f32 0.5, %v3134_v2 }
 0x6ef   : > { %v3068_v51 = vmax.f32 %v3052_v49, 0.0  ;;  %v3290_v1 = vmul.f32 %v8284_v63, %v3273_v55 }
 0x6f0   : > { %v3136_v31 = vsub.f32 1.5, %v3135_v4  ;;  %v2905_v52 = vpop.xlane.xlu2 %2904 }
 0x6f1   : > { %v8297_v61 = vadd.f32 1e-05, %v3068_v51  ;;  %v8299_v8 = vmul.f32 0.015625, %v2905_v52  ;;  %v6379_v24 = vpop.eup %6378  ;;  %v8302_v29 = vadd.f32 %v8293_v45, %v3290_v1 }
 0x6f2   : > { %v2969_v11 = vpop.xlane.xlu1 %2968  ;;  %v3143_v5 = vmul.f32 %v6379_v24, %v3099_v36  ;;  %v3137_v39 = vmul.f32 %v6377_v56, %v3136_v31  ;;  %vm3149_vm7 = vweird.f32 %v6379_v24 }
 0x6f3   : > { %6380 = vrsqrt.f32 %v8297_v61  ;;  %v3037_v17 = vmul.f32 %v8299_v8, %v8299_v8  ;;  %v3021_v10 = vmul.f32 0.015625, %v2969_v11  ;;  %v3330_v6 = vpack.c.bf16 %v8302_v29, %v8305_v3  ;;  %vm3150_vm9 = vmor %vm3148_vm8, %vm3149_vm7 }
 0x6f4   : > { %v3144_v14 = vmul.f32 %v6379_v24, %v3143_v5  ;;  %v3141_v18 = vsel %vm3140_vm6, %v6377_v56, %v3137_v39  ;;  %v3083_v56 = vsub.f32 %v8146_v38, %v8273_v35  ;;  %vm3158_vm11 = vweird.f32 %v8297_v61 }
 0x6f5   : > { %v3053_v0 = vsub.f32 %v3021_v10, %v3037_v17  ;;  %5935 = vmatmul.msk.bf16.vlgmr.msra.gmra.mxu2 %vm250_vm0, %v3330_v6  ;;  %v3274_v62 = vmul.f32 %v3141_v18, %v3082_v59  ;;  %v6156_v17 = vld [vmem:[#allocation2 + $0x178] sm:$0xff]  ;;  %v3084_v6 = vsub.f32 %v8155_v54, %v8279_v47 }
 0x6f6   : > { %v3145_v22 = vmul.f32 0.5, %v3144_v14  ;;  %3527 = vmatpush.bf16.msra.mxu0 %v6156_v17 }
 0x6f7   : > { %v3069_v50 = vmax.f32 %v3053_v0, 0.0  ;;  %v3291_v28 = vmul.f32 %v8284_v63, %v3274_v62 }
 0x6f8   : > { %v3146_v26 = vsub.f32 1.5, %v3145_v22  ;;  %v2908_v12 = vpop.xlane.xlu2 %2907 }
 0x6f9   : > { %v6381_v32 = vpop.eup %6380  ;;  %v3101_v46 = vadd.f32 1e-05, %v3069_v50  ;;  %v8316_v42 = vmul.f32 0.015625, %v2908_v12  ;;  %v8330_v51 = vadd.f32 %v8293_v45, %v3291_v28 }
 0x6fa   : > { %v3153_v60 = vmul.f32 %v6381_v32, %v8297_v61  ;;  %v3147_v37 = vmul.f32 %v6379_v24, %v3146_v26  ;;  %v2972_v20 = vpop.xlane.xlu1 %2971  ;;  %vm3159_vm10 = vweird.f32 %v6381_v32 }
 0x6fb   : > { %6382 = vrsqrt.f32 %v3101_v46  ;;  %v3038_v30 = vmul.f32 %v8316_v42, %v8316_v42  ;;  %v3022_v13 = vmul.f32 0.015625, %v2972_v20  ;;  %vm3160_vm12 = vmor %vm3158_vm11, %vm3159_vm10  ;;  %vm3168_vm14 = vweird.f32 %v3101_v46 }
 0x6fc   : > { %v3154_v33 = vmul.f32 %v6381_v32, %v3153_v60  ;;  %v3151_v48 = vsel %vm3150_vm9, %v6379_v24, %v3147_v37 }
 0x6fd   : > { %v3275_v27 = vmul.f32 %v3151_v48, %v3083_v56  ;;  %v3054_v25 = vsub.f32 %v3022_v13, %v3038_v30 }
 0x6fe   : > { %v3155_v57 = vmul.f32 0.5, %v3154_v33 }
 0x6ff   : > { %v3292_v36 = vmul.f32 %v8284_v63, %v3275_v27  ;;  %v3070_v2 = vmax.f32 %v3054_v25, 0.0 }
 0x700   : > { %v3156_v40 = vsub.f32 1.5, %v3155_v57  ;;  %v2911_v19 = vpop.xlane.xlu0 %2910 }
 0x701   : > { %v6383_v49 = vpop.eup %6382  ;;  %v8324_v38 = vmul.f32 0.015625, %v2911_v19  ;;  %v8327_v35 = vadd.f32 %v8293_v45, %v3292_v36  ;;  %v3102_v4 = vadd.f32 1e-05, %v3070_v2 }
 0x702   : > { %v3163_v55 = vmul.f32 %v6383_v49, %v3101_v46  ;;  %v2975_v58 = vpop.xlane.xlu2 %2974  ;;  %v3157_v1 = vmul.f32 %v6381_v32, %v3156_v40  ;;  %vm3169_vm13 = vweird.f32 %v6383_v49 }
 0x703   : > { %v3039_v31 = vmul.f32 %v8324_v38, %v8324_v38  ;;  %v3023_v52 = vmul.f32 0.015625, %v2975_v58  ;;  %6384 = vrsqrt.f32 %v3102_v4  ;;  %v3331_v5 = vpack.c.bf16 %v8327_v35, %v8330_v51  ;;  %vm3170_vm15 = vmor %vm3168_vm14, %vm3169_vm13 }
 0x704   : > { %v3164_v24 = vmul.f32 %v6383_v49, %v3163_v55  ;;  %v3161_v10 = vsel %vm3160_vm12, %v6381_v32, %v3157_v1  ;;  %v3085_v32 = vsub.f32 %v8164_v7, %v8299_v8  ;;  %vm3178_vm2 = vweird.f32 %v3102_v4 }
 0x705   : > { %v3055_v11 = vsub.f32 %v3023_v52, %v3039_v31  ;;  %5936 = vmatmul.msk.bf16.gmra.mxu2 %vm250_vm0, %v3331_v5  ;;  %v3276_v59 = vmul.f32 %v3161_v10, %v3084_v6  ;;  %v6155_v52 = vld [vmem:[#allocation2 + $0x170] sm:$0xff]  ;;  %v3086_v5 = vsub.f32 %v8173_v53, %v8316_v42 }
 0x706   : > { %v3165_v39 = vmul.f32 0.5, %v3164_v24  ;;  %3528 = vmatpush.bf16.msra.mxu0 %v6155_v52 }
 0x707   : > { %v3071_v14 = vmax.f32 %v3055_v11, 0.0  ;;  %v3293_v33 = vmul.f32 %v8284_v63, %v3276_v59 }
 0x708   : > { %v3166_v0 = vsub.f32 1.5, %v3165_v39 }
 0x709   : > { %v2914_v22 = vpop.xlane.xlu0 %2913  ;;  %v3103_v18 = vadd.f32 1e-05, %v3071_v14  ;;  %v6385_v50 = vpop.eup %6384  ;;  %v8356_v36 = vadd.f32 %v8293_v45, %v3293_v33 }
 0x70a   : > { %v8340_v61 = vmul.f32 0.015625, %v2914_v22  ;;  %v3167_v26 = vmul.f32 %v6383_v49, %v3166_v0  ;;  %v3173_v60 = vmul.f32 %v6385_v50, %v3102_v4  ;;  %vm3179_vm1 = vweird.f32 %v6385_v50 }
 0x70b   : > { %v2978_v12 = vpop.xlane.xlu2 %2977  ;;  %6386 = vrsqrt.f32 %v3103_v18  ;;  %vm3180_vm3 = vmor %vm3178_vm2, %vm3179_vm1  ;;  %vm3188_vm5 = vweird.f32 %v3103_v18 }
 0x70c   : > { %v3171_v62 = vsel %vm3170_vm15, %v6383_v49, %v3167_v26  ;;  %v3040_v54 = vmul.f32 %v8340_v61, %v8340_v61  ;;  %v3024_v47 = vmul.f32 0.015625, %v2978_v12  ;;  %v3174_v20 = vmul.f32 %v6385_v50, %v3173_v60  ;;  %v6154_v60 = vld [vmem:[#allocation2 + $0x168] sm:$0xff] }
 0x70d   : > { %v3277_v37 = vmul.f32 %v3171_v62, %v3085_v32  ;;  %3529 = vmatpush.bf16.msra.mxu0 %v6154_v60 }
 0x70e   : > { %v3056_v56 = vsub.f32 %v3024_v47, %v3040_v54  ;;  %v3175_v30 = vmul.f32 0.5, %v3174_v20 }
 0x70f   : > { %v3294_v46 = vmul.f32 %v8284_v63, %v3277_v37 }
 0x710   : > { %v3072_v48 = vmax.f32 %v3056_v56, 0.0  ;;  %v3176_v7 = vsub.f32 1.5, %v3175_v30 }
 0x711   : > { %v2917_v13 = vpop.xlane.xlu1 %2916  ;;  %v6387_v27 = vpop.eup %6386  ;;  %v8351_v57 = vadd.f32 %v8293_v45, %v3294_v46 }
 0x712   : > { %v8348_v8 = vmul.f32 0.015625, %v2917_v13  ;;  %v3183_v25 = vmul.f32 %v6387_v27, %v3103_v18  ;;  %v8353_v28 = vadd.f32 1e-05, %v3072_v48  ;;  %v3177_v2 = vmul.f32 %v6385_v50, %v3176_v7 }
 0x713   : > { %v2981_v40 = vpop.xlane.xlu0 %2980  ;;  %v3332_v58 = vpack.c.bf16 %v8351_v57, %v8356_v36  ;;  %vm3189_vm4 = vweird.f32 %v6387_v27 }
 0x714   : > { %v3041_v19 = vmul.f32 %v8348_v8, %v8348_v8  ;;  %v3025_v49 = vmul.f32 0.015625, %v2981_v40  ;;  %v3184_v55 = vmul.f32 %v6387_v27, %v3183_v25  ;;  %6388 = vrsqrt.f32 %v8353_v28  ;;  %vm3190_vm6 = vmor %vm3188_vm5, %vm3189_vm4 }
 0x715   : > { %v3181_v24 = vsel %vm3180_vm3, %v6385_v50, %v3177_v2  ;;  %5937 = vmatmul.msk.bf16.gmra.mxu2 %vm250_vm0, %v3332_v58  ;;  %v3087_v50 = vsub.f32 %v8182_v9, %v8324_v38  ;;  %vm3198_vm8 = vweird.f32 %v8353_v28  ;;  %v3088_v58 = vsub.f32 %v8191_v23, %v8340_v61 }
 0x716   : > { %v3057_v1 = vsub.f32 %v3025_v49, %v3041_v19  ;;  %v3185_v31 = vmul.f32 0.5, %v3184_v55  ;;  %v3278_v4 = vmul.f32 %v3181_v24, %v3086_v5 }
 0x718   : > { %v3073_v11 = vmax.f32 %v3057_v1, 0.0  ;;  %v3186_v39 = vsub.f32 1.5, %v3185_v31  ;;  %v3295_v54 = vmul.f32 %v8284_v63, %v3278_v4 }
 0x719   : > { %v2920_v17 = vpop.xlane.xlu1 %2919 }
 0x71a   : > { %v3105_v10 = vadd.f32 1e-05, %v3073_v11  ;;  %v8366_v14 = vmul.f32 0.015625, %v2920_v17  ;;  %v6389_v6 = vpop.eup %6388  ;;  %v3187_v0 = vmul.f32 %v6387_v27, %v3186_v39  ;;  %v8381_v13 = vadd.f32 %v8293_v45, %v3295_v54 }
 0x71b   : > { %v2984_v22 = vpop.xlane.xlu0 %2983  ;;  %v3193_v59 = vmul.f32 %v6389_v6, %v8353_v28  ;;  %vm3199_vm7 = vweird.f32 %v6389_v6  ;;  %v3089_v17 = vsub.f32 %v8200_v16, %v8348_v8 }
 0x71c   : > { %6390 = vrsqrt.f32 %v3105_v10  ;;  %v3191_v53 = vsel %vm3190_vm6, %v6387_v27, %v3187_v0  ;;  %v3042_v42 = vmul.f32 %v8366_v14, %v8366_v14  ;;  %v3026_v26 = vmul.f32 0.015625, %v2984_v22  ;;  %vm3200_vm9 = vmor %vm3198_vm8, %vm3199_vm7 }
 0x71d   : > { %v3279_v12 = vmul.f32 %v3191_v53, %v3087_v50  ;;  %v3194_v32 = vmul.f32 %v6389_v6, %v3193_v59  ;;  %vm3208_vm11 = vweird.f32 %v3105_v10 }
 0x71e   : > { %v3058_v62 = vsub.f32 %v3026_v26, %v3042_v42  ;;  %v6153_v26 = vld [vmem:[#allocation2 + $0x160] sm:$0xff] }
 0x71f   : > { %v3195_v18 = vmul.f32 0.5, %v3194_v32  ;;  %v3296_v47 = vmul.f32 %v8284_v63, %v3279_v12  ;;  %3530 = vmatpush.bf16.msra.mxu0 %v6153_v26 }
 0x720   : > { %v3074_v9 = vmax.f32 %v3058_v62, 0.0 }
 0x721   : > { %v2923_v38 = vpop.xlane.xlu2 %2922  ;;  %v3196_v20 = vsub.f32 1.5, %v3195_v18  ;;  %v8378_v33 = vadd.f32 %v8293_v45, %v3296_v47 }
 0x722   : > { %v6391_v37 = vpop.eup %6390  ;;  %v8375_v56 = vmul.f32 0.015625, %v2923_v38  ;;  %v3106_v46 = vadd.f32 1e-05, %v3074_v9 }
 0x723   : > { %v3203_v30 = vmul.f32 %v6391_v37, %v3105_v10  ;;  %v2987_v48 = vpop.xlane.xlu1 %2986  ;;  %v3197_v27 = vmul.f32 %v6389_v6, %v3196_v20  ;;  %v3333_v2 = vpack.c.bf16 %v8378_v33, %v8381_v13  ;;  %vm3209_vm10 = vweird.f32 %v6391_v37 }
 0x724   : > { %v3043_v7 = vmul.f32 %v8375_v56, %v8375_v56  ;;  %v3027_v25 = vmul.f32 0.015625, %v2987_v48  ;;  %6392 = vrsqrt.f32 %v3106_v46  ;;  %vm3210_vm12 = vmor %vm3208_vm11, %vm3209_vm10  ;;  %vm3218_vm14 = vweird.f32 %v3106_v46 }
 0x725   : > { %v3204_v40 = vmul.f32 %v6391_v37, %v3203_v30  ;;  %v3201_v49 = vsel %vm3200_vm9, %v6389_v6, %v3197_v27  ;;  %5938 = vmatmul.msk.bf16.gmra.mxu2 %vm250_vm0, %v3333_v2 }
 0x726   : > { %v3059_v19 = vsub.f32 %v3027_v25, %v3043_v7  ;;  %v3280_v52 = vmul.f32 %v3201_v49, %v3088_v58  ;;  %v3090_v25 = vsub.f32 %v8209_v44, %v8366_v14 }
 0x727   : > { %v3205_v55 = vmul.f32 0.5, %v3204_v40 }
 0x728   : > { %v3075_v1 = vmax.f32 %v3059_v19, 0.0  ;;  %v3297_v59 = vmul.f32 %v8284_v63, %v3280_v52 }
 0x729   : > { %v3206_v31 = vsub.f32 1.5, %v3205_v55 }
 0x72a   : > { %v3107_v24 = vadd.f32 1e-05, %v3075_v1  ;;  %v6393_v11 = vpop.eup %6392  ;;  %v8400_v60 = vadd.f32 %v8293_v45, %v3297_v59 }
 0x72b   : > { %v3207_v5 = vmul.f32 %v6391_v37, %v3206_v31  ;;  %v3213_v6 = vmul.f32 %v6393_v11, %v3106_v46  ;;  %vm3219_vm13 = vweird.f32 %v6393_v11  ;;  %v3091_v31 = vsub.f32 %v8218_v21, %v8375_v56 }
 0x72c   : > { %v2926_v28 = vpop.xlane.xlu2 %2925  ;;  %6394 = vrsqrt.f32 %v3107_v24  ;;  %vm3220_vm15 = vmor %vm3218_vm14, %vm3219_vm13  ;;  %vm3228_vm2 = vweird.f32 %v3107_v24 }
 0x72d   : > { %v8391_v39 = vmul.f32 0.015625, %v2926_v28  ;;  %v3211_v61 = vsel %vm3210_vm12, %v6391_v37, %v3207_v5  ;;  %v3214_v50 = vmul.f32 %v6393_v11, %v3213_v6 }
 0x72e   : > { %v2990_v23 = vpop.xlane.xlu1 %2989  ;;  %v3281_v22 = vmul.f32 %v3211_v61, %v3089_v17 }
 0x72f   : > { %v3044_v4 = vmul.f32 %v8391_v39, %v8391_v39  ;;  %v3028_v0 = vmul.f32 0.015625, %v2990_v23  ;;  %v3215_v10 = vmul.f32 0.5, %v3214_v50 }
 0x730   : > { %v3298_v42 = vmul.f32 %v8284_v63, %v3281_v22 }
 0x731   : > { %v3060_v53 = vsub.f32 %v3028_v0, %v3044_v4  ;;  %v3216_v8 = vsub.f32 1.5, %v3215_v10  ;;  %v6152_v0 = vld [vmem:[#allocation2 + $0x158] sm:$0xff] }
 0x732   : > { %v6395_v16 = vpop.eup %6394  ;;  %v8403_v62 = vadd.f32 %v8293_v45, %v3298_v42  ;;  %3531 = vmatpush.bf16.msra.mxu0 %v6152_v0 }
 0x733   : > { %v3076_v12 = vmax.f32 %v3060_v53, 0.0  ;;  %v3223_v54 = vmul.f32 %v6395_v16, %v3107_v24  ;;  %v3217_v9 = vmul.f32 %v6393_v11, %v3216_v8  ;;  %vm3229_vm1 = vweird.f32 %v6395_v16  ;;  %v6151_v53 = vld [vmem:[#allocation2 + $0x150] sm:$0xff] }
 0x734   : > { %v2929_v32 = vpop.xlane.xlu0 %2928  ;;  %v3334_v38 = vpack.c.bf16 %v8403_v62, %v8400_v60  ;;  %vm3230_vm3 = vmor %vm3228_vm2, %vm3229_vm1 }
 0x735   : > { %v3108_v18 = vadd.f32 1e-05, %v3076_v12  ;;  %v8405_v47 = vmul.f32 0.015625, %v2929_v32  ;;  %v3224_v20 = vmul.f32 %v6395_v16, %v3223_v54  ;;  %v3221_v27 = vsel %vm3220_vm15, %v6393_v11, %v3217_v9 }
 0x736   : > { %v2993_v37 = vpop.xlane.xlu2 %2992  ;;  %5939 = vmatmul.msk.bf16.gmra.mxu2 %vm250_vm0, %v3334_v38  ;;  %v3282_v19 = vmul.f32 %v3221_v27, %v3090_v25  ;;  %3532 = vmatpush.bf16.msra.mxu0 %v6151_v53  ;;  %v3092_v27 = vsub.f32 %v8227_v43, %v8391_v39 }
 0x737   : > { %6396 = vrsqrt.f32 %v3108_v18  ;;  %v3045_v30 = vmul.f32 %v8405_v47, %v8405_v47  ;;  %v3029_v48 = vmul.f32 0.015625, %v2993_v37  ;;  %v3225_v7 = vmul.f32 0.5, %v3224_v20  ;;  %v6150_v20 = vld [vmem:[#allocation2 + $0x148] sm:$0xff] }
 0x738   : > { %v3299_v23 = vmul.f32 %v8284_v63, %v3282_v19  ;;  %vm3238_vm5 = vweird.f32 %v3108_v18 }
 0x739   : > { %v3061_v40 = vsub.f32 %v3029_v48, %v3045_v30  ;;  %v3226_v2 = vsub.f32 1.5, %v3225_v7 }
 0x73a   : > { %v8423_v50 = vadd.f32 %v8293_v45, %v3299_v23  ;;  %3533 = vmatpush.bf16.msra.mxu0 %v6150_v20 }
 0x73b   : > { %v3077_v49 = vmax.f32 %v3061_v40, 0.0  ;;  %v3227_v58 = vmul.f32 %v6395_v16, %v3226_v2 }
 0x73c   : > { %v2932_v46 = vpop.xlane.xlu0 %2931 }
 0x73d   : > { %v6397_v55 = vpop.eup %6396  ;;  %v8414_v1 = vmul.f32 0.015625, %v2932_v46  ;;  %v3109_v28 = vadd.f32 1e-05, %v3077_v49  ;;  %v3231_v14 = vsel %vm3230_vm3, %v6395_v16, %v3227_v58  ;;  %v3093_v46 = vsub.f32 %v8236_v34, %v8405_v47 }
 0x73e   : > { %v3233_v52 = vmul.f32 %v6397_v55, %v3108_v18  ;;  %v2996_v44 = vpop.xlane.xlu2 %2995  ;;  %v3283_v17 = vmul.f32 %v3231_v14, %v3091_v31  ;;  %vm3239_vm4 = vweird.f32 %v6397_v55 }
 0x73f   : > { %v3046_v11 = vmul.f32 %v8414_v1, %v8414_v1  ;;  %v3030_v5 = vmul.f32 0.015625, %v2996_v44  ;;  %6398 = vrsqrt.f32 %v3109_v28  ;;  %vm3240_vm6 = vmor %vm3238_vm5, %vm3239_vm4  ;;  %vm3248_vm8 = vweird.f32 %v3109_v28 }
 0x740   : > { %v3234_v6 = vmul.f32 %v6397_v55, %v3233_v52  ;;  %v3300_v4 = vmul.f32 %v8284_v63, %v3283_v17 }
 0x741   : > { %v3062_v24 = vsub.f32 %v3030_v5, %v3046_v11 }
 0x742   : > { %v3235_v61 = vmul.f32 0.5, %v3234_v6  ;;  %v8426_v59 = vadd.f32 %v8293_v45, %v3300_v4 }
 0x743   : > { %v3078_v21 = vmax.f32 %v3062_v24, 0.0  ;;  %v3094_v24 = vsub.f32 %v8245_v15, %v8414_v1 }
 0x744   : > { %v3236_v56 = vsub.f32 1.5, %v3235_v61  ;;  %v2935_v22 = vpop.xlane.xlu1 %2934  ;;  %v3335_v12 = vpack.c.bf16 %v8426_v59, %v8423_v50 }
 0x745   : > { %v3110_v10 = vadd.f32 1e-05, %v3078_v21  ;;  %v8428_v42 = vmul.f32 0.015625, %v2935_v22  ;;  %v6399_v26 = vpop.eup %6398  ;;  %v6149_v21 = vld [vmem:[#allocation2 + $0x140] sm:$0xff] }
 0x746   : > { %v2999_v16 = vpop.xlane.xlu0 %2998  ;;  %v3237_v8 = vmul.f32 %v6397_v55, %v3236_v56  ;;  %v3243_v32 = vmul.f32 %v6399_v26, %v3109_v28  ;;  %5940 = vmatmul.msk.bf16.gmra.mxu2 %vm250_vm0, %v3335_v12  ;;  %vm3249_vm7 = vweird.f32 %v6399_v26  ;;  %3534 = vmatpush.bf16.msra.mxu0 %v6149_v21 }
 0x747   : > { %6400 = vrsqrt.f32 %v3110_v10  ;;  %v3047_v54 = vmul.f32 %v8428_v42, %v8428_v42  ;;  %v3031_v9 = vmul.f32 0.015625, %v2999_v16  ;;  %vm3250_vm9 = vmor %vm3248_vm8, %vm3249_vm7  ;;  %vm3258_vm11 = vweird.f32 %v3110_v10 }
 0x748   : > { %v3244_v38 = vmul.f32 %v6399_v26, %v3243_v32  ;;  %v3241_v30 = vsel %vm3240_vm6, %v6397_v55, %v3237_v8  ;;  %v3095_v56 = vsub.f32 %v8258_v41, %v8428_v42  ;;  %v6230_v42 = vld [vmem:[%s9551_s2 + $0x15] ss:$0 sm:$0xff] }
 0x749   : > { %v3063_v37 = vsub.f32 %v3031_v9, %v3047_v54  ;;  %v3284_v2 = vmul.f32 %v3241_v30, %v3092_v27 }
 0x74a   : > { %v3245_v48 = vmul.f32 0.5, %v3244_v38 }
 0x74b   : > { %v3079_v7 = vmax.f32 %v3063_v37, 0.0  ;;  %v3301_v43 = vmul.f32 %v8284_v63, %v3284_v2 }
 0x74c   : > { %v3246_v40 = vsub.f32 1.5, %v3245_v48 }
 0x74d   : > { %v6401_v25 = vpop.eup %6400  ;;  %v3111_v49 = vadd.f32 1e-05, %v3079_v7  ;;  %v8442_v11 = vadd.f32 %v8293_v45, %v3301_v43 }
 0x74e   : > { %v3253_v19 = vmul.f32 %v6401_v25, %v3110_v10  ;;  %v3247_v18 = vmul.f32 %v6399_v26, %v3246_v40  ;;  %vm3259_vm10 = vweird.f32 %v6401_v25 }
 0x74f   : > { %6402 = vrsqrt.f32 %v3111_v49  ;;  %vm3260_vm12 = vmor %vm3258_vm11, %vm3259_vm10  ;;  %vm3268_vm14 = vweird.f32 %v3111_v49 }
 0x750   : > { %v3254_v58 = vmul.f32 %v6401_v25, %v3253_v19  ;;  %v3251_v55 = vsel %vm3250_vm9, %v6399_v26, %v3247_v18 }
 0x751   : > { %v3285_v31 = vmul.f32 %v3251_v55, %v3093_v46 }
 0x752   : > { %v3255_v52 = vmul.f32 0.5, %v3254_v58 }
 0x753   : > { %v3302_v44 = vmul.f32 %v8284_v63, %v3285_v31 }
 0x754   : > { %v3256_v39 = vsub.f32 1.5, %v3255_v52 }
 0x755   : > { %v6403_v14 = vpop.eup %6402  ;;  %v8445_v28 = vadd.f32 %v8293_v45, %v3302_v44 }
 0x756   : > { %v3257_v5 = vmul.f32 %v6401_v25, %v3256_v39  ;;  %v3263_v34 = vmul.f32 %v6403_v14, %v3111_v49  ;;  %vm3269_vm13 = vweird.f32 %v6403_v14 }
 0x757   : > { %v3336_v47 = vpack.c.bf16 %v8445_v28, %v8442_v11  ;;  %vm3270_vm15 = vmor %vm3268_vm14, %vm3269_vm13 }
 0x758   : > { %v3264_v17 = vmul.f32 %v6403_v14, %v3263_v34  ;;  %v3261_v6 = vsel %vm3260_vm12, %v6401_v25, %v3257_v5 }
 0x759   : > { %5941 = vmatmul.msk.bf16.gmra.mxu2 %vm250_vm0, %v3336_v47  ;;  %v3286_v4 = vmul.f32 %v3261_v6, %v3094_v24 }
 0x75a   : > { %v3265_v23 = vmul.f32 0.5, %v3264_v17 }
 0x75b   : > { %v3303_v10 = vmul.f32 %v8284_v63, %v3286_v4 }
 0x75c   : > { %v3266_v61 = vsub.f32 1.5, %v3265_v23 }
 0x75d   : > { %v8457_v12 = vadd.f32 %v8293_v45, %v3303_v10 }
 0x75e   : > { %v3267_v0 = vmul.f32 %v6403_v14, %v3266_v61 }
 0x760   : > { %v3271_v22 = vsel %vm3270_vm15, %v6403_v14, %v3267_v0 }
 0x761   : > { %v3287_v53 = vmul.f32 %v3271_v22, %v3095_v56 }
 0x763   : > { %v3304_v26 = vmul.f32 %v8284_v63, %v3287_v53 }
 0x765   : > { %v8460_v15 = vadd.f32 %v8293_v45, %v3304_v26 }
 0x767   : > { %v3337_v1 = vpack.c.bf16 %v8460_v15, %v8457_v12 }
 0x769   : > { %5942 = vmatmul.msk.bf16.gmra.mxu2 %vm250_vm0, %v3337_v1 }
 0x778   : > { %v3397_v41 = vpop.f32.mrf.mxu2 }
 0x779   : > { %v3398_v16 = vadd.f32 %v6230_v42, %v3397_v41 }
 0x77b   : > { %v3437_v63 = vmax.f32 %v3398_v16, 0.0 }
 0x780   : > { %v3399_v8 = vpop.f32.mrf.mxu2 }
 0x781   : > { %v3400_v32 = vadd.f32 %v6230_v42, %v3399_v8 }
 0x783   : > { %v3438_v54 = vmax.f32 %v3400_v32, 0.0 }
 0x785   : > { %v3469_v9 = vpack.c.bf16 %v3438_v54, %v3437_v63 }
 0x787   : > { %3535 = vmatmul.bf16.vlgmr.msra.gmra.mxu0 %v3469_v9 }
 0x788   : > { %v3402_v38 = vpop.f32.mrf.mxu2 }
 0x789   : > { %v3403_v45 = vadd.f32 %v6230_v42, %v3402_v38 }
 0x78b   : > { %v3439_v30 = vmax.f32 %v3403_v45, 0.0 }
 0x790   : > { %v3404_v37 = vpop.f32.mrf.mxu2 }
 0x791   : > { %v3405_v20 = vadd.f32 %v6230_v42, %v3404_v37  ;;  %v8471_v37 = vld [vmem:[%s9551_s2 + $0x16] ss:$0 sm:$0xff] }
 0x793   : > { %v3440_v48 = vmax.f32 %v3405_v20, 0.0 }
 0x795   : > { %v3470_v27 = vpack.c.bf16 %v3440_v48, %v3439_v30 }
 0x797   : > { %3540 = vmatmul.bf16.gmra.mxu0 %v3470_v27 }
 0x798   : > { %v3407_v7 = vpop.f32.mrf.mxu2 }
 0x799   : > { %v3408_v25 = vadd.f32 %v6230_v42, %v3407_v7 }
 0x79b   : > { %v3441_v19 = vmax.f32 %v3408_v25, 0.0 }
 0x7a0   : > { %v3409_v40 = vpop.f32.mrf.mxu2 }
 0x7a1   : > { %v3410_v2 = vadd.f32 %v6230_v42, %v3409_v40 }
 0x7a3   : > { %v3442_v49 = vmax.f32 %v3410_v2, 0.0 }
 0x7a5   : > { %v3471_v18 = vpack.c.bf16 %v3442_v49, %v3441_v19  ;;  %v6160_v19 = vld [vmem:[#allocation2 + $0x198] sm:$0xff] }
 0x7a6   : > { %4098 = vmatpush.bf16.msra.mxu1 %v6160_v19 }
 0x7a7   : > { %3545 = vmatmul.bf16.gmra.mxu0 %v3471_v18 }
 0x7a8   : > { %v3412_v46 = vpop.f32.mrf.mxu2 }
 0x7a9   : > { %v3413_v58 = vadd.f32 %v6230_v42, %v3412_v46 }
 0x7ab   : > { %v3443_v52 = vmax.f32 %v3413_v58, 0.0 }
 0x7b0   : > { %v3414_v55 = vpop.f32.mrf.mxu2 }
 0x7b1   : > { %v3415_v31 = vadd.f32 %v6230_v42, %v3414_v55 }
 0x7b3   : > { %v3444_v43 = vmax.f32 %v3415_v31, 0.0 }
 0x7b5   : > { %v3472_v39 = vpack.c.bf16 %v3444_v43, %v3443_v52 }
 0x7b7   : > { %3550 = vmatmul.bf16.gmra.mxu0 %v3472_v39 }
 0x7b9   : > { %v3417_v44 = vpop.f32.mrf.mxu2 }
 0x7ba   : > { %v3418_v14 = vadd.f32 %v6230_v42, %v3417_v44 }
 0x7bc   : > { %v3445_v47 = vmax.f32 %v3418_v14, 0.0 }
 0x7c1   : > { %v3419_v5 = vpop.f32.mrf.mxu2 }
 0x7c2   : > { %v3420_v34 = vadd.f32 %v6230_v42, %v3419_v5 }
 0x7c4   : > { %v3446_v17 = vmax.f32 %v3420_v34, 0.0 }
 0x7c6   : > { %v3473_v6 = vpack.c.bf16 %v3446_v17, %v3445_v47 }
 0x7c8   : > { %3555 = vmatmul.bf16.gmra.mxu0 %v3473_v6 }
 0x7c9   : > { %v3422_v23 = vpop.f32.mrf.mxu2 }
 0x7ca   : > { %v3423_v24 = vadd.f32 %v6230_v42, %v3422_v23 }
 0x7cc   : > { %v3447_v0 = vmax.f32 %v3423_v24, 0.0 }
 0x7d1   : > { %v3424_v61 = vpop.f32.mrf.mxu2 }
 0x7d2   : > { %v3425_v4 = vadd.f32 %v6230_v42, %v3424_v61 }
 0x7d4   : > { %v3448_v21 = vmax.f32 %v3425_v4, 0.0 }
 0x7d6   : > { %v3474_v56 = vpack.c.bf16 %v3448_v21, %v3447_v0  ;;  %v6159_v0 = vld [vmem:[#allocation2 + $0x190] sm:$0xff] }
 0x7d7   : > { %4099 = vmatpush.bf16.msra.mxu1 %v6159_v0 }
 0x7d8   : > { %3560 = vmatmul.bf16.gmra.mxu0 %v3474_v56 }
 0x7dc   : > { %v3427_v22 = vpop.f32.mrf.mxu2 }
 0x7dd   : > { %v3428_v53 = vadd.f32 %v6230_v42, %v3427_v22 }
 0x7df   : > { %v3449_v1 = vmax.f32 %v3428_v53, 0.0 }
 0x7e4   : > { %v3429_v10 = vpop.f32.mrf.mxu2 }
 0x7e5   : > { %v3430_v26 = vadd.f32 %v6230_v42, %v3429_v10 }
 0x7e7   : > { %v3450_v41 = vmax.f32 %v3430_v26, 0.0 }
 0x7e9   : > { %v3475_v16 = vpack.c.bf16 %v3450_v41, %v3449_v1 }
 0x7eb   : > { %3565 = vmatmul.bf16.gmra.mxu0 %v3475_v16 }
 0x7ec   : > { %v3432_v8 = vpop.f32.mrf.mxu2 }
 0x7ed   : > { %v3433_v32 = vadd.f32 %v6230_v42, %v3432_v8 }
 0x7ef   : > { %v3451_v9 = vmax.f32 %v3433_v32, 0.0 }
 0x7f4   : > { %v3434_v63 = vpop.f32.mrf.mxu2 }
 0x7f5   : > { %v3435_v54 = vadd.f32 %v6230_v42, %v3434_v63 }
 0x7f7   : > { %v3452_v38 = vmax.f32 %v3435_v54, 0.0 }
 0x7f9   : > { %v3476_v45 = vpack.c.bf16 %v3452_v38, %v3451_v9 }
 0x7fb   : > { %3570 = vmatmul.bf16.gmra.mxu0 %v3476_v45  ;;  %v6158_v45 = vld [vmem:[#allocation2 + $0x188] sm:$0xff] }
 0x7fc   : > { %4100 = vmatpush.bf16.msra.mxu1 %v6158_v45 }
 0x804   : > { %v3536_v20 = vpop.f32.mrf.mxu0 }
 0x805   : > { %v3537_v30 = vadd.f32 %v8471_v37, %v3536_v20 }
 0x807   : > { %v8475_v48 = vadd.f32 %v3537_v30, %v8305_v3 }
 0x809   : > { %v3594_v27 = vsel %vm250_vm0, %v8475_v48, 0.0  ;;  %v3642_v42 = vmul.f32 %v8475_v48, %v8475_v48 }
 0x80a   : > { %3595 = vadd.xlane.f32.xlu1 %v3594_v27 }
 0x80b   : > { %v3658_v7 = vsel %vm250_vm0, %v3642_v42, 0.0 }
 0x80c   : > { %v3538_v25 = vpop.f32.mrf.mxu0  ;;  %3659 = vadd.xlane.f32.xlu0 %v3658_v7 }
 0x80d   : > { %v3539_v40 = vadd.f32 %v8471_v37, %v3538_v25 }
 0x80f   : > { %v8484_v2 = vadd.f32 %v3539_v40, %v8302_v29 }
 0x811   : > { %v3597_v3 = vsel %vm250_vm0, %v8484_v2, 0.0  ;;  %v3643_v49 = vmul.f32 %v8484_v2, %v8484_v2 }
 0x812   : > { %3598 = vadd.xlane.f32.xlu2 %v3597_v3 }
 0x813   : > { %v3661_v18 = vsel %vm250_vm0, %v3643_v49, 0.0 }
 0x814   : > { %3662 = vadd.xlane.f32.xlu1 %v3661_v18  ;;  %v3541_v46 = vpop.f32.mrf.mxu0 }
 0x815   : > { %v3542_v58 = vadd.f32 %v8471_v37, %v3541_v46 }
 0x817   : > { %v8493_v55 = vadd.f32 %v3542_v58, %v8330_v51 }
 0x819   : > { %v3600_v29 = vsel %vm250_vm0, %v8493_v55, 0.0  ;;  %v3644_v31 = vmul.f32 %v8493_v55, %v8493_v55 }
 0x81a   : > { %3601 = vadd.xlane.f32.xlu2 %v3600_v29 }
 0x81b   : > { %v3664_v52 = vsel %vm250_vm0, %v3644_v31, 0.0 }
 0x81c   : > { %v3543_v43 = vpop.f32.mrf.mxu0  ;;  %3665 = vadd.xlane.f32.xlu1 %v3664_v52 }
 0x81d   : > { %v3544_v39 = vadd.f32 %v8471_v37, %v3543_v43 }
 0x81f   : > { %v8502_v44 = vadd.f32 %v3544_v39, %v8327_v35 }
 0x821   : > { %v3603_v51 = vsel %vm250_vm0, %v8502_v44, 0.0  ;;  %v3645_v14 = vmul.f32 %v8502_v44, %v8502_v44 }
 0x822   : > { %3604 = vadd.xlane.f32.xlu0 %v3603_v51 }
 0x823   : > { %v3667_v5 = vsel %vm250_vm0, %v3645_v14, 0.0 }
 0x824   : > { %3668 = vadd.xlane.f32.xlu2 %v3667_v5  ;;  %v3546_v34 = vpop.f32.mrf.mxu0 }
 0x825   : > { %v3547_v47 = vadd.f32 %v8471_v37, %v3546_v34 }
 0x827   : > { %v8511_v17 = vadd.f32 %v3547_v47, %v8356_v36 }
 0x829   : > { %v3606_v35 = vsel %vm250_vm0, %v8511_v17, 0.0  ;;  %v3646_v6 = vmul.f32 %v8511_v17, %v8511_v17 }
 0x82a   : > { %3607 = vadd.xlane.f32.xlu0 %v3606_v35 }
 0x82b   : > { %v3670_v23 = vsel %vm250_vm0, %v3646_v6, 0.0 }
 0x82c   : > { %v3548_v24 = vpop.f32.mrf.mxu0  ;;  %3671 = vadd.xlane.f32.xlu2 %v3670_v23 }
 0x82d   : > { %v3549_v61 = vadd.f32 %v8471_v37, %v3548_v24 }
 0x82f   : > { %v8520_v4 = vadd.f32 %v3549_v61, %v8351_v57 }
 0x831   : > { %v3609_v36 = vsel %vm250_vm0, %v8520_v4, 0.0  ;;  %v3647_v21 = vmul.f32 %v8520_v4, %v8520_v4 }
 0x832   : > { %3610 = vadd.xlane.f32.xlu1 %v3609_v36 }
 0x833   : > { %v3673_v56 = vsel %vm250_vm0, %v3647_v21, 0.0 }
 0x834   : > { %3674 = vadd.xlane.f32.xlu0 %v3673_v56  ;;  %v3551_v22 = vpop.f32.mrf.mxu0 }
 0x835   : > { %v3552_v53 = vadd.f32 %v8471_v37, %v3551_v22 }
 0x837   : > { %v8529_v10 = vadd.f32 %v3552_v53, %v8381_v13 }
 0x839   : > { %v3612_v57 = vsel %vm250_vm0, %v8529_v10, 0.0  ;;  %v3648_v26 = vmul.f32 %v8529_v10, %v8529_v10 }
 0x83a   : > { %3613 = vadd.xlane.f32.xlu1 %v3612_v57 }
 0x83b   : > { %v3676_v1 = vsel %vm250_vm0, %v3648_v26, 0.0 }
 0x83c   : > { %v3553_v41 = vpop.f32.mrf.mxu0  ;;  %3677 = vadd.xlane.f32.xlu0 %v3676_v1 }
 0x83d   : > { %v3554_v16 = vadd.f32 %v8471_v37, %v3553_v41 }
 0x83f   : > { %v8538_v8 = vadd.f32 %v3554_v16, %v8378_v33 }
 0x841   : > { %v3615_v13 = vsel %vm250_vm0, %v8538_v8, 0.0  ;;  %v3649_v32 = vmul.f32 %v8538_v8, %v8538_v8 }
 0x842   : > { %3616 = vadd.xlane.f32.xlu2 %v3615_v13 }
 0x843   : > { %v3679_v63 = vsel %vm250_vm0, %v3649_v32, 0.0 }
 0x844   : > { %3680 = vadd.xlane.f32.xlu1 %v3679_v63 }
 0x845   : > { %v3556_v54 = vpop.f32.mrf.mxu0 }
 0x846   : > { %v3557_v9 = vadd.f32 %v8471_v37, %v3556_v54 }
 0x848   : > { %v8547_v38 = vadd.f32 %v3557_v9, %v8400_v60 }
 0x84a   : > { %v3618_v33 = vsel %vm250_vm0, %v8547_v38, 0.0  ;;  %v3650_v20 = vmul.f32 %v8547_v38, %v8547_v38 }
 0x84b   : > { %3619 = vadd.xlane.f32.xlu2 %v3618_v33 }
 0x84c   : > { %v3682_v30 = vsel %vm250_vm0, %v3650_v20, 0.0 }
 0x84d   : > { %v3558_v27 = vpop.f32.mrf.mxu0  ;;  %3683 = vadd.xlane.f32.xlu1 %v3682_v30  ;;  %v6157_v30 = vld [vmem:[#allocation2 + $0x180] sm:$0xff] }
 0x84e   : > { %v3559_v42 = vadd.f32 %v8471_v37, %v3558_v27  ;;  %4101 = vmatpush.bf16.msra.mxu1 %v6157_v30 }
 0x850   : > { %v8556_v7 = vadd.f32 %v3559_v42, %v8403_v62 }
 0x852   : > { %v3621_v60 = vsel %vm250_vm0, %v8556_v7, 0.0  ;;  %v3651_v25 = vmul.f32 %v8556_v7, %v8556_v7 }
 0x853   : > { %3622 = vadd.xlane.f32.xlu0 %v3621_v60 }
 0x854   : > { %v3685_v40 = vsel %vm250_vm0, %v3651_v25, 0.0 }
 0x855   : > { %3686 = vadd.xlane.f32.xlu2 %v3685_v40  ;;  %v3561_v19 = vpop.f32.mrf.mxu0 }
 0x856   : > { %v3562_v3 = vadd.f32 %v8471_v37, %v3561_v19 }
 0x858   : > { %v8565_v49 = vadd.f32 %v3562_v3, %v8423_v50 }
 0x85a   : > { %v3624_v62 = vsel %vm250_vm0, %v8565_v49, 0.0  ;;  %v3652_v18 = vmul.f32 %v8565_v49, %v8565_v49 }
 0x85b   : > { %3625 = vadd.xlane.f32.xlu0 %v3624_v62 }
 0x85c   : > { %v3688_v46 = vsel %vm250_vm0, %v3652_v18, 0.0 }
 0x85d   : > { %v3563_v58 = vpop.f32.mrf.mxu0  ;;  %3689 = vadd.xlane.f32.xlu2 %v3688_v46 }
 0x85e   : > { %v3564_v29 = vadd.f32 %v8471_v37, %v3563_v58 }
 0x860   : > { %v8574_v31 = vadd.f32 %v3564_v29, %v8426_v59 }
 0x862   : > { %v3627_v50 = vsel %vm250_vm0, %v8574_v31, 0.0  ;;  %v3653_v52 = vmul.f32 %v8574_v31, %v8574_v31 }
 0x863   : > { %3628 = vadd.xlane.f32.xlu1 %v3627_v50 }
 0x864   : > { %v3691_v43 = vsel %vm250_vm0, %v3653_v52, 0.0 }
 0x865   : > { %3692 = vadd.xlane.f32.xlu0 %v3691_v43 }
 0x868   : > { %v3566_v39 = vpop.f32.mrf.mxu0 }
 0x869   : > { %v3567_v51 = vadd.f32 %v8471_v37, %v3566_v39 }
 0x86b   : > { %v8583_v14 = vadd.f32 %v3567_v51, %v8442_v11 }
 0x86d   : > { %v3630_v59 = vsel %vm250_vm0, %v8583_v14, 0.0  ;;  %v3654_v5 = vmul.f32 %v8583_v14, %v8583_v14 }
 0x86e   : > { %3631 = vadd.xlane.f32.xlu1 %v3630_v59 }
 0x86f   : > { %v3694_v34 = vsel %vm250_vm0, %v3654_v5, 0.0 }
 0x870   : > { %v3568_v47 = vpop.f32.mrf.mxu0  ;;  %3695 = vadd.xlane.f32.xlu0 %v3694_v34 }
 0x871   : > { %v3569_v35 = vadd.f32 %v8471_v37, %v3568_v47 }
 0x873   : > { %v8592_v6 = vadd.f32 %v3569_v35, %v8445_v28 }
 0x875   : > { %v3633_v11 = vsel %vm250_vm0, %v8592_v6, 0.0  ;;  %v3655_v23 = vmul.f32 %v8592_v6, %v8592_v6 }
 0x876   : > { %3634 = vadd.xlane.f32.xlu2 %v3633_v11 }
 0x877   : > { %v3697_v24 = vsel %vm250_vm0, %v3655_v23, 0.0 }
 0x878   : > { %3698 = vadd.xlane.f32.xlu1 %v3697_v24  ;;  %v3571_v61 = vpop.f32.mrf.mxu0 }
 0x879   : > { %v3572_v0 = vadd.f32 %v8471_v37, %v3571_v61 }
 0x87b   : > { %v8601_v36 = vadd.f32 %v3572_v0, %v8457_v12 }
 0x87d   : > { %v3636_v28 = vsel %vm250_vm0, %v8601_v36, 0.0  ;;  %v3656_v21 = vmul.f32 %v8601_v36, %v8601_v36  ;;  %v3596_v22 = vpop.xlane.xlu1 %3595 }
 0x87e   : > { %3637 = vadd.xlane.f32.xlu2 %v3636_v28  ;;  %v8608_v57 = vmul.f32 0.015625, %v3596_v22 }
 0x87f   : > { %v3700_v56 = vsel %vm250_vm0, %v3656_v21, 0.0  ;;  %v3660_v1 = vpop.xlane.xlu0 %3659 }
 0x880   : > { %v3573_v53 = vpop.f32.mrf.mxu0  ;;  %3701 = vadd.xlane.f32.xlu1 %v3700_v56  ;;  %v3738_v12 = vmul.f32 %v8608_v57, %v8608_v57  ;;  %v3722_v41 = vmul.f32 0.015625, %v3660_v1  ;;  %v3786_v22 = vsub.f32 %v8475_v48, %v8608_v57 }
 0x881   : > { %v3574_v26 = vadd.f32 %v8471_v37, %v3573_v53 }
 0x882   : > { %v3754_v13 = vsub.f32 %v3722_v41, %v3738_v12 }
 0x883   : > { %v8614_v16 = vadd.f32 %v3574_v26, %v8460_v15 }
 0x884   : > { %v3770_v54 = vmax.f32 %v3754_v13, 0.0  ;;  %v8636_v13 = vld [vmem:[%s9551_s2 + $0x13] ss:$0 sm:$0xff] }
 0x885   : > { %v3639_v32 = vsel %vm250_vm0, %v8614_v16, 0.0  ;;  %v3657_v63 = vmul.f32 %v8614_v16, %v8614_v16  ;;  %v3599_v37 = vpop.xlane.xlu2 %3598 }
 0x886   : > { %3640 = vadd.xlane.f32.xlu0 %v3639_v32  ;;  %v3802_v45 = vadd.f32 1e-05, %v3770_v54  ;;  %v3707_v33 = vmul.f32 0.015625, %v3599_v37 }
 0x887   : > { %v3703_v9 = vsel %vm250_vm0, %v3657_v63, 0.0  ;;  %v3663_v20 = vpop.xlane.xlu1 %3662 }
 0x888   : > { %3704 = vadd.xlane.f32.xlu2 %v3703_v9  ;;  %6404 = vrsqrt.f32 %v3802_v45  ;;  %v3739_v15 = vmul.f32 %v3707_v33, %v3707_v33  ;;  %v3723_v27 = vmul.f32 0.015625, %v3663_v20  ;;  %vm3824_vm2 = vweird.f32 %v3802_v45 }
 0x889   : > { %v3787_v9 = vsub.f32 %v8484_v2, %v3707_v33 }
 0x88a   : > { %v3755_v42 = vsub.f32 %v3723_v27, %v3739_v15  ;;  %v8644_v15 = vld [vmem:[%s9551_s2 + $0x14] ss:$0 sm:$0xff] }
 0x88c   : > { %v3771_v60 = vmax.f32 %v3755_v42, 0.0 }
 0x88d   : > { %v3602_v40 = vpop.xlane.xlu2 %3601 }
 0x88e   : > { %v6405_v25 = vpop.eup %6404  ;;  %v3803_v3 = vadd.f32 1e-05, %v3771_v60  ;;  %v8621_v62 = vmul.f32 0.015625, %v3602_v40 }
 0x88f   : > { %v3819_v19 = vmul.f32 %v6405_v25, %v3802_v45  ;;  %v3666_v18 = vpop.xlane.xlu1 %3665  ;;  %vm3825_vm1 = vweird.f32 %v6405_v25 }
 0x890   : > { %6406 = vrsqrt.f32 %v3803_v3  ;;  %v3740_v58 = vmul.f32 %v8621_v62, %v8621_v62  ;;  %v3724_v29 = vmul.f32 0.015625, %v3666_v18  ;;  %vm3826_vm3 = vmor %vm3824_vm2, %vm3825_vm1  ;;  %vm3834_vm5 = vweird.f32 %v3803_v3 }
 0x891   : > { %v3820_v46 = vmul.f32 %v6405_v25, %v3819_v19 }
 0x892   : > { %v3756_v52 = vsub.f32 %v3724_v29, %v3740_v58 }
 0x893   : > { %v3821_v50 = vmul.f32 0.5, %v3820_v46 }
 0x894   : > { %v3772_v39 = vmax.f32 %v3756_v52, 0.0 }
 0x895   : > { %v3822_v43 = vsub.f32 1.5, %v3821_v50  ;;  %v3605_v51 = vpop.xlane.xlu0 %3604 }
 0x896   : > { %v6407_v59 = vpop.eup %6406  ;;  %v8625_v5 = vmul.f32 0.015625, %v3605_v51  ;;  %v3804_v47 = vadd.f32 1e-05, %v3772_v39 }
 0x897   : > { %v3829_v34 = vmul.f32 %v6407_v59, %v3803_v3  ;;  %v3669_v35 = vpop.xlane.xlu2 %3668  ;;  %v3823_v11 = vmul.f32 %v6405_v25, %v3822_v43  ;;  %vm3835_vm4 = vweird.f32 %v6407_v59 }
 0x898   : > { %v3741_v23 = vmul.f32 %v8625_v5, %v8625_v5  ;;  %v3725_v24 = vmul.f32 0.015625, %v3669_v35  ;;  %6408 = vrsqrt.f32 %v3804_v47  ;;  %vm3836_vm6 = vmor %vm3834_vm5, %vm3835_vm4  ;;  %vm3844_vm8 = vweird.f32 %v3804_v47 }
 0x899   : > { %v3830_v61 = vmul.f32 %v6407_v59, %v3829_v34  ;;  %v3827_v21 = vsel %vm3826_vm3, %v6405_v25, %v3823_v11 }
 0x89a   : > { %v3757_v0 = vsub.f32 %v3725_v24, %v3741_v23  ;;  %v3978_v32 = vmul.f32 %v3827_v21, %v3786_v22  ;;  %v3788_v24 = vsub.f32 %v8493_v55, %v8621_v62 }
 0x89b   : > { %v3831_v28 = vmul.f32 0.5, %v3830_v61 }
 0x89c   : > { %v3773_v56 = vmax.f32 %v3757_v0, 0.0  ;;  %v3995_v27 = vmul.f32 %v8636_v13, %v3978_v32 }
 0x89d   : > { %v3832_v53 = vsub.f32 1.5, %v3831_v28  ;;  %v3608_v26 = vpop.xlane.xlu0 %3607 }
 0x89e   : > { %v3805_v1 = vadd.f32 1e-05, %v3773_v56  ;;  %v8631_v12 = vmul.f32 0.015625, %v3608_v26  ;;  %v6409_v41 = vpop.eup %6408  ;;  %v8654_v46 = vadd.f32 %v8644_v15, %v3995_v27  ;;  %v3789_v26 = vsub.f32 %v8502_v44, %v8625_v5 }
 0x89f   : > { %v3833_v63 = vmul.f32 %v6407_v59, %v3832_v53  ;;  %v3672_v54 = vpop.xlane.xlu2 %3671  ;;  %v3839_v48 = vmul.f32 %v6409_v41, %v3804_v47  ;;  %vm3845_vm7 = vweird.f32 %v6409_v41 }
 0x8a0   : > { %6410 = vrsqrt.f32 %v3805_v1  ;;  %v3742_v37 = vmul.f32 %v8631_v12, %v8631_v12  ;;  %v3726_v45 = vmul.f32 0.015625, %v3672_v54  ;;  %vm3846_vm9 = vmor %vm3844_vm8, %vm3845_vm7  ;;  %vm3854_vm11 = vweird.f32 %v3805_v1 }
 0x8a1   : > { %v3837_v57 = vsel %vm3836_vm6, %v6407_v59, %v3833_v63  ;;  %v3840_v30 = vmul.f32 %v6409_v41, %v3839_v48 }
 0x8a2   : > { %v3979_v20 = vmul.f32 %v3837_v57, %v3787_v9  ;;  %v3758_v42 = vsub.f32 %v3726_v45, %v3742_v37 }
 0x8a3   : > { %v3841_v33 = vmul.f32 0.5, %v3840_v30 }
 0x8a4   : > { %v3996_v2 = vmul.f32 %v8636_v13, %v3979_v20  ;;  %v3774_v60 = vmax.f32 %v3758_v42, 0.0 }
 0x8a5   : > { %v3611_v25 = vpop.xlane.xlu1 %3610  ;;  %v3842_v3 = vsub.f32 1.5, %v3841_v33 }
 0x8a6   : > { %v6411_v40 = vpop.eup %6410  ;;  %v8649_v19 = vadd.f32 %v8644_v15, %v3996_v2  ;;  %v8651_v18 = vmul.f32 0.015625, %v3611_v25  ;;  %v3806_v29 = vadd.f32 1e-05, %v3774_v60 }
 0x8a7   : > { %v3849_v58 = vmul.f32 %v6411_v40, %v3805_v1  ;;  %v3675_v50 = vpop.xlane.xlu0 %3674  ;;  %v3843_v52 = vmul.f32 %v6409_v41, %v3842_v3  ;;  %vm3855_vm10 = vweird.f32 %v6411_v40 }
 0x8a8   : > { %v3743_v43 = vmul.f32 %v8651_v18, %v8651_v18  ;;  %v3727_v39 = vmul.f32 0.015625, %v3675_v50  ;;  %6412 = vrsqrt.f32 %v3806_v29  ;;  %v4036_v59 = vpack.c.bf16 %v8649_v19, %v8654_v46  ;;  %vm3856_vm12 = vmor %vm3854_vm11, %vm3855_vm10 }
 0x8a9   : > { %v3850_v51 = vmul.f32 %v6411_v40, %v3849_v58  ;;  %v3847_v11 = vsel %vm3846_vm9, %v6409_v41, %v3843_v52  ;;  %vm3864_vm14 = vweird.f32 %v3806_v29 }
 0x8aa   : > { %v3759_v34 = vsub.f32 %v3727_v39, %v3743_v43  ;;  %5991 = vmatmul.msk.bf16.vlgmr.msra.gmra.mxu1 %vm250_vm0, %v4036_v59  ;;  %v3980_v22 = vmul.f32 %v3847_v11, %v3788_v24 }
 0x8ab   : > { %v3851_v35 = vmul.f32 0.5, %v3850_v51  ;;  %v3790_v51 = vsub.f32 %v8511_v17, %v8631_v12 }
 0x8ac   : > { %v3775_v23 = vmax.f32 %v3759_v34, 0.0  ;;  %v3997_v48 = vmul.f32 %v8636_v13, %v3980_v22 }
 0x8ad   : > { %v3852_v61 = vsub.f32 1.5, %v3851_v35  ;;  %v3614_v0 = vpop.xlane.xlu1 %3613 }
 0x8ae   : > { %v3807_v28 = vadd.f32 1e-05, %v3775_v23  ;;  %v8663_v21 = vmul.f32 0.015625, %v3614_v0  ;;  %v6413_v56 = vpop.eup %6412  ;;  %v8677_v33 = vadd.f32 %v8644_v15, %v3997_v48  ;;  %v3791_v0 = vsub.f32 %v8520_v4, %v8651_v18 }
 0x8af   : > { %v3853_v53 = vmul.f32 %v6411_v40, %v3852_v61  ;;  %v3678_v47 = vpop.xlane.xlu0 %3677  ;;  %v3859_v41 = vmul.f32 %v6413_v56, %v3806_v29  ;;  %vm3865_vm13 = vweird.f32 %v6413_v56 }
 0x8b0   : > { %6414 = vrsqrt.f32 %v3807_v28  ;;  %v3744_v55 = vmul.f32 %v8663_v21, %v8663_v21  ;;  %v3728_v62 = vmul.f32 0.015625, %v3678_v47  ;;  %vm3866_vm15 = vmor %vm3864_vm14, %vm3865_vm13  ;;  %vm3874_vm2 = vweird.f32 %v3807_v28 }
 0x8b1   : > { %v3857_v32 = vsel %vm3856_vm12, %v6411_v40, %v3853_v53  ;;  %v3860_v54 = vmul.f32 %v6413_v56, %v3859_v41 }
 0x8b2   : > { %v3981_v63 = vmul.f32 %v3857_v32, %v3789_v26  ;;  %v3760_v9 = vsub.f32 %v3728_v62, %v3744_v55 }
 0x8b3   : > { %v3861_v57 = vmul.f32 0.5, %v3860_v54 }
 0x8b4   : > { %v3998_v1 = vmul.f32 %v8636_v13, %v3981_v63  ;;  %v3776_v37 = vmax.f32 %v3760_v9, 0.0 }
 0x8b5   : > { %v3617_v45 = vpop.xlane.xlu2 %3616  ;;  %v3862_v44 = vsub.f32 1.5, %v3861_v57 }
 0x8b6   : > { %v6415_v20 = vpop.eup %6414  ;;  %v8671_v5 = vmul.f32 0.015625, %v3617_v45  ;;  %v8674_v30 = vadd.f32 %v8644_v15, %v3998_v1  ;;  %v3808_v42 = vadd.f32 1e-05, %v3776_v37 }
 0x8b7   : > { %v3869_v27 = vmul.f32 %v6415_v20, %v3807_v28  ;;  %v3681_v2 = vpop.xlane.xlu1 %3680  ;;  %v3863_v60 = vmul.f32 %v6413_v56, %v3862_v44  ;;  %vm3875_vm1 = vweird.f32 %v6415_v20 }
 0x8b8   : > { %v3745_v25 = vmul.f32 %v8671_v5, %v8671_v5  ;;  %v3729_v40 = vmul.f32 0.015625, %v3681_v2  ;;  %6416 = vrsqrt.f32 %v3808_v42  ;;  %v4037_v58 = vpack.c.bf16 %v8674_v30, %v8677_v33  ;;  %vm3876_vm3 = vmor %vm3874_vm2, %vm3875_vm1 }
 0x8b9   : > { %v3870_v3 = vmul.f32 %v6415_v20, %v3869_v27  ;;  %v3867_v43 = vsel %vm3866_vm15, %v6413_v56, %v3863_v60  ;;  %vm3884_vm5 = vweird.f32 %v3808_v42 }
 0x8ba   : > { %v3761_v50 = vsub.f32 %v3729_v40, %v3745_v25  ;;  %5992 = vmatmul.msk.bf16.gmra.mxu1 %vm250_vm0, %v4037_v58  ;;  %v3982_v24 = vmul.f32 %v3867_v43, %v3790_v51 }
 0x8bb   : > { %v3871_v52 = vmul.f32 0.5, %v3870_v3  ;;  %v3792_v3 = vsub.f32 %v8529_v10, %v8663_v21 }
 0x8bc   : > { %v3777_v39 = vmax.f32 %v3761_v50, 0.0  ;;  %v3999_v41 = vmul.f32 %v8636_v13, %v3982_v24 }
 0x8bd   : > { %v3872_v59 = vsub.f32 1.5, %v3871_v52 }
 0x8be   : > { %v3620_v34 = vpop.xlane.xlu2 %3619  ;;  %v3809_v35 = vadd.f32 1e-05, %v3777_v39  ;;  %v6417_v23 = vpop.eup %6416  ;;  %v8700_v1 = vadd.f32 %v8644_v15, %v3999_v41 }
 0x8bf   : > { %v8686_v11 = vmul.f32 0.015625, %v3620_v34  ;;  %v3873_v61 = vmul.f32 %v6415_v20, %v3872_v59  ;;  %v3879_v56 = vmul.f32 %v6417_v23, %v3808_v42  ;;  %vm3885_vm4 = vweird.f32 %v6417_v23 }
 0x8c0   : > { %v3684_v29 = vpop.xlane.xlu1 %3683  ;;  %6418 = vrsqrt.f32 %v3809_v35  ;;  %vm3886_vm6 = vmor %vm3884_vm5, %vm3885_vm4  ;;  %vm3894_vm8 = vweird.f32 %v3809_v35  ;;  %v3793_v34 = vsub.f32 %v8538_v8, %v8671_v5 }
 0x8c1   : > { %v3877_v22 = vsel %vm3876_vm3, %v6415_v20, %v3873_v61  ;;  %v3746_v17 = vmul.f32 %v8686_v11, %v8686_v11  ;;  %v3730_v12 = vmul.f32 0.015625, %v3684_v29  ;;  %v3880_v47 = vmul.f32 %v6417_v23, %v3879_v56 }
 0x8c2   : > { %v3983_v53 = vmul.f32 %v3877_v22, %v3791_v0 }
 0x8c3   : > { %v3762_v26 = vsub.f32 %v3730_v12, %v3746_v17  ;;  %v3881_v32 = vmul.f32 0.5, %v3880_v47 }
 0x8c4   : > { %v4000_v28 = vmul.f32 %v8636_v13, %v3983_v53 }
 0x8c5   : > { %v3778_v55 = vmax.f32 %v3762_v26, 0.0  ;;  %v3882_v4 = vsub.f32 1.5, %v3881_v32 }
 0x8c6   : > { %v3623_v62 = vpop.xlane.xlu0 %3622  ;;  %v6419_v63 = vpop.eup %6418  ;;  %v8697_v54 = vadd.f32 %v8644_v15, %v4000_v28 }
 0x8c7   : > { %v8694_v18 = vmul.f32 0.015625, %v3623_v62  ;;  %v3889_v9 = vmul.f32 %v6419_v63, %v3809_v35  ;;  %v3810_v48 = vadd.f32 1e-05, %v3778_v55  ;;  %v3883_v37 = vmul.f32 %v6417_v23, %v3882_v4 }
 0x8c8   : > { %v3687_v57 = vpop.xlane.xlu2 %3686  ;;  %v4038_v27 = vpack.c.bf16 %v8697_v54, %v8700_v1  ;;  %vm3895_vm7 = vweird.f32 %v6419_v63 }
 0x8c9   : > { %v3747_v45 = vmul.f32 %v8694_v18, %v8694_v18  ;;  %v3731_v20 = vmul.f32 0.015625, %v3687_v57  ;;  %v3890_v44 = vmul.f32 %v6419_v63, %v3889_v9  ;;  %6420 = vrsqrt.f32 %v3810_v48  ;;  %vm3896_vm9 = vmor %vm3894_vm8, %vm3895_vm7 }
 0x8ca   : > { %5993 = vmatmul.msk.bf16.gmra.mxu1 %vm250_vm0, %v4038_v27  ;;  %v3887_v25 = vsel %vm3886_vm6, %v6417_v23, %v3883_v37  ;;  %vm3904_vm11 = vweird.f32 %v3810_v48 }
 0x8cb   : > { %v3763_v2 = vsub.f32 %v3731_v20, %v3747_v45  ;;  %v3891_v60 = vmul.f32 0.5, %v3890_v44  ;;  %v3984_v51 = vmul.f32 %v3887_v25, %v3792_v3  ;;  %v3794_v20 = vsub.f32 %v8547_v38, %v8686_v11 }
 0x8cd   : > { %v3779_v40 = vmax.f32 %v3763_v2, 0.0  ;;  %v3892_v58 = vsub.f32 1.5, %v3891_v60  ;;  %v4001_v56 = vmul.f32 %v8636_v13, %v3984_v51 }
 0x8ce   : > { %v3626_v50 = vpop.xlane.xlu0 %3625 }
 0x8cf   : > { %v3811_v52 = vadd.f32 1e-05, %v3779_v40  ;;  %v8709_v43 = vmul.f32 0.015625, %v3626_v50  ;;  %v6421_v39 = vpop.eup %6420  ;;  %v3893_v59 = vmul.f32 %v6419_v63, %v3892_v58  ;;  %v8723_v28 = vadd.f32 %v8644_v15, %v4001_v56 }
 0x8d0   : > { %v3690_v42 = vpop.xlane.xlu2 %3689  ;;  %v3899_v23 = vmul.f32 %v6421_v39, %v3810_v48  ;;  %vm3905_vm10 = vweird.f32 %v6421_v39  ;;  %v3795_v50 = vsub.f32 %v8556_v7, %v8694_v18 }
 0x8d1   : > { %6422 = vrsqrt.f32 %v3811_v52  ;;  %v3897_v24 = vsel %vm3896_vm9, %v6419_v63, %v3893_v59  ;;  %v3748_v10 = vmul.f32 %v8709_v43, %v8709_v43  ;;  %v3732_v21 = vmul.f32 0.015625, %v3690_v42  ;;  %vm3906_vm12 = vmor %vm3904_vm11, %vm3905_vm10 }
 0x8d2   : > { %v3985_v61 = vmul.f32 %v3897_v24, %v3793_v34  ;;  %v3900_v29 = vmul.f32 %v6421_v39, %v3899_v23  ;;  %vm3914_vm14 = vweird.f32 %v3811_v52 }
 0x8d3   : > { %v3764_v0 = vsub.f32 %v3732_v21, %v3748_v10 }
 0x8d4   : > { %v3901_v22 = vmul.f32 0.5, %v3900_v29  ;;  %v4002_v35 = vmul.f32 %v8636_v13, %v3985_v61 }
 0x8d5   : > { %v3780_v17 = vmax.f32 %v3764_v0, 0.0 }
 0x8d6   : > { %v3629_v12 = vpop.xlane.xlu1 %3628  ;;  %v3902_v8 = vsub.f32 1.5, %v3901_v22  ;;  %v8720_v47 = vadd.f32 %v8644_v15, %v4002_v35 }
 0x8d7   : > { %v6423_v53 = vpop.eup %6422  ;;  %v8717_v5 = vmul.f32 0.015625, %v3629_v12  ;;  %v3812_v41 = vadd.f32 1e-05, %v3780_v17 }
 0x8d8   : > { %v3909_v26 = vmul.f32 %v6423_v53, %v3811_v52  ;;  %v3693_v32 = vpop.xlane.xlu0 %3692  ;;  %v3903_v55 = vmul.f32 %v6421_v39, %v3902_v8  ;;  %v4039_v9 = vpack.c.bf16 %v8720_v47, %v8723_v28  ;;  %vm3915_vm13 = vweird.f32 %v6423_v53 }
 0x8d9   : > { %v3749_v62 = vmul.f32 %v8717_v5, %v8717_v5  ;;  %v3733_v63 = vmul.f32 0.015625, %v3693_v32  ;;  %6424 = vrsqrt.f32 %v3812_v41  ;;  %vm3916_vm15 = vmor %vm3914_vm14, %vm3915_vm13  ;;  %vm3924_vm2 = vweird.f32 %v3812_v41 }
 0x8da   : > { %v3910_v4 = vmul.f32 %v6423_v53, %v3909_v26  ;;  %v3907_v37 = vsel %vm3906_vm12, %v6421_v39, %v3903_v55  ;;  %5994 = vmatmul.msk.bf16.gmra.mxu1 %vm250_vm0, %v4039_v9 }
 0x8db   : > { %v3765_v57 = vsub.f32 %v3733_v63, %v3749_v62  ;;  %v3986_v60 = vmul.f32 %v3907_v37, %v3794_v20  ;;  %v3796_v63 = vsub.f32 %v8565_v49, %v8709_v43 }
 0x8dc   : > { %v3911_v45 = vmul.f32 0.5, %v3910_v4 }
 0x8dd   : > { %v3781_v44 = vmax.f32 %v3765_v57, 0.0  ;;  %v4003_v34 = vmul.f32 %v8636_v13, %v3986_v60 }
 0x8de   : > { %v3912_v27 = vsub.f32 1.5, %v3911_v45 }
 0x8df   : > { %v3813_v48 = vadd.f32 1e-05, %v3781_v44  ;;  %v6425_v40 = vpop.eup %6424  ;;  %v8743_v29 = vadd.f32 %v8644_v15, %v4003_v34 }
 0x8e0   : > { %v3913_v3 = vmul.f32 %v6423_v53, %v3912_v27  ;;  %v3919_v39 = vmul.f32 %v6425_v40, %v3812_v41  ;;  %vm3925_vm1 = vweird.f32 %v6425_v40 }
 0x8e1   : > { %v3632_v2 = vpop.xlane.xlu1 %3631  ;;  %6426 = vrsqrt.f32 %v3813_v48  ;;  %vm3926_vm3 = vmor %vm3924_vm2, %vm3925_vm1  ;;  %vm3934_vm5 = vweird.f32 %v3813_v48 }
 0x8e2   : > { %v8732_v25 = vmul.f32 0.015625, %v3632_v2  ;;  %v3917_v51 = vsel %vm3916_vm15, %v6423_v53, %v3913_v3  ;;  %v3920_v42 = vmul.f32 %v6425_v40, %v3919_v39  ;;  %v3797_v2 = vsub.f32 %v8574_v31, %v8717_v5 }
 0x8e3   : > { %v3696_v58 = vpop.xlane.xlu0 %3695  ;;  %v3987_v59 = vmul.f32 %v3917_v51, %v3795_v50 }
 0x8e4   : > { %v3750_v38 = vmul.f32 %v8732_v25, %v8732_v25  ;;  %v3734_v11 = vmul.f32 0.015625, %v3696_v58  ;;  %v3921_v24 = vmul.f32 0.5, %v3920_v42 }
 0x8e5   : > { %v4004_v52 = vmul.f32 %v8636_v13, %v3987_v59 }
 0x8e6   : > { %v3766_v23 = vsub.f32 %v3734_v11, %v3750_v38  ;;  %v3922_v7 = vsub.f32 1.5, %v3921_v24 }
 0x8e7   : > { %v6427_v61 = vpop.eup %6426  ;;  %v8746_v0 = vadd.f32 %v8644_v15, %v4004_v52 }
 0x8e8   : > { %v3782_v10 = vmax.f32 %v3766_v23, 0.0  ;;  %v3929_v56 = vmul.f32 %v6427_v61, %v3813_v48  ;;  %v3923_v17 = vmul.f32 %v6425_v40, %v3922_v7  ;;  %vm3935_vm4 = vweird.f32 %v6427_v61 }
 0x8e9   : > { %v3635_v21 = vpop.xlane.xlu2 %3634  ;;  %v4040_v53 = vpack.c.bf16 %v8746_v0, %v8743_v29  ;;  %vm3936_vm6 = vmor %vm3934_vm5, %vm3935_vm4 }
 0x8ea   : > { %v8740_v18 = vmul.f32 0.015625, %v3635_v21  ;;  %v3814_v22 = vadd.f32 1e-05, %v3782_v10  ;;  %v3930_v8 = vmul.f32 %v6427_v61, %v3929_v56  ;;  %v3927_v62 = vsel %vm3926_vm3, %v6425_v40, %v3923_v17 }
 0x8eb   : > { %v3699_v35 = vpop.xlane.xlu1 %3698  ;;  %5995 = vmatmul.msk.bf16.gmra.mxu1 %vm250_vm0, %v4040_v53  ;;  %v3988_v20 = vmul.f32 %v3927_v62, %v3796_v63  ;;  %v3798_v53 = vsub.f32 %v8583_v14, %v8732_v25 }
 0x8ec   : > { %v3751_v12 = vmul.f32 %v8740_v18, %v8740_v18  ;;  %6428 = vrsqrt.f32 %v3814_v22  ;;  %v3735_v26 = vmul.f32 0.015625, %v3699_v35  ;;  %v3931_v32 = vmul.f32 0.5, %v3930_v8 }
 0x8ed   : > { %v4005_v39 = vmul.f32 %v8636_v13, %v3988_v20  ;;  %vm3944_vm8 = vweird.f32 %v3814_v22 }
 0x8ee   : > { %v3767_v55 = vsub.f32 %v3735_v26, %v3751_v12  ;;  %v3932_v4 = vsub.f32 1.5, %v3931_v32 }
 0x8ef   : > { %v8769_v23 = vadd.f32 %v8644_v15, %v4005_v39 }
 0x8f0   : > { %v3783_v9 = vmax.f32 %v3767_v55, 0.0  ;;  %v3933_v44 = vmul.f32 %v6427_v61, %v3932_v4  ;;  %v3799_v4 = vsub.f32 %v8592_v6, %v8740_v18 }
 0x8f1   : > { %v3638_v57 = vpop.xlane.xlu2 %3637 }
 0x8f2   : > { %v8755_v37 = vmul.f32 0.015625, %v3638_v57  ;;  %v6429_v45 = vpop.eup %6428  ;;  %v3815_v41 = vadd.f32 1e-05, %v3783_v9  ;;  %v3937_v43 = vsel %vm3936_vm6, %v6427_v61, %v3933_v44 }
 0x8f3   : > { %v3702_v27 = vpop.xlane.xlu1 %3701  ;;  %v3939_v60 = vmul.f32 %v6429_v45, %v3814_v22  ;;  %v3989_v3 = vmul.f32 %v3937_v43, %v3797_v2  ;;  %vm3945_vm7 = vweird.f32 %v6429_v45 }
 0x8f4   : > { %v3752_v49 = vmul.f32 %v8755_v37, %v8755_v37  ;;  %6430 = vrsqrt.f32 %v3815_v41  ;;  %v3736_v40 = vmul.f32 0.015625, %v3702_v27  ;;  %vm3946_vm9 = vmor %vm3944_vm8, %vm3945_vm7  ;;  %vm3954_vm11 = vweird.f32 %v3815_v41 }
 0x8f5   : > { %v3940_v58 = vmul.f32 %v6429_v45, %v3939_v60  ;;  %v4006_v48 = vmul.f32 %v8636_v13, %v3989_v3  ;;  %v3800_v3 = vsub.f32 %v8601_v36, %v8755_v37 }
 0x8f6   : > { %v3768_v50 = vsub.f32 %v3736_v40, %v3752_v49 }
 0x8f7   : > { %v3941_v51 = vmul.f32 0.5, %v3940_v58  ;;  %v8766_v5 = vadd.f32 %v8644_v15, %v4006_v48 }
 0x8f8   : > { %v3784_v38 = vmax.f32 %v3768_v50, 0.0 }
 0x8f9   : > { %v3641_v11 = vpop.xlane.xlu0 %3640  ;;  %v3942_v59 = vsub.f32 1.5, %v3941_v51  ;;  %v4041_v61 = vpack.c.bf16 %v8766_v5, %v8769_v23 }
 0x8fa   : > { %v8763_v31 = vmul.f32 0.015625, %v3641_v11  ;;  %v6431_v42 = vpop.eup %6430  ;;  %v3816_v34 = vadd.f32 1e-05, %v3784_v38 }
 0x8fb   : > { %v3705_v24 = vpop.xlane.xlu2 %3704  ;;  %v3943_v52 = vmul.f32 %v6429_v45, %v3942_v59  ;;  %v3949_v10 = vmul.f32 %v6431_v42, %v3815_v41  ;;  %5996 = vmatmul.msk.bf16.gmra.mxu1 %vm250_vm0, %v4041_v61  ;;  %vm3955_vm10 = vweird.f32 %v6431_v42 }
 0x8fc   : > { %v3753_v21 = vmul.f32 %v8763_v31, %v8763_v31  ;;  %6432 = vrsqrt.f32 %v3816_v34  ;;  %v3737_v56 = vmul.f32 0.015625, %v3705_v24  ;;  %vm3956_vm12 = vmor %vm3954_vm11, %vm3955_vm10  ;;  %vm3964_vm14 = vweird.f32 %v3816_v34 }
 0x8fd   : > { %v3950_v7 = vmul.f32 %v6431_v42, %v3949_v10  ;;  %v3947_v35 = vsel %vm3946_vm9, %v6429_v45, %v3943_v52  ;;  %v3801_v51 = vsub.f32 %v8614_v16, %v8763_v31  ;;  %v8809_v16 = vld [vmem:[%s9551_s2 + $0x18] ss:$0 sm:$0xff] }
 0x8fe   : > { %v3769_v12 = vsub.f32 %v3737_v56, %v3753_v21  ;;  %v3990_v55 = vmul.f32 %v3947_v35, %v3798_v53 }
 0x8ff   : > { %v3951_v17 = vmul.f32 0.5, %v3950_v7  ;;  %v6164_v7 = vld [vmem:[#allocation2 + $0x1b8] sm:$0xff] }
 0x900   : > { %v3785_v26 = vmax.f32 %v3769_v12, 0.0  ;;  %v4007_v20 = vmul.f32 %v8636_v13, %v3990_v55  ;;  %4665 = vmatpush.bf16.msra.mxu3 %v6164_v7 }
 0x901   : > { %v3952_v8 = vsub.f32 1.5, %v3951_v17 }
 0x902   : > { %v6433_v32 = vpop.eup %6432  ;;  %v3817_v22 = vadd.f32 1e-05, %v3785_v26  ;;  %v8783_v27 = vadd.f32 %v8644_v15, %v4007_v20 }
 0x903   : > { %v3953_v62 = vmul.f32 %v6431_v42, %v3952_v8  ;;  %v3959_v63 = vmul.f32 %v6433_v32, %v3816_v34  ;;  %vm3965_vm13 = vweird.f32 %v6433_v32 }
 0x904   : > { %6434 = vrsqrt.f32 %v3817_v22  ;;  %vm3966_vm15 = vmor %vm3964_vm14, %vm3965_vm13  ;;  %vm3974_vm2 = vweird.f32 %v3817_v22 }
 0x905   : > { %v3957_v9 = vsel %vm3956_vm12, %v6431_v42, %v3953_v62  ;;  %v3960_v57 = vmul.f32 %v6433_v32, %v3959_v63 }
 0x906   : > { %v3991_v45 = vmul.f32 %v3957_v9, %v3799_v4 }
 0x907   : > { %v3961_v14 = vmul.f32 0.5, %v3960_v57 }
 0x908   : > { %v4008_v25 = vmul.f32 %v8636_v13, %v3991_v45 }
 0x909   : > { %v3962_v44 = vsub.f32 1.5, %v3961_v14 }
 0x90a   : > { %v8786_v41 = vadd.f32 %v8644_v15, %v4008_v25  ;;  %v6435_v2 = vpop.eup %6434 }
 0x90b   : > { %v3963_v60 = vmul.f32 %v6433_v32, %v3962_v44  ;;  %v3969_v6 = vmul.f32 %v6435_v2, %v3817_v22  ;;  %vm3975_vm1 = vweird.f32 %v6435_v2 }
 0x90c   : > { %v4042_v18 = vpack.c.bf16 %v8786_v41, %v8783_v27  ;;  %vm3976_vm3 = vmor %vm3974_vm2, %vm3975_vm1 }
 0x90d   : > { %v3970_v49 = vmul.f32 %v6435_v2, %v3969_v6  ;;  %v3967_v43 = vsel %vm3966_vm15, %v6433_v32, %v3963_v60 }
 0x90e   : > { %5997 = vmatmul.msk.bf16.gmra.mxu1 %vm250_vm0, %v4042_v18  ;;  %v3992_v50 = vmul.f32 %v3967_v43, %v3800_v3 }
 0x90f   : > { %v3971_v40 = vmul.f32 0.5, %v3970_v49 }
 0x910   : > { %v4009_v11 = vmul.f32 %v8636_v13, %v3992_v50 }
 0x911   : > { %v3972_v58 = vsub.f32 1.5, %v3971_v40 }
 0x912   : > { %v8798_v42 = vadd.f32 %v8644_v15, %v4009_v11 }
 0x913   : > { %v3973_v39 = vmul.f32 %v6435_v2, %v3972_v58 }
 0x915   : > { %v3977_v48 = vsel %vm3976_vm3, %v6435_v2, %v3973_v39  ;;  %v6163_v2 = vld [vmem:[#allocation2 + $0x1b0] sm:$0xff] }
 0x916   : > { %v3993_v38 = vmul.f32 %v3977_v48, %v3801_v51  ;;  %4666 = vmatpush.bf16.msra.mxu3 %v6163_v2 }
 0x918   : > { %v4010_v59 = vmul.f32 %v8636_v13, %v3993_v38 }
 0x91a   : > { %v8801_v36 = vadd.f32 %v8644_v15, %v4010_v59 }
 0x91c   : > { %v4043_v37 = vpack.c.bf16 %v8801_v36, %v8798_v42 }
 0x91e   : > { %5998 = vmatmul.msk.bf16.gmra.mxu1 %vm250_vm0, %v4043_v37  ;;  %v6162_v37 = vld [vmem:[#allocation2 + $0x1a8] sm:$0xff] }
 0x91f   : > { %4667 = vmatpush.bf16.msra.mxu3 %v6162_v37 }
 0x927   : > { %v4103_v31 = vpop.f32.mrf.mxu1 }
 0x928   : > { %v4104_v34 = vadd.f32 %v8809_v16, %v4103_v31 }
 0x92a   : > { %v8813_v13 = vadd.f32 %v4104_v34, %v8654_v46 }
 0x92c   : > { %v4161_v15 = vsel %vm250_vm0, %v8813_v13, 0.0  ;;  %v4209_v24 = vmul.f32 %v8813_v13, %v8813_v13 }
 0x92d   : > { %4162 = vadd.xlane.f32.xlu0 %v4161_v15 }
 0x92e   : > { %v4225_v52 = vsel %vm250_vm0, %v4209_v24, 0.0 }
 0x92f   : > { %v4105_v10 = vpop.f32.mrf.mxu1  ;;  %4226 = vadd.xlane.f32.xlu2 %v4225_v52 }
 0x930   : > { %v4106_v21 = vadd.f32 %v8809_v16, %v4105_v10 }
 0x932   : > { %v8822_v61 = vadd.f32 %v4106_v21, %v8649_v19 }
 0x934   : > { %v4164_v46 = vsel %vm250_vm0, %v8822_v61, 0.0  ;;  %v4210_v56 = vmul.f32 %v8822_v61, %v8822_v61 }
 0x935   : > { %4165 = vadd.xlane.f32.xlu1 %v4164_v46 }
 0x936   : > { %v4228_v35 = vsel %vm250_vm0, %v4210_v56, 0.0 }
 0x937   : > { %4229 = vadd.xlane.f32.xlu0 %v4228_v35  ;;  %v4108_v17 = vpop.f32.mrf.mxu1 }
 0x938   : > { %v4109_v12 = vadd.f32 %v8809_v16, %v4108_v17 }
 0x93a   : > { %v8831_v53 = vadd.f32 %v4109_v12, %v8677_v33 }
 0x93c   : > { %v4167_v19 = vsel %vm250_vm0, %v8831_v53, 0.0  ;;  %v4211_v8 = vmul.f32 %v8831_v53, %v8831_v53 }
 0x93d   : > { %4168 = vadd.xlane.f32.xlu1 %v4167_v19 }
 0x93e   : > { %v4231_v26 = vsel %vm250_vm0, %v4211_v8, 0.0 }
 0x93f   : > { %v4110_v32 = vpop.f32.mrf.mxu1  ;;  %4232 = vadd.xlane.f32.xlu0 %v4231_v26 }
 0x940   : > { %v4111_v55 = vadd.f32 %v8809_v16, %v4110_v32 }
 0x942   : > { %v8840_v62 = vadd.f32 %v4111_v55, %v8674_v30 }
 0x944   : > { %v4170_v33 = vsel %vm250_vm0, %v8840_v62, 0.0  ;;  %v4212_v63 = vmul.f32 %v8840_v62, %v8840_v62 }
 0x945   : > { %4171 = vadd.xlane.f32.xlu2 %v4170_v33 }
 0x946   : > { %v4234_v22 = vsel %vm250_vm0, %v4212_v63, 0.0 }
 0x947   : > { %4235 = vadd.xlane.f32.xlu1 %v4234_v22  ;;  %v4113_v4 = vpop.f32.mrf.mxu1 }
 0x948   : > { %v4114_v9 = vadd.f32 %v8809_v16, %v4113_v4 }
 0x94a   : > { %v8849_v57 = vadd.f32 %v4114_v9, %v8700_v1 }
 0x94c   : > { %v4173_v30 = vsel %vm250_vm0, %v8849_v57, 0.0  ;;  %v4213_v45 = vmul.f32 %v8849_v57, %v8849_v57 }
 0x94d   : > { %4174 = vadd.xlane.f32.xlu2 %v4173_v30 }
 0x94e   : > { %v4237_v20 = vsel %vm250_vm0, %v4213_v45, 0.0 }
 0x94f   : > { %v4115_v14 = vpop.f32.mrf.mxu1  ;;  %4238 = vadd.xlane.f32.xlu1 %v4237_v20 }
 0x950   : > { %v4116_v25 = vadd.f32 %v8809_v16, %v4115_v14 }
 0x952   : > { %v8858_v44 = vadd.f32 %v4116_v25, %v8697_v54 }
 0x954   : > { %v4176_v1 = vsel %vm250_vm0, %v8858_v44, 0.0  ;;  %v4214_v60 = vmul.f32 %v8858_v44, %v8858_v44 }
 0x955   : > { %4177 = vadd.xlane.f32.xlu0 %v4176_v1 }
 0x956   : > { %v4240_v6 = vsel %vm250_vm0, %v4214_v60, 0.0 }
 0x957   : > { %4241 = vadd.xlane.f32.xlu2 %v4240_v6  ;;  %v4118_v18 = vpop.f32.mrf.mxu1 }
 0x958   : > { %v4119_v49 = vadd.f32 %v8809_v16, %v4118_v18 }
 0x95a   : > { %v8867_v43 = vadd.f32 %v4119_v49, %v8723_v28 }
 0x95c   : > { %v4179_v54 = vsel %vm250_vm0, %v8867_v43, 0.0  ;;  %v4215_v40 = vmul.f32 %v8867_v43, %v8867_v43 }
 0x95d   : > { %4180 = vadd.xlane.f32.xlu0 %v4179_v54 }
 0x95e   : > { %v4243_v3 = vsel %vm250_vm0, %v4215_v40, 0.0 }
 0x95f   : > { %v4120_v58 = vpop.f32.mrf.mxu1  ;;  %4244 = vadd.xlane.f32.xlu2 %v4243_v3 }
 0x960   : > { %v4121_v50 = vadd.f32 %v8809_v16, %v4120_v58 }
 0x962   : > { %v8876_v39 = vadd.f32 %v4121_v50, %v8720_v47 }
 0x964   : > { %v4182_v28 = vsel %vm250_vm0, %v8876_v39, 0.0  ;;  %v4216_v51 = vmul.f32 %v8876_v39, %v8876_v39 }
 0x965   : > { %4183 = vadd.xlane.f32.xlu1 %v4182_v28 }
 0x966   : > { %v4246_v48 = vsel %vm250_vm0, %v4216_v51, 0.0 }
 0x967   : > { %4247 = vadd.xlane.f32.xlu0 %v4246_v48 }
 0x968   : > { %v4123_v38 = vpop.f32.mrf.mxu1 }
 0x969   : > { %v4124_v11 = vadd.f32 %v8809_v16, %v4123_v38 }
 0x96b   : > { %v8885_v59 = vadd.f32 %v4124_v11, %v8743_v29 }
 0x96d   : > { %v4185_v47 = vsel %vm250_vm0, %v8885_v59, 0.0  ;;  %v4217_v31 = vmul.f32 %v8885_v59, %v8885_v59 }
 0x96e   : > { %4186 = vadd.xlane.f32.xlu1 %v4185_v47 }
 0x96f   : > { %v4249_v34 = vsel %vm250_vm0, %v4217_v31, 0.0  ;;  %v6161_v31 = vld [vmem:[#allocation2 + $0x1a0] sm:$0xff] }
 0x970   : > { %v4125_v15 = vpop.f32.mrf.mxu1  ;;  %4250 = vadd.xlane.f32.xlu0 %v4249_v34  ;;  %4668 = vmatpush.bf16.msra.mxu3 %v6161_v31 }
 0x971   : > { %v4126_v24 = vadd.f32 %v8809_v16, %v4125_v15 }
 0x973   : > { %v8894_v52 = vadd.f32 %v4126_v24, %v8746_v0 }
 0x975   : > { %v4188_v29 = vsel %vm250_vm0, %v8894_v52, 0.0  ;;  %v4218_v10 = vmul.f32 %v8894_v52, %v8894_v52 }
 0x976   : > { %4189 = vadd.xlane.f32.xlu2 %v4188_v29 }
 0x977   : > { %v4252_v21 = vsel %vm250_vm0, %v4218_v10, 0.0 }
 0x978   : > { %4253 = vadd.xlane.f32.xlu1 %v4252_v21  ;;  %v4128_v7 = vpop.f32.mrf.mxu1 }
 0x979   : > { %v4129_v46 = vadd.f32 %v8809_v16, %v4128_v7 }
 0x97b   : > { %v8903_v56 = vadd.f32 %v4129_v46, %v8769_v23 }
 0x97d   : > { %v4191_v0 = vsel %vm250_vm0, %v8903_v56, 0.0  ;;  %v4219_v35 = vmul.f32 %v8903_v56, %v8903_v56 }
 0x97e   : > { %4192 = vadd.xlane.f32.xlu2 %v4191_v0 }
 0x97f   : > { %v4255_v17 = vsel %vm250_vm0, %v4219_v35, 0.0 }
 0x980   : > { %v4130_v12 = vpop.f32.mrf.mxu1  ;;  %4256 = vadd.xlane.f32.xlu1 %v4255_v17 }
 0x981   : > { %v4131_v19 = vadd.f32 %v8809_v16, %v4130_v12 }
 0x983   : > { %v8912_v8 = vadd.f32 %v4131_v19, %v8766_v5 }
 0x985   : > { %v4194_v23 = vsel %vm250_vm0, %v8912_v8, 0.0  ;;  %v4220_v26 = vmul.f32 %v8912_v8, %v8912_v8 }
 0x986   : > { %4195 = vadd.xlane.f32.xlu0 %v4194_v23 }
 0x987   : > { %v4258_v32 = vsel %vm250_vm0, %v4220_v26, 0.0 }
 0x988   : > { %4259 = vadd.xlane.f32.xlu2 %v4258_v32 }
 0x98b   : > { %v4133_v55 = vpop.f32.mrf.mxu1 }
 0x98c   : > { %v4134_v33 = vadd.f32 %v8809_v16, %v4133_v55 }
 0x98e   : > { %v8921_v63 = vadd.f32 %v4134_v33, %v8783_v27 }
 0x990   : > { %v4197_v5 = vsel %vm250_vm0, %v8921_v63, 0.0  ;;  %v4221_v22 = vmul.f32 %v8921_v63, %v8921_v63 }
 0x991   : > { %4198 = vadd.xlane.f32.xlu0 %v4197_v5 }
 0x992   : > { %v4261_v4 = vsel %vm250_vm0, %v4221_v22, 0.0 }
 0x993   : > { %v4135_v9 = vpop.f32.mrf.mxu1  ;;  %4262 = vadd.xlane.f32.xlu2 %v4261_v4 }
 0x994   : > { %v4136_v30 = vadd.f32 %v8809_v16, %v4135_v9 }
 0x996   : > { %v8930_v45 = vadd.f32 %v4136_v30, %v8786_v41 }
 0x998   : > { %v4200_v27 = vsel %vm250_vm0, %v8930_v45, 0.0  ;;  %v4222_v20 = vmul.f32 %v8930_v45, %v8930_v45 }
 0x999   : > { %4201 = vadd.xlane.f32.xlu1 %v4200_v27 }
 0x99a   : > { %v4264_v14 = vsel %vm250_vm0, %v4222_v20, 0.0 }
 0x99b   : > { %4265 = vadd.xlane.f32.xlu0 %v4264_v14  ;;  %v4138_v25 = vpop.f32.mrf.mxu1 }
 0x99c   : > { %v4139_v2 = vadd.f32 %v8809_v16, %v4138_v25 }
 0x99e   : > { %v8939_v1 = vadd.f32 %v4139_v2, %v8798_v42 }
 0x9a0   : > { %v4203_v41 = vsel %vm250_vm0, %v8939_v1, 0.0  ;;  %v4223_v60 = vmul.f32 %v8939_v1, %v8939_v1  ;;  %v4163_v18 = vpop.xlane.xlu0 %4162 }
 0x9a1   : > { %4204 = vadd.xlane.f32.xlu1 %v4203_v41  ;;  %v8946_v54 = vmul.f32 0.015625, %v4163_v18 }
 0x9a2   : > { %v4267_v6 = vsel %vm250_vm0, %v4223_v60, 0.0  ;;  %v4227_v3 = vpop.xlane.xlu2 %4226 }
 0x9a3   : > { %v4140_v49 = vpop.f32.mrf.mxu1  ;;  %4268 = vadd.xlane.f32.xlu0 %v4267_v6  ;;  %v4305_v42 = vmul.f32 %v8946_v54, %v8946_v54  ;;  %v4289_v58 = vmul.f32 0.015625, %v4227_v3  ;;  %v4353_v6 = vsub.f32 %v8813_v13, %v8946_v54 }
 0x9a4   : > { %v4141_v40 = vadd.f32 %v8809_v16, %v4140_v49 }
 0x9a5   : > { %v4321_v28 = vsub.f32 %v4289_v58, %v4305_v42  ;;  %v8978_v58 = vld [vmem:[%s9551_s2 + $0x19] ss:$0 sm:$0xff] }
 0x9a6   : > { %v8952_v50 = vadd.f32 %v4141_v40, %v8801_v36 }
 0x9a7   : > { %v4337_v38 = vmax.f32 %v4321_v28, 0.0 }
 0x9a8   : > { %v4206_v51 = vsel %vm250_vm0, %v8952_v50, 0.0  ;;  %v4224_v48 = vmul.f32 %v8952_v50, %v8952_v50  ;;  %v4166_v16 = vpop.xlane.xlu1 %4165 }
 0x9a9   : > { %4207 = vadd.xlane.f32.xlu2 %v4206_v51  ;;  %v4369_v37 = vadd.f32 1e-05, %v4337_v38  ;;  %v8959_v47 = vmul.f32 0.015625, %v4166_v16 }
 0x9aa   : > { %v4270_v11 = vsel %vm250_vm0, %v4224_v48, 0.0  ;;  %v4230_v34 = vpop.xlane.xlu0 %4229 }
 0x9ab   : > { %4271 = vadd.xlane.f32.xlu1 %v4270_v11  ;;  %6436 = vrsqrt.f32 %v4369_v37  ;;  %v4306_v36 = vmul.f32 %v8959_v47, %v8959_v47  ;;  %v4290_v15 = vmul.f32 0.015625, %v4230_v34  ;;  %vm4391_vm5 = vweird.f32 %v4369_v37 }
 0x9ac   : > { %v4354_v16 = vsub.f32 %v8822_v61, %v8959_v47 }
 0x9ad   : > { %v4322_v24 = vsub.f32 %v4290_v15, %v4306_v36  ;;  %v8987_v36 = vld [vmem:[%s9551_s2 + $0x1a] ss:$0 sm:$0xff] }
 0x9af   : > { %v4338_v29 = vmax.f32 %v4322_v24, 0.0 }
 0x9b0   : > { %v4169_v10 = vpop.xlane.xlu1 %4168 }
 0x9b1   : > { %v6437_v21 = vpop.eup %6436  ;;  %v8963_v7 = vmul.f32 0.015625, %v4169_v10  ;;  %v4370_v0 = vadd.f32 1e-05, %v4338_v29 }
 0x9b2   : > { %v4386_v46 = vmul.f32 %v6437_v21, %v4369_v37  ;;  %v4233_v35 = vpop.xlane.xlu0 %4232  ;;  %vm4392_vm4 = vweird.f32 %v6437_v21 }
 0x9b3   : > { %v4307_v17 = vmul.f32 %v8963_v7, %v8963_v7  ;;  %v4291_v12 = vmul.f32 0.015625, %v4233_v35  ;;  %6438 = vrsqrt.f32 %v4370_v0  ;;  %vm4393_vm6 = vmor %vm4391_vm5, %vm4392_vm4  ;;  %vm4401_vm8 = vweird.f32 %v4370_v0 }
 0x9b4   : > { %v4387_v19 = vmul.f32 %v6437_v21, %v4386_v46 }
 0x9b5   : > { %v4323_v23 = vsub.f32 %v4291_v12, %v4307_v17 }
 0x9b6   : > { %v4388_v26 = vmul.f32 0.5, %v4387_v19 }
 0x9b7   : > { %v4339_v32 = vmax.f32 %v4323_v23, 0.0 }
 0x9b8   : > { %v4389_v55 = vsub.f32 1.5, %v4388_v26  ;;  %v4172_v33 = vpop.xlane.xlu2 %4171 }
 0x9b9   : > { %v4371_v5 = vadd.f32 1e-05, %v4339_v32  ;;  %v8967_v22 = vmul.f32 0.015625, %v4172_v33  ;;  %v6439_v4 = vpop.eup %6438 }
 0x9ba   : > { %v4236_v9 = vpop.xlane.xlu1 %4235  ;;  %v4390_v30 = vmul.f32 %v6437_v21, %v4389_v55  ;;  %v4396_v27 = vmul.f32 %v6439_v4, %v4370_v0  ;;  %vm4402_vm7 = vweird.f32 %v6439_v4 }
 0x9bb   : > { %6440 = vrsqrt.f32 %v4371_v5  ;;  %v4308_v20 = vmul.f32 %v8967_v22, %v8967_v22  ;;  %v4292_v14 = vmul.f32 0.015625, %v4236_v9  ;;  %vm4403_vm9 = vmor %vm4401_vm8, %vm4402_vm7  ;;  %vm4411_vm11 = vweird.f32 %v4371_v5 }
 0x9bc   : > { %v4397_v25 = vmul.f32 %v6439_v4, %v4396_v27  ;;  %v4394_v41 = vsel %vm4393_vm6, %v6437_v21, %v4390_v30 }
 0x9bd   : > { %v4324_v2 = vsub.f32 %v4292_v14, %v4308_v20  ;;  %v4545_v28 = vmul.f32 %v4394_v41, %v4353_v6  ;;  %v4355_v20 = vsub.f32 %v8831_v53, %v8963_v7  ;;  %v4356_v53 = vsub.f32 %v8840_v62, %v8967_v22 }
 0x9be   : > { %v4398_v60 = vmul.f32 0.5, %v4397_v25 }
 0x9bf   : > { %v4340_v18 = vmax.f32 %v4324_v2, 0.0  ;;  %v4562_v15 = vmul.f32 %v8978_v58, %v4545_v28 }
 0x9c0   : > { %v4175_v49 = vpop.xlane.xlu2 %4174  ;;  %v4399_v3 = vsub.f32 1.5, %v4398_v60 }
 0x9c1   : > { %v6441_v40 = vpop.eup %6440  ;;  %v8973_v42 = vmul.f32 0.015625, %v4175_v49  ;;  %v4372_v48 = vadd.f32 1e-05, %v4340_v18  ;;  %v8996_v17 = vadd.f32 %v8987_v36, %v4562_v15 }
 0x9c2   : > { %v4406_v51 = vmul.f32 %v6441_v40, %v4371_v5  ;;  %v4239_v38 = vpop.xlane.xlu1 %4238  ;;  %v4400_v11 = vmul.f32 %v6439_v4, %v4399_v3  ;;  %vm4412_vm10 = vweird.f32 %v6441_v40 }
 0x9c3   : > { %v4309_v13 = vmul.f32 %v8973_v42, %v8973_v42  ;;  %v4293_v54 = vmul.f32 0.015625, %v4239_v38  ;;  %6442 = vrsqrt.f32 %v4372_v48  ;;  %vm4413_vm12 = vmor %vm4411_vm11, %vm4412_vm10  ;;  %vm4421_vm14 = vweird.f32 %v4372_v48 }
 0x9c4   : > { %v4407_v37 = vmul.f32 %v6441_v40, %v4406_v51  ;;  %v4404_v31 = vsel %vm4403_vm9, %v6439_v4, %v4400_v11 }
 0x9c5   : > { %v4325_v34 = vsub.f32 %v4293_v54, %v4309_v13  ;;  %v4546_v24 = vmul.f32 %v4404_v31, %v4354_v16 }
 0x9c6   : > { %v4408_v29 = vmul.f32 0.5, %v4407_v37 }
 0x9c7   : > { %v4341_v10 = vmax.f32 %v4325_v34, 0.0  ;;  %v4563_v21 = vmul.f32 %v8978_v58, %v4546_v24 }
 0x9c8   : > { %v4409_v46 = vsub.f32 1.5, %v4408_v29  ;;  %v4178_v0 = vpop.xlane.xlu0 %4177 }
 0x9c9   : > { %v8991_v61 = vadd.f32 1e-05, %v4341_v10  ;;  %v8993_v47 = vmul.f32 0.015625, %v4178_v0  ;;  %v6443_v35 = vpop.eup %6442  ;;  %v8999_v12 = vadd.f32 %v8987_v36, %v4563_v21 }
 0x9ca   : > { %v4242_v19 = vpop.xlane.xlu2 %4241  ;;  %v4410_v23 = vmul.f32 %v6441_v40, %v4409_v46  ;;  %v4416_v26 = vmul.f32 %v6443_v35, %v4372_v48  ;;  %vm4422_vm13 = vweird.f32 %v6443_v35 }
 0x9cb   : > { %6444 = vrsqrt.f32 %v8991_v61  ;;  %v4310_v32 = vmul.f32 %v8993_v47, %v8993_v47  ;;  %v4294_v55 = vmul.f32 0.015625, %v4242_v19  ;;  %v4603_v4 = vpack.c.bf16 %v8999_v12, %v8996_v17  ;;  %vm4423_vm15 = vmor %vm4421_vm14, %vm4422_vm13 }
 0x9cc   : > { %v4417_v33 = vmul.f32 %v6443_v35, %v4416_v26  ;;  %v4414_v30 = vsel %vm4413_vm12, %v6441_v40, %v4410_v23  ;;  %vm4431_vm2 = vweird.f32 %v8991_v61  ;;  %v6172_v23 = vld [vmem:[#allocation2 + $0x1f8] sm:$0xff] }
 0x9cd   : > { %v4326_v9 = vsub.f32 %v4294_v55, %v4310_v32  ;;  %6015 = vmatmul.msk.bf16.vlgmr.msra.gmra.mxu3 %vm250_vm0, %v4603_v4  ;;  %v4547_v5 = vmul.f32 %v4414_v30, %v4355_v20  ;;  %4800 = vmatpush.bf16.msrb.mxu2 %v6172_v23 }
 0x9ce   : > { %v4418_v27 = vmul.f32 0.5, %v4417_v33  ;;  %v4357_v33 = vsub.f32 %v8849_v57, %v8973_v42  ;;  %v4358_v57 = vsub.f32 %v8858_v44, %v8993_v47 }
 0x9cf   : > { %v4342_v14 = vmax.f32 %v4326_v9, 0.0  ;;  %v4564_v54 = vmul.f32 %v8978_v58, %v4547_v5 }
 0x9d0   : > { %v4181_v25 = vpop.xlane.xlu0 %4180  ;;  %v4419_v41 = vsub.f32 1.5, %v4418_v27 }
 0x9d1   : > { %v6445_v2 = vpop.eup %6444  ;;  %v9009_v60 = vmul.f32 0.015625, %v4181_v25  ;;  %v4374_v18 = vadd.f32 1e-05, %v4342_v14  ;;  %v9023_v22 = vadd.f32 %v8987_v36, %v4564_v54 }
 0x9d2   : > { %v4426_v6 = vmul.f32 %v6445_v2, %v8991_v61  ;;  %v4245_v49 = vpop.xlane.xlu2 %4244  ;;  %v4420_v3 = vmul.f32 %v6443_v35, %v4419_v41  ;;  %vm4432_vm1 = vweird.f32 %v6445_v2 }
 0x9d3   : > { %v4311_v40 = vmul.f32 %v9009_v60, %v9009_v60  ;;  %v4295_v28 = vmul.f32 0.015625, %v4245_v49  ;;  %6446 = vrsqrt.f32 %v4374_v18  ;;  %vm4433_vm3 = vmor %vm4431_vm2, %vm4432_vm1  ;;  %vm4441_vm5 = vweird.f32 %v4374_v18 }
 0x9d4   : > { %v4427_v7 = vmul.f32 %v6445_v2, %v4426_v6  ;;  %v4424_v51 = vsel %vm4423_vm15, %v6443_v35, %v4420_v3 }
 0x9d5   : > { %v4327_v38 = vsub.f32 %v4295_v28, %v4311_v40  ;;  %v4548_v11 = vmul.f32 %v4424_v51, %v4356_v53 }
 0x9d6   : > { %v4428_v13 = vmul.f32 0.5, %v4427_v7 }
 0x9d7   : > { %v4343_v16 = vmax.f32 %v4327_v38, 0.0  ;;  %v4565_v48 = vmul.f32 %v8978_v58, %v4548_v11 }
 0x9d8   : > { %v4429_v37 = vsub.f32 1.5, %v4428_v13  ;;  %v4184_v31 = vpop.xlane.xlu1 %4183 }
 0x9d9   : > { %v9018_v34 = vadd.f32 1e-05, %v4343_v16  ;;  %v9020_v15 = vmul.f32 0.015625, %v4184_v31  ;;  %v6447_v24 = vpop.eup %6446  ;;  %v9026_v29 = vadd.f32 %v8987_v36, %v4565_v48 }
 0x9da   : > { %v4248_v62 = vpop.xlane.xlu0 %4247  ;;  %v4430_v10 = vmul.f32 %v6445_v2, %v4429_v37  ;;  %v4436_v21 = vmul.f32 %v6447_v24, %v4374_v18  ;;  %vm4442_vm4 = vweird.f32 %v6447_v24 }
 0x9db   : > { %6448 = vrsqrt.f32 %v9018_v34  ;;  %v4312_v46 = vmul.f32 %v9020_v15, %v9020_v15  ;;  %v4296_v0 = vmul.f32 0.015625, %v4248_v62  ;;  %v4604_v19 = vpack.c.bf16 %v9026_v29, %v9023_v22  ;;  %vm4443_vm6 = vmor %vm4441_vm5, %vm4442_vm4 }
 0x9dc   : > { %v4437_v35 = vmul.f32 %v6447_v24, %v4436_v21  ;;  %v4434_v32 = vsel %vm4433_vm3, %v6445_v2, %v4430_v10  ;;  %vm4451_vm8 = vweird.f32 %v9018_v34  ;;  %v6171_v21 = vld [vmem:[#allocation2 + $0x1f0] sm:$0xff] }
 0x9dd   : > { %v4328_v26 = vsub.f32 %v4296_v0, %v4312_v46  ;;  %6016 = vmatmul.msk.bf16.gmra.mxu3 %vm250_vm0, %v4604_v19  ;;  %v4549_v20 = vmul.f32 %v4434_v32, %v4357_v33  ;;  %4801 = vmatpush.bf16.msrb.mxu2 %v6171_v21  ;;  %v4359_v19 = vsub.f32 %v8867_v43, %v9009_v60 }
 0x9de   : > { %v4438_v55 = vmul.f32 0.5, %v4437_v35  ;;  %v4360_v43 = vsub.f32 %v8876_v39, %v9020_v15 }
 0x9df   : > { %v4344_v4 = vmax.f32 %v4328_v26, 0.0  ;;  %v4566_v53 = vmul.f32 %v8978_v58, %v4549_v20 }
 0x9e0   : > { %v4439_v27 = vsub.f32 1.5, %v4438_v55 }
 0x9e1   : > { %v4187_v9 = vpop.xlane.xlu1 %4186  ;;  %v6449_v30 = vpop.eup %6448  ;;  %v4376_v25 = vadd.f32 1e-05, %v4344_v4  ;;  %v9051_v47 = vadd.f32 %v8987_v36, %v4566_v53 }
 0x9e2   : > { %v9037_v61 = vmul.f32 0.015625, %v4187_v9  ;;  %v4446_v14 = vmul.f32 %v6449_v30, %v9018_v34  ;;  %v4440_v2 = vmul.f32 %v6447_v24, %v4439_v27  ;;  %vm4452_vm7 = vweird.f32 %v6449_v30 }
 0x9e3   : > { %v4251_v41 = vpop.xlane.xlu0 %4250  ;;  %6450 = vrsqrt.f32 %v4376_v25  ;;  %vm4453_vm9 = vmor %vm4451_vm8, %vm4452_vm7  ;;  %vm4461_vm11 = vweird.f32 %v4376_v25 }
 0x9e4   : > { %v4313_v5 = vmul.f32 %v9037_v61, %v9037_v61  ;;  %v4297_v6 = vmul.f32 0.015625, %v4251_v41  ;;  %v4447_v42 = vmul.f32 %v6449_v30, %v4446_v14  ;;  %v4444_v49 = vsel %vm4443_vm6, %v6447_v24, %v4440_v2 }
 0x9e5   : > { %v4550_v40 = vmul.f32 %v4444_v49, %v4358_v57 }
 0x9e6   : > { %v4329_v3 = vsub.f32 %v4297_v6, %v4313_v5  ;;  %v4448_v28 = vmul.f32 0.5, %v4447_v42  ;;  %v6170_v42 = vld [vmem:[#allocation2 + $0x1e8] sm:$0xff] }
 0x9e7   : > { %v4567_v18 = vmul.f32 %v8978_v58, %v4550_v40  ;;  %4802 = vmatpush.bf16.msrb.mxu2 %v6170_v42 }
 0x9e8   : > { %v4345_v7 = vmax.f32 %v4329_v3, 0.0  ;;  %v4449_v51 = vsub.f32 1.5, %v4448_v28 }
 0x9e9   : > { %v4190_v38 = vpop.xlane.xlu2 %4189  ;;  %v6451_v54 = vpop.eup %6450  ;;  %v9054_v16 = vadd.f32 %v8987_v36, %v4567_v18 }
 0x9ea   : > { %v9046_v11 = vadd.f32 1e-05, %v4345_v7  ;;  %v9048_v13 = vmul.f32 0.015625, %v4190_v38  ;;  %v4450_v37 = vmul.f32 %v6449_v30, %v4449_v51  ;;  %v4456_v31 = vmul.f32 %v6451_v54, %v4376_v25 }
 0x9eb   : > { %v4254_v44 = vpop.xlane.xlu1 %4253  ;;  %v4605_v10 = vpack.c.bf16 %v9054_v16, %v9051_v47  ;;  %vm4462_vm10 = vweird.f32 %v6451_v54 }
 0x9ec   : > { %6452 = vrsqrt.f32 %v9046_v11  ;;  %v4314_v48 = vmul.f32 %v9048_v13, %v9048_v13  ;;  %v4298_v24 = vmul.f32 0.015625, %v4254_v44  ;;  %v4457_v62 = vmul.f32 %v6451_v54, %v4456_v31  ;;  %vm4463_vm12 = vmor %vm4461_vm11, %vm4462_vm10 }
 0x9ed   : > { %v4454_v0 = vsel %vm4453_vm9, %v6449_v30, %v4450_v37  ;;  %6017 = vmatmul.msk.bf16.gmra.mxu3 %vm250_vm0, %v4605_v10  ;;  %vm4471_vm14 = vweird.f32 %v9046_v11  ;;  %v4361_v10 = vsub.f32 %v8885_v59, %v9037_v61  ;;  %v4362_v59 = vsub.f32 %v8894_v52, %v9048_v13 }
 0x9ee   : > { %v4330_v46 = vsub.f32 %v4298_v24, %v4314_v48  ;;  %v4458_v35 = vmul.f32 0.5, %v4457_v62  ;;  %v4551_v33 = vmul.f32 %v4454_v0, %v4359_v19 }
 0x9f0   : > { %v4346_v23 = vmax.f32 %v4330_v46, 0.0  ;;  %v4459_v55 = vsub.f32 1.5, %v4458_v35  ;;  %v4568_v57 = vmul.f32 %v8978_v58, %v4551_v33 }
 0x9f1   : > { %v4193_v26 = vpop.xlane.xlu2 %4192 }
 0x9f2   : > { %v6453_v32 = vpop.eup %6452  ;;  %v9065_v34 = vmul.f32 0.015625, %v4193_v26  ;;  %v4378_v9 = vadd.f32 1e-05, %v4346_v23  ;;  %v4460_v30 = vmul.f32 %v6451_v54, %v4459_v55  ;;  %v9079_v7 = vadd.f32 %v8987_v36, %v4568_v57 }
 0x9f3   : > { %v4466_v4 = vmul.f32 %v6453_v32, %v9046_v11  ;;  %v4257_v27 = vpop.xlane.xlu1 %4256  ;;  %vm4472_vm13 = vweird.f32 %v6453_v32 }
 0x9f4   : > { %v4315_v20 = vmul.f32 %v9065_v34, %v9065_v34  ;;  %v4299_v14 = vmul.f32 0.015625, %v4257_v27  ;;  %6454 = vrsqrt.f32 %v4378_v9  ;;  %v4464_v41 = vsel %vm4463_vm12, %v6451_v54, %v4460_v30  ;;  %vm4473_vm15 = vmor %vm4471_vm14, %vm4472_vm13 }
 0x9f5   : > { %v4467_v60 = vmul.f32 %v6453_v32, %v4466_v4  ;;  %v4552_v5 = vmul.f32 %v4464_v41, %v4360_v43  ;;  %vm4481_vm2 = vweird.f32 %v4378_v9  ;;  %v6169_v41 = vld [vmem:[#allocation2 + $0x1e0] sm:$0xff] }
 0x9f6   : > { %v4331_v2 = vsub.f32 %v4299_v14, %v4315_v20  ;;  %4803 = vmatpush.bf16.msrb.mxu2 %v6169_v41 }
 0x9f7   : > { %v4468_v6 = vmul.f32 0.5, %v4467_v60  ;;  %v4569_v40 = vmul.f32 %v8978_v58, %v4552_v5 }
 0x9f8   : > { %v4347_v49 = vmax.f32 %v4331_v2, 0.0 }
 0x9f9   : > { %v4469_v3 = vsub.f32 1.5, %v4468_v6  ;;  %v4196_v25 = vpop.xlane.xlu0 %4195  ;;  %v9082_v51 = vadd.f32 %v8987_v36, %v4569_v40 }
 0x9fa   : > { %v9074_v28 = vadd.f32 1e-05, %v4347_v49  ;;  %v9076_v53 = vmul.f32 0.015625, %v4196_v25  ;;  %v6455_v39 = vpop.eup %6454 }
 0x9fb   : > { %v4260_v15 = vpop.xlane.xlu2 %4259  ;;  %v4470_v38 = vmul.f32 %v6453_v32, %v4469_v3  ;;  %v4476_v18 = vmul.f32 %v6455_v39, %v4378_v9  ;;  %v4606_v31 = vpack.c.bf16 %v9082_v51, %v9079_v7  ;;  %vm4482_vm1 = vweird.f32 %v6455_v39 }
 0x9fc   : > { %6456 = vrsqrt.f32 %v9074_v28  ;;  %v4316_v54 = vmul.f32 %v9076_v53, %v9076_v53  ;;  %v4300_v44 = vmul.f32 0.015625, %v4260_v15  ;;  %vm4483_vm3 = vmor %vm4481_vm2, %vm4482_vm1  ;;  %vm4491_vm5 = vweird.f32 %v9074_v28 }
 0x9fd   : > { %v4477_v37 = vmul.f32 %v6455_v39, %v4476_v18  ;;  %v4474_v24 = vsel %vm4473_vm15, %v6453_v32, %v4470_v38  ;;  %6018 = vmatmul.msk.bf16.gmra.mxu3 %vm250_vm0, %v4606_v31  ;;  %v4363_v31 = vsub.f32 %v8903_v56, %v9065_v34 }
 0x9fe   : > { %v4332_v48 = vsub.f32 %v4300_v44, %v4316_v54  ;;  %v4553_v11 = vmul.f32 %v4474_v24, %v4361_v10 }
 0x9ff   : > { %v4478_v62 = vmul.f32 0.5, %v4477_v37 }
 0xa00   : > { %v4348_v21 = vmax.f32 %v4332_v48, 0.0  ;;  %v4570_v43 = vmul.f32 %v8978_v58, %v4553_v11 }
 0xa01   : > { %v4479_v35 = vsub.f32 1.5, %v4478_v62 }
 0xa02   : > { %v6457_v0 = vpop.eup %6456  ;;  %v4380_v26 = vadd.f32 1e-05, %v4348_v21  ;;  %v9107_v13 = vadd.f32 %v8987_v36, %v4570_v43  ;;  %v6167_v43 = vld [vmem:[#allocation2 + $0x1d0] sm:$0xff] }
 0xa03   : > { %v4486_v23 = vmul.f32 %v6457_v0, %v9074_v28  ;;  %v4480_v33 = vmul.f32 %v6455_v39, %v4479_v35  ;;  %vm4492_vm4 = vweird.f32 %v6457_v0 }
 0xa04   : > { %v4199_v46 = vpop.xlane.xlu0 %4198  ;;  %6458 = vrsqrt.f32 %v4380_v26  ;;  %vm4493_vm6 = vmor %vm4491_vm5, %vm4492_vm4  ;;  %vm4501_vm8 = vweird.f32 %v4380_v26 }
 0xa05   : > { %v9093_v19 = vmul.f32 0.015625, %v4199_v46  ;;  %v4487_v61 = vmul.f32 %v6457_v0, %v4486_v23  ;;  %v4484_v27 = vsel %vm4483_vm3, %v6455_v39, %v4480_v33 }
 0xa06   : > { %v4263_v55 = vpop.xlane.xlu2 %4262  ;;  %v4554_v20 = vmul.f32 %v4484_v27, %v4362_v59 }
 0xa07   : > { %v4317_v32 = vmul.f32 %v9093_v19, %v9093_v19  ;;  %v4301_v4 = vmul.f32 0.015625, %v4263_v55  ;;  %v4488_v14 = vmul.f32 0.5, %v4487_v61 }
 0xa08   : > { %v4571_v5 = vmul.f32 %v8978_v58, %v4554_v20 }
 0xa09   : > { %v4333_v30 = vsub.f32 %v4301_v4, %v4317_v32  ;;  %v4489_v2 = vsub.f32 1.5, %v4488_v14 }
 0xa0a   : > { %v6459_v52 = vpop.eup %6458  ;;  %v9110_v42 = vadd.f32 %v8987_v36, %v4571_v5 }
 0xa0b   : > { %v4349_v60 = vmax.f32 %v4333_v30, 0.0  ;;  %v4496_v3 = vmul.f32 %v6459_v52, %v4380_v26  ;;  %v4490_v25 = vmul.f32 %v6457_v0, %v4489_v2  ;;  %vm4502_vm7 = vweird.f32 %v6459_v52  ;;  %v6168_v30 = vld [vmem:[#allocation2 + $0x1d8] sm:$0xff] }
 0xa0c   : > { %v4202_v9 = vpop.xlane.xlu1 %4201  ;;  %v4607_v39 = vpack.c.bf16 %v9110_v42, %v9107_v13  ;;  %vm4503_vm9 = vmor %vm4501_vm8, %vm4502_vm7  ;;  %4804 = vmatpush.bf16.msrb.mxu2 %v6168_v30 }
 0xa0d   : > { %v9102_v6 = vadd.f32 1e-05, %v4349_v60  ;;  %v9104_v57 = vmul.f32 0.015625, %v4202_v9  ;;  %v4497_v15 = vmul.f32 %v6459_v52, %v4496_v3  ;;  %v4494_v44 = vsel %vm4493_vm6, %v6457_v0, %v4490_v25 }
 0xa0e   : > { %v4266_v49 = vpop.xlane.xlu0 %4265  ;;  %6019 = vmatmul.msk.bf16.gmra.mxu3 %vm250_vm0, %v4607_v39  ;;  %v4555_v46 = vmul.f32 %v4494_v44, %v4363_v31  ;;  %v4364_v0 = vsub.f32 %v8912_v8, %v9076_v53 }
 0xa0f   : > { %6460 = vrsqrt.f32 %v9102_v6  ;;  %v4318_v40 = vmul.f32 %v9104_v57, %v9104_v57  ;;  %v4302_v38 = vmul.f32 0.015625, %v4266_v49  ;;  %v4498_v18 = vmul.f32 0.5, %v4497_v15 }
 0xa10   : > { %v4572_v59 = vmul.f32 %v8978_v58, %v4555_v46  ;;  %vm4511_vm11 = vweird.f32 %v9102_v6  ;;  %4805 = vmatpush.bf16.msrb.mxu2 %v6167_v43 }
 0xa11   : > { %v4334_v54 = vsub.f32 %v4302_v38, %v4318_v40  ;;  %v4499_v48 = vsub.f32 1.5, %v4498_v18  ;;  %v6166_v38 = vld [vmem:[#allocation2 + $0x1c8] sm:$0xff]  ;;  %v4365_v18 = vsub.f32 %v8921_v63, %v9093_v19 }
 0xa12   : > { %v9136_v41 = vadd.f32 %v8987_v36, %v4572_v59 }
 0xa13   : > { %v4350_v24 = vmax.f32 %v4334_v54, 0.0  ;;  %v4500_v28 = vmul.f32 %v6459_v52, %v4499_v48 }
 0xa14   : > { %v4205_v62 = vpop.xlane.xlu1 %4204  ;;  %4806 = vmatpush.bf16.msrb.mxu2 %v6166_v38 }
 0xa15   : > { %v6461_v37 = vpop.eup %6460  ;;  %v9122_v21 = vmul.f32 0.015625, %v4205_v62  ;;  %v4382_v35 = vadd.f32 1e-05, %v4350_v24  ;;  %v4504_v55 = vsel %vm4503_vm9, %v6459_v52, %v4500_v28 }
 0xa16   : > { %v4506_v10 = vmul.f32 %v6461_v37, %v9102_v6  ;;  %v4269_v11 = vpop.xlane.xlu0 %4268  ;;  %v4556_v33 = vmul.f32 %v4504_v55, %v4364_v0  ;;  %vm4512_vm10 = vweird.f32 %v6461_v37 }
 0xa17   : > { %v4319_v56 = vmul.f32 %v9122_v21, %v9122_v21  ;;  %v4303_v34 = vmul.f32 0.015625, %v4269_v11  ;;  %6462 = vrsqrt.f32 %v4382_v35  ;;  %vm4513_vm12 = vmor %vm4511_vm11, %vm4512_vm10  ;;  %vm4521_vm14 = vweird.f32 %v4382_v35 }
 0xa18   : > { %v4507_v23 = vmul.f32 %v6461_v37, %v4506_v10  ;;  %v4573_v27 = vmul.f32 %v8978_v58, %v4556_v33 }
 0xa19   : > { %v4335_v4 = vsub.f32 %v4303_v34, %v4319_v56 }
 0xa1a   : > { %v4508_v32 = vmul.f32 0.5, %v4507_v23  ;;  %v9133_v14 = vadd.f32 %v8987_v36, %v4573_v27  ;;  %v6165_v27 = vld [vmem:[#allocation2 + $0x1c0] sm:$0xff] }
 0xa1b   : > { %v4351_v26 = vmax.f32 %v4335_v4, 0.0  ;;  %v4367_v4 = vsub.f32 %v8939_v1, %v9122_v21  ;;  %4807 = vmatpush.bf16.msrb.mxu2 %v6165_v27 }
 0xa1c   : > { %v4509_v61 = vsub.f32 1.5, %v4508_v32  ;;  %v4208_v20 = vpop.xlane.xlu2 %4207  ;;  %v4608_v3 = vpack.c.bf16 %v9133_v14, %v9136_v41 }
 0xa1d   : > { %v4383_v8 = vadd.f32 1e-05, %v4351_v26  ;;  %v9130_v53 = vmul.f32 0.015625, %v4208_v20  ;;  %v6463_v60 = vpop.eup %6462 }
 0xa1e   : > { %v4272_v2 = vpop.xlane.xlu1 %4271  ;;  %v4510_v9 = vmul.f32 %v6461_v37, %v4509_v61  ;;  %v4516_v5 = vmul.f32 %v6463_v60, %v4382_v35  ;;  %6020 = vmatmul.msk.bf16.gmra.mxu3 %vm250_vm0, %v4608_v3  ;;  %vm4522_vm13 = vweird.f32 %v6463_v60 }
 0xa1f   : > { %6464 = vrsqrt.f32 %v4383_v8  ;;  %v4320_v52 = vmul.f32 %v9130_v53, %v9130_v53  ;;  %v4304_v25 = vmul.f32 0.015625, %v4272_v2  ;;  %vm4523_vm15 = vmor %vm4521_vm14, %vm4522_vm13  ;;  %vm4531_vm2 = vweird.f32 %v4383_v8 }
 0xa20   : > { %v4517_v49 = vmul.f32 %v6463_v60, %v4516_v5  ;;  %v4514_v40 = vsel %vm4513_vm12, %v6461_v37, %v4510_v9  ;;  %v4366_v37 = vsub.f32 %v8930_v45, %v9104_v57  ;;  %v4368_v30 = vsub.f32 %v8952_v50, %v9130_v53  ;;  %v6237_v53 = vld [vmem:[%s9551_s2 + $0x1d] ss:$0 sm:$0xff] }
 0xa21   : > { %v4336_v15 = vsub.f32 %v4304_v25, %v4320_v52  ;;  %v4557_v31 = vmul.f32 %v4514_v40, %v4365_v18 }
 0xa22   : > { %v4518_v39 = vmul.f32 0.5, %v4517_v49 }
 0xa23   : > { %v4352_v6 = vmax.f32 %v4336_v15, 0.0  ;;  %v4574_v63 = vmul.f32 %v8978_v58, %v4557_v31 }
 0xa24   : > { %v4519_v44 = vsub.f32 1.5, %v4518_v39 }
 0xa25   : > { %v6465_v54 = vpop.eup %6464  ;;  %v4384_v62 = vadd.f32 1e-05, %v4352_v6  ;;  %v9151_v23 = vadd.f32 %v8987_v36, %v4574_v63 }
 0xa26   : > { %v4526_v48 = vmul.f32 %v6465_v54, %v4383_v8  ;;  %v4520_v24 = vmul.f32 %v6463_v60, %v4519_v44  ;;  %vm4532_vm1 = vweird.f32 %v6465_v54 }
 0xa27   : > { %6466 = vrsqrt.f32 %v4384_v62  ;;  %vm4533_vm3 = vmor %vm4531_vm2, %vm4532_vm1  ;;  %vm4541_vm5 = vweird.f32 %v4384_v62 }
 0xa28   : > { %v4527_v10 = vmul.f32 %v6465_v54, %v4526_v48  ;;  %v4524_v46 = vsel %vm4523_vm15, %v6463_v60, %v4520_v24 }
 0xa29   : > { %v4558_v28 = vmul.f32 %v4524_v46, %v4366_v37 }
 0xa2a   : > { %v4528_v11 = vmul.f32 0.5, %v4527_v10 }
 0xa2b   : > { %v4575_v0 = vmul.f32 %v8978_v58, %v4558_v28 }
 0xa2c   : > { %v4529_v19 = vsub.f32 1.5, %v4528_v11 }
 0xa2d   : > { %v9154_v35 = vadd.f32 %v8987_v36, %v4575_v0  ;;  %v6467_v56 = vpop.eup %6466 }
 0xa2e   : > { %v4530_v34 = vmul.f32 %v6465_v54, %v4529_v19  ;;  %v4536_v45 = vmul.f32 %v6467_v56, %v4384_v62  ;;  %vm4542_vm4 = vweird.f32 %v6467_v56 }
 0xa2f   : > { %v4609_v57 = vpack.c.bf16 %v9154_v35, %v9151_v23  ;;  %vm4543_vm6 = vmor %vm4541_vm5, %vm4542_vm4 }
 0xa30   : > { %v4537_v55 = vmul.f32 %v6467_v56, %v4536_v45  ;;  %v4534_v33 = vsel %vm4533_vm3, %v6465_v54, %v4530_v34 }
 0xa31   : > { %6021 = vmatmul.msk.bf16.gmra.mxu3 %vm250_vm0, %v4609_v57  ;;  %v4559_v61 = vmul.f32 %v4534_v33, %v4367_v4 }
 0xa32   : > { %v4538_v32 = vmul.f32 0.5, %v4537_v55 }
 0xa33   : > { %v4576_v43 = vmul.f32 %v8978_v58, %v4559_v61 }
 0xa34   : > { %v4539_v59 = vsub.f32 1.5, %v4538_v32 }
 0xa35   : > { %v9166_v2 = vadd.f32 %v8987_v36, %v4576_v43 }
 0xa36   : > { %v4540_v26 = vmul.f32 %v6467_v56, %v4539_v59 }
 0xa38   : > { %v4544_v20 = vsel %vm4543_vm6, %v6467_v56, %v4540_v26 }
 0xa39   : > { %v4560_v8 = vmul.f32 %v4544_v20, %v4368_v30 }
 0xa3b   : > { %v4577_v60 = vmul.f32 %v8978_v58, %v4560_v8 }
 0xa3d   : > { %v9169_v1 = vadd.f32 %v8987_v36, %v4577_v60 }
 0xa3f   : > { %v4610_v21 = vpack.c.bf16 %v9169_v1, %v9166_v2 }
 0xa41   : > { %6022 = vmatmul.msk.bf16.gmra.mxu3 %vm250_vm0, %v4610_v21 }
 0xa50   : > { %v4670_v50 = vpop.f32.mrf.mxu3 }
 0xa51   : > { %v4671_v9 = vadd.f32 %v6237_v53, %v4670_v50 }
 0xa53   : > { %v4710_v58 = vmax.f32 %v4671_v9, 0.0 }
 0xa58   : > { %v4672_v5 = vpop.f32.mrf.mxu3 }
 0xa59   : > { %v4673_v52 = vadd.f32 %v6237_v53, %v4672_v5 }
 0xa5b   : > { %v4711_v49 = vmax.f32 %v4673_v52, 0.0 }
 0xa5d   : > { %v4742_v3 = vpack.c.bf16 %v4711_v49, %v4710_v58 }
 0xa5f   : > { %4808 = vmatmul.bf16.vlgmr.msrb.gmra.mxu2 %v4742_v3 }
 0xa60   : > { %v4675_v25 = vpop.f32.mrf.mxu3 }
 0xa61   : > { %v4676_v36 = vadd.f32 %v6237_v53, %v4675_v25 }
 0xa63   : > { %v4712_v15 = vmax.f32 %v4676_v36, 0.0 }
 0xa68   : > { %v4677_v40 = vpop.f32.mrf.mxu3 }
 0xa69   : > { %v4678_v39 = vadd.f32 %v6237_v53, %v4677_v40  ;;  %v9180_v40 = vld [vmem:[%s9551_s2 + $0x1e] ss:$0 sm:$0xff] }
 0xa6b   : > { %v4713_v38 = vmax.f32 %v4678_v39, 0.0 }
 0xa6d   : > { %v4743_v18 = vpack.c.bf16 %v4713_v38, %v4712_v15 }
 0xa6f   : > { %4813 = vmatmul.bf16.gmra.mxu2 %v4743_v18 }
 0xa70   : > { %v4680_v54 = vpop.f32.mrf.mxu3 }
 0xa71   : > { %v4681_v44 = vadd.f32 %v6237_v53, %v4680_v54 }
 0xa73   : > { %v4714_v48 = vmax.f32 %v4681_v44, 0.0 }
 0xa78   : > { %v4682_v6 = vpop.f32.mrf.mxu3 }
 0xa79   : > { %v4683_v31 = vadd.f32 %v6237_v53, %v4682_v6 }
 0xa7b   : > { %v4715_v24 = vmax.f32 %v4683_v31, 0.0 }
 0xa7d   : > { %v4744_v62 = vpack.c.bf16 %v4715_v24, %v4714_v48  ;;  %v6176_v48 = vld [vmem:[#allocation2 + $0x218] sm:$0xff] }
 0xa7e   : > { %5371 = vmatpush.bf16.msrb.mxu0 %v6176_v48 }
 0xa7f   : > { %4818 = vmatmul.bf16.gmra.mxu2 %v4744_v62 }
 0xa80   : > { %v4685_v37 = vpop.f32.mrf.mxu3 }
 0xa81   : > { %v4686_v10 = vadd.f32 %v6237_v53, %v4685_v37 }
 0xa83   : > { %v4716_v11 = vmax.f32 %v4686_v10, 0.0 }
 0xa88   : > { %v4687_v46 = vpop.f32.mrf.mxu3 }
 0xa89   : > { %v4688_v28 = vadd.f32 %v6237_v53, %v4687_v46 }
 0xa8b   : > { %v4717_v63 = vmax.f32 %v4688_v28, 0.0 }
 0xa8d   : > { %v4745_v19 = vpack.c.bf16 %v4717_v63, %v4716_v11 }
 0xa8f   : > { %4823 = vmatmul.bf16.gmra.mxu2 %v4745_v19 }
 0xa91   : > { %v4690_v0 = vpop.f32.mrf.mxu3 }
 0xa92   : > { %v4691_v56 = vadd.f32 %v6237_v53, %v4690_v0 }
 0xa94   : > { %v4718_v57 = vmax.f32 %v4691_v56, 0.0 }
 0xa99   : > { %v4692_v34 = vpop.f32.mrf.mxu3 }
 0xa9a   : > { %v4693_v45 = vadd.f32 %v6237_v53, %v4692_v34 }
 0xa9c   : > { %v4719_v55 = vmax.f32 %v4693_v45, 0.0 }
 0xa9e   : > { %v4746_v33 = vpack.c.bf16 %v4719_v55, %v4718_v57 }
 0xaa0   : > { %4828 = vmatmul.bf16.gmra.mxu2 %v4746_v33 }
 0xaa1   : > { %v4695_v32 = vpop.f32.mrf.mxu3 }
 0xaa2   : > { %v4696_v4 = vadd.f32 %v6237_v53, %v4695_v32 }
 0xaa4   : > { %v4720_v26 = vmax.f32 %v4696_v4, 0.0 }
 0xaa9   : > { %v4697_v59 = vpop.f32.mrf.mxu3 }
 0xaaa   : > { %v4698_v61 = vadd.f32 %v6237_v53, %v4697_v59 }
 0xaac   : > { %v4721_v27 = vmax.f32 %v4698_v61, 0.0 }
 0xaae   : > { %v4747_v30 = vpack.c.bf16 %v4721_v27, %v4720_v26  ;;  %v6175_v26 = vld [vmem:[#allocation2 + $0x210] sm:$0xff] }
 0xaaf   : > { %5372 = vmatpush.bf16.msrb.mxu0 %v6175_v26 }
 0xab0   : > { %4833 = vmatmul.bf16.gmra.mxu2 %v4747_v30 }
 0xab4   : > { %v4700_v20 = vpop.f32.mrf.mxu3 }
 0xab5   : > { %v4701_v8 = vadd.f32 %v6237_v53, %v4700_v20 }
 0xab7   : > { %v4722_v21 = vmax.f32 %v4701_v8, 0.0 }
 0xabc   : > { %v4702_v43 = vpop.f32.mrf.mxu3 }
 0xabd   : > { %v4703_v60 = vadd.f32 %v6237_v53, %v4702_v43 }
 0xabf   : > { %v4723_v50 = vmax.f32 %v4703_v60, 0.0 }
 0xac1   : > { %v4748_v9 = vpack.c.bf16 %v4723_v50, %v4722_v21 }
 0xac3   : > { %4838 = vmatmul.bf16.gmra.mxu2 %v4748_v9 }
 0xac4   : > { %v4705_v5 = vpop.f32.mrf.mxu3 }
 0xac5   : > { %v4706_v52 = vadd.f32 %v6237_v53, %v4705_v5 }
 0xac7   : > { %v4724_v3 = vmax.f32 %v4706_v52, 0.0 }
 0xacc   : > { %v4707_v58 = vpop.f32.mrf.mxu3 }
 0xacd   : > { %v4708_v49 = vadd.f32 %v6237_v53, %v4707_v58 }
 0xacf   : > { %v4725_v25 = vmax.f32 %v4708_v49, 0.0 }
 0xad1   : > { %v4749_v36 = vpack.c.bf16 %v4725_v25, %v4724_v3 }
 0xad3   : > { %4843 = vmatmul.bf16.gmra.mxu2 %v4749_v36  ;;  %v6174_v36 = vld [vmem:[#allocation2 + $0x208] sm:$0xff] }
 0xad4   : > { %5373 = vmatpush.bf16.msrb.mxu0 %v6174_v36 }
 0xae2   : > { %v4809_v39 = vpop.f32.mrf.mxu2 }
 0xae3   : > { %v4810_v15 = vadd.f32 %v9180_v40, %v4809_v39 }
 0xae5   : > { %v9184_v38 = vadd.f32 %v4810_v15, %v8996_v17 }
 0xae7   : > { %v4867_v18 = vsel %vm250_vm0, %v9184_v38, 0.0  ;;  %v4915_v53 = vmul.f32 %v9184_v38, %v9184_v38 }
 0xae8   : > { %4868 = vadd.xlane.f32.xlu2 %v4867_v18 }
 0xae9   : > { %v4931_v54 = vsel %vm250_vm0, %v4915_v53, 0.0 }
 0xaea   : > { %v4811_v44 = vpop.f32.mrf.mxu2  ;;  %4932 = vadd.xlane.f32.xlu1 %v4931_v54 }
 0xaeb   : > { %v4812_v6 = vadd.f32 %v9180_v40, %v4811_v44 }
 0xaed   : > { %v9193_v31 = vadd.f32 %v4812_v6, %v8999_v12 }
 0xaef   : > { %v4870_v17 = vsel %vm250_vm0, %v9193_v31, 0.0  ;;  %v4916_v24 = vmul.f32 %v9193_v31, %v9193_v31 }
 0xaf0   : > { %4871 = vadd.xlane.f32.xlu0 %v4870_v17 }
 0xaf1   : > { %v4934_v62 = vsel %vm250_vm0, %v4916_v24, 0.0 }
 0xaf2   : > { %4935 = vadd.xlane.f32.xlu2 %v4934_v62  ;;  %v4814_v37 = vpop.f32.mrf.mxu2 }
 0xaf3   : > { %v4815_v10 = vadd.f32 %v9180_v40, %v4814_v37 }
 0xaf5   : > { %v9202_v46 = vadd.f32 %v4815_v10, %v9023_v22 }
 0xaf7   : > { %v4873_v12 = vsel %vm250_vm0, %v9202_v46, 0.0  ;;  %v4917_v28 = vmul.f32 %v9202_v46, %v9202_v46 }
 0xaf8   : > { %4874 = vadd.xlane.f32.xlu0 %v4873_v12 }
 0xaf9   : > { %v4937_v11 = vsel %vm250_vm0, %v4917_v28, 0.0 }
 0xafa   : > { %v4816_v63 = vpop.f32.mrf.mxu2  ;;  %4938 = vadd.xlane.f32.xlu2 %v4937_v11 }
 0xafb   : > { %v4817_v19 = vadd.f32 %v9180_v40, %v4816_v63 }
 0xafd   : > { %v9211_v0 = vadd.f32 %v4817_v19, %v9026_v29 }
 0xaff   : > { %v4876_v22 = vsel %vm250_vm0, %v9211_v0, 0.0  ;;  %v4918_v56 = vmul.f32 %v9211_v0, %v9211_v0 }
 0xb00   : > { %4877 = vadd.xlane.f32.xlu1 %v4876_v22 }
 0xb01   : > { %v4940_v34 = vsel %vm250_vm0, %v4918_v56, 0.0 }
 0xb02   : > { %4941 = vadd.xlane.f32.xlu0 %v4940_v34  ;;  %v4819_v45 = vpop.f32.mrf.mxu2 }
 0xb03   : > { %v4820_v57 = vadd.f32 %v9180_v40, %v4819_v45 }
 0xb05   : > { %v9220_v55 = vadd.f32 %v4820_v57, %v9051_v47 }
 0xb07   : > { %v4879_v29 = vsel %vm250_vm0, %v9220_v55, 0.0  ;;  %v4919_v33 = vmul.f32 %v9220_v55, %v9220_v55 }
 0xb08   : > { %4880 = vadd.xlane.f32.xlu1 %v4879_v29 }
 0xb09   : > { %v4943_v32 = vsel %vm250_vm0, %v4919_v33, 0.0 }
 0xb0a   : > { %v4821_v4 = vpop.f32.mrf.mxu2  ;;  %4944 = vadd.xlane.f32.xlu0 %v4943_v32 }
 0xb0b   : > { %v4822_v59 = vadd.f32 %v9180_v40, %v4821_v4 }
 0xb0d   : > { %v9229_v61 = vadd.f32 %v4822_v59, %v9054_v16 }
 0xb0f   : > { %v4882_v47 = vsel %vm250_vm0, %v9229_v61, 0.0  ;;  %v4920_v27 = vmul.f32 %v9229_v61, %v9229_v61 }
 0xb10   : > { %4883 = vadd.xlane.f32.xlu2 %v4882_v47 }
 0xb11   : > { %v4946_v30 = vsel %vm250_vm0, %v4920_v27, 0.0 }
 0xb12   : > { %4947 = vadd.xlane.f32.xlu1 %v4946_v30  ;;  %v4824_v20 = vpop.f32.mrf.mxu2 }
 0xb13   : > { %v4825_v8 = vadd.f32 %v9180_v40, %v4824_v20 }
 0xb15   : > { %v9238_v43 = vadd.f32 %v4825_v8, %v9079_v7 }
 0xb17   : > { %v4885_v16 = vsel %vm250_vm0, %v9238_v43, 0.0  ;;  %v4921_v60 = vmul.f32 %v9238_v43, %v9238_v43 }
 0xb18   : > { %4886 = vadd.xlane.f32.xlu2 %v4885_v16 }
 0xb19   : > { %v4949_v21 = vsel %vm250_vm0, %v4921_v60, 0.0 }
 0xb1a   : > { %v4826_v50 = vpop.f32.mrf.mxu2  ;;  %4950 = vadd.xlane.f32.xlu1 %v4949_v21 }
 0xb1b   : > { %v4827_v9 = vadd.f32 %v9180_v40, %v4826_v50 }
 0xb1d   : > { %v9247_v5 = vadd.f32 %v4827_v9, %v9082_v51 }
 0xb1f   : > { %v4888_v7 = vsel %vm250_vm0, %v9247_v5, 0.0  ;;  %v4922_v52 = vmul.f32 %v9247_v5, %v9247_v5 }
 0xb20   : > { %4889 = vadd.xlane.f32.xlu0 %v4888_v7 }
 0xb21   : > { %v4952_v58 = vsel %vm250_vm0, %v4922_v52, 0.0 }
 0xb22   : > { %4953 = vadd.xlane.f32.xlu2 %v4952_v58 }
 0xb23   : > { %v4829_v49 = vpop.f32.mrf.mxu2 }
 0xb24   : > { %v4830_v3 = vadd.f32 %v9180_v40, %v4829_v49 }
 0xb26   : > { %v9256_v25 = vadd.f32 %v4830_v3, %v9107_v13 }
 0xb28   : > { %v4891_v51 = vsel %vm250_vm0, %v9256_v25, 0.0  ;;  %v4923_v39 = vmul.f32 %v9256_v25, %v9256_v25 }
 0xb29   : > { %4892 = vadd.xlane.f32.xlu0 %v4891_v51 }
 0xb2a   : > { %v4955_v15 = vsel %vm250_vm0, %v4923_v39, 0.0  ;;  %v6173_v39 = vld [vmem:[#allocation2 + $0x200] sm:$0xff] }
 0xb2b   : > { %v4831_v18 = vpop.f32.mrf.mxu2  ;;  %4956 = vadd.xlane.f32.xlu2 %v4955_v15  ;;  %5374 = vmatpush.bf16.msrb.mxu0 %v6173_v39 }
 0xb2c   : > { %v4832_v53 = vadd.f32 %v9180_v40, %v4831_v18 }
 0xb2e   : > { %v9265_v54 = vadd.f32 %v4832_v53, %v9110_v42 }
 0xb30   : > { %v4894_v13 = vsel %vm250_vm0, %v9265_v54, 0.0  ;;  %v4924_v44 = vmul.f32 %v9265_v54, %v9265_v54 }
 0xb31   : > { %4895 = vadd.xlane.f32.xlu1 %v4894_v13 }
 0xb32   : > { %v4958_v6 = vsel %vm250_vm0, %v4924_v44, 0.0 }
 0xb33   : > { %4959 = vadd.xlane.f32.xlu0 %v4958_v6  ;;  %v4834_v48 = vpop.f32.mrf.mxu2 }
 0xb34   : > { %v4835_v17 = vadd.f32 %v9180_v40, %v4834_v48 }
 0xb36   : > { %v9274_v24 = vadd.f32 %v4835_v17, %v9136_v41 }
 0xb38   : > { %v4897_v42 = vsel %vm250_vm0, %v9274_v24, 0.0  ;;  %v4925_v62 = vmul.f32 %v9274_v24, %v9274_v24 }
 0xb39   : > { %4898 = vadd.xlane.f32.xlu1 %v4897_v42 }
 0xb3a   : > { %v4961_v37 = vsel %vm250_vm0, %v4925_v62, 0.0 }
 0xb3b   : > { %v4836_v10 = vpop.f32.mrf.mxu2  ;;  %4962 = vadd.xlane.f32.xlu0 %v4961_v37 }
 0xb3c   : > { %v4837_v12 = vadd.f32 %v9180_v40, %v4836_v10 }
 0xb3e   : > { %v9283_v28 = vadd.f32 %v4837_v12, %v9133_v14 }
 0xb40   : > { %v4900_v41 = vsel %vm250_vm0, %v9283_v28, 0.0  ;;  %v4926_v11 = vmul.f32 %v9283_v28, %v9283_v28 }
 0xb41   : > { %4901 = vadd.xlane.f32.xlu2 %v4900_v41 }
 0xb42   : > { %v4964_v63 = vsel %vm250_vm0, %v4926_v11, 0.0 }
 0xb43   : > { %4965 = vadd.xlane.f32.xlu1 %v4964_v63 }
 0xb46   : > { %v4839_v19 = vpop.f32.mrf.mxu2 }
 0xb47   : > { %v4840_v22 = vadd.f32 %v9180_v40, %v4839_v19 }
 0xb49   : > { %v9292_v56 = vadd.f32 %v4840_v22, %v9151_v23 }
 0xb4b   : > { %v4903_v14 = vsel %vm250_vm0, %v9292_v56, 0.0  ;;  %v4927_v34 = vmul.f32 %v9292_v56, %v9292_v56 }
 0xb4c   : > { %4904 = vadd.xlane.f32.xlu2 %v4903_v14 }
 0xb4d   : > { %v4967_v45 = vsel %vm250_vm0, %v4927_v34, 0.0 }
 0xb4e   : > { %v4841_v57 = vpop.f32.mrf.mxu2  ;;  %4968 = vadd.xlane.f32.xlu1 %v4967_v45 }
 0xb4f   : > { %v4842_v29 = vadd.f32 %v9180_v40, %v4841_v57 }
 0xb51   : > { %v9301_v33 = vadd.f32 %v4842_v29, %v9154_v35 }
 0xb53   : > { %v4906_v23 = vsel %vm250_vm0, %v9301_v33, 0.0  ;;  %v4928_v32 = vmul.f32 %v9301_v33, %v9301_v33 }
 0xb54   : > { %4907 = vadd.xlane.f32.xlu0 %v4906_v23 }
 0xb55   : > { %v4970_v4 = vsel %vm250_vm0, %v4928_v32, 0.0 }
 0xb56   : > { %4971 = vadd.xlane.f32.xlu2 %v4970_v4  ;;  %v4844_v59 = vpop.f32.mrf.mxu2 }
 0xb57   : > { %v4845_v26 = vadd.f32 %v9180_v40, %v4844_v59 }
 0xb59   : > { %v9310_v47 = vadd.f32 %v4845_v26, %v9166_v2 }
 0xb5b   : > { %v4909_v35 = vsel %vm250_vm0, %v9310_v47, 0.0  ;;  %v4929_v27 = vmul.f32 %v9310_v47, %v9310_v47  ;;  %v4869_v20 = vpop.xlane.xlu2 %4868 }
 0xb5c   : > { %4910 = vadd.xlane.f32.xlu0 %v4909_v35  ;;  %v9317_v16 = vmul.f32 0.015625, %v4869_v20 }
 0xb5d   : > { %v4973_v30 = vsel %vm250_vm0, %v4929_v27, 0.0  ;;  %v4933_v21 = vpop.xlane.xlu1 %4932 }
 0xb5e   : > { %v4846_v8 = vpop.f32.mrf.mxu2  ;;  %4974 = vadd.xlane.f32.xlu2 %v4973_v30  ;;  %v5011_v2 = vmul.f32 %v9317_v16, %v9317_v16  ;;  %v4995_v50 = vmul.f32 0.015625, %v4933_v21 }
 0xb5f   : > { %v4847_v60 = vadd.f32 %v9180_v40, %v4846_v8 }
 0xb60   : > { %v5027_v7 = vsub.f32 %v4995_v50, %v5011_v2 }
 0xb61   : > { %v9323_v9 = vadd.f32 %v4847_v60, %v9169_v1  ;;  %v5059_v60 = vsub.f32 %v9184_v38, %v9317_v16 }
 0xb62   : > { %v5043_v49 = vmax.f32 %v5027_v7, 0.0 }
 0xb63   : > { %v4912_v52 = vsel %vm250_vm0, %v9323_v9, 0.0  ;;  %v4930_v58 = vmul.f32 %v9323_v9, %v9323_v9  ;;  %v4872_v40 = vpop.xlane.xlu0 %4871 }
 0xb64   : > { %4913 = vadd.xlane.f32.xlu1 %v4912_v52  ;;  %v5075_v36 = vadd.f32 1e-05, %v5043_v49  ;;  %v9330_v51 = vmul.f32 0.015625, %v4872_v40 }
 0xb65   : > { %v4976_v3 = vsel %vm250_vm0, %v4930_v58, 0.0  ;;  %v4936_v15 = vpop.xlane.xlu2 %4935  ;;  %v9349_v58 = vld [vmem:[%s9551_s2 + $0x1b] ss:$0 sm:$0xff] }
 0xb66   : > { %4977 = vadd.xlane.f32.xlu0 %v4976_v3  ;;  %6468 = vrsqrt.f32 %v5075_v36  ;;  %v5012_v1 = vmul.f32 %v9330_v51, %v9330_v51  ;;  %v4996_v18 = vmul.f32 0.015625, %v4936_v15  ;;  %vm5097_vm8 = vweird.f32 %v5075_v36 }
 0xb67   : > { %v5060_v38 = vsub.f32 %v9193_v31, %v9330_v51 }
 0xb68   : > { %v5028_v53 = vsub.f32 %v4996_v18, %v5012_v1 }
 0xb6a   : > { %v5044_v13 = vmax.f32 %v5028_v53, 0.0  ;;  %v9358_v53 = vld [vmem:[%s9551_s2 + $0x1c] ss:$0 sm:$0xff] }
 0xb6b   : > { %v4875_v44 = vpop.xlane.xlu0 %4874 }
 0xb6c   : > { %v6469_v6 = vpop.eup %6468  ;;  %v9334_v48 = vmul.f32 0.015625, %v4875_v44  ;;  %v5076_v42 = vadd.f32 1e-05, %v5044_v13 }
 0xb6d   : > { %v5092_v17 = vmul.f32 %v6469_v6, %v5075_v36  ;;  %v4939_v62 = vpop.xlane.xlu2 %4938  ;;  %vm5098_vm7 = vweird.f32 %v6469_v6 }
 0xb6e   : > { %v5013_v37 = vmul.f32 %v9334_v48, %v9334_v48  ;;  %v4997_v10 = vmul.f32 0.015625, %v4939_v62  ;;  %6470 = vrsqrt.f32 %v5076_v42  ;;  %vm5099_vm9 = vmor %vm5097_vm8, %vm5098_vm7  ;;  %vm5107_vm11 = vweird.f32 %v5076_v42 }
 0xb6f   : > { %v5093_v12 = vmul.f32 %v6469_v6, %v5092_v17 }
 0xb70   : > { %v5029_v41 = vsub.f32 %v4997_v10, %v5013_v37 }
 0xb71   : > { %v5094_v11 = vmul.f32 0.5, %v5093_v12 }
 0xb72   : > { %v5045_v63 = vmax.f32 %v5029_v41, 0.0 }
 0xb73   : > { %v5095_v19 = vsub.f32 1.5, %v5094_v11  ;;  %v4878_v22 = vpop.xlane.xlu1 %4877 }
 0xb74   : > { %v5077_v14 = vadd.f32 1e-05, %v5045_v63  ;;  %v9338_v34 = vmul.f32 0.015625, %v4878_v22  ;;  %v6471_v45 = vpop.eup %6470 }
 0xb75   : > { %v4942_v57 = vpop.xlane.xlu0 %4941  ;;  %v5102_v29 = vmul.f32 %v6471_v45, %v5076_v42  ;;  %v5096_v23 = vmul.f32 %v6469_v6, %v5095_v19  ;;  %vm5108_vm10 = vweird.f32 %v6471_v45 }
 0xb76   : > { %6472 = vrsqrt.f32 %v5077_v14  ;;  %v5014_v32 = vmul.f32 %v9338_v34, %v9338_v34  ;;  %v4998_v4 = vmul.f32 0.015625, %v4942_v57  ;;  %vm5109_vm12 = vmor %vm5107_vm11, %vm5108_vm10  ;;  %vm5117_vm14 = vweird.f32 %v5077_v14 }
 0xb77   : > { %v5103_v59 = vmul.f32 %v6471_v45, %v5102_v29  ;;  %v5100_v27 = vsel %vm5099_vm9, %v6469_v6, %v5096_v23 }
 0xb78   : > { %v5030_v26 = vsub.f32 %v4998_v4, %v5014_v32  ;;  %v5251_v49 = vmul.f32 %v5100_v27, %v5059_v60 }
 0xb79   : > { %v5104_v35 = vmul.f32 0.5, %v5103_v59 }
 0xb7a   : > { %v5046_v30 = vmax.f32 %v5030_v26, 0.0  ;;  %v5268_v13 = vmul.f32 %v9349_v58, %v5251_v49  ;;  %v5061_v26 = vsub.f32 %v9202_v46, %v9334_v48 }
 0xb7b   : > { %v4881_v20 = vpop.xlane.xlu1 %4880  ;;  %v5105_v21 = vsub.f32 1.5, %v5104_v35 }
 0xb7c   : > { %v6473_v8 = vpop.eup %6472  ;;  %v9344_v2 = vmul.f32 0.015625, %v4881_v20  ;;  %v5078_v7 = vadd.f32 1e-05, %v5046_v30  ;;  %v5285_v12 = vadd.f32 %v9358_v53, %v5268_v13 }
 0xb7d   : > { %v5112_v50 = vmul.f32 %v6473_v8, %v5077_v14  ;;  %v4945_v52 = vpop.xlane.xlu0 %4944  ;;  %v5106_v3 = vmul.f32 %v6471_v45, %v5105_v21  ;;  %vm5118_vm13 = vweird.f32 %v6473_v8 }
 0xb7e   : > { %v5015_v40 = vmul.f32 %v9344_v2, %v9344_v2  ;;  %v4999_v36 = vmul.f32 0.015625, %v4945_v52  ;;  %6474 = vrsqrt.f32 %v5078_v7  ;;  %vm5119_vm15 = vmor %vm5117_vm14, %vm5118_vm13  ;;  %vm5127_vm2 = vweird.f32 %v5078_v7 }
 0xb7f   : > { %v5113_v16 = vmul.f32 %v6473_v8, %v5112_v50  ;;  %v5110_v39 = vsel %vm5109_vm12, %v6471_v45, %v5106_v3  ;;  %v5062_v52 = vsub.f32 %v9211_v0, %v9338_v34 }
 0xb80   : > { %v5031_v15 = vsub.f32 %v4999_v36, %v5015_v40  ;;  %v5252_v1 = vmul.f32 %v5110_v39, %v5060_v38  ;;  %v6178_v40 = vld [vmem:[#allocation2 + $0x228] sm:$0xff] }
 0xb81   : > { %v5114_v18 = vmul.f32 0.5, %v5113_v16  ;;  %5489 = vmatpush.bf16.msrb.mxu1 %v6178_v40 }
 0xb82   : > { %v5047_v44 = vmax.f32 %v5031_v15, 0.0  ;;  %v5269_v6 = vmul.f32 %v9349_v58, %v5252_v1 }
 0xb83   : > { %v5115_v17 = vsub.f32 1.5, %v5114_v18  ;;  %v4884_v42 = vpop.xlane.xlu2 %4883 }
 0xb84   : > { %v9362_v31 = vadd.f32 1e-05, %v5047_v44  ;;  %v9364_v51 = vmul.f32 0.015625, %v4884_v42  ;;  %v6475_v62 = vpop.eup %6474  ;;  %v5286_v37 = vadd.f32 %v9358_v53, %v5269_v6 }
 0xb85   : > { %v4948_v10 = vpop.xlane.xlu1 %4947  ;;  %v5122_v41 = vmul.f32 %v6475_v62, %v5078_v7  ;;  %v5116_v11 = vmul.f32 %v6473_v8, %v5115_v17  ;;  %vm5128_vm1 = vweird.f32 %v6475_v62 }
 0xb86   : > { %6476 = vrsqrt.f32 %v9362_v31  ;;  %v5016_v63 = vmul.f32 %v9364_v51, %v9364_v51  ;;  %v5000_v19 = vmul.f32 0.015625, %v4948_v10  ;;  %v5309_v45 = vpack.c.bf16 %v5286_v37, %v5285_v12  ;;  %vm5129_vm3 = vmor %vm5127_vm2, %vm5128_vm1 }
 0xb87   : > { %v5123_v22 = vmul.f32 %v6475_v62, %v5122_v41  ;;  %v5120_v23 = vsel %vm5119_vm15, %v6473_v8, %v5116_v11  ;;  %vm5137_vm5 = vweird.f32 %v9362_v31 }
 0xb88   : > { %v5032_v57 = vsub.f32 %v5000_v19, %v5016_v63  ;;  %6071 = vmatmul.msk.bf16.vlgmr.msrb.gmra.mxu0 %vm250_vm0, %v5309_v45  ;;  %v5253_v60 = vmul.f32 %v5120_v23, %v5061_v26  ;;  %v5063_v45 = vsub.f32 %v9220_v55, %v9344_v2 }
 0xb89   : > { %v5124_v29 = vmul.f32 0.5, %v5123_v22 }
 0xb8a   : > { %v5048_v32 = vmax.f32 %v5032_v57, 0.0  ;;  %v5270_v38 = vmul.f32 %v9349_v58, %v5253_v60 }
 0xb8b   : > { %v4887_v4 = vpop.xlane.xlu2 %4886  ;;  %v5125_v35 = vsub.f32 1.5, %v5124_v29 }
 0xb8c   : > { %v6477_v59 = vpop.eup %6476  ;;  %v9374_v27 = vmul.f32 0.015625, %v4887_v4  ;;  %v5080_v14 = vadd.f32 1e-05, %v5048_v32  ;;  %v5287_v6 = vadd.f32 %v9358_v53, %v5270_v38 }
 0xb8d   : > { %v5132_v30 = vmul.f32 %v6477_v59, %v9362_v31  ;;  %v4951_v20 = vpop.xlane.xlu1 %4950  ;;  %v5126_v21 = vmul.f32 %v6475_v62, %v5125_v35  ;;  %vm5138_vm4 = vweird.f32 %v6477_v59 }
 0xb8e   : > { %v5017_v8 = vmul.f32 %v9374_v27, %v9374_v27  ;;  %v5001_v50 = vmul.f32 0.015625, %v4951_v20  ;;  %6478 = vrsqrt.f32 %v5080_v14  ;;  %vm5139_vm6 = vmor %vm5137_vm5, %vm5138_vm4  ;;  %vm5147_vm8 = vweird.f32 %v5080_v14 }
 0xb8f   : > { %v5133_v46 = vmul.f32 %v6477_v59, %v5132_v30  ;;  %v5130_v48 = vsel %vm5129_vm3, %v6475_v62, %v5126_v21  ;;  %v5064_v30 = vsub.f32 %v9229_v61, %v9364_v51 }
 0xb90   : > { %v5033_v49 = vsub.f32 %v5001_v50, %v5017_v8  ;;  %v5254_v3 = vmul.f32 %v5130_v48, %v5062_v52 }
 0xb91   : > { %v5134_v7 = vmul.f32 0.5, %v5133_v46 }
 0xb92   : > { %v5049_v36 = vmax.f32 %v5033_v49, 0.0  ;;  %v5271_v15 = vmul.f32 %v9349_v58, %v5254_v3 }
 0xb93   : > { %v5135_v16 = vsub.f32 1.5, %v5134_v7  ;;  %v4890_v39 = vpop.xlane.xlu0 %4889 }
 0xb94   : > { %v9383_v1 = vadd.f32 1e-05, %v5049_v36  ;;  %v9385_v18 = vmul.f32 0.015625, %v4890_v39  ;;  %v6479_v0 = vpop.eup %6478  ;;  %v5288_v13 = vadd.f32 %v9358_v53, %v5271_v15 }
 0xb95   : > { %v4954_v34 = vpop.xlane.xlu2 %4953  ;;  %v5142_v44 = vmul.f32 %v6479_v0, %v5080_v14  ;;  %v5136_v17 = vmul.f32 %v6477_v59, %v5135_v16  ;;  %vm5148_vm7 = vweird.f32 %v6479_v0 }
 0xb96   : > { %6480 = vrsqrt.f32 %v9383_v1  ;;  %v5018_v42 = vmul.f32 %v9385_v18, %v9385_v18  ;;  %v5002_v62 = vmul.f32 0.015625, %v4954_v34  ;;  %v5310_v10 = vpack.c.bf16 %v5288_v13, %v5287_v6  ;;  %vm5149_vm9 = vmor %vm5147_vm8, %vm5148_vm7 }
 0xb97   : > { %v5143_v37 = vmul.f32 %v6479_v0, %v5142_v44  ;;  %v5140_v11 = vsel %vm5139_vm6, %v6477_v59, %v5136_v17  ;;  %vm5157_vm11 = vweird.f32 %v9383_v1 }
 0xb98   : > { %v5034_v12 = vsub.f32 %v5002_v62, %v5018_v42  ;;  %6072 = vmatmul.msk.bf16.gmra.mxu0 %vm250_vm0, %v5310_v10  ;;  %v5255_v4 = vmul.f32 %v5140_v11, %v5063_v45  ;;  %v5065_v62 = vsub.f32 %v9238_v43, %v9374_v27 }
 0xb99   : > { %v5144_v41 = vmul.f32 0.5, %v5143_v37 }
 0xb9a   : > { %v5050_v63 = vmax.f32 %v5034_v12, 0.0  ;;  %v5272_v8 = vmul.f32 %v9349_v58, %v5255_v4 }
 0xb9b   : > { %v5145_v57 = vsub.f32 1.5, %v5144_v41 }
 0xb9c   : > { %v4893_v19 = vpop.xlane.xlu0 %4892  ;;  %v6481_v22 = vpop.eup %6480  ;;  %v5082_v31 = vadd.f32 1e-05, %v5050_v63  ;;  %v5289_v40 = vadd.f32 %v9358_v53, %v5272_v8 }
 0xb9d   : > { %v9396_v29 = vmul.f32 0.015625, %v4893_v19  ;;  %v5152_v23 = vmul.f32 %v6481_v22, %v9383_v1  ;;  %v5146_v26 = vmul.f32 %v6479_v0, %v5145_v57  ;;  %vm5158_vm10 = vweird.f32 %v6481_v22 }
 0xb9e   : > { %v4957_v32 = vpop.xlane.xlu2 %4956  ;;  %6482 = vrsqrt.f32 %v5082_v31  ;;  %vm5159_vm12 = vmor %vm5157_vm11, %vm5158_vm10  ;;  %v5066_v1 = vsub.f32 %v9247_v5, %v9385_v18  ;;  %vm5167_vm14 = vweird.f32 %v5082_v31 }
 0xb9f   : > { %v5019_v59 = vmul.f32 %v9396_v29, %v9396_v29  ;;  %v5003_v35 = vmul.f32 0.015625, %v4957_v32  ;;  %v5153_v55 = vmul.f32 %v6481_v22, %v5152_v23  ;;  %v5150_v2 = vsel %vm5149_vm9, %v6479_v0, %v5146_v26 }
 0xba0   : > { %v5256_v60 = vmul.f32 %v5150_v2, %v5064_v30 }
 0xba1   : > { %v5035_v20 = vsub.f32 %v5003_v35, %v5019_v59  ;;  %v5154_v14 = vmul.f32 0.5, %v5153_v55 }
 0xba2   : > { %v5273_v52 = vmul.f32 %v9349_v58, %v5256_v60 }
 0xba3   : > { %v5051_v21 = vmax.f32 %v5035_v20, 0.0  ;;  %v5155_v46 = vsub.f32 1.5, %v5154_v14 }
 0xba4   : > { %v4896_v50 = vpop.xlane.xlu1 %4895  ;;  %v6483_v3 = vpop.eup %6482  ;;  %v5290_v61 = vadd.f32 %v9358_v53, %v5273_v52 }
 0xba5   : > { %v5083_v48 = vadd.f32 1e-05, %v5051_v21  ;;  %v9405_v49 = vmul.f32 0.015625, %v4896_v50  ;;  %v5162_v51 = vmul.f32 %v6483_v3, %v5082_v31  ;;  %v5156_v16 = vmul.f32 %v6481_v22, %v5155_v46 }
 0xba6   : > { %v4960_v7 = vpop.xlane.xlu0 %4959  ;;  %v5311_v15 = vpack.c.bf16 %v5290_v61, %v5289_v40  ;;  %vm5168_vm13 = vweird.f32 %v6483_v3 }
 0xba7   : > { %6484 = vrsqrt.f32 %v5083_v48  ;;  %v5020_v36 = vmul.f32 %v9405_v49, %v9405_v49  ;;  %v5004_v38 = vmul.f32 0.015625, %v4960_v7  ;;  %v5163_v39 = vmul.f32 %v6483_v3, %v5162_v51  ;;  %vm5169_vm15 = vmor %vm5167_vm14, %vm5168_vm13 }
 0xba8   : > { %6073 = vmatmul.msk.bf16.gmra.mxu0 %vm250_vm0, %v5311_v15  ;;  %v5160_v6 = vsel %vm5159_vm12, %v6481_v22, %v5156_v16  ;;  %vm5177_vm2 = vweird.f32 %v5083_v48  ;;  %v5067_v7 = vsub.f32 %v9256_v25, %v9396_v29 }
 0xba9   : > { %v5036_v0 = vsub.f32 %v5004_v38, %v5020_v36  ;;  %v5164_v34 = vmul.f32 0.5, %v5163_v39  ;;  %v5257_v63 = vmul.f32 %v5160_v6, %v5065_v62 }
 0xbab   : > { %v5052_v13 = vmax.f32 %v5036_v0, 0.0  ;;  %v5165_v17 = vsub.f32 1.5, %v5164_v34  ;;  %v5274_v4 = vmul.f32 %v9349_v58, %v5257_v63  ;;  %v5068_v0 = vsub.f32 %v9265_v54, %v9405_v49 }
 0xbac   : > { %v4899_v42 = vpop.xlane.xlu1 %4898 }
 0xbad   : > { %v6485_v44 = vpop.eup %6484  ;;  %v5084_v10 = vadd.f32 1e-05, %v5052_v13  ;;  %v9415_v12 = vmul.f32 0.015625, %v4899_v42  ;;  %v5166_v41 = vmul.f32 %v6483_v3, %v5165_v17  ;;  %v5291_v21 = vadd.f32 %v9358_v53, %v5274_v4 }
 0xbae   : > { %v5172_v37 = vmul.f32 %v6485_v44, %v5083_v48  ;;  %v4963_v11 = vpop.xlane.xlu0 %4962  ;;  %vm5178_vm1 = vweird.f32 %v6485_v44 }
 0xbaf   : > { %6486 = vrsqrt.f32 %v5084_v10  ;;  %v5021_v22 = vmul.f32 %v9415_v12, %v9415_v12  ;;  %v5170_v45 = vsel %vm5169_vm15, %v6483_v3, %v5166_v41  ;;  %v5005_v57 = vmul.f32 0.015625, %v4963_v11  ;;  %vm5179_vm3 = vmor %vm5177_vm2, %vm5178_vm1 }
 0xbb0   : > { %v5173_v19 = vmul.f32 %v6485_v44, %v5172_v37  ;;  %v5258_v43 = vmul.f32 %v5170_v45, %v5066_v1  ;;  %vm5187_vm5 = vweird.f32 %v5084_v10 }
 0xbb1   : > { %v5037_v23 = vsub.f32 %v5005_v57, %v5021_v22 }
 0xbb2   : > { %v5174_v27 = vmul.f32 0.5, %v5173_v19  ;;  %v5275_v5 = vmul.f32 %v9349_v58, %v5258_v43 }
 0xbb3   : > { %v5053_v18 = vmax.f32 %v5037_v23, 0.0 }
 0xbb4   : > { %v5175_v32 = vsub.f32 1.5, %v5174_v27  ;;  %v4902_v31 = vpop.xlane.xlu2 %4901  ;;  %v5292_v35 = vadd.f32 %v9358_v53, %v5275_v5 }
 0xbb5   : > { %v6487_v26 = vpop.eup %6486  ;;  %v9423_v59 = vmul.f32 0.015625, %v4902_v31  ;;  %v5085_v2 = vadd.f32 1e-05, %v5053_v18  ;;  %v6177_v18 = vld [vmem:[#allocation2 + $0x220] sm:$0xff] }
 0xbb6   : > { %v5176_v30 = vmul.f32 %v6485_v44, %v5175_v32  ;;  %v5182_v55 = vmul.f32 %v6487_v26, %v5084_v10  ;;  %v4966_v20 = vpop.xlane.xlu1 %4965  ;;  %v5312_v52 = vpack.c.bf16 %v5292_v35, %v5291_v21  ;;  %vm5188_vm4 = vweird.f32 %v6487_v26  ;;  %5490 = vmatpush.bf16.msrb.mxu1 %v6177_v18 }
 0xbb7   : > { %v5022_v60 = vmul.f32 %v9423_v59, %v9423_v59  ;;  %v5006_v14 = vmul.f32 0.015625, %v4966_v20  ;;  %6488 = vrsqrt.f32 %v5085_v2  ;;  %vm5189_vm6 = vmor %vm5187_vm5, %vm5188_vm4  ;;  %vm5197_vm8 = vweird.f32 %v5085_v2 }
 0xbb8   : > { %v5183_v8 = vmul.f32 %v6487_v26, %v5182_v55  ;;  %v5180_v46 = vsel %vm5179_vm3, %v6485_v44, %v5176_v30  ;;  %6074 = vmatmul.msk.bf16.gmra.mxu0 %vm250_vm0, %v5312_v52 }
 0xbb9   : > { %v5038_v50 = vsub.f32 %v5006_v14, %v5022_v60  ;;  %v5259_v36 = vmul.f32 %v5180_v46, %v5067_v7 }
 0xbba   : > { %v5184_v3 = vmul.f32 0.5, %v5183_v8 }
 0xbbb   : > { %v5054_v61 = vmax.f32 %v5038_v50, 0.0  ;;  %v5276_v17 = vmul.f32 %v9349_v58, %v5259_v36  ;;  %v5070_v50 = vsub.f32 %v9283_v28, %v9423_v59 }
 0xbbc   : > { %v5185_v51 = vsub.f32 1.5, %v5184_v3 }
 0xbbd   : > { %v5086_v38 = vadd.f32 1e-05, %v5054_v61  ;;  %v6489_v48 = vpop.eup %6488  ;;  %v5293_v11 = vadd.f32 %v9358_v53, %v5276_v17 }
 0xbbe   : > { %v5186_v39 = vmul.f32 %v6487_v26, %v5185_v51  ;;  %v5192_v34 = vmul.f32 %v6489_v48, %v5085_v2  ;;  %vm5198_vm7 = vweird.f32 %v6489_v48 }
 0xbbf   : > { %v4905_v40 = vpop.xlane.xlu2 %4904  ;;  %6490 = vrsqrt.f32 %v5086_v38  ;;  %vm5199_vm9 = vmor %vm5197_vm8, %vm5198_vm7  ;;  %vm5207_vm11 = vweird.f32 %v5086_v38 }
 0xbc0   : > { %v9432_v16 = vmul.f32 0.015625, %v4905_v40  ;;  %v5190_v25 = vsel %vm5189_vm6, %v6487_v26, %v5186_v39  ;;  %v5193_v6 = vmul.f32 %v6489_v48, %v5192_v34  ;;  %v5069_v26 = vsub.f32 %v9274_v24, %v9415_v12 }
 0xbc1   : > { %v4969_v15 = vpop.xlane.xlu1 %4968  ;;  %v5260_v44 = vmul.f32 %v5190_v25, %v5068_v0 }
 0xbc2   : > { %v5023_v29 = vmul.f32 %v9432_v16, %v9432_v16  ;;  %v5007_v13 = vmul.f32 0.015625, %v4969_v15  ;;  %v5194_v62 = vmul.f32 0.5, %v5193_v6 }
 0xbc3   : > { %v5277_v37 = vmul.f32 %v9349_v58, %v5260_v44 }
 0xbc4   : > { %v5039_v42 = vsub.f32 %v5007_v13, %v5023_v29  ;;  %v5195_v54 = vsub.f32 1.5, %v5194_v62 }
 0xbc5   : > { %v6491_v41 = vpop.eup %6490  ;;  %v5294_v63 = vadd.f32 %v9358_v53, %v5277_v37 }
 0xbc6   : > { %v5055_v10 = vmax.f32 %v5039_v42, 0.0  ;;  %v5202_v19 = vmul.f32 %v6491_v41, %v5086_v38  ;;  %v5196_v57 = vmul.f32 %v6489_v48, %v5195_v54  ;;  %vm5208_vm10 = vweird.f32 %v6491_v41 }
 0xbc7   : > { %v4908_v1 = vpop.xlane.xlu0 %4907  ;;  %v5313_v27 = vpack.c.bf16 %v5294_v63, %v5293_v11  ;;  %vm5209_vm12 = vmor %vm5207_vm11, %vm5208_vm10  ;;  %vm5458_vm10 = vcmask 261120  }
 0xbc8   : > { %v9440_v49 = vmul.f32 0.015625, %v4908_v1  ;;  %v5087_v22 = vadd.f32 1e-05, %v5055_v10  ;;  %v5203_v23 = vmul.f32 %v6491_v41, %v5202_v19  ;;  %v5200_v31 = vsel %vm5199_vm9, %v6489_v48, %v5196_v57 }
 0xbc9   : > { %v4972_v45 = vpop.xlane.xlu2 %4971  ;;  %6075 = vmatmul.msk.bf16.gmra.mxu0 %vm250_vm0, %v5313_v27  ;;  %v5261_v14 = vmul.f32 %v5200_v31, %v5069_v26  ;;  %v5071_v1 = vsub.f32 %v9292_v56, %v9432_v16 }
 0xbca   : > { %v5024_v43 = vmul.f32 %v9440_v49, %v9440_v49  ;;  %6492 = vrsqrt.f32 %v5087_v22  ;;  %v5008_v32 = vmul.f32 0.015625, %v4972_v45  ;;  %v5204_v4 = vmul.f32 0.5, %v5203_v23 }
 0xbcb   : > { %v5278_v51 = vmul.f32 %v9349_v58, %v5261_v14  ;;  %vm5217_vm14 = vweird.f32 %v5087_v22  ;;  %v5072_v57 = vsub.f32 %v9301_v33, %v9440_v49 }
 0xbcc   : > { %v5040_v5 = vsub.f32 %v5008_v32, %v5024_v43  ;;  %v5205_v35 = vsub.f32 1.5, %v5204_v4 }
 0xbcd   : > { %v5295_v34 = vadd.f32 %v9358_v53, %v5278_v51 }
 0xbce   : > { %v5056_v30 = vmax.f32 %v5040_v5, 0.0  ;;  %v5206_v2 = vmul.f32 %v6491_v41, %v5205_v35 }
 0xbcf   : > { %v4911_v55 = vpop.xlane.xlu0 %4910 }
 0xbd0   : > { %v9449_v20 = vmul.f32 0.015625, %v4911_v55  ;;  %v6493_v60 = vpop.eup %6492  ;;  %v5088_v21 = vadd.f32 1e-05, %v5056_v30  ;;  %v5210_v12 = vsel %vm5209_vm12, %v6491_v41, %v5206_v2 }
 0xbd1   : > { %v4975_v8 = vpop.xlane.xlu2 %4974  ;;  %v5212_v52 = vmul.f32 %v6493_v60, %v5087_v22  ;;  %v5262_v3 = vmul.f32 %v5210_v12, %v5070_v50  ;;  %vm5218_vm13 = vweird.f32 %v6493_v60 }
 0xbd2   : > { %v5025_v24 = vmul.f32 %v9449_v20, %v9449_v20  ;;  %6494 = vrsqrt.f32 %v5088_v21  ;;  %v5009_v46 = vmul.f32 0.015625, %v4975_v8  ;;  %vm5219_vm15 = vmor %vm5217_vm14, %vm5218_vm13  ;;  %vm5227_vm2 = vweird.f32 %v5088_v21 }
 0xbd3   : > { %v5213_v7 = vmul.f32 %v6493_v60, %v5212_v52  ;;  %v5279_v36 = vmul.f32 %v9349_v58, %v5262_v3 }
 0xbd4   : > { %v5041_v61 = vsub.f32 %v5009_v46, %v5025_v24 }
 0xbd5   : > { %v5214_v40 = vmul.f32 0.5, %v5213_v7  ;;  %v5296_v59 = vadd.f32 %v9358_v53, %v5279_v36 }
 0xbd6   : > { %v5057_v38 = vmax.f32 %v5041_v61, 0.0 }
 0xbd7   : > { %v4914_v48 = vpop.xlane.xlu1 %4913  ;;  %v5215_v39 = vsub.f32 1.5, %v5214_v40  ;;  %v5314_v6 = vpack.c.bf16 %v5296_v59, %v5295_v34 }
 0xbd8   : > { %v9457_v28 = vmul.f32 0.015625, %v4914_v48  ;;  %v6495_v15 = vpop.eup %6494  ;;  %v5089_v0 = vadd.f32 1e-05, %v5057_v38 }
 0xbd9   : > { %v4978_v25 = vpop.xlane.xlu0 %4977  ;;  %v5216_v29 = vmul.f32 %v6493_v60, %v5215_v39  ;;  %v5222_v13 = vmul.f32 %v6495_v15, %v5088_v21  ;;  %6076 = vmatmul.msk.bf16.gmra.mxu0 %vm250_vm0, %v5314_v6  ;;  %vm5228_vm1 = vweird.f32 %v6495_v15 }
 0xbda   : > { %v5026_v44 = vmul.f32 %v9457_v28, %v9457_v28  ;;  %6496 = vrsqrt.f32 %v5089_v0  ;;  %v5010_v42 = vmul.f32 0.015625, %v4978_v25  ;;  %vm5229_vm3 = vmor %vm5227_vm2, %vm5228_vm1  ;;  %vm5237_vm5 = vweird.f32 %v5089_v0 }
 0xbdb   : > { %v5223_v17 = vmul.f32 %v6495_v15, %v5222_v13  ;;  %v5220_v62 = vsel %vm5219_vm15, %v6493_v60, %v5216_v29  ;;  %v5073_v60 = vsub.f32 %v9310_v47, %v9449_v20  ;;  %v5074_v8 = vsub.f32 %v9323_v9, %v9457_v28  ;;  %v6179_v20 = vld [vmem:[#allocation2 + $0x230] sm:$0xff]  ;;  %v6241_v9 = vld [vmem:[%s9551_s2 + $0x20] ss:$0 sm:$0xff] }
 0xbdc   : > { %v5042_v10 = vsub.f32 %v5010_v42, %v5026_v44  ;;  %v5263_v63 = vmul.f32 %v5220_v62, %v5071_v1  ;;  %5598 = vmatpush.bf16.msrb.mxu3 %v6179_v20 }
 0xbdd   : > { %v5224_v37 = vmul.f32 0.5, %v5223_v17 }
 0xbde   : > { %v5058_v54 = vmax.f32 %v5042_v10, 0.0  ;;  %v5280_v32 = vmul.f32 %v9349_v58, %v5263_v63 }
 0xbdf   : > { %v5225_v41 = vsub.f32 1.5, %v5224_v37 }
 0xbe0   : > { %v6497_v11 = vpop.eup %6496  ;;  %v5090_v22 = vadd.f32 1e-05, %v5058_v54  ;;  %v5297_v5 = vadd.f32 %v9358_v53, %v5280_v32 }
 0xbe1   : > { %v5226_v19 = vmul.f32 %v6495_v15, %v5225_v41  ;;  %v5232_v45 = vmul.f32 %v6497_v11, %v5089_v0  ;;  %vm5238_vm4 = vweird.f32 %v6497_v11 }
 0xbe2   : > { %6498 = vrsqrt.f32 %v5090_v22  ;;  %vm5239_vm6 = vmor %vm5237_vm5, %vm5238_vm4  ;;  %vm5247_vm8 = vweird.f32 %v5090_v22 }
 0xbe3   : > { %v5230_v43 = vsel %vm5229_vm3, %v6495_v15, %v5226_v19  ;;  %v5233_v27 = vmul.f32 %v6497_v11, %v5232_v45 }
 0xbe4   : > { %v5264_v23 = vmul.f32 %v5230_v43, %v5072_v57 }
 0xbe5   : > { %v5234_v56 = vmul.f32 0.5, %v5233_v27 }
 0xbe6   : > { %v5281_v16 = vmul.f32 %v9349_v58, %v5264_v23 }
 0xbe7   : > { %v5235_v4 = vsub.f32 1.5, %v5234_v56 }
 0xbe8   : > { %v5298_v18 = vadd.f32 %v9358_v53, %v5281_v16  ;;  %v6499_v31 = vpop.eup %6498 }
 0xbe9   : > { %v5236_v26 = vmul.f32 %v6497_v11, %v5235_v4  ;;  %v5242_v35 = vmul.f32 %v6499_v31, %v5090_v22  ;;  %vm5248_vm7 = vweird.f32 %v6499_v31 }
 0xbea   : > { %v5315_v33 = vpack.c.bf16 %v5298_v18, %v5297_v5  ;;  %vm5249_vm9 = vmor %vm5247_vm8, %vm5248_vm7 }
 0xbeb   : > { %v5243_v49 = vmul.f32 %v6499_v31, %v5242_v35  ;;  %v5240_v30 = vsel %vm5239_vm6, %v6497_v11, %v5236_v26 }
 0xbec   : > { %6077 = vmatmul.msk.bf16.gmra.mxu0 %vm250_vm0, %v5315_v33  ;;  %v5265_v2 = vmul.f32 %v5240_v30, %v5073_v60 }
 0xbed   : > { %v5244_v55 = vmul.f32 0.5, %v5243_v49 }
 0xbee   : > { %v5282_v24 = vmul.f32 %v9349_v58, %v5265_v2 }
 0xbef   : > { %v5245_v14 = vsub.f32 1.5, %v5244_v55 }
 0xbf0   : > { %v5299_v46 = vadd.f32 %v9358_v53, %v5282_v24  ;;  %v6242_v24 = vld [vmem:[%s9551_s2 + $0x21] ss:$0 sm:$0xff] }
 0xbf1   : > { %v5246_v21 = vmul.f32 %v6499_v31, %v5245_v14 }
 0xbf3   : > { %v5250_v50 = vsel %vm5249_vm9, %v6499_v31, %v5246_v21 }
 0xbf4   : > { %v5266_v52 = vmul.f32 %v5250_v50, %v5074_v8 }
 0xbf6   : > { %v5283_v12 = vmul.f32 %v9349_v58, %v5266_v52 }
 0xbf8   : > { %v5300_v3 = vadd.f32 %v9358_v53, %v5283_v12 }
 0xbfa   : > { %v5316_v47 = vpack.c.bf16 %v5300_v3, %v5299_v46 }
 0xbfc   : > { %6078 = vmatmul.msk.bf16.gmra.mxu0 %vm250_vm0, %v5316_v47  ;;  %vm5566_vm0 = vcmask 130048  }
 0xc05   : > { %v5376_v7 = vpop.f32.mrf.mxu0 }
 0xc06   : > { %v5377_v61 = vadd.f32 %v6241_v9, %v5376_v7 }
 0xc08   : > { %v5416_v36 = vmax.f32 %v5377_v61, 0.0 }
 0xc0d   : > { %v5378_v51 = vpop.f32.mrf.mxu0 }
 0xc0e   : > { %v5379_v40 = vadd.f32 %v6241_v9, %v5378_v51 }
 0xc10   : > { %v5417_v38 = vmax.f32 %v5379_v40, 0.0 }
 0xc12   : > { %v5436_v58 = vpack.c.bf16 %v5417_v38, %v5416_v36 }
 0xc14   : > { %6087 = vmatmul.msk.bf16.vlgmr.msrb.gmra.mxu1 %vm5458_vm10, %v5436_v58 }
 0xc15   : > { %v5381_v53 = vpop.f32.mrf.mxu0 }
 0xc16   : > { %v5382_v48 = vadd.f32 %v6241_v9, %v5381_v53 }
 0xc18   : > { %v5418_v59 = vmax.f32 %v5382_v48, 0.0 }
 0xc1d   : > { %v5383_v39 = vpop.f32.mrf.mxu0 }
 0xc1e   : > { %v5384_v28 = vadd.f32 %v6241_v9, %v5383_v39 }
 0xc20   : > { %v5419_v15 = vmax.f32 %v5384_v28, 0.0 }
 0xc22   : > { %v5437_v0 = vpack.c.bf16 %v5419_v15, %v5418_v59 }
 0xc24   : > { %6088 = vmatmul.msk.bf16.gmra.mxu1 %vm5458_vm10, %v5437_v0 }
 0xc25   : > { %v5386_v34 = vpop.f32.mrf.mxu0 }
 0xc26   : > { %v5387_v25 = vadd.f32 %v6241_v9, %v5386_v34 }
 0xc28   : > { %v5420_v44 = vmax.f32 %v5387_v25, 0.0 }
 0xc2d   : > { %v5388_v29 = vpop.f32.mrf.mxu0 }
 0xc2e   : > { %v5389_v13 = vadd.f32 %v6241_v9, %v5388_v29 }
 0xc30   : > { %v5421_v6 = vmax.f32 %v5389_v13, 0.0 }
 0xc32   : > { %v5438_v17 = vpack.c.bf16 %v5421_v6, %v5420_v44 }
 0xc34   : > { %6089 = vmatmul.msk.bf16.gmra.mxu1 %vm5458_vm10, %v5438_v17 }
 0xc35   : > { %v5391_v42 = vpop.f32.mrf.mxu0 }
 0xc36   : > { %v5392_v62 = vadd.f32 %v6241_v9, %v5391_v42 }
 0xc38   : > { %v5422_v1 = vmax.f32 %v5392_v62, 0.0 }
 0xc3d   : > { %v5393_v37 = vpop.f32.mrf.mxu0 }
 0xc3e   : > { %v5394_v10 = vadd.f32 %v6241_v9, %v5393_v37 }
 0xc40   : > { %v5423_v41 = vmax.f32 %v5394_v10, 0.0 }
 0xc42   : > { %v5439_v54 = vpack.c.bf16 %v5423_v41, %v5422_v1 }
 0xc44   : > { %6090 = vmatmul.msk.bf16.gmra.mxu1 %vm5458_vm10, %v5439_v54 }
 0xc46   : > { %v5396_v11 = vpop.f32.mrf.mxu0 }
 0xc47   : > { %v5397_v63 = vadd.f32 %v6241_v9, %v5396_v11 }
 0xc49   : > { %v5424_v22 = vmax.f32 %v5397_v63, 0.0 }
 0xc4e   : > { %v5398_v19 = vpop.f32.mrf.mxu0 }
 0xc4f   : > { %v5399_v45 = vadd.f32 %v6241_v9, %v5398_v19 }
 0xc51   : > { %v5425_v57 = vmax.f32 %v5399_v45, 0.0 }
 0xc53   : > { %v5440_v43 = vpack.c.bf16 %v5425_v57, %v5424_v22 }
 0xc55   : > { %6091 = vmatmul.msk.bf16.gmra.mxu1 %vm5458_vm10, %v5440_v43 }
 0xc56   : > { %v5401_v27 = vpop.f32.mrf.mxu0 }
 0xc57   : > { %v5402_v23 = vadd.f32 %v6241_v9, %v5401_v27 }
 0xc59   : > { %v5426_v16 = vmax.f32 %v5402_v23, 0.0 }
 0xc5e   : > { %v5403_v32 = vpop.f32.mrf.mxu0 }
 0xc5f   : > { %v5404_v56 = vadd.f32 %v6241_v9, %v5403_v32 }
 0xc61   : > { %v5427_v4 = vmax.f32 %v5404_v56, 0.0 }
 0xc63   : > { %v5441_v5 = vpack.c.bf16 %v5427_v4, %v5426_v16 }
 0xc65   : > { %6092 = vmatmul.msk.bf16.gmra.mxu1 %vm5458_vm10, %v5441_v5 }
 0xc69   : > { %v5406_v18 = vpop.f32.mrf.mxu0 }
 0xc6a   : > { %v5407_v31 = vadd.f32 %v6241_v9, %v5406_v18 }
 0xc6c   : > { %v5428_v33 = vmax.f32 %v5407_v31, 0.0 }
 0xc71   : > { %v5408_v26 = vpop.f32.mrf.mxu0 }
 0xc72   : > { %v5409_v35 = vadd.f32 %v6241_v9, %v5408_v26 }
 0xc74   : > { %v5429_v49 = vmax.f32 %v5409_v35, 0.0 }
 0xc76   : > { %v5442_v30 = vpack.c.bf16 %v5429_v49, %v5428_v33 }
 0xc78   : > { %6093 = vmatmul.msk.bf16.gmra.mxu1 %vm5458_vm10, %v5442_v30 }
 0xc79   : > { %v5411_v55 = vpop.f32.mrf.mxu0 }
 0xc7a   : > { %v5412_v60 = vadd.f32 %v6241_v9, %v5411_v55  ;;  %v6243_v55 = vld [vmem:[%s9551_s2 + $0x22] ss:$0 sm:$0xff] }
 0xc7c   : > { %v5430_v21 = vmax.f32 %v5412_v60, 0.0 }
 0xc81   : > { %v5413_v14 = vpop.f32.mrf.mxu0 }
 0xc82   : > { %v5414_v2 = vadd.f32 %v6241_v9, %v5413_v14 }
 0xc84   : > { %v5431_v8 = vmax.f32 %v5414_v2, 0.0 }
 0xc86   : > { %v5443_v50 = vpack.c.bf16 %v5431_v8, %v5430_v21 }
 0xc88   : > { %6094 = vmatmul.msk.bf16.gmra.mxu1 %vm5458_vm10, %v5443_v50 }
 0xc91   : > { %v5492_v52 = vpop.f32.mrf.mxu1 }
 0xc92   : > { %v5493_v12 = vadd.f32 %v6242_v24, %v5492_v52 }
 0xc94   : > { %v5532_v47 = vmax.f32 %v5493_v12, 0.0 }
 0xc99   : > { %v5494_v46 = vpop.f32.mrf.mxu1 }
 0xc9a   : > { %v5495_v3 = vadd.f32 %v6242_v24, %v5494_v46 }
 0xc9c   : > { %v5533_v20 = vmax.f32 %v5495_v3, 0.0 }
 0xc9e   : > { %v5550_v7 = vpack.c.bf16 %v5533_v20, %v5532_v47 }
 0xca0   : > { %6099 = vmatmul.msk.bf16.vlgmr.msrb.gmra.mxu3 %vm5566_vm0, %v5550_v7 }
 0xca1   : > { %v5497_v9 = vpop.f32.mrf.mxu1 }
 0xca2   : > { %v5498_v61 = vadd.f32 %v6242_v24, %v5497_v9 }
 0xca4   : > { %v5534_v36 = vmax.f32 %v5498_v61, 0.0 }
 0xca9   : > { %v5499_v51 = vpop.f32.mrf.mxu1 }
 0xcaa   : > { %v5500_v40 = vadd.f32 %v6242_v24, %v5499_v51 }
 0xcac   : > { %v5535_v38 = vmax.f32 %v5500_v40, 0.0 }
 0xcae   : > { %v5551_v58 = vpack.c.bf16 %v5535_v38, %v5534_v36 }
 0xcb0   : > { %6100 = vmatmul.msk.bf16.gmra.mxu3 %vm5566_vm0, %v5551_v58 }
 0xcb1   : > { %v5502_v53 = vpop.f32.mrf.mxu1 }
 0xcb2   : > { %v5503_v48 = vadd.f32 %v6242_v24, %v5502_v53 }
 0xcb4   : > { %v5536_v59 = vmax.f32 %v5503_v48, 0.0 }
 0xcb9   : > { %v5504_v39 = vpop.f32.mrf.mxu1 }
 0xcba   : > { %v5505_v28 = vadd.f32 %v6242_v24, %v5504_v39 }
 0xcbc   : > { %v5537_v15 = vmax.f32 %v5505_v28, 0.0 }
 0xcbe   : > { %v5552_v0 = vpack.c.bf16 %v5537_v15, %v5536_v59 }
 0xcc0   : > { %6101 = vmatmul.msk.bf16.gmra.mxu3 %vm5566_vm0, %v5552_v0 }
 0xcc1   : > { %v5507_v34 = vpop.f32.mrf.mxu1 }
 0xcc2   : > { %v5508_v25 = vadd.f32 %v6242_v24, %v5507_v34 }
 0xcc4   : > { %v5538_v44 = vmax.f32 %v5508_v25, 0.0 }
 0xcc9   : > { %v5509_v29 = vpop.f32.mrf.mxu1 }
 0xcca   : > { %v5510_v13 = vadd.f32 %v6242_v24, %v5509_v29 }
 0xccc   : > { %v5539_v6 = vmax.f32 %v5510_v13, 0.0 }
 0xcce   : > { %v5553_v17 = vpack.c.bf16 %v5539_v6, %v5538_v44 }
 0xcd0   : > { %6102 = vmatmul.msk.bf16.gmra.mxu3 %vm5566_vm0, %v5553_v17 }
 0xcd2   : > { %v5512_v42 = vpop.f32.mrf.mxu1 }
 0xcd3   : > { %v5513_v62 = vadd.f32 %v6242_v24, %v5512_v42 }
 0xcd5   : > { %v5540_v1 = vmax.f32 %v5513_v62, 0.0 }
 0xcda   : > { %v5514_v37 = vpop.f32.mrf.mxu1 }
 0xcdb   : > { %v5515_v10 = vadd.f32 %v6242_v24, %v5514_v37 }
 0xcdd   : > { %v5541_v41 = vmax.f32 %v5515_v10, 0.0 }
 0xcdf   : > { %v5554_v54 = vpack.c.bf16 %v5541_v41, %v5540_v1 }
 0xce1   : > { %6103 = vmatmul.msk.bf16.gmra.mxu3 %vm5566_vm0, %v5554_v54 }
 0xce2   : > { %v5517_v11 = vpop.f32.mrf.mxu1 }
 0xce3   : > { %v5518_v63 = vadd.f32 %v6242_v24, %v5517_v11 }
 0xce5   : > { %v5542_v22 = vmax.f32 %v5518_v63, 0.0 }
 0xcea   : > { %v5519_v19 = vpop.f32.mrf.mxu1 }
 0xceb   : > { %v5520_v45 = vadd.f32 %v6242_v24, %v5519_v19 }
 0xced   : > { %v5543_v57 = vmax.f32 %v5520_v45, 0.0 }
 0xcef   : > { %v5555_v43 = vpack.c.bf16 %v5543_v57, %v5542_v22 }
 0xcf1   : > { %6104 = vmatmul.msk.bf16.gmra.mxu3 %vm5566_vm0, %v5555_v43 }
 0xcf5   : > { %v5522_v27 = vpop.f32.mrf.mxu1 }
 0xcf6   : > { %v5523_v23 = vadd.f32 %v6242_v24, %v5522_v27 }
 0xcf8   : > { %v5544_v16 = vmax.f32 %v5523_v23, 0.0 }
 0xcfd   : > { %v5524_v32 = vpop.f32.mrf.mxu1 }
 0xcfe   : > { %v5525_v56 = vadd.f32 %v6242_v24, %v5524_v32 }
 0xd00   : > { %v5545_v4 = vmax.f32 %v5525_v56, 0.0 }
 0xd02   : > { %v5556_v5 = vpack.c.bf16 %v5545_v4, %v5544_v16 }
 0xd04   : > { %6105 = vmatmul.msk.bf16.gmra.mxu3 %vm5566_vm0, %v5556_v5 }
 0xd05   : > { %v5527_v18 = vpop.f32.mrf.mxu1 }
 0xd06   : > { %v5528_v31 = vadd.f32 %v6242_v24, %v5527_v18 }
 0xd08   : > { %v5546_v33 = vmax.f32 %v5528_v31, 0.0 }
 0xd0d   : > { %v5529_v26 = vpop.f32.mrf.mxu1 }
 0xd0e   : > { %v5530_v35 = vadd.f32 %v6242_v24, %v5529_v26 }
 0xd10   : > { %v5547_v49 = vmax.f32 %v5530_v35, 0.0 }
 0xd12   : > { %v5557_v30 = vpack.c.bf16 %v5547_v49, %v5546_v33 }
 0xd14   : > { %6106 = vmatmul.msk.bf16.gmra.mxu3 %vm5566_vm0, %v5557_v30 }
 0xd23   : > { %v5600_v60 = vpop.f32.mrf.mxu3 }
 0xd24   : > { %v5601_v14 = vadd.f32 %v6243_v55, %v5600_v60 }
 0xd26   : > { %5640 = vst.msk [vmem:[%s9512_s16] sm:$0xff] %vm5566_vm0, %v5601_v14 }
 0xd2b   : > { %v5602_v2 = vpop.f32.mrf.mxu3 }
 0xd2c   : > { %v5603_v21 = vadd.f32 %v6243_v55, %v5602_v2 }
 0xd2e   : > { %5641 = vst.msk [vmem:[%s9512_s16 + $0x8] sm:$0xff] %vm5566_vm0, %v5603_v21 }
 0xd33   : > { %v5605_v8 = vpop.f32.mrf.mxu3 }
 0xd34   : > { %v5606_v50 = vadd.f32 %v6243_v55, %v5605_v8 }
 0xd36   : > { %5642 = vst.msk [vmem:[%s9512_s16 + $0x10] sm:$0xff] %vm5566_vm0, %v5606_v50 }
 0xd3b   : > { %v5607_v52 = vpop.f32.mrf.mxu3 }
 0xd3c   : > { %v5608_v24 = vadd.f32 %v6243_v55, %v5607_v52 }
 0xd3e   : > { %5643 = vst.msk [vmem:[%s9512_s16 + $0x18] sm:$0xff] %vm5566_vm0, %v5608_v24 }
 0xd43   : > { %v5610_v12 = vpop.f32.mrf.mxu3 }
 0xd44   : > { %v5611_v46 = vadd.f32 %v6243_v55, %v5610_v12 }
 0xd46   : > { %5644 = vst.msk [vmem:[%s9512_s16 + $0x20] sm:$0xff] %vm5566_vm0, %v5611_v46 }
 0xd4b   : > { %v5612_v3 = vpop.f32.mrf.mxu3 }
 0xd4c   : > { %v5613_v47 = vadd.f32 %v6243_v55, %v5612_v3 }
 0xd4e   : > { %5645 = vst.msk [vmem:[%s9512_s16 + $0x28] sm:$0xff] %vm5566_vm0, %v5613_v47 }
 0xd53   : > { %v5615_v20 = vpop.f32.mrf.mxu3 }
 0xd54   : > { %v5616_v7 = vadd.f32 %v6243_v55, %v5615_v20 }
 0xd56   : > { %5646 = vst.msk [vmem:[%s9512_s16 + $0x30] sm:$0xff] %vm5566_vm0, %v5616_v7 }
 0xd5b   : > { %v5617_v9 = vpop.f32.mrf.mxu3 }
 0xd5c   : > { %v5618_v61 = vadd.f32 %v6243_v55, %v5617_v9 }
 0xd5e   : > { %5647 = vst.msk [vmem:[%s9512_s16 + $0x38] sm:$0xff] %vm5566_vm0, %v5618_v61 }
 0xd64   : > { %v5620_v51 = vpop.f32.mrf.mxu3 }
 0xd65   : > { %v5621_v40 = vadd.f32 %v6243_v55, %v5620_v51 }
 0xd67   : > { %5648 = vst.msk [vmem:[%s9512_s16 + $0x40] sm:$0xff] %vm5566_vm0, %v5621_v40 }
 0xd6c   : > { %v5622_v36 = vpop.f32.mrf.mxu3 }
 0xd6d   : > { %v5623_v38 = vadd.f32 %v6243_v55, %v5622_v36 }
 0xd6f   : > { %5649 = vst.msk [vmem:[%s9512_s16 + $0x48] sm:$0xff] %vm5566_vm0, %v5623_v38 }
 0xd74   : > { %v5625_v58 = vpop.f32.mrf.mxu3 }
 0xd75   : > { %v5626_v53 = vadd.f32 %v6243_v55, %v5625_v58 }
 0xd77   : > { %5650 = vst.msk [vmem:[%s9512_s16 + $0x50] sm:$0xff] %vm5566_vm0, %v5626_v53 }
 0xd7c   : > { %v5627_v48 = vpop.f32.mrf.mxu3 }
 0xd7d   : > { %v5628_v39 = vadd.f32 %v6243_v55, %v5627_v48 }
 0xd7f   : > { %5651 = vst.msk [vmem:[%s9512_s16 + $0x58] sm:$0xff] %vm5566_vm0, %v5628_v39 }
 0xd87   : > { %v5630_v28 = vpop.f32.mrf.mxu3 }
 0xd88   : > { %v5631_v59 = vadd.f32 %v6243_v55, %v5630_v28 }
 0xd8a   : > { %5652 = vst.msk [vmem:[%s9512_s16 + $0x60] sm:$0xff] %vm5566_vm0, %v5631_v59 }
 0xd8f   : > { %v5632_v15 = vpop.f32.mrf.mxu3 }
 0xd90   : > { %v5633_v0 = vadd.f32 %v6243_v55, %v5632_v15 }
 0xd92   : > { %5653 = vst.msk [vmem:[%s9512_s16 + $0x68] sm:$0xff] %vm5566_vm0, %v5633_v0 }
 0xd97   : > { %v5635_v34 = vpop.f32.mrf.mxu3 }
 0xd98   : > { %v5636_v25 = vadd.f32 %v6243_v55, %v5635_v34 }
 0xd9a   : > { %5654 = vst.msk [vmem:[%s9512_s16 + $0x70] sm:$0xff] %vm5566_vm0, %v5636_v25 }
 0xd9f   : > { %v5637_v29 = vpop.f32.mrf.mxu3 }
 0xda0   : > { %v5638_v13 = vadd.f32 %v6243_v55, %v5637_v29 }
 0xda2   : > { %5655 = vst.msk [vmem:[%s9512_s16 + $0x78] sm:$0xff] %vm5566_vm0, %v5638_v13 }
 0xda3 PF: > { %s14_s12 = sadd.s32 1, %s6540_s12  }
 0xda4   : > { %p11_p7 = scmp.ge.s32.totalorder %s14_s12, 4  }
 0xda6   :  { %13 = sbr.rel (!%p11_p7) target bundleno = 1 (0x1), region = 67 }
 0xdab   :  { %5678 = vsyncpa [#allocation3], 1 }
 0xdac   :  { %5680 = vsyncpa [#allocation3 + $0x1], 1 }

</bundles_post_ra>
